<compile_context>
chip_gen: v6e
topology: v6e:2x2x1
jax: 0.10.0
libtpu: 0.0.40
codegen_flags: <defaults>
</compile_context>

<pallas_src>
import functools

import jax
import jax.numpy as jnp
from jax.experimental import pallas as pl
from jax.experimental.pallas import tpu as pltpu


def _round_up(x, m):
    return ((x + m - 1) // m) * m


# ----------------------------- Pallas kernels -------------------------------

def _conv_gemm_kernel(w_ref, a_ref, b_ref, o_ref):
    """(Cout, K) @ (K, tn) + bias, ReLU.  Lane dim = spatial tile (tn)."""
    acc = jnp.dot(w_ref[...], a_ref[...], preferred_element_type=jnp.float32)
    acc = acc + b_ref[...]                    # (Cout, 1) broadcasts over lanes
    o_ref[...] = jnp.maximum(acc, 0.0).astype(o_ref.dtype)


def _linear_reparam_kernel(a_ref, w_ref, b_ref, eps_ref,
                           z_ref, mu_ref, sp_ref, acc_ref):
    """Fused [mu | logvar] projection (N=1024) with reparam epilogue."""
    @pl.when(pl.program_id(0) == 0)
    def _():
        acc_ref[...] = jnp.zeros_like(acc_ref)

    acc_ref[...] += jnp.dot(a_ref[...], w_ref[...],
                            preferred_element_type=jnp.float32)

    @pl.when(pl.program_id(0) == pl.num_programs(0) - 1)
    def _():
        acc = acc_ref[...] + b_ref[...]
        half = acc.shape[1] // 2
        mu = acc[:, :half]
        sp = acc[:, half:]
        mu_ref[...] = mu
        sp_ref[...] = sp
        z_ref[...] = eps_ref[...] * jnp.exp(sp * 0.5) + mu


# ------------------------------ Pallas wrappers ------------------------------

def _conv_gemm(w, a, bias, tn):
    Cout, K = w.shape
    _, Np = a.shape
    grid = (Np // tn,)
    return pl.pallas_call(
        _conv_gemm_kernel,
        out_shape=jax.ShapeDtypeStruct((Cout, Np), jnp.bfloat16),
        grid_spec=pltpu.PrefetchScalarGridSpec(
            num_scalar_prefetch=0,
            grid=grid,
            in_specs=[
                pl.BlockSpec((Cout, K), lambda j: (0, 0)),
                pl.BlockSpec((K, tn), lambda j: (0, j)),
                pl.BlockSpec((Cout, 1), lambda j: (0, 0)),
            ],
            out_specs=pl.BlockSpec((Cout, tn), lambda j: (0, j)),
        ),
        compiler_params=pltpu.CompilerParams(
            dimension_semantics=("parallel",)),
    )(w, a, bias)


def conv2d_s2p1(z, w_mat, bias):
    """3x3 / stride-2 / pad-1 conv (PyTorch semantics) on C-major activations.

    z:     (Cin, B, H, W)  bf16
    w_mat: (Cout, Cin*9)   bf16   (torch weight .reshape(Cout, -1))
    bias:  (Cout, 1)       f32
    returns (Cout, B, OH, OW) bf16  (ReLU applied)
    """
    Cin, B, H, W = z.shape
    Cout = w_mat.shape[0]
    OH = (H + 2 - 3) // 2 + 1
    OW = (W + 2 - 3) // 2 + 1

    zp = jnp.pad(z, ((0, 0), (0, 0), (1, 1), (1, 1)))
    # TODO(synk): the 3x3 patch tensor is still materialized in HBM (bf16); an
    # in-kernel (phase-decomposed) im2col would save roughly one activation-
    # sized HBM round trip per layer.
    taps = [zp[:, :, kh:kh + 2 * OH:2, kw:kw + 2 * OW:2]
            for kh in range(3) for kw in range(3)]
    patches = jnp.stack(taps, axis=1)              # (Cin, 9, B, OH, OW)
    a = patches.reshape(Cin * 9, B * OH * OW)      # row = ci*9 + kh*3 + kw

    nsp = B * OH * OW
    tn = min(2048, _round_up(nsp, 128))            # lane-dense spatial tiles
    nsp_pad = _round_up(nsp, tn)
    if nsp_pad != nsp:
        a = jnp.pad(a, ((0, 0), (0, nsp_pad - nsp)))

    out = _conv_gemm(w_mat, a, bias, tn)           # (Cout, nsp_pad) bf16
    return out[:, :nsp].reshape(Cout, B, OH, OW)


def _pick_tk(k, cap=2048):
    """Largest multiple-of-128 divisor of k that is <= cap (keeps the
    double-buffered weight tile well inside every generation's VMEM budget)."""
    if k <= cap:
        return k
    best = None
    for cand in range(128, cap + 1, 128):
        if k % cand == 0:
            best = cand
    return best if best is not None else cap


def linear_reparam(hf, w_cat, b_cat, eps):
    """hf @ [Wm^T | Ws^T] + [bm | bs], fused with z = eps*exp(0.5*sp) + mu."""
    B, K = hf.shape
    N = w_cat.shape[1]
    half = N // 2

    Bp = _round_up(max(B, 8), 8)                   # pad tiny batch to 8 rows
    if Bp != B:
        hf = jnp.pad(hf, ((0, Bp - B), (0, 0)))
        eps = jnp.pad(eps, ((0, Bp - B), (0, 0)))

    tk = _pick_tk(K)
    assert K % tk == 0
    grid = (K // tk,)

    z, mu, sp = pl.pallas_call(
        _linear_reparam_kernel,
        out_shape=(
            jax.ShapeDtypeStruct((Bp, half), jnp.float32),
            jax.ShapeDtypeStruct((Bp, half), jnp.float32),
            jax.ShapeDtypeStruct((Bp, half), jnp.float32),
        ),
        grid_spec=pltpu.PrefetchScalarGridSpec(
            num_scalar_prefetch=0,
            grid=grid,
            in_specs=[
                pl.BlockSpec((Bp, tk), lambda k: (0, k)),
                pl.BlockSpec((tk, N), lambda k: (k, 0)),
                pl.BlockSpec((1, N), lambda k: (0, 0)),
                pl.BlockSpec((Bp, half), lambda k: (0, 0)),
            ],
            out_specs=(
                pl.BlockSpec((Bp, half), lambda k: (0, 0)),
                pl.BlockSpec((Bp, half), lambda k: (0, 0)),
                pl.BlockSpec((Bp, half), lambda k: (0, 0)),
            ),
            scratch_shapes=[pltpu.VMEM((Bp, N), jnp.float32)],
        ),
        compiler_params=pltpu.CompilerParams(
            dimension_semantics=("arbitrary",)),
    )(hf, w_cat, b_cat, eps)
    # TODO(synk): the reparam fusion forces a single N=1024 output block, so
    # the linear runs on one TensorCore on v7x (a tn=512 / j=2 split would
    # preclude the in-kernel z = eps*std + mu epilogue).
    return z[:B], mu[:B], sp[:B]


# ------------------------------ Encoder_conv --------------------------------

def init_params(key, in_size, out_size):
    ks = jax.random.split(key, 12)

    def uconv(k, shape):
        fan_in = shape[1] * shape[2] * shape[3]
        bound = 1.0 / jnp.sqrt(fan_in)
        return jax.random.uniform(k, shape, jnp.float32, -bound, bound)

    def ulin(k, shape):
        bound = 1.0 / jnp.sqrt(shape[1])
        return jax.random.uniform(k, shape, jnp.float32, -bound, bound)

    def ubias(k, n, fan_in):
        bound = 1.0 / jnp.sqrt(fan_in)
        return jax.random.uniform(k, (n,), jnp.float32, -bound, bound)

    half = out_size // 2
    flat = 32 * 14 * 18
    return {
        "w1": uconv(ks[0], (half, in_size, 3, 3)), "b1": ubias(ks[1], half, in_size * 9),
        "w2": uconv(ks[2], (out_size, half, 3, 3)), "b2": ubias(ks[3], out_size, half * 9),
        "w3": uconv(ks[4], (out_size, out_size, 3, 3)), "b3": ubias(ks[5], out_size, out_size * 9),
        "w4": uconv(ks[6], (out_size, out_size, 3, 3)), "b4": ubias(ks[7], out_size, out_size * 9),
        "wm": ulin(ks[8], (512, flat)), "bm": ubias(ks[9], 512, flat),
        "ws": ulin(ks[10], (512, flat)), "bs": ubias(ks[11], 512, flat),
    }


def prepare_params(p):
    """One-time conversion of torch-layout f32 params into kernel-ready form:
    bf16 GEMM weights (conv weights flattened, the two linears concatenated
    along N) and f32 biases.  Done outside the jitted forward so the weight
    cast/concat is not re-streamed on every call."""
    def cw(w):
        return w.reshape(w.shape[0], -1).astype(jnp.bfloat16)

    def cb(b):
        return b.reshape(-1, 1).astype(jnp.float32)

    return {
        "w1": cw(p["w1"]), "b1": cb(p["b1"]),
        "w2": cw(p["w2"]), "b2": cb(p["b2"]),
        "w3": cw(p["w3"]), "b3": cb(p["b3"]),
        "w4": cw(p["w4"]), "b4": cb(p["b4"]),
        "wlin": jnp.concatenate([p["wm"].T, p["ws"].T], axis=1).astype(jnp.bfloat16),
        "blin": jnp.concatenate([p["bm"], p["bs"]]).reshape(1, -1).astype(jnp.float32),
    }


@functools.partial(jax.jit, static_argnames=("is_train",))
def encoder_conv_forward(prep, x, eps, is_train=True):
    # C-major (C, B, H, W) activations throughout: each conv writes directly
    # in this lane-dense layout, so no per-layer activation transposes.
    h = x.astype(jnp.bfloat16).transpose(1, 0, 2, 3)
    h = conv2d_s2p1(h, prep["w1"], prep["b1"])
    h = conv2d_s2p1(h, prep["w2"], prep["b2"])
    h = conv2d_s2p1(h, prep["w3"], prep["b3"])
    h = conv2d_s2p1(h, prep["w4"], prep["b4"])
    # Restore torch NCHW flatten order once, on the tiny final feature map.
    Cout, B, OH, OW = h.shape
    hf = h.transpose(1, 0, 2, 3).reshape(B, Cout * OH * OW)
    z, mu, sp = linear_reparam(hf, prep["wlin"], prep["blin"], eps)
    if not is_train:
        z = mu
    return z, mu, sp


if __name__ == "__main__":
    key = jax.random.PRNGKey(0)
    k_param, k_x, k_eps = jax.random.split(key, 3)

    in_size, out_size, batch = 3, 32, 2
    # Spatial size implied by the hardcoded Linear(32*14*18, 512):
    # four stride-2 convs => 224x288 -> 14x18 feature map with 32 channels.
    H, W = 224, 288

    params = init_params(k_param, in_size, out_size)
    prep = prepare_params(params)

    x = jax.random.normal(k_x, (batch, in_size, H, W), jnp.float32)
    # TODO(synk): eps is drawn host-side with jax.random (torch's .normal_()
    # RNG stream is not reproducible); the reparam arithmetic itself is fused
    # into the Pallas linear kernel.
    eps = jax.random.normal(k_eps, (batch, 512), jnp.float32)

    z, mu, sp = encoder_conv_forward(prep, x, eps, is_train=True)
    jax.block_until_ready((z, mu, sp))
    assert z.shape == (batch, 512) and mu.shape == (batch, 512) and sp.shape == (batch, 512)
    print("KERNEL_OK")
</pallas_src>

<mosaic_0001>
module attributes {stable_mosaic.version = 11 : i64} {
  func.func @_conv_gemm_kernel(%arg0: i32, %arg1: memref<16x27xbf16, #tpu.memory_space<vmem>>, %arg2: memref<27x2048xbf16, #tpu.memory_space<vmem>>, %arg3: memref<16x1xf32, #tpu.memory_space<vmem>>, %arg4: memref<16x2048xbf16, #tpu.memory_space<vmem>>) attributes {dimension_semantics = [#tpu.dimension_semantics<parallel>], iteration_bounds = array<i64: 16>, scalar_prefetch = 0 : i64, scratch_operands = 0 : i64, tpu.core_type = #tpu.core_type<tc>, window_params = [{pipeline_mode = #tpu.pipeline_mode<synchronous>, transform_indices = @transform_0, window_bounds = array<i64: 16, 27>}, {transform_indices = @transform_1, window_bounds = array<i64: 27, 2048>}, {pipeline_mode = #tpu.pipeline_mode<synchronous>, transform_indices = @transform_2, window_bounds = array<i64: 16, 1>}, {transform_indices = @transform_3, window_bounds = array<i64: 16, 2048>}]} {
    %c0 = arith.constant 0 : index
    %c0_0 = arith.constant 0 : index
    %0 = vector.load %arg1[%c0, %c0_0] : memref<16x27xbf16, #tpu.memory_space<vmem>>, vector<16x27xbf16>
    %c0_1 = arith.constant 0 : index
    %c0_2 = arith.constant 0 : index
    %1 = vector.load %arg2[%c0_1, %c0_2] : memref<27x2048xbf16, #tpu.memory_space<vmem>>, vector<27x2048xbf16>
    %cst = arith.constant dense<0.000000e+00> : vector<16x2048xf32>
    %2 = tpu.matmul %0, %1, %cst {dimension_numbers = #tpu.dot_dimension_numbers<[1], [0], [0], [1], [0, 0, 1, 1], [], []>} : vector<16x27xbf16>, vector<27x2048xbf16>, vector<16x2048xf32> -> vector<16x2048xf32>
    %c0_3 = arith.constant 0 : index
    %c0_4 = arith.constant 0 : index
    %3 = vector.load %arg3[%c0_3, %c0_4] : memref<16x1xf32, #tpu.memory_space<vmem>>, vector<16x1xf32>
    %4 = vector.broadcast %3 : vector<16x1xf32> to vector<16x2048xf32>
    %5 = arith.addf %2, %4 : vector<16x2048xf32>
    %cst_5 = arith.constant 0.000000e+00 : f32
    %6 = vector.broadcast %cst_5 : f32 to vector<16x2048xf32>
    %7 = arith.maximumf %5, %6 : vector<16x2048xf32>
    %8 = arith.truncf %7 : vector<16x2048xf32> to vector<16x2048xbf16>
    %c0_6 = arith.constant 0 : index
    %c0_7 = arith.constant 0 : index
    %9 = vector.load %arg4[%c0_6, %c0_7] : memref<16x2048xbf16, #tpu.memory_space<vmem>>, vector<16x2048xbf16>
    tpu.vector_store %arg4[%c0_6, %c0_7], %8 {strides = array<i32>} : memref<16x2048xbf16, #tpu.memory_space<vmem>>, vector<16x2048xbf16>,
    return
  }
  func.func @transform_0(%arg0: i32) -> (i32, i32) {
    %c0_i32 = arith.constant 0 : i32
    %c0_i32_0 = arith.constant 0 : i32
    %c0_i32_1 = arith.constant 0 : i32
    return %c0_i32, %c0_i32_0 : i32, i32
  }
  func.func @transform_1(%arg0: i32) -> (i32, i32) {
    %c0_i32 = arith.constant 0 : i32
    %c0_i32_0 = arith.constant 0 : i32
    return %c0_i32, %arg0 : i32, i32
  }
  func.func @transform_2(%arg0: i32) -> (i32, i32) {
    %c0_i32 = arith.constant 0 : i32
    %c0_i32_0 = arith.constant 0 : i32
    %c0_i32_1 = arith.constant 0 : i32
    return %c0_i32, %c0_i32_0 : i32, i32
  }
  func.func @transform_3(%arg0: i32) -> (i32, i32) {
    %c0_i32 = arith.constant 0 : i32
    %c0_i32_0 = arith.constant 0 : i32
    return %c0_i32, %arg0 : i32, i32
  }
}

module attributes {stable_mosaic.version = 11 : i64} {
  func.func @_conv_gemm_kernel(%arg0: i32, %arg1: memref<32x144xbf16, #tpu.memory_space<vmem>>, %arg2: memref<144x2048xbf16, #tpu.memory_space<vmem>>, %arg3: memref<32x1xf32, #tpu.memory_space<vmem>>, %arg4: memref<32x2048xbf16, #tpu.memory_space<vmem>>) attributes {dimension_semantics = [#tpu.dimension_semantics<parallel>], iteration_bounds = array<i64: 4>, scalar_prefetch = 0 : i64, scratch_operands = 0 : i64, tpu.core_type = #tpu.core_type<tc>, window_params = [{pipeline_mode = #tpu.pipeline_mode<synchronous>, transform_indices = @transform_0, window_bounds = array<i64: 32, 144>}, {transform_indices = @transform_1, window_bounds = array<i64: 144, 2048>}, {pipeline_mode = #tpu.pipeline_mode<synchronous>, transform_indices = @transform_2, window_bounds = array<i64: 32, 1>}, {transform_indices = @transform_3, window_bounds = array<i64: 32, 2048>}]} {
    %c0 = arith.constant 0 : index
    %c0_0 = arith.constant 0 : index
    %0 = vector.load %arg1[%c0, %c0_0] : memref<32x144xbf16, #tpu.memory_space<vmem>>, vector<32x144xbf16>
    %c0_1 = arith.constant 0 : index
    %c0_2 = arith.constant 0 : index
    %1 = vector.load %arg2[%c0_1, %c0_2] : memref<144x2048xbf16, #tpu.memory_space<vmem>>, vector<144x2048xbf16>
    %cst = arith.constant dense<0.000000e+00> : vector<32x2048xf32>
    %2 = tpu.matmul %0, %1, %cst {dimension_numbers = #tpu.dot_dimension_numbers<[1], [0], [0], [1], [0, 0, 1, 1], [], []>} : vector<32x144xbf16>, vector<144x2048xbf16>, vector<32x2048xf32> -> vector<32x2048xf32>
    %c0_3 = arith.constant 0 : index
    %c0_4 = arith.constant 0 : index
    %3 = vector.load %arg3[%c0_3, %c0_4] : memref<32x1xf32, #tpu.memory_space<vmem>>, vector<32x1xf32>
    %4 = vector.broadcast %3 : vector<32x1xf32> to vector<32x2048xf32>
    %5 = arith.addf %2, %4 : vector<32x2048xf32>
    %cst_5 = arith.constant 0.000000e+00 : f32
    %6 = vector.broadcast %cst_5 : f32 to vector<32x2048xf32>
    %7 = arith.maximumf %5, %6 : vector<32x2048xf32>
    %8 = arith.truncf %7 : vector<32x2048xf32> to vector<32x2048xbf16>
    %c0_6 = arith.constant 0 : index
    %c0_7 = arith.constant 0 : index
    %9 = vector.load %arg4[%c0_6, %c0_7] : memref<32x2048xbf16, #tpu.memory_space<vmem>>, vector<32x2048xbf16>
    tpu.vector_store %arg4[%c0_6, %c0_7], %8 {strides = array<i32>} : memref<32x2048xbf16, #tpu.memory_space<vmem>>, vector<32x2048xbf16>,
    return
  }
  func.func @transform_0(%arg0: i32) -> (i32, i32) {
    %c0_i32 = arith.constant 0 : i32
    %c0_i32_0 = arith.constant 0 : i32
    %c0_i32_1 = arith.constant 0 : i32
    return %c0_i32, %c0_i32_0 : i32, i32
  }
  func.func @transform_1(%arg0: i32) -> (i32, i32) {
    %c0_i32 = arith.constant 0 : i32
    %c0_i32_0 = arith.constant 0 : i32
    return %c0_i32, %arg0 : i32, i32
  }
  func.func @transform_2(%arg0: i32) -> (i32, i32) {
    %c0_i32 = arith.constant 0 : i32
    %c0_i32_0 = arith.constant 0 : i32
    %c0_i32_1 = arith.constant 0 : i32
    return %c0_i32, %c0_i32_0 : i32, i32
  }
  func.func @transform_3(%arg0: i32) -> (i32, i32) {
    %c0_i32 = arith.constant 0 : i32
    %c0_i32_0 = arith.constant 0 : i32
    return %c0_i32, %arg0 : i32, i32
  }
}

module attributes {stable_mosaic.version = 11 : i64} {
  func.func @_conv_gemm_kernel(%arg0: i32, %arg1: memref<32x288xbf16, #tpu.memory_space<vmem>>, %arg2: memref<288x2048xbf16, #tpu.memory_space<vmem>>, %arg3: memref<32x1xf32, #tpu.memory_space<vmem>>, %arg4: memref<32x2048xbf16, #tpu.memory_space<vmem>>) attributes {dimension_semantics = [#tpu.dimension_semantics<parallel>], iteration_bounds = array<i64: 1>, scalar_prefetch = 0 : i64, scratch_operands = 0 : i64, tpu.core_type = #tpu.core_type<tc>, window_params = [{pipeline_mode = #tpu.pipeline_mode<synchronous>, transform_indices = @transform_0, window_bounds = array<i64: 32, 288>}, {transform_indices = @transform_1, window_bounds = array<i64: 288, 2048>}, {pipeline_mode = #tpu.pipeline_mode<synchronous>, transform_indices = @transform_2, window_bounds = array<i64: 32, 1>}, {transform_indices = @transform_3, window_bounds = array<i64: 32, 2048>}]} {
    %c0 = arith.constant 0 : index
    %c0_0 = arith.constant 0 : index
    %0 = vector.load %arg1[%c0, %c0_0] : memref<32x288xbf16, #tpu.memory_space<vmem>>, vector<32x288xbf16>
    %c0_1 = arith.constant 0 : index
    %c0_2 = arith.constant 0 : index
    %1 = vector.load %arg2[%c0_1, %c0_2] : memref<288x2048xbf16, #tpu.memory_space<vmem>>, vector<288x2048xbf16>
    %cst = arith.constant dense<0.000000e+00> : vector<32x2048xf32>
    %2 = tpu.matmul %0, %1, %cst {dimension_numbers = #tpu.dot_dimension_numbers<[1], [0], [0], [1], [0, 0, 1, 1], [], []>} : vector<32x288xbf16>, vector<288x2048xbf16>, vector<32x2048xf32> -> vector<32x2048xf32>
    %c0_3 = arith.constant 0 : index
    %c0_4 = arith.constant 0 : index
    %3 = vector.load %arg3[%c0_3, %c0_4] : memref<32x1xf32, #tpu.memory_space<vmem>>, vector<32x1xf32>
    %4 = vector.broadcast %3 : vector<32x1xf32> to vector<32x2048xf32>
    %5 = arith.addf %2, %4 : vector<32x2048xf32>
    %cst_5 = arith.constant 0.000000e+00 : f32
    %6 = vector.broadcast %cst_5 : f32 to vector<32x2048xf32>
    %7 = arith.maximumf %5, %6 : vector<32x2048xf32>
    %8 = arith.truncf %7 : vector<32x2048xf32> to vector<32x2048xbf16>
    %c0_6 = arith.constant 0 : index
    %c0_7 = arith.constant 0 : index
    %9 = vector.load %arg4[%c0_6, %c0_7] : memref<32x2048xbf16, #tpu.memory_space<vmem>>, vector<32x2048xbf16>
    tpu.vector_store %arg4[%c0_6, %c0_7], %8 {strides = array<i32>} : memref<32x2048xbf16, #tpu.memory_space<vmem>>, vector<32x2048xbf16>,
    return
  }
  func.func @transform_0(%arg0: i32) -> (i32, i32) {
    %c0_i32 = arith.constant 0 : i32
    %c0_i32_0 = arith.constant 0 : i32
    %c0_i32_1 = arith.constant 0 : i32
    return %c0_i32, %c0_i32_0 : i32, i32
  }
  func.func @transform_1(%arg0: i32) -> (i32, i32) {
    %c0_i32 = arith.constant 0 : i32
    %c0_i32_0 = arith.constant 0 : i32
    return %c0_i32, %arg0 : i32, i32
  }
  func.func @transform_2(%arg0: i32) -> (i32, i32) {
    %c0_i32 = arith.constant 0 : i32
    %c0_i32_0 = arith.constant 0 : i32
    %c0_i32_1 = arith.constant 0 : i32
    return %c0_i32, %c0_i32_0 : i32, i32
  }
  func.func @transform_3(%arg0: i32) -> (i32, i32) {
    %c0_i32 = arith.constant 0 : i32
    %c0_i32_0 = arith.constant 0 : i32
    return %c0_i32, %arg0 : i32, i32
  }
}

module attributes {stable_mosaic.version = 11 : i64} {
  func.func @_conv_gemm_kernel(%arg0: i32, %arg1: memref<32x288xbf16, #tpu.memory_space<vmem>>, %arg2: memref<288x512xbf16, #tpu.memory_space<vmem>>, %arg3: memref<32x1xf32, #tpu.memory_space<vmem>>, %arg4: memref<32x512xbf16, #tpu.memory_space<vmem>>) attributes {dimension_semantics = [#tpu.dimension_semantics<parallel>], iteration_bounds = array<i64: 1>, scalar_prefetch = 0 : i64, scratch_operands = 0 : i64, tpu.core_type = #tpu.core_type<tc>, window_params = [{pipeline_mode = #tpu.pipeline_mode<synchronous>, transform_indices = @transform_0, window_bounds = array<i64: 32, 288>}, {transform_indices = @transform_1, window_bounds = array<i64: 288, 512>}, {pipeline_mode = #tpu.pipeline_mode<synchronous>, transform_indices = @transform_2, window_bounds = array<i64: 32, 1>}, {transform_indices = @transform_3, window_bounds = array<i64: 32, 512>}]} {
    %c0 = arith.constant 0 : index
    %c0_0 = arith.constant 0 : index
    %0 = vector.load %arg1[%c0, %c0_0] : memref<32x288xbf16, #tpu.memory_space<vmem>>, vector<32x288xbf16>
    %c0_1 = arith.constant 0 : index
    %c0_2 = arith.constant 0 : index
    %1 = vector.load %arg2[%c0_1, %c0_2] : memref<288x512xbf16, #tpu.memory_space<vmem>>, vector<288x512xbf16>
    %cst = arith.constant dense<0.000000e+00> : vector<32x512xf32>
    %2 = tpu.matmul %0, %1, %cst {dimension_numbers = #tpu.dot_dimension_numbers<[1], [0], [0], [1], [0, 0, 1, 1], [], []>} : vector<32x288xbf16>, vector<288x512xbf16>, vector<32x512xf32> -> vector<32x512xf32>
    %c0_3 = arith.constant 0 : index
    %c0_4 = arith.constant 0 : index
    %3 = vector.load %arg3[%c0_3, %c0_4] : memref<32x1xf32, #tpu.memory_space<vmem>>, vector<32x1xf32>
    %4 = vector.broadcast %3 : vector<32x1xf32> to vector<32x512xf32>
    %5 = arith.addf %2, %4 : vector<32x512xf32>
    %cst_5 = arith.constant 0.000000e+00 : f32
    %6 = vector.broadcast %cst_5 : f32 to vector<32x512xf32>
    %7 = arith.maximumf %5, %6 : vector<32x512xf32>
    %8 = arith.truncf %7 : vector<32x512xf32> to vector<32x512xbf16>
    %c0_6 = arith.constant 0 : index
    %c0_7 = arith.constant 0 : index
    %9 = vector.load %arg4[%c0_6, %c0_7] : memref<32x512xbf16, #tpu.memory_space<vmem>>, vector<32x512xbf16>
    tpu.vector_store %arg4[%c0_6, %c0_7], %8 {strides = array<i32>} : memref<32x512xbf16, #tpu.memory_space<vmem>>, vector<32x512xbf16>,
    return
  }
  func.func @transform_0(%arg0: i32) -> (i32, i32) {
    %c0_i32 = arith.constant 0 : i32
    %c0_i32_0 = arith.constant 0 : i32
    %c0_i32_1 = arith.constant 0 : i32
    return %c0_i32, %c0_i32_0 : i32, i32
  }
  func.func @transform_1(%arg0: i32) -> (i32, i32) {
    %c0_i32 = arith.constant 0 : i32
    %c0_i32_0 = arith.constant 0 : i32
    return %c0_i32, %arg0 : i32, i32
  }
  func.func @transform_2(%arg0: i32) -> (i32, i32) {
    %c0_i32 = arith.constant 0 : i32
    %c0_i32_0 = arith.constant 0 : i32
    %c0_i32_1 = arith.constant 0 : i32
    return %c0_i32, %c0_i32_0 : i32, i32
  }
  func.func @transform_3(%arg0: i32) -> (i32, i32) {
    %c0_i32 = arith.constant 0 : i32
    %c0_i32_0 = arith.constant 0 : i32
    return %c0_i32, %arg0 : i32, i32
  }
}

module attributes {stable_mosaic.version = 11 : i64} {
  func.func @_linear_reparam_kernel(%arg0: i32, %arg1: memref<8x1152xbf16, #tpu.memory_space<vmem>>, %arg2: memref<1152x1024xbf16, #tpu.memory_space<vmem>>, %arg3: memref<1x1024xf32, #tpu.memory_space<vmem>>, %arg4: memref<8x512xf32, #tpu.memory_space<vmem>>, %arg5: memref<8x512xf32, #tpu.memory_space<vmem>>, %arg6: memref<8x512xf32, #tpu.memory_space<vmem>>, %arg7: memref<8x512xf32, #tpu.memory_space<vmem>>, %arg8: memref<8x1024xf32, #tpu.memory_space<vmem>>) attributes {dimension_semantics = [#tpu.dimension_semantics<arbitrary>], iteration_bounds = array<i64: 7>, scalar_prefetch = 0 : i64, scratch_operands = 1 : i64, tpu.core_type = #tpu.core_type<tc>, window_params = [{transform_indices = @transform_0, window_bounds = array<i64: 8, 1152>}, {transform_indices = @transform_1, window_bounds = array<i64: 1152, 1024>}, {pipeline_mode = #tpu.pipeline_mode<synchronous>, transform_indices = @transform_2, window_bounds = array<i64: 1, 1024>}, {pipeline_mode = #tpu.pipeline_mode<synchronous>, transform_indices = @transform_3, window_bounds = array<i64: 8, 512>}, {pipeline_mode = #tpu.pipeline_mode<synchronous>, transform_indices = @transform_4, window_bounds = array<i64: 8, 512>}, {pipeline_mode = #tpu.pipeline_mode<synchronous>, transform_indices = @transform_5, window_bounds = array<i64: 8, 512>}, {pipeline_mode = #tpu.pipeline_mode<synchronous>, transform_indices = @transform_6, window_bounds = array<i64: 8, 512>}]} {
    %c0_i32 = arith.constant 0 : i32
    %0 = arith.cmpi eq, %arg0, %c0_i32 : i32
    %1 = arith.extui %0 : i1 to i32
    %c0_i32_0 = arith.constant 0 : i32
    %2 = arith.cmpi ne, %1, %c0_i32_0 : i32
    scf.if %2 {
      %cst_9 = arith.constant 0.000000e+00 : f32
      %12 = vector.broadcast %cst_9 : f32 to vector<8x1024xf32>
      %c0_10 = arith.constant 0 : index
      %c0_11 = arith.constant 0 : index
      %13 = vector.load %arg8[%c0_10, %c0_11] : memref<8x1024xf32, #tpu.memory_space<vmem>>, vector<8x1024xf32>
      tpu.vector_store %arg8[%c0_10, %c0_11], %12 {strides = array<i32>} : memref<8x1024xf32, #tpu.memory_space<vmem>>, vector<8x1024xf32>,
    } else {
    }
    %c0 = arith.constant 0 : index
    %c0_1 = arith.constant 0 : index
    %3 = vector.load %arg8[%c0, %c0_1] : memref<8x1024xf32, #tpu.memory_space<vmem>>, vector<8x1024xf32>
    %c0_2 = arith.constant 0 : index
    %c0_3 = arith.constant 0 : index
    %4 = vector.load %arg1[%c0_2, %c0_3] : memref<8x1152xbf16, #tpu.memory_space<vmem>>, vector<8x1152xbf16>
    %c0_4 = arith.constant 0 : index
    %c0_5 = arith.constant 0 : index
    %5 = vector.load %arg2[%c0_4, %c0_5] : memref<1152x1024xbf16, #tpu.memory_space<vmem>>, vector<1152x1024xbf16>
    %cst = arith.constant dense<0.000000e+00> : vector<8x1024xf32>
    %6 = tpu.matmul %4, %5, %cst {dimension_numbers = #tpu.dot_dimension_numbers<[1], [0], [0], [1], [0, 0, 1, 1], [], []>} : vector<8x1152xbf16>, vector<1152x1024xbf16>, vector<8x1024xf32> -> vector<8x1024xf32>
    %7 = arith.addf %3, %6 : vector<8x1024xf32>
    %c0_6 = arith.constant 0 : index
    %c0_7 = arith.constant 0 : index
    %8 = vector.load %arg8[%c0_6, %c0_7] : memref<8x1024xf32, #tpu.memory_space<vmem>>, vector<8x1024xf32>
    tpu.vector_store %arg8[%c0_6, %c0_7], %7 {strides = array<i32>} : memref<8x1024xf32, #tpu.memory_space<vmem>>, vector<8x1024xf32>,
    %c6_i32 = arith.constant 6 : i32
    %9 = arith.cmpi eq, %arg0, %c6_i32 : i32
    %10 = arith.extui %9 : i1 to i32
    %c0_i32_8 = arith.constant 0 : i32
    %11 = arith.cmpi ne, %10, %c0_i32_8 : i32
    scf.if %11 {
      %c0_9 = arith.constant 0 : index
      %c0_10 = arith.constant 0 : index
      %12 = vector.load %arg8[%c0_9, %c0_10] : memref<8x1024xf32, #tpu.memory_space<vmem>>, vector<8x1024xf32>
      %c0_11 = arith.constant 0 : index
      %c0_12 = arith.constant 0 : index
      %13 = vector.load %arg3[%c0_11, %c0_12] : memref<1x1024xf32, #tpu.memory_space<vmem>>, vector<1x1024xf32>
      %14 = vector.broadcast %13 : vector<1x1024xf32> to vector<8x1024xf32>
      %15 = arith.addf %12, %14 : vector<8x1024xf32>
      %16 = vector.extract_strided_slice %15 {offsets = [0, 0], sizes = [8, 512], strides = [1, 1]} : vector<8x1024xf32> to vector<8x512xf32>
      %17 = vector.extract_strided_slice %15 {offsets = [0, 512], sizes = [8, 512], strides = [1, 1]} : vector<8x1024xf32> to vector<8x512xf32>
      %c0_13 = arith.constant 0 : index
      %c0_14 = arith.constant 0 : index
      %18 = vector.load %arg6[%c0_13, %c0_14] : memref<8x512xf32, #tpu.memory_space<vmem>>, vector<8x512xf32>
      tpu.vector_store %arg6[%c0_13, %c0_14], %16 {strides = array<i32>} : memref<8x512xf32, #tpu.memory_space<vmem>>, vector<8x512xf32>,
      %c0_15 = arith.constant 0 : index
      %c0_16 = arith.constant 0 : index
      %19 = vector.load %arg7[%c0_15, %c0_16] : memref<8x512xf32, #tpu.memory_space<vmem>>, vector<8x512xf32>
      tpu.vector_store %arg7[%c0_15, %c0_16], %17 {strides = array<i32>} : memref<8x512xf32, #tpu.memory_space<vmem>>, vector<8x512xf32>,
      %c0_17 = arith.constant 0 : index
      %c0_18 = arith.constant 0 : index
      %20 = vector.load %arg4[%c0_17, %c0_18] : memref<8x512xf32, #tpu.memory_space<vmem>>, vector<8x512xf32>
      %cst_19 = arith.constant 5.000000e-01 : f32
      %21 = vector.broadcast %cst_19 : f32 to vector<8x512xf32>
      %22 = arith.mulf %17, %21 : vector<8x512xf32>
      %23 = math.exp %22 : vector<8x512xf32>
      %24 = arith.mulf %20, %23 : vector<8x512xf32>
      %25 = arith.addf %24, %16 : vector<8x512xf32>
      %c0_20 = arith.constant 0 : index
      %c0_21 = arith.constant 0 : index
      %26 = vector.load %arg5[%c0_20, %c0_21] : memref<8x512xf32, #tpu.memory_space<vmem>>, vector<8x512xf32>
      tpu.vector_store %arg5[%c0_20, %c0_21], %25 {strides = array<i32>} : memref<8x512xf32, #tpu.memory_space<vmem>>, vector<8x512xf32>,
    } else {
    }
    return
  }
  func.func @transform_0(%arg0: i32) -> (i32, i32) {
    %c0_i32 = arith.constant 0 : i32
    %c0_i32_0 = arith.constant 0 : i32
    return %c0_i32, %arg0 : i32, i32
  }
  func.func @transform_1(%arg0: i32) -> (i32, i32) {
    %c0_i32 = arith.constant 0 : i32
    %c0_i32_0 = arith.constant 0 : i32
    return %arg0, %c0_i32 : i32, i32
  }
  func.func @transform_2(%arg0: i32) -> (i32, i32) {
    %c0_i32 = arith.constant 0 : i32
    %c0_i32_0 = arith.constant 0 : i32
    %c0_i32_1 = arith.constant 0 : i32
    return %c0_i32, %c0_i32_0 : i32, i32
  }
  func.func @transform_3(%arg0: i32) -> (i32, i32) {
    %c0_i32 = arith.constant 0 : i32
    %c0_i32_0 = arith.constant 0 : i32
    %c0_i32_1 = arith.constant 0 : i32
    return %c0_i32, %c0_i32_0 : i32, i32
  }
  func.func @transform_4(%arg0: i32) -> (i32, i32) {
    %c0_i32 = arith.constant 0 : i32
    %c0_i32_0 = arith.constant 0 : i32
    %c0_i32_1 = arith.constant 0 : i32
    return %c0_i32, %c0_i32_0 : i32, i32
  }
  func.func @transform_5(%arg0: i32) -> (i32, i32) {
    %c0_i32 = arith.constant 0 : i32
    %c0_i32_0 = arith.constant 0 : i32
    %c0_i32_1 = arith.constant 0 : i32
    return %c0_i32, %c0_i32_0 : i32, i32
  }
  func.func @transform_6(%arg0: i32) -> (i32, i32) {
    %c0_i32 = arith.constant 0 : i32
    %c0_i32_0 = arith.constant 0 : i32
    %c0_i32_1 = arith.constant 0 : i32
    return %c0_i32, %c0_i32_0 : i32, i32
  }
}

</mosaic_0001>

<bundles_post_ra>
// kernel: encoder_conv_forward.5
= control target key start
LH: loop header
LB: loop body
LE: loop exit
PB: predicated region body
PF: predicated region fallthrough
CT: control target
= control target key end

     0   :  { %s1266_s12 = smov 0   ;;  %s1268_s13 = smov 0   ;;  %s1556_s0 = inlined_call_operand.vmem [shape: bf16[16,27], index: 0, kind: input, shape index: {}]   ;;  %s1557_s1 = inlined_call_operand.vmem [shape: bf16[27,32768], index: 1, kind: input, shape index: {}]   ;;  %s1558_s2 = inlined_call_operand.vmem [shape: f32[16,1], index: 2, kind: input, shape index: {}]   ;;  %s1559_s3 = inlined_call_operand.vmem [shape: bf16[16,32768], index: 3, kind: output, shape index: {}]  }
   0x1   :  { %s1270_s14 = smov 0  }
   0x2 LB: > { %s1102_s15 = sadd.s32 4294967295, %s1242_s14   ;;  %s1283_s16 = sadd.s32 1, %s1242_s14   ;;  %s1242_s14 = sphi %s1270_s14, %s1563_s14   ;;  %s1238_s13 = sphi %s1268_s13, %s1562_s13   ;;  %s1234_s12 = sphi %s1266_s12, %s1561_s12  }
   0x3   : > { %s38_s17 = ssub.s32 %s1242_s14, %s1283_s16  ;;  %s41_s18 = sadd.s32 1, %s1238_s13 }
   0x4   : > { %p39_p0 = scmp.eq.s32.totalorder %s38_s17, 0  ;;  %p48_p1 = scmp.ne.s32.totalorder %s1238_s13, %s1234_s12 }
   0x5   : > { %p49_p2 = scmp.eq.s32.totalorder %s1242_s14, 0  ;;  %p99_p3 = scmp.eq.s32.totalorder %s1102_s15, 15 }
   0x6   : > { %s1294_s19 = scalar_select %p39_p0, %s1238_s13, %s41_s18  }
   0x7   : > { %p50_p4 = por %p49_p2, %p48_p1  ;;  %p1296_p5 = por %p99_p3, %p48_p1 }
   0x8   : > { %p1105_p6 = scmp.ge.s32.totalorder %s1242_s14, 16 }
   0xa   : > { %127 = sbr.rel (%p1105_p6) target bundleno = 35 (0x23), region = 24 }
   0xf   : > { %130 = sbr.rel (!%p50_p4) target bundleno = 35 (0x23), region = 28  ;;  %s132_s21 = sand.u32 (%p50_p4), 1, %s1238_s13  }
  0x10   : > { %s1174_s22 = sshll.u32 (%p50_p4), %s1242_s14, 6  ;;  %s1106_s23 = sshll.u32 (%p50_p4), %s132_s21, 8 }
  0x11   : > { %s1306_s26 = scalar_lea.vmem (%p50_p4), %s1557_s1, %s1174_s22  ;;  %s1311_s27 = scalar_lea.vmem (%p50_p4), [#allocation2], %s1106_s23 }
  0x12   : > { %v150_v0 = vld [vmem:[%s1306_s26] sm:$0xff] (%p50_p4)  ;;  %v152_v1 = vld [vmem:[%s1306_s26 + $0x8] sm:$0xff] (%p50_p4)  ;;  %v154_v2 = vld [vmem:[%s1306_s26 + $0x10] sm:$0xff] (%p50_p4) }
  0x13   : > { %151 = vst [vmem:[%s1311_s27] sm:$0xff] (%p50_p4), %v150_v0  ;;  %153 = vst [vmem:[%s1311_s27 + $0x8] sm:$0xff] (%p50_p4), %v152_v1  ;;  %v156_v3 = vld [vmem:[%s1306_s26 + $0x18] sm:$0xff] (%p50_p4)  ;;  %v158_v4 = vld [vmem:[%s1306_s26 + $0x20] sm:$0xff] (%p50_p4) }
  0x14   : > { %155 = vst [vmem:[%s1311_s27 + $0x10] sm:$0xff] %v154_v2  ;;  %v160_v5 = vld [vmem:[%s1306_s26 + $0x28] sm:$0xff]  ;;  %157 = vst [vmem:[%s1311_s27 + $0x18] sm:$0xff] %v156_v3  ;;  %v162_v6 = vld [vmem:[%s1306_s26 + $0x30] sm:$0xff] }
  0x15   : > { %159 = vst [vmem:[%s1311_s27 + $0x20] sm:$0xff] %v158_v4  ;;  %161 = vst [vmem:[%s1311_s27 + $0x28] sm:$0xff] %v160_v5  ;;  %v164_v7 = vld [vmem:[%s1306_s26 + $0x38] sm:$0xff]  ;;  %v166_v8 = vld [vmem:[%s1306_s26 + $0x400] sm:$0xff] }
  0x16   : > { %163 = vst [vmem:[%s1311_s27 + $0x30] sm:$0xff] %v162_v6  ;;  %165 = vst [vmem:[%s1311_s27 + $0x38] sm:$0xff] %v164_v7  ;;  %v168_v9 = vld [vmem:[%s1306_s26 + $0x408] sm:$0xff]  ;;  %v170_v10 = vld [vmem:[%s1306_s26 + $0x410] sm:$0xff] }
  0x17   : > { %167 = vst [vmem:[%s1311_s27 + $0x40] sm:$0xff] %v166_v8  ;;  %v172_v11 = vld [vmem:[%s1306_s26 + $0x418] sm:$0xff]  ;;  %169 = vst [vmem:[%s1311_s27 + $0x48] sm:$0xff] %v168_v9  ;;  %v174_v12 = vld [vmem:[%s1306_s26 + $0x420] sm:$0xff] }
  0x18   : > { %171 = vst [vmem:[%s1311_s27 + $0x50] sm:$0xff] %v170_v10  ;;  %173 = vst [vmem:[%s1311_s27 + $0x58] sm:$0xff] %v172_v11  ;;  %v176_v13 = vld [vmem:[%s1306_s26 + $0x428] sm:$0xff]  ;;  %v178_v14 = vld [vmem:[%s1306_s26 + $0x430] sm:$0xff] }
  0x19   : > { %175 = vst [vmem:[%s1311_s27 + $0x60] sm:$0xff] %v174_v12  ;;  %177 = vst [vmem:[%s1311_s27 + $0x68] sm:$0xff] %v176_v13  ;;  %v180_v15 = vld [vmem:[%s1306_s26 + $0x438] sm:$0xff]  ;;  %v182_v16 = vld [vmem:[%s1306_s26 + $0x800] sm:$0xff] }
  0x1a   : > { %179 = vst [vmem:[%s1311_s27 + $0x70] sm:$0xff] %v178_v14  ;;  %v184_v17 = vld [vmem:[%s1306_s26 + $0x808] sm:$0xff]  ;;  %181 = vst [vmem:[%s1311_s27 + $0x78] sm:$0xff] %v180_v15  ;;  %v186_v18 = vld [vmem:[%s1306_s26 + $0x810] sm:$0xff] }
  0x1b   : > { %183 = vst [vmem:[%s1311_s27 + $0x80] sm:$0xff] %v182_v16  ;;  %185 = vst [vmem:[%s1311_s27 + $0x88] sm:$0xff] %v184_v17  ;;  %v188_v19 = vld [vmem:[%s1306_s26 + $0x818] sm:$0xff]  ;;  %v190_v20 = vld [vmem:[%s1306_s26 + $0x820] sm:$0xff] }
  0x1c   : > { %187 = vst [vmem:[%s1311_s27 + $0x90] sm:$0xff] %v186_v18  ;;  %189 = vst [vmem:[%s1311_s27 + $0x98] sm:$0xff] %v188_v19  ;;  %v192_v21 = vld [vmem:[%s1306_s26 + $0x828] sm:$0xff]  ;;  %v194_v22 = vld [vmem:[%s1306_s26 + $0x830] sm:$0xff] }
  0x1d   : > { %191 = vst [vmem:[%s1311_s27 + $0xa0] sm:$0xff] %v190_v20  ;;  %v196_v23 = vld [vmem:[%s1306_s26 + $0x838] sm:$0xff]  ;;  %193 = vst [vmem:[%s1311_s27 + $0xa8] sm:$0xff] %v192_v21  ;;  %v198_v24 = vld [vmem:[%s1306_s26 + $0xc00] sm:$0xff] }
  0x1e   : > { %195 = vst [vmem:[%s1311_s27 + $0xb0] sm:$0xff] %v194_v22  ;;  %197 = vst [vmem:[%s1311_s27 + $0xb8] sm:$0xff] %v196_v23  ;;  %v200_v25 = vld [vmem:[%s1306_s26 + $0xc08] sm:$0xff]  ;;  %v202_v26 = vld [vmem:[%s1306_s26 + $0xc10] sm:$0xff] }
  0x1f   : > { %199 = vst [vmem:[%s1311_s27 + $0xc0] sm:$0xff] %v198_v24  ;;  %201 = vst [vmem:[%s1311_s27 + $0xc8] sm:$0xff] %v200_v25  ;;  %v204_v27 = vld [vmem:[%s1306_s26 + $0xc18] sm:$0xff]  ;;  %v206_v28 = vld [vmem:[%s1306_s26 + $0xc20] sm:$0xff] }
  0x20   : > { %203 = vst [vmem:[%s1311_s27 + $0xd0] sm:$0xff] %v202_v26  ;;  %v208_v29 = vld [vmem:[%s1306_s26 + $0xc28] sm:$0xff]  ;;  %205 = vst [vmem:[%s1311_s27 + $0xd8] sm:$0xff] %v204_v27  ;;  %v210_v30 = vld [vmem:[%s1306_s26 + $0xc30] sm:$0xff] }
  0x21   : > { %207 = vst [vmem:[%s1311_s27 + $0xe0] sm:$0xff] %v206_v28  ;;  %209 = vst [vmem:[%s1311_s27 + $0xe8] sm:$0xff] %v208_v29  ;;  %v212_v31 = vld [vmem:[%s1306_s26 + $0xc38] sm:$0xff] }
  0x22   : > { %211 = vst [vmem:[%s1311_s27 + $0xf0] sm:$0xff] %v210_v30  ;;  %213 = vst [vmem:[%s1311_s27 + $0xf8] sm:$0xff] %v212_v31 }
  0x23 PF: > { %p1109_p7 = scmp.ge.s32.totalorder %s1242_s14, 1  ;;  %p218_p8 = scmp.lt.s32.totalorder %s1242_s14, 17 }
  0x25   : > { %p219_p9 = pnand %p1109_p7, %p218_p8 }
  0x26   : > { %s225_s28 = sand.u32 (!%p219_p9), 1, %s1234_s12  }
  0x27   : > { %222 = sbr.rel (%p219_p9) target bundleno = 298 (0x12a), region = 51  ;;  %s1110_s29 = sshll.u32 (!%p219_p9), %s225_s28, 8 }
  0x28   : > { %s1388_s7 = scalar_lea.vmem (!%p219_p9), [#allocation2], %s1110_s29  ;;  %s1111_s10 = sshll.u32 (!%p219_p9), %s225_s28, 7 }
  0x29   : > { %s1481_s11 = scalar_lea.vmem (!%p219_p9), [#allocation3], %s1111_s10 }
  0x2c   : > { %vm449_vm0 = vcmask 1044480   ;;  %vm450_vm1 = vcmask 1045504   ;;  %v1244_v32 = vmov 65535   ;;  %v1245_v34 = vmov 0   ;;  %v284_v35 = vld [vmem:[%s1558_s2] sm:$0xff]  ;;  %v285_v36 = vld [vmem:[%s1558_s2 + $0x8] sm:$0xff] }
  0x2d   : > { %v451_v33 = vsel %vm449_vm0, 4294967295, %v1244_v32  ;;  %533 = vmatprep.mubr.bf16.mxu0 %v1245_v34  ;;  %576 = vmatprep.mubr.bf16.mxu1 %v1245_v34  ;;  %v268_v37 = vld [vmem:[%s1388_s7 + $0x80] sm:$0xff]  ;;  %v269_v40 = vld [vmem:[%s1388_s7 + $0x88] sm:$0xff]  ;;  %v270_v50 = vld [vmem:[%s1388_s7 + $0x90] sm:$0xff]  ;;  %vm445_vm2 = vcmask 220160   ;;  %s1191_s12 = sshll.u32 (%p1296_p5), %s1102_s15, 6 }
  0x2e   : > { %1218 = vset.pattern.permute.xlu0 %v1245_v34  ;;  %v276_v38 = vld [vmem:[%s1388_s7 + $0xc0] sm:$0x33]  ;;  %v1392_v39 = vsel %vm450_vm1, %v451_v33, 0  ;;  %v277_v42 = vld [vmem:[%s1388_s7 + $0xc8] sm:$0x33]  ;;  %v271_v55 = vld [vmem:[%s1388_s7 + $0x98] sm:$0xff]  ;;  %s998_s20 = scalar_lea.vmem (%p1296_p5), %s1559_s3, %s1191_s12 }
  0x2f   : > { %288 = vperm.xlu0 %1218, %v284_v35   ;;  %v1130_v41 = vcombine.high %v268_v37, %v276_v38  ;;  %v1129_v43 = vcombine.low %v268_v37, %v276_v38  ;;  %v252_v44 = vld [vmem:[%s1388_s7] sm:$0xff]  ;;  %v1132_v46 = vcombine.high %v269_v40, %v277_v42  ;;  %v1131_v47 = vcombine.low %v269_v40, %v277_v42  ;;  %v253_v48 = vld [vmem:[%s1388_s7 + $0x8] sm:$0xff]  ;;  %v278_v54 = vld [vmem:[%s1388_s7 + $0xd0] sm:$0x33] }
  0x30   : > { %v260_v45 = vld [vmem:[%s1388_s7 + $0x40] sm:$0xff]  ;;  %v261_v49 = vld [vmem:[%s1388_s7 + $0x48] sm:$0xff]  ;;  %v279_v56 = vld [vmem:[%s1388_s7 + $0xd8] sm:$0x33]  ;;  %v1134_v60 = vcombine.high %v270_v50, %v278_v54  ;;  %v1133_v63 = vcombine.low %v270_v50, %v278_v54 }
  0x31   : > { %v457_v51 = vand.u32 %v1130_v41, %v1392_v39  ;;  %v454_v52 = vand.u32 %v1129_v43, %v1392_v39  ;;  %v1114_v53 = vcombine.high %v252_v44, %v260_v45  ;;  %v463_v57 = vand.u32 %v1132_v46, %v1392_v39  ;;  %v1411_v1 = vld [vmem:[%s1556_s0] sm:$0xff]   ;;  %v254_v4 = vld [vmem:[%s1388_s7 + $0x10] sm:$0xff]  ;;  %v255_v7 = vld [vmem:[%s1388_s7 + $0x18] sm:$0xff] }
  0x32   : > { %v460_v58 = vand.u32 %v1131_v47, %v1392_v39  ;;  %v1116_v59 = vcombine.high %v253_v48, %v261_v49  ;;  %v1136_v61 = vcombine.high %v271_v55, %v279_v56  ;;  %v1113_v62 = vcombine.low %v252_v44, %v260_v45  ;;  %v262_v5 = vld [vmem:[%s1388_s7 + $0x50] sm:$0xff]  ;;  %v272_v8 = vld [vmem:[%s1388_s7 + $0xa0] sm:$0xff]  ;;  %v263_v10 = vld [vmem:[%s1388_s7 + $0x58] sm:$0xff] }
  0x33   : > { %293 = vperm.xlu0 %1218, %v285_v36   ;;  %513 = vmatprep.subr.bf16.mxu0 %v457_v51  ;;  %v1115_v0 = vcombine.low %v253_v48, %v261_v49  ;;  %v469_v2 = vand.u32 %v1134_v60, %v1392_v39  ;;  %v1135_v3 = vcombine.low %v271_v55, %v279_v56  ;;  %v280_v9 = vld [vmem:[%s1388_s7 + $0xe0] sm:$0x33]  ;;  %v273_v11 = vld [vmem:[%s1388_s7 + $0xa8] sm:$0xff]  ;;  %v274_v28 = vld [vmem:[%s1388_s7 + $0xb0] sm:$0xff] }
  0x34   : > { %556 = vmatprep.subr.bf16.mxu1 %v463_v57  ;;  %514 = vmatpush1.bf16.msra.mxu0 %v454_v52  ;;  %v475_v6 = vand.u32 %v1136_v61, %v1392_v39  ;;  %v281_v12 = vld [vmem:[%s1388_s7 + $0xe8] sm:$0x33]  ;;  %v466_v13 = vand.u32 %v1133_v63, %v1392_v39  ;;  %v1118_v15 = vcombine.high %v254_v4, %v262_v5  ;;  %v256_v24 = vld [vmem:[%s1388_s7 + $0x20] sm:$0xff]  ;;  %v282_v29 = vld [vmem:[%s1388_s7 + $0xf0] sm:$0x33] }
  0x35   : > { %557 = vmatpush1.bf16.msra.mxu1 %v460_v58  ;;  %515 = vmatprep.subr.bf16.mxu0 %v1114_v53  ;;  %v472_v14 = vand.u32 %v1135_v3, %v1392_v39  ;;  %v1138_v16 = vcombine.high %v272_v8, %v280_v9  ;;  %v1120_v17 = vcombine.high %v255_v7, %v263_v10  ;;  %v264_v25 = vld [vmem:[%s1388_s7 + $0x60] sm:$0xff]  ;;  %v257_v27 = vld [vmem:[%s1388_s7 + $0x28] sm:$0xff]  ;;  %v275_v31 = vld [vmem:[%s1388_s7 + $0xb8] sm:$0xff] }
  0x36   : > { %558 = vmatprep.subr.bf16.mxu1 %v1116_v59  ;;  %v1140_v18 = vcombine.high %v273_v11, %v281_v12  ;;  %v1117_v19 = vcombine.low %v254_v4, %v262_v5  ;;  %v1137_v20 = vcombine.low %v272_v8, %v280_v9  ;;  %v1119_v21 = vcombine.low %v255_v7, %v263_v10  ;;  %v265_v30 = vld [vmem:[%s1388_s7 + $0x68] sm:$0xff]  ;;  %v283_v32 = vld [vmem:[%s1388_s7 + $0xf8] sm:$0x33]  ;;  %v258_v47 = vld [vmem:[%s1388_s7 + $0x30] sm:$0xff] }
  0x37   : > { %v481_v22 = vand.u32 %v1138_v16, %v1392_v39  ;;  %v1139_v23 = vcombine.low %v273_v11, %v281_v12  ;;  %v1122_v36 = vcombine.high %v256_v24, %v264_v25  ;;  %v1142_v37 = vcombine.high %v274_v28, %v282_v29  ;;  %v266_v48 = vld [vmem:[%s1388_s7 + $0x70] sm:$0xff]  ;;  %v259_v49 = vld [vmem:[%s1388_s7 + $0x38] sm:$0xff] }
  0x38   : > { %516 = vmatpush1.bf16.msra.mxu0 %v1113_v62  ;;  %v487_v26 = vand.u32 %v1140_v18, %v1392_v39  ;;  %v478_v33 = vand.u32 %v1137_v20, %v1392_v39  ;;  %v1124_v38 = vcombine.high %v257_v27, %v265_v30  ;;  %v1144_v40 = vcombine.high %v275_v31, %v283_v32  ;;  %v267_v50 = vld [vmem:[%s1388_s7 + $0x78] sm:$0xff] }
  0x39   : > { %559 = vmatpush1.bf16.msra.mxu1 %v1115_v0  ;;  %599 = vmatprep.subr.bf16.mxu0 %v469_v2  ;;  %v484_v35 = vand.u32 %v1139_v23, %v1392_v39  ;;  %v1121_v41 = vcombine.low %v256_v24, %v264_v25  ;;  %v1141_v42 = vcombine.low %v274_v28, %v282_v29 }
  0x3a   : > { %642 = vmatprep.subr.bf16.mxu1 %v475_v6  ;;  %v1123_v43 = vcombine.low %v257_v27, %v265_v30  ;;  %v493_v44 = vand.u32 %v1142_v37, %v1392_v39  ;;  %v1143_v45 = vcombine.low %v275_v31, %v283_v32  ;;  %v499_v46 = vand.u32 %v1144_v40, %v1392_v39 }
  0x3b   : > { %1145 = vmatmul.mubr.msk.bf16.vlgmr.msra.gmra.mxu0 %vm445_vm2, %v1411_v1  ;;  %v490_v51 = vand.u32 %v1141_v42, %v1392_v39  ;;  %v1126_v53 = vcombine.high %v258_v47, %v266_v48  ;;  %v1128_v54 = vcombine.high %v259_v49, %v267_v50  ;;  %v1125_v55 = vcombine.low %v258_v47, %v266_v48 }
  0x3c   : > { %1146 = vmatmul.mubr.msk.bf16.vlgmr.msra.gmra.mxu1 %vm445_vm2, %v1411_v1  ;;  %600 = vmatpush1.bf16.msra.mxu0 %v466_v13  ;;  %v496_v52 = vand.u32 %v1143_v45, %v1392_v39  ;;  %v1127_v56 = vcombine.low %v259_v49, %v267_v50 }
  0x3d   : > { %643 = vmatpush1.bf16.msra.mxu1 %v472_v14  ;;  %601 = vmatprep.subr.bf16.mxu0 %v1118_v15 }
  0x3e   : > { %644 = vmatprep.subr.bf16.mxu1 %v1120_v17  ;;  %619 = vmatprep.mubr.bf16.mxu0 %v1245_v34 }
  0x3f   : > { %662 = vmatprep.mubr.bf16.mxu1 %v1245_v34 }
  0x40   : > { %602 = vmatpush1.bf16.msra.mxu0 %v1117_v19 }
  0x41   : > { %645 = vmatpush1.bf16.msra.mxu1 %v1119_v21  ;;  %685 = vmatprep.subr.bf16.mxu0 %v481_v22 }
  0x42   : > { %728 = vmatprep.subr.bf16.mxu1 %v487_v26 }
  0x43   : > { %1147 = vmatmul.mubr.msk.bf16.vlgmr.msra.gmra.mxu0 %vm445_vm2, %v1411_v1 }
  0x44   : > { %1148 = vmatmul.mubr.msk.bf16.vlgmr.msra.gmra.mxu1 %vm445_vm2, %v1411_v1  ;;  %686 = vmatpush1.bf16.msra.mxu0 %v478_v33 }
  0x45   : > { %729 = vmatpush1.bf16.msra.mxu1 %v484_v35  ;;  %687 = vmatprep.subr.bf16.mxu0 %v1122_v36 }
  0x46   : > { %730 = vmatprep.subr.bf16.mxu1 %v1124_v38  ;;  %705 = vmatprep.mubr.bf16.mxu0 %v1245_v34 }
  0x47   : > { %748 = vmatprep.mubr.bf16.mxu1 %v1245_v34 }
  0x48   : > { %688 = vmatpush1.bf16.msra.mxu0 %v1121_v41 }
  0x49   : > { %731 = vmatpush1.bf16.msra.mxu1 %v1123_v43  ;;  %771 = vmatprep.subr.bf16.mxu0 %v493_v44 }
  0x4a   : > { %814 = vmatprep.subr.bf16.mxu1 %v499_v46 }
  0x4b   : > { %1149 = vmatmul.mubr.msk.bf16.vlgmr.msra.gmra.mxu0 %vm445_vm2, %v1411_v1 }
  0x4c   : > { %1150 = vmatmul.mubr.msk.bf16.vlgmr.msra.gmra.mxu1 %vm445_vm2, %v1411_v1  ;;  %772 = vmatpush1.bf16.msra.mxu0 %v490_v51 }
  0x4d   : > { %815 = vmatpush1.bf16.msra.mxu1 %v496_v52  ;;  %773 = vmatprep.subr.bf16.mxu0 %v1126_v53 }
  0x4e   : > { %816 = vmatprep.subr.bf16.mxu1 %v1128_v54  ;;  %791 = vmatprep.mubr.bf16.mxu0 %v1245_v34 }
  0x4f   : > { %834 = vmatprep.mubr.bf16.mxu1 %v1245_v34 }
  0x50   : > { %774 = vmatpush1.bf16.msra.mxu0 %v1125_v55 }
  0x51   : > { %817 = vmatpush1.bf16.msra.mxu1 %v1127_v56 }
  0x53   : > { %1151 = vmatmul.mubr.msk.bf16.vlgmr.msra.gmra.mxu0 %vm445_vm2, %v1411_v1 }
  0x54   : > { %1152 = vmatmul.mubr.msk.bf16.vlgmr.msra.gmra.mxu1 %vm445_vm2, %v1411_v1 }
  0xaa   : > { %v1467_v39 = vpop.permute.xlu0 %288 }
  0xae   : > { %v1471_v62 = vpop.permute.xlu0 %293 }
  0xfb   : > { %v535_v57 = vpop.f32.mrf.mxu0 }
  0xfc   : > { %v536_v58 = vadd.f32 %v535_v57, %v1467_v39  ;;  %v578_v59 = vpop.f32.mrf.mxu1 }
  0xfd   : > { %v579_v60 = vadd.f32 %v578_v59, %v1467_v39  ;;  %v537_v61 = vpop.f32.mrf.mxu0 }
  0xfe   : > { %v538_v34 = vadd.f32 %v537_v61, %v1467_v39  ;;  %v580_v63 = vpop.f32.mrf.mxu1  ;;  %v845_v1 = vmax.f32 %v536_v58, 0.0 }
  0xff   : > { %v581_v0 = vadd.f32 %v580_v63, %v1467_v39  ;;  %v539_v2 = vpop.f32.mrf.mxu0  ;;  %v847_v6 = vmax.f32 %v579_v60, 0.0 }
 0x100   : > { %v846_v3 = vmax.f32 %v538_v34, 0.0  ;;  %v540_v4 = vadd.f32 %v539_v2, %v1471_v62  ;;  %v582_v5 = vpop.f32.mrf.mxu1 }
 0x101   : > { %v848_v7 = vmax.f32 %v581_v0, 0.0  ;;  %v583_v8 = vadd.f32 %v582_v5, %v1471_v62  ;;  %v541_v9 = vpop.f32.mrf.mxu0 }
 0x102   : > { %v1175_v10 = vpack.c.bf16 %v846_v3, %v845_v1  ;;  %v542_v11 = vadd.f32 %v541_v9, %v1471_v62  ;;  %v584_v12 = vpop.f32.mrf.mxu1  ;;  %v861_v16 = vmax.f32 %v540_v4, 0.0 }
 0x103   : > { %v1176_v13 = vpack.c.bf16 %v848_v7, %v847_v6  ;;  %v585_v14 = vadd.f32 %v584_v12, %v1471_v62  ;;  %v621_v15 = vpop.f32.mrf.mxu0  ;;  %v863_v20 = vmax.f32 %v583_v8, 0.0 }
 0x104   : > { %973 = vst [vmem:[%s1481_s11] sm:$0xff] %v1175_v10  ;;  %v862_v17 = vmax.f32 %v542_v11, 0.0  ;;  %v622_v18 = vadd.f32 %v621_v15, %v1467_v39  ;;  %v664_v19 = vpop.f32.mrf.mxu1 }
 0x105   : > { %974 = vst [vmem:[%s1481_s11 + $0x8] sm:$0xff] %v1176_v13  ;;  %v864_v21 = vmax.f32 %v585_v14, 0.0  ;;  %v665_v22 = vadd.f32 %v664_v19, %v1467_v39  ;;  %v623_v23 = vpop.f32.mrf.mxu0 }
 0x106   : > { %v1183_v24 = vpack.c.bf16 %v862_v17, %v861_v16  ;;  %v624_v25 = vadd.f32 %v623_v23, %v1467_v39  ;;  %v666_v26 = vpop.f32.mrf.mxu1  ;;  %v849_v30 = vmax.f32 %v622_v18, 0.0 }
 0x107   : > { %v1184_v27 = vpack.c.bf16 %v864_v21, %v863_v20  ;;  %v667_v28 = vadd.f32 %v666_v26, %v1467_v39  ;;  %v625_v29 = vpop.f32.mrf.mxu0  ;;  %v851_v35 = vmax.f32 %v665_v22, 0.0 }
 0x108   : > { %981 = vst [vmem:[%s1481_s11 + $0x40] sm:$0xff] %v1183_v24  ;;  %v850_v31 = vmax.f32 %v624_v25, 0.0  ;;  %v626_v32 = vadd.f32 %v625_v29, %v1471_v62  ;;  %v668_v33 = vpop.f32.mrf.mxu1 }
 0x109   : > { %982 = vst [vmem:[%s1481_s11 + $0x48] sm:$0xff] %v1184_v27  ;;  %v852_v36 = vmax.f32 %v667_v28, 0.0  ;;  %v669_v37 = vadd.f32 %v668_v33, %v1471_v62  ;;  %v627_v38 = vpop.f32.mrf.mxu0 }
 0x10a   : > { %v1177_v40 = vpack.c.bf16 %v850_v31, %v849_v30  ;;  %v628_v41 = vadd.f32 %v627_v38, %v1471_v62  ;;  %v670_v42 = vpop.f32.mrf.mxu1  ;;  %v865_v46 = vmax.f32 %v626_v32, 0.0 }
 0x10b   : > { %v1178_v43 = vpack.c.bf16 %v852_v36, %v851_v35  ;;  %v671_v44 = vadd.f32 %v670_v42, %v1471_v62  ;;  %v707_v45 = vpop.f32.mrf.mxu0  ;;  %v867_v50 = vmax.f32 %v669_v37, 0.0 }
 0x10c   : > { %975 = vst [vmem:[%s1481_s11 + $0x10] sm:$0xff] %v1177_v40  ;;  %v866_v47 = vmax.f32 %v628_v41, 0.0  ;;  %v708_v48 = vadd.f32 %v707_v45, %v1467_v39  ;;  %v750_v49 = vpop.f32.mrf.mxu1 }
 0x10d   : > { %976 = vst [vmem:[%s1481_s11 + $0x18] sm:$0xff] %v1178_v43  ;;  %v868_v51 = vmax.f32 %v671_v44, 0.0  ;;  %v751_v52 = vadd.f32 %v750_v49, %v1467_v39  ;;  %v709_v53 = vpop.f32.mrf.mxu0  ;;  %v1013_v44 = vld [vmem:[%s1481_s11 + $0x8] sm:$0xff] (%p1296_p5) }
 0x10e   : > { %v1185_v54 = vpack.c.bf16 %v866_v47, %v865_v46  ;;  %v710_v55 = vadd.f32 %v709_v53, %v1467_v39  ;;  %v752_v56 = vpop.f32.mrf.mxu1  ;;  %v853_v60 = vmax.f32 %v708_v48, 0.0  ;;  %1014 = vst [vmem:[%s998_s20 + $0x8] sm:$0xff] (%p1296_p5), %v1013_v44 }
 0x10f   : > { %v1186_v57 = vpack.c.bf16 %v868_v51, %v867_v50  ;;  %v753_v58 = vadd.f32 %v752_v56, %v1467_v39  ;;  %v711_v59 = vpop.f32.mrf.mxu0  ;;  %v855_v0 = vmax.f32 %v751_v52, 0.0  ;;  %v1027_v51 = vld [vmem:[%s1481_s11 + $0x40] sm:$0xff] (%p1296_p5) }
 0x110   : > { %983 = vst [vmem:[%s1481_s11 + $0x50] sm:$0xff] %v1185_v54  ;;  %v854_v61 = vmax.f32 %v710_v55, 0.0  ;;  %v712_v34 = vadd.f32 %v711_v59, %v1471_v62  ;;  %v754_v63 = vpop.f32.mrf.mxu1  ;;  %1028 = vst [vmem:[%s998_s20 + $0x400] sm:$0xff] (%p1296_p5), %v1027_v51  ;;  %v1029_v52 = vld [vmem:[%s1481_s11 + $0x48] sm:$0xff] (%p1296_p5) }
 0x111   : > { %984 = vst [vmem:[%s1481_s11 + $0x58] sm:$0xff] %v1186_v57  ;;  %v856_v2 = vmax.f32 %v753_v58, 0.0  ;;  %v755_v1 = vadd.f32 %v754_v63, %v1471_v62  ;;  %v713_v3 = vpop.f32.mrf.mxu0  ;;  %1030 = vst [vmem:[%s998_s20 + $0x408] sm:$0xff] (%p1296_p5), %v1029_v52 }
 0x112   : > { %v1179_v4 = vpack.c.bf16 %v854_v61, %v853_v60  ;;  %v714_v5 = vadd.f32 %v713_v3, %v1471_v62  ;;  %v756_v6 = vpop.f32.mrf.mxu1  ;;  %v869_v10 = vmax.f32 %v712_v34, 0.0 }
 0x113   : > { %v1180_v7 = vpack.c.bf16 %v856_v2, %v855_v0  ;;  %v757_v8 = vadd.f32 %v756_v6, %v1471_v62  ;;  %v793_v9 = vpop.f32.mrf.mxu0  ;;  %v871_v14 = vmax.f32 %v755_v1, 0.0  ;;  %v1015_v45 = vld [vmem:[%s1481_s11 + $0x10] sm:$0xff] (%p1296_p5) }
 0x114   : > { %977 = vst [vmem:[%s1481_s11 + $0x20] sm:$0xff] %v1179_v4  ;;  %v870_v11 = vmax.f32 %v714_v5, 0.0  ;;  %v794_v12 = vadd.f32 %v793_v9, %v1467_v39  ;;  %v836_v13 = vpop.f32.mrf.mxu1  ;;  %v1017_v46 = vld [vmem:[%s1481_s11 + $0x18] sm:$0xff] (%p1296_p5)  ;;  %1016 = vst [vmem:[%s998_s20 + $0x10] sm:$0xff] (%p1296_p5), %v1015_v45 }
 0x115   : > { %978 = vst [vmem:[%s1481_s11 + $0x28] sm:$0xff] %v1180_v7  ;;  %v872_v15 = vmax.f32 %v757_v8, 0.0  ;;  %v837_v16 = vadd.f32 %v836_v13, %v1467_v39  ;;  %v795_v17 = vpop.f32.mrf.mxu0  ;;  %1018 = vst [vmem:[%s998_s20 + $0x18] sm:$0xff] (%p1296_p5), %v1017_v46 }
 0x116   : > { %v1187_v18 = vpack.c.bf16 %v870_v11, %v869_v10  ;;  %v796_v19 = vadd.f32 %v795_v17, %v1467_v39  ;;  %v838_v20 = vpop.f32.mrf.mxu1  ;;  %v857_v24 = vmax.f32 %v794_v12, 0.0 }
 0x117   : > { %v1188_v21 = vpack.c.bf16 %v872_v15, %v871_v14  ;;  %v839_v22 = vadd.f32 %v838_v20, %v1467_v39  ;;  %v797_v23 = vpop.f32.mrf.mxu0  ;;  %v859_v28 = vmax.f32 %v837_v16, 0.0  ;;  %v1031_v53 = vld [vmem:[%s1481_s11 + $0x50] sm:$0xff] (%p1296_p5) }
 0x118   : > { %985 = vst [vmem:[%s1481_s11 + $0x60] sm:$0xff] %v1187_v18  ;;  %v858_v25 = vmax.f32 %v796_v19, 0.0  ;;  %v798_v26 = vadd.f32 %v797_v23, %v1471_v62  ;;  %v840_v27 = vpop.f32.mrf.mxu1  ;;  %v1033_v54 = vld [vmem:[%s1481_s11 + $0x58] sm:$0xff] (%p1296_p5)  ;;  %1032 = vst [vmem:[%s998_s20 + $0x410] sm:$0xff] (%p1296_p5), %v1031_v53 }
 0x119   : > { %986 = vst [vmem:[%s1481_s11 + $0x68] sm:$0xff] %v1188_v21  ;;  %v860_v29 = vmax.f32 %v839_v22, 0.0  ;;  %v841_v30 = vadd.f32 %v840_v27, %v1471_v62  ;;  %v799_v31 = vpop.f32.mrf.mxu0  ;;  %1034 = vst [vmem:[%s998_s20 + $0x418] sm:$0xff] (%p1296_p5), %v1033_v54 }
 0x11a   : > { %v1181_v32 = vpack.c.bf16 %v858_v25, %v857_v24  ;;  %v800_v39 = vadd.f32 %v799_v31, %v1471_v62  ;;  %v842_v33 = vpop.f32.mrf.mxu1  ;;  %v873_v37 = vmax.f32 %v798_v26, 0.0 }
 0x11b   : > { %v1182_v35 = vpack.c.bf16 %v860_v29, %v859_v28  ;;  %v843_v36 = vadd.f32 %v842_v33, %v1471_v62  ;;  %v875_v40 = vmax.f32 %v841_v30, 0.0  ;;  %v1011_v62 = vld [vmem:[%s1481_s11] sm:$0xff] (%p1296_p5) }
 0x11c   : > { %979 = vst [vmem:[%s1481_s11 + $0x30] sm:$0xff] %v1181_v32  ;;  %v874_v38 = vmax.f32 %v800_v39, 0.0  ;;  %v1019_v47 = vld [vmem:[%s1481_s11 + $0x20] sm:$0xff] (%p1296_p5)  ;;  %v1021_v48 = vld [vmem:[%s1481_s11 + $0x28] sm:$0xff] (%p1296_p5)  ;;  %1012 = vst [vmem:[%s998_s20] sm:$0xff] (%p1296_p5), %v1011_v62 }
 0x11d   : > { %980 = vst [vmem:[%s1481_s11 + $0x38] sm:$0xff] %v1182_v35  ;;  %v876_v41 = vmax.f32 %v843_v36, 0.0  ;;  %995 = sbr.rel (!%p1296_p5) target bundleno = 298 (0x12a), region = 59  ;;  %1020 = vst [vmem:[%s998_s20 + $0x20] sm:$0xff] (%p1296_p5), %v1019_v47 }
 0x11e   : > { %v1189_v42 = vpack.c.bf16 %v874_v38, %v873_v37  ;;  %1022 = vst [vmem:[%s998_s20 + $0x28] sm:$0xff] (%p1296_p5), %v1021_v48 }
 0x11f   : > { %v1190_v43 = vpack.c.bf16 %v876_v41, %v875_v40  ;;  %v1035_v55 = vld [vmem:[%s1481_s11 + $0x60] sm:$0xff] (%p1296_p5) }
 0x120   : > { %987 = vst [vmem:[%s1481_s11 + $0x70] sm:$0xff] %v1189_v42  ;;  %v1037_v56 = vld [vmem:[%s1481_s11 + $0x68] sm:$0xff] (%p1296_p5)  ;;  %1036 = vst [vmem:[%s998_s20 + $0x420] sm:$0xff] (%p1296_p5), %v1035_v55 }
 0x121   : > { %988 = vst [vmem:[%s1481_s11 + $0x78] sm:$0xff] %v1190_v43  ;;  %1038 = vst [vmem:[%s998_s20 + $0x428] sm:$0xff] (%p1296_p5), %v1037_v56 }
 0x123   : > { %v1023_v49 = vld [vmem:[%s1481_s11 + $0x30] sm:$0xff] }
 0x124   : > { %v1025_v50 = vld [vmem:[%s1481_s11 + $0x38] sm:$0xff]  ;;  %1024 = vst [vmem:[%s998_s20 + $0x30] sm:$0xff] %v1023_v49 }
 0x125   : > { %1026 = vst [vmem:[%s998_s20 + $0x38] sm:$0xff] %v1025_v50 }
 0x127   : > { %v1039_v57 = vld [vmem:[%s1481_s11 + $0x70] sm:$0xff] }
 0x128   : > { %1040 = vst [vmem:[%s998_s20 + $0x430] sm:$0xff] %v1039_v57  ;;  %v1041_v58 = vld [vmem:[%s1481_s11 + $0x78] sm:$0xff] }
 0x129   : > { %1042 = vst [vmem:[%s998_s20 + $0x438] sm:$0xff] %v1041_v58 }
 0x12a PF: > { %p10_p10 = scmp.ge.s32.totalorder %s1283_s16, 18   ;;  %s1561_s12 = smov %s1238_s13 }
 0x12b   : > { %s1562_s13 = smov %s1294_s19  ;;  %s1563_s14 = smov %s1283_s16 }
 0x12c   :  { %12 = sbr.rel (!%p10_p10) target bundleno = 2 (0x2), region = 113 }

// kernel: encoder_conv_forward.6
= control target key start
LH: loop header
LB: loop body
LE: loop exit
PB: predicated region body
PF: predicated region fallthrough
CT: control target
= control target key end

     0   :  { %s2571_s12 = smov 0   ;;  %s2573_s13 = smov 0   ;;  %s3325_s0 = inlined_call_operand.vmem [shape: bf16[32,144], index: 0, kind: input, shape index: {}]   ;;  %s3326_s1 = inlined_call_operand.vmem [shape: bf16[144,8192], index: 1, kind: input, shape index: {}]   ;;  %s3327_s2 = inlined_call_operand.vmem [shape: f32[32,1], index: 2, kind: input, shape index: {}]   ;;  %s3328_s3 = inlined_call_operand.vmem [shape: bf16[32,8192], index: 3, kind: output, shape index: {}]  }
   0x1   :  { %s2575_s14 = smov 0  }
   0x2 LB: > { %s2248_s15 = sadd.s32 4294967295, %s2548_s14   ;;  %s2588_s16 = sadd.s32 1, %s2548_s14   ;;  %s2548_s14 = sphi %s2575_s14, %s3332_s14   ;;  %s2544_s13 = sphi %s2573_s13, %s3331_s13   ;;  %s2540_s12 = sphi %s2571_s12, %s3330_s12  }
   0x3   : > { %s38_s17 = ssub.s32 %s2548_s14, %s2588_s16  ;;  %s41_s18 = sadd.s32 1, %s2544_s13 }
   0x4   : > { %p39_p0 = scmp.eq.s32.totalorder %s38_s17, 0  ;;  %p48_p1 = scmp.ne.s32.totalorder %s2544_s13, %s2540_s12 }
   0x5   : > { %p49_p2 = scmp.eq.s32.totalorder %s2548_s14, 0  ;;  %p99_p3 = scmp.eq.s32.totalorder %s2248_s15, 3 }
   0x6   : > { %s2599_s19 = scalar_select %p39_p0, %s2544_s13, %s41_s18  }
   0x7   : > { %p50_p4 = por %p49_p2, %p48_p1  ;;  %p2601_p5 = por %p99_p3, %p48_p1 }
   0x8   : > { %p2251_p6 = scmp.ge.s32.totalorder %s2548_s14, 4 }
   0xa   : > { %127 = sbr.rel (%p2251_p6) target bundleno = 92 (0x5c), region = 24 }
   0xf   : > { %130 = sbr.rel (!%p50_p4) target bundleno = 92 (0x5c), region = 28  ;;  %s132_s21 = sand.u32 (%p50_p4), 1, %s2544_s13  }
  0x10   : > { %s2457_s22 = sshll.u32 (%p50_p4), %s2548_s14, 6  ;;  %s2491_s23 = smul.u32 (%p50_p4), 1152, %s132_s21 }
  0x11   : > { %s2611_s26 = scalar_lea.vmem (%p50_p4), %s3326_s1, %s2457_s22 }
  0x12   : > { %v150_v0 = vld [vmem:[%s2611_s26] sm:$0xff] (%p50_p4)  ;;  %v152_v1 = vld [vmem:[%s2611_s26 + $0x8] sm:$0xff] (%p50_p4)  ;;  %v154_v2 = vld [vmem:[%s2611_s26 + $0x10] sm:$0xff] (%p50_p4)  ;;  %s2619_s27 = scalar_lea.vmem (%p50_p4), [#allocation2], %s2491_s23 }
  0x13   : > { %v156_v3 = vld [vmem:[%s2611_s26 + $0x18] sm:$0xff] (%p50_p4)  ;;  %v158_v4 = vld [vmem:[%s2611_s26 + $0x20] sm:$0xff] (%p50_p4)  ;;  %v160_v5 = vld [vmem:[%s2611_s26 + $0x28] sm:$0xff] (%p50_p4)  ;;  %151 = vst [vmem:[%s2619_s27] sm:$0xff] (%p50_p4), %v150_v0 }
  0x14   : > { %153 = vst [vmem:[%s2619_s27 + $0x8] sm:$0xff] %v152_v1  ;;  %155 = vst [vmem:[%s2619_s27 + $0x10] sm:$0xff] %v154_v2  ;;  %v162_v6 = vld [vmem:[%s2611_s26 + $0x30] sm:$0xff]  ;;  %v164_v7 = vld [vmem:[%s2611_s26 + $0x38] sm:$0xff] }
  0x15   : > { %157 = vst [vmem:[%s2619_s27 + $0x18] sm:$0xff] %v156_v3  ;;  %159 = vst [vmem:[%s2619_s27 + $0x20] sm:$0xff] %v158_v4  ;;  %v166_v8 = vld [vmem:[%s2611_s26 + $0x100] sm:$0xff]  ;;  %v168_v9 = vld [vmem:[%s2611_s26 + $0x108] sm:$0xff] }
  0x16   : > { %161 = vst [vmem:[%s2619_s27 + $0x28] sm:$0xff] %v160_v5  ;;  %163 = vst [vmem:[%s2619_s27 + $0x30] sm:$0xff] %v162_v6  ;;  %v170_v10 = vld [vmem:[%s2611_s26 + $0x110] sm:$0xff]  ;;  %v172_v11 = vld [vmem:[%s2611_s26 + $0x118] sm:$0xff] }
  0x17   : > { %165 = vst [vmem:[%s2619_s27 + $0x38] sm:$0xff] %v164_v7  ;;  %167 = vst [vmem:[%s2619_s27 + $0x40] sm:$0xff] %v166_v8  ;;  %v174_v12 = vld [vmem:[%s2611_s26 + $0x120] sm:$0xff]  ;;  %v176_v13 = vld [vmem:[%s2611_s26 + $0x128] sm:$0xff] }
  0x18   : > { %169 = vst [vmem:[%s2619_s27 + $0x48] sm:$0xff] %v168_v9  ;;  %171 = vst [vmem:[%s2619_s27 + $0x50] sm:$0xff] %v170_v10  ;;  %v178_v14 = vld [vmem:[%s2611_s26 + $0x130] sm:$0xff]  ;;  %v180_v15 = vld [vmem:[%s2611_s26 + $0x138] sm:$0xff] }
  0x19   : > { %173 = vst [vmem:[%s2619_s27 + $0x58] sm:$0xff] %v172_v11  ;;  %175 = vst [vmem:[%s2619_s27 + $0x60] sm:$0xff] %v174_v12  ;;  %v182_v16 = vld [vmem:[%s2611_s26 + $0x200] sm:$0xff]  ;;  %v184_v17 = vld [vmem:[%s2611_s26 + $0x208] sm:$0xff] }
  0x1a   : > { %177 = vst [vmem:[%s2619_s27 + $0x68] sm:$0xff] %v176_v13  ;;  %179 = vst [vmem:[%s2619_s27 + $0x70] sm:$0xff] %v178_v14  ;;  %v186_v18 = vld [vmem:[%s2611_s26 + $0x210] sm:$0xff]  ;;  %v188_v19 = vld [vmem:[%s2611_s26 + $0x218] sm:$0xff] }
  0x1b   : > { %181 = vst [vmem:[%s2619_s27 + $0x78] sm:$0xff] %v180_v15  ;;  %183 = vst [vmem:[%s2619_s27 + $0x80] sm:$0xff] %v182_v16  ;;  %v190_v20 = vld [vmem:[%s2611_s26 + $0x220] sm:$0xff]  ;;  %v192_v21 = vld [vmem:[%s2611_s26 + $0x228] sm:$0xff] }
  0x1c   : > { %185 = vst [vmem:[%s2619_s27 + $0x88] sm:$0xff] %v184_v17  ;;  %187 = vst [vmem:[%s2619_s27 + $0x90] sm:$0xff] %v186_v18  ;;  %v194_v22 = vld [vmem:[%s2611_s26 + $0x230] sm:$0xff]  ;;  %v196_v23 = vld [vmem:[%s2611_s26 + $0x238] sm:$0xff] }
  0x1d   : > { %189 = vst [vmem:[%s2619_s27 + $0x98] sm:$0xff] %v188_v19  ;;  %191 = vst [vmem:[%s2619_s27 + $0xa0] sm:$0xff] %v190_v20  ;;  %v198_v24 = vld [vmem:[%s2611_s26 + $0x300] sm:$0xff]  ;;  %v200_v25 = vld [vmem:[%s2611_s26 + $0x308] sm:$0xff] }
  0x1e   : > { %193 = vst [vmem:[%s2619_s27 + $0xa8] sm:$0xff] %v192_v21  ;;  %195 = vst [vmem:[%s2619_s27 + $0xb0] sm:$0xff] %v194_v22  ;;  %v202_v26 = vld [vmem:[%s2611_s26 + $0x310] sm:$0xff]  ;;  %v204_v27 = vld [vmem:[%s2611_s26 + $0x318] sm:$0xff] }
  0x1f   : > { %197 = vst [vmem:[%s2619_s27 + $0xb8] sm:$0xff] %v196_v23  ;;  %199 = vst [vmem:[%s2619_s27 + $0xc0] sm:$0xff] %v198_v24  ;;  %v206_v28 = vld [vmem:[%s2611_s26 + $0x320] sm:$0xff]  ;;  %v208_v29 = vld [vmem:[%s2611_s26 + $0x328] sm:$0xff] }
  0x20   : > { %201 = vst [vmem:[%s2619_s27 + $0xc8] sm:$0xff] %v200_v25  ;;  %203 = vst [vmem:[%s2619_s27 + $0xd0] sm:$0xff] %v202_v26  ;;  %v210_v30 = vld [vmem:[%s2611_s26 + $0x330] sm:$0xff]  ;;  %v212_v31 = vld [vmem:[%s2611_s26 + $0x338] sm:$0xff] }
  0x21   : > { %205 = vst [vmem:[%s2619_s27 + $0xd8] sm:$0xff] %v204_v27  ;;  %207 = vst [vmem:[%s2619_s27 + $0xe0] sm:$0xff] %v206_v28  ;;  %v214_v32 = vld [vmem:[%s2611_s26 + $0x400] sm:$0xff]  ;;  %v216_v33 = vld [vmem:[%s2611_s26 + $0x408] sm:$0xff] }
  0x22   : > { %209 = vst [vmem:[%s2619_s27 + $0xe8] sm:$0xff] %v208_v29  ;;  %211 = vst [vmem:[%s2619_s27 + $0xf0] sm:$0xff] %v210_v30  ;;  %v218_v34 = vld [vmem:[%s2611_s26 + $0x410] sm:$0xff]  ;;  %v220_v35 = vld [vmem:[%s2611_s26 + $0x418] sm:$0xff] }
  0x23   : > { %213 = vst [vmem:[%s2619_s27 + $0xf8] sm:$0xff] %v212_v31  ;;  %215 = vst [vmem:[%s2619_s27 + $0x100] sm:$0xff] %v214_v32  ;;  %v222_v36 = vld [vmem:[%s2611_s26 + $0x420] sm:$0xff]  ;;  %v224_v37 = vld [vmem:[%s2611_s26 + $0x428] sm:$0xff] }
  0x24   : > { %217 = vst [vmem:[%s2619_s27 + $0x108] sm:$0xff] %v216_v33  ;;  %219 = vst [vmem:[%s2619_s27 + $0x110] sm:$0xff] %v218_v34  ;;  %v226_v38 = vld [vmem:[%s2611_s26 + $0x430] sm:$0xff]  ;;  %v228_v39 = vld [vmem:[%s2611_s26 + $0x438] sm:$0xff] }
  0x25   : > { %221 = vst [vmem:[%s2619_s27 + $0x118] sm:$0xff] %v220_v35  ;;  %223 = vst [vmem:[%s2619_s27 + $0x120] sm:$0xff] %v222_v36  ;;  %v230_v40 = vld [vmem:[%s2611_s26 + $0x500] sm:$0xff]  ;;  %v232_v41 = vld [vmem:[%s2611_s26 + $0x508] sm:$0xff] }
  0x26   : > { %225 = vst [vmem:[%s2619_s27 + $0x128] sm:$0xff] %v224_v37  ;;  %227 = vst [vmem:[%s2619_s27 + $0x130] sm:$0xff] %v226_v38  ;;  %v234_v42 = vld [vmem:[%s2611_s26 + $0x510] sm:$0xff]  ;;  %v236_v43 = vld [vmem:[%s2611_s26 + $0x518] sm:$0xff] }
  0x27   : > { %229 = vst [vmem:[%s2619_s27 + $0x138] sm:$0xff] %v228_v39  ;;  %231 = vst [vmem:[%s2619_s27 + $0x140] sm:$0xff] %v230_v40  ;;  %v238_v44 = vld [vmem:[%s2611_s26 + $0x520] sm:$0xff]  ;;  %v240_v45 = vld [vmem:[%s2611_s26 + $0x528] sm:$0xff] }
  0x28   : > { %233 = vst [vmem:[%s2619_s27 + $0x148] sm:$0xff] %v232_v41  ;;  %235 = vst [vmem:[%s2619_s27 + $0x150] sm:$0xff] %v234_v42  ;;  %v242_v46 = vld [vmem:[%s2611_s26 + $0x530] sm:$0xff]  ;;  %v244_v47 = vld [vmem:[%s2611_s26 + $0x538] sm:$0xff] }
  0x29   : > { %237 = vst [vmem:[%s2619_s27 + $0x158] sm:$0xff] %v236_v43  ;;  %239 = vst [vmem:[%s2619_s27 + $0x160] sm:$0xff] %v238_v44  ;;  %v246_v48 = vld [vmem:[%s2611_s26 + $0x600] sm:$0xff]  ;;  %v248_v49 = vld [vmem:[%s2611_s26 + $0x608] sm:$0xff] }
  0x2a   : > { %241 = vst [vmem:[%s2619_s27 + $0x168] sm:$0xff] %v240_v45  ;;  %243 = vst [vmem:[%s2619_s27 + $0x170] sm:$0xff] %v242_v46  ;;  %v250_v50 = vld [vmem:[%s2611_s26 + $0x610] sm:$0xff]  ;;  %v252_v51 = vld [vmem:[%s2611_s26 + $0x618] sm:$0xff] }
  0x2b   : > { %245 = vst [vmem:[%s2619_s27 + $0x178] sm:$0xff] %v244_v47  ;;  %247 = vst [vmem:[%s2619_s27 + $0x180] sm:$0xff] %v246_v48  ;;  %v254_v52 = vld [vmem:[%s2611_s26 + $0x620] sm:$0xff]  ;;  %v256_v53 = vld [vmem:[%s2611_s26 + $0x628] sm:$0xff] }
  0x2c   : > { %249 = vst [vmem:[%s2619_s27 + $0x188] sm:$0xff] %v248_v49  ;;  %251 = vst [vmem:[%s2619_s27 + $0x190] sm:$0xff] %v250_v50  ;;  %v258_v54 = vld [vmem:[%s2611_s26 + $0x630] sm:$0xff]  ;;  %v260_v55 = vld [vmem:[%s2611_s26 + $0x638] sm:$0xff] }
  0x2d   : > { %253 = vst [vmem:[%s2619_s27 + $0x198] sm:$0xff] %v252_v51  ;;  %255 = vst [vmem:[%s2619_s27 + $0x1a0] sm:$0xff] %v254_v52  ;;  %v262_v56 = vld [vmem:[%s2611_s26 + $0x700] sm:$0xff]  ;;  %v264_v57 = vld [vmem:[%s2611_s26 + $0x708] sm:$0xff] }
  0x2e   : > { %257 = vst [vmem:[%s2619_s27 + $0x1a8] sm:$0xff] %v256_v53  ;;  %259 = vst [vmem:[%s2619_s27 + $0x1b0] sm:$0xff] %v258_v54  ;;  %v266_v58 = vld [vmem:[%s2611_s26 + $0x710] sm:$0xff]  ;;  %v268_v59 = vld [vmem:[%s2611_s26 + $0x718] sm:$0xff] }
  0x2f   : > { %261 = vst [vmem:[%s2619_s27 + $0x1b8] sm:$0xff] %v260_v55  ;;  %263 = vst [vmem:[%s2619_s27 + $0x1c0] sm:$0xff] %v262_v56  ;;  %v270_v60 = vld [vmem:[%s2611_s26 + $0x720] sm:$0xff]  ;;  %v272_v61 = vld [vmem:[%s2611_s26 + $0x728] sm:$0xff] }
  0x30   : > { %265 = vst [vmem:[%s2619_s27 + $0x1c8] sm:$0xff] %v264_v57  ;;  %267 = vst [vmem:[%s2619_s27 + $0x1d0] sm:$0xff] %v266_v58  ;;  %v274_v62 = vld [vmem:[%s2611_s26 + $0x730] sm:$0xff]  ;;  %v276_v63 = vld [vmem:[%s2611_s26 + $0x738] sm:$0xff] }
  0x31   : > { %269 = vst [vmem:[%s2619_s27 + $0x1d8] sm:$0xff] %v268_v59  ;;  %271 = vst [vmem:[%s2619_s27 + $0x1e0] sm:$0xff] %v270_v60  ;;  %v278_v0 = vld [vmem:[%s2611_s26 + $0x800] sm:$0xff]  ;;  %v280_v1 = vld [vmem:[%s2611_s26 + $0x808] sm:$0xff] }
  0x32   : > { %273 = vst [vmem:[%s2619_s27 + $0x1e8] sm:$0xff] %v272_v61  ;;  %275 = vst [vmem:[%s2619_s27 + $0x1f0] sm:$0xff] %v274_v62  ;;  %v282_v2 = vld [vmem:[%s2611_s26 + $0x810] sm:$0xff]  ;;  %v284_v3 = vld [vmem:[%s2611_s26 + $0x818] sm:$0xff] }
  0x33   : > { %277 = vst [vmem:[%s2619_s27 + $0x1f8] sm:$0xff] %v276_v63  ;;  %279 = vst [vmem:[%s2619_s27 + $0x200] sm:$0xff] %v278_v0  ;;  %v286_v4 = vld [vmem:[%s2611_s26 + $0x820] sm:$0xff]  ;;  %v288_v5 = vld [vmem:[%s2611_s26 + $0x828] sm:$0xff] }
  0x34   : > { %281 = vst [vmem:[%s2619_s27 + $0x208] sm:$0xff] %v280_v1  ;;  %283 = vst [vmem:[%s2619_s27 + $0x210] sm:$0xff] %v282_v2  ;;  %v290_v6 = vld [vmem:[%s2611_s26 + $0x830] sm:$0xff]  ;;  %v292_v7 = vld [vmem:[%s2611_s26 + $0x838] sm:$0xff] }
  0x35   : > { %285 = vst [vmem:[%s2619_s27 + $0x218] sm:$0xff] %v284_v3  ;;  %287 = vst [vmem:[%s2619_s27 + $0x220] sm:$0xff] %v286_v4  ;;  %v294_v8 = vld [vmem:[%s2611_s26 + $0x900] sm:$0xff]  ;;  %v296_v9 = vld [vmem:[%s2611_s26 + $0x908] sm:$0xff] }
  0x36   : > { %289 = vst [vmem:[%s2619_s27 + $0x228] sm:$0xff] %v288_v5  ;;  %291 = vst [vmem:[%s2619_s27 + $0x230] sm:$0xff] %v290_v6  ;;  %v298_v10 = vld [vmem:[%s2611_s26 + $0x910] sm:$0xff]  ;;  %v300_v11 = vld [vmem:[%s2611_s26 + $0x918] sm:$0xff] }
  0x37   : > { %293 = vst [vmem:[%s2619_s27 + $0x238] sm:$0xff] %v292_v7  ;;  %295 = vst [vmem:[%s2619_s27 + $0x240] sm:$0xff] %v294_v8  ;;  %v302_v12 = vld [vmem:[%s2611_s26 + $0x920] sm:$0xff]  ;;  %v304_v13 = vld [vmem:[%s2611_s26 + $0x928] sm:$0xff] }
  0x38   : > { %297 = vst [vmem:[%s2619_s27 + $0x248] sm:$0xff] %v296_v9  ;;  %299 = vst [vmem:[%s2619_s27 + $0x250] sm:$0xff] %v298_v10  ;;  %v306_v14 = vld [vmem:[%s2611_s26 + $0x930] sm:$0xff]  ;;  %v308_v15 = vld [vmem:[%s2611_s26 + $0x938] sm:$0xff] }
  0x39   : > { %301 = vst [vmem:[%s2619_s27 + $0x258] sm:$0xff] %v300_v11  ;;  %303 = vst [vmem:[%s2619_s27 + $0x260] sm:$0xff] %v302_v12  ;;  %v310_v16 = vld [vmem:[%s2611_s26 + $0xa00] sm:$0xff]  ;;  %v312_v17 = vld [vmem:[%s2611_s26 + $0xa08] sm:$0xff] }
  0x3a   : > { %305 = vst [vmem:[%s2619_s27 + $0x268] sm:$0xff] %v304_v13  ;;  %307 = vst [vmem:[%s2619_s27 + $0x270] sm:$0xff] %v306_v14  ;;  %v314_v18 = vld [vmem:[%s2611_s26 + $0xa10] sm:$0xff]  ;;  %v316_v19 = vld [vmem:[%s2611_s26 + $0xa18] sm:$0xff] }
  0x3b   : > { %309 = vst [vmem:[%s2619_s27 + $0x278] sm:$0xff] %v308_v15  ;;  %311 = vst [vmem:[%s2619_s27 + $0x280] sm:$0xff] %v310_v16  ;;  %v318_v20 = vld [vmem:[%s2611_s26 + $0xa20] sm:$0xff]  ;;  %v320_v21 = vld [vmem:[%s2611_s26 + $0xa28] sm:$0xff] }
  0x3c   : > { %313 = vst [vmem:[%s2619_s27 + $0x288] sm:$0xff] %v312_v17  ;;  %315 = vst [vmem:[%s2619_s27 + $0x290] sm:$0xff] %v314_v18  ;;  %v322_v22 = vld [vmem:[%s2611_s26 + $0xa30] sm:$0xff]  ;;  %v324_v23 = vld [vmem:[%s2611_s26 + $0xa38] sm:$0xff] }
  0x3d   : > { %317 = vst [vmem:[%s2619_s27 + $0x298] sm:$0xff] %v316_v19  ;;  %319 = vst [vmem:[%s2619_s27 + $0x2a0] sm:$0xff] %v318_v20  ;;  %v326_v24 = vld [vmem:[%s2611_s26 + $0xb00] sm:$0xff]  ;;  %v328_v25 = vld [vmem:[%s2611_s26 + $0xb08] sm:$0xff] }
  0x3e   : > { %321 = vst [vmem:[%s2619_s27 + $0x2a8] sm:$0xff] %v320_v21  ;;  %323 = vst [vmem:[%s2619_s27 + $0x2b0] sm:$0xff] %v322_v22  ;;  %v330_v26 = vld [vmem:[%s2611_s26 + $0xb10] sm:$0xff]  ;;  %v332_v27 = vld [vmem:[%s2611_s26 + $0xb18] sm:$0xff] }
  0x3f   : > { %325 = vst [vmem:[%s2619_s27 + $0x2b8] sm:$0xff] %v324_v23  ;;  %327 = vst [vmem:[%s2619_s27 + $0x2c0] sm:$0xff] %v326_v24  ;;  %v334_v28 = vld [vmem:[%s2611_s26 + $0xb20] sm:$0xff]  ;;  %v336_v29 = vld [vmem:[%s2611_s26 + $0xb28] sm:$0xff] }
  0x40   : > { %329 = vst [vmem:[%s2619_s27 + $0x2c8] sm:$0xff] %v328_v25  ;;  %331 = vst [vmem:[%s2619_s27 + $0x2d0] sm:$0xff] %v330_v26  ;;  %v338_v30 = vld [vmem:[%s2611_s26 + $0xb30] sm:$0xff]  ;;  %v340_v31 = vld [vmem:[%s2611_s26 + $0xb38] sm:$0xff] }
  0x41   : > { %333 = vst [vmem:[%s2619_s27 + $0x2d8] sm:$0xff] %v332_v27  ;;  %335 = vst [vmem:[%s2619_s27 + $0x2e0] sm:$0xff] %v334_v28  ;;  %v342_v32 = vld [vmem:[%s2611_s26 + $0xc00] sm:$0xff]  ;;  %v344_v33 = vld [vmem:[%s2611_s26 + $0xc08] sm:$0xff] }
  0x42   : > { %337 = vst [vmem:[%s2619_s27 + $0x2e8] sm:$0xff] %v336_v29  ;;  %339 = vst [vmem:[%s2619_s27 + $0x2f0] sm:$0xff] %v338_v30  ;;  %v346_v34 = vld [vmem:[%s2611_s26 + $0xc10] sm:$0xff]  ;;  %v348_v35 = vld [vmem:[%s2611_s26 + $0xc18] sm:$0xff] }
  0x43   : > { %341 = vst [vmem:[%s2619_s27 + $0x2f8] sm:$0xff] %v340_v31  ;;  %343 = vst [vmem:[%s2619_s27 + $0x300] sm:$0xff] %v342_v32  ;;  %v350_v36 = vld [vmem:[%s2611_s26 + $0xc20] sm:$0xff]  ;;  %v352_v37 = vld [vmem:[%s2611_s26 + $0xc28] sm:$0xff] }
  0x44   : > { %345 = vst [vmem:[%s2619_s27 + $0x308] sm:$0xff] %v344_v33  ;;  %347 = vst [vmem:[%s2619_s27 + $0x310] sm:$0xff] %v346_v34  ;;  %v354_v38 = vld [vmem:[%s2611_s26 + $0xc30] sm:$0xff]  ;;  %v356_v39 = vld [vmem:[%s2611_s26 + $0xc38] sm:$0xff] }
  0x45   : > { %349 = vst [vmem:[%s2619_s27 + $0x318] sm:$0xff] %v348_v35  ;;  %351 = vst [vmem:[%s2619_s27 + $0x320] sm:$0xff] %v350_v36  ;;  %v358_v40 = vld [vmem:[%s2611_s26 + $0xd00] sm:$0xff]  ;;  %v360_v41 = vld [vmem:[%s2611_s26 + $0xd08] sm:$0xff] }
  0x46   : > { %353 = vst [vmem:[%s2619_s27 + $0x328] sm:$0xff] %v352_v37  ;;  %355 = vst [vmem:[%s2619_s27 + $0x330] sm:$0xff] %v354_v38  ;;  %v362_v42 = vld [vmem:[%s2611_s26 + $0xd10] sm:$0xff]  ;;  %v364_v43 = vld [vmem:[%s2611_s26 + $0xd18] sm:$0xff] }
  0x47   : > { %357 = vst [vmem:[%s2619_s27 + $0x338] sm:$0xff] %v356_v39  ;;  %359 = vst [vmem:[%s2619_s27 + $0x340] sm:$0xff] %v358_v40  ;;  %v366_v44 = vld [vmem:[%s2611_s26 + $0xd20] sm:$0xff]  ;;  %v368_v45 = vld [vmem:[%s2611_s26 + $0xd28] sm:$0xff] }
  0x48   : > { %361 = vst [vmem:[%s2619_s27 + $0x348] sm:$0xff] %v360_v41  ;;  %363 = vst [vmem:[%s2619_s27 + $0x350] sm:$0xff] %v362_v42  ;;  %v370_v46 = vld [vmem:[%s2611_s26 + $0xd30] sm:$0xff]  ;;  %v372_v47 = vld [vmem:[%s2611_s26 + $0xd38] sm:$0xff] }
  0x49   : > { %365 = vst [vmem:[%s2619_s27 + $0x358] sm:$0xff] %v364_v43  ;;  %367 = vst [vmem:[%s2619_s27 + $0x360] sm:$0xff] %v366_v44  ;;  %v374_v48 = vld [vmem:[%s2611_s26 + $0xe00] sm:$0xff]  ;;  %v376_v49 = vld [vmem:[%s2611_s26 + $0xe08] sm:$0xff] }
  0x4a   : > { %369 = vst [vmem:[%s2619_s27 + $0x368] sm:$0xff] %v368_v45  ;;  %371 = vst [vmem:[%s2619_s27 + $0x370] sm:$0xff] %v370_v46  ;;  %v378_v50 = vld [vmem:[%s2611_s26 + $0xe10] sm:$0xff]  ;;  %v380_v51 = vld [vmem:[%s2611_s26 + $0xe18] sm:$0xff] }
  0x4b   : > { %373 = vst [vmem:[%s2619_s27 + $0x378] sm:$0xff] %v372_v47  ;;  %375 = vst [vmem:[%s2619_s27 + $0x380] sm:$0xff] %v374_v48  ;;  %v382_v52 = vld [vmem:[%s2611_s26 + $0xe20] sm:$0xff]  ;;  %v384_v53 = vld [vmem:[%s2611_s26 + $0xe28] sm:$0xff] }
  0x4c   : > { %377 = vst [vmem:[%s2619_s27 + $0x388] sm:$0xff] %v376_v49  ;;  %379 = vst [vmem:[%s2619_s27 + $0x390] sm:$0xff] %v378_v50  ;;  %v386_v54 = vld [vmem:[%s2611_s26 + $0xe30] sm:$0xff]  ;;  %v388_v55 = vld [vmem:[%s2611_s26 + $0xe38] sm:$0xff] }
  0x4d   : > { %381 = vst [vmem:[%s2619_s27 + $0x398] sm:$0xff] %v380_v51  ;;  %383 = vst [vmem:[%s2619_s27 + $0x3a0] sm:$0xff] %v382_v52  ;;  %v390_v56 = vld [vmem:[%s2611_s26 + $0xf00] sm:$0xff]  ;;  %v392_v57 = vld [vmem:[%s2611_s26 + $0xf08] sm:$0xff] }
  0x4e   : > { %385 = vst [vmem:[%s2619_s27 + $0x3a8] sm:$0xff] %v384_v53  ;;  %387 = vst [vmem:[%s2619_s27 + $0x3b0] sm:$0xff] %v386_v54  ;;  %v394_v58 = vld [vmem:[%s2611_s26 + $0xf10] sm:$0xff]  ;;  %v396_v59 = vld [vmem:[%s2611_s26 + $0xf18] sm:$0xff] }
  0x4f   : > { %389 = vst [vmem:[%s2619_s27 + $0x3b8] sm:$0xff] %v388_v55  ;;  %391 = vst [vmem:[%s2619_s27 + $0x3c0] sm:$0xff] %v390_v56  ;;  %v398_v60 = vld [vmem:[%s2611_s26 + $0xf20] sm:$0xff]  ;;  %v400_v61 = vld [vmem:[%s2611_s26 + $0xf28] sm:$0xff] }
  0x50   : > { %393 = vst [vmem:[%s2619_s27 + $0x3c8] sm:$0xff] %v392_v57  ;;  %395 = vst [vmem:[%s2619_s27 + $0x3d0] sm:$0xff] %v394_v58  ;;  %v402_v62 = vld [vmem:[%s2611_s26 + $0xf30] sm:$0xff]  ;;  %v404_v63 = vld [vmem:[%s2611_s26 + $0xf38] sm:$0xff] }
  0x51   : > { %397 = vst [vmem:[%s2619_s27 + $0x3d8] sm:$0xff] %v396_v59  ;;  %399 = vst [vmem:[%s2619_s27 + $0x3e0] sm:$0xff] %v398_v60  ;;  %v406_v0 = vld [vmem:[%s2611_s26 + $0x1000] sm:$0xff]  ;;  %v408_v1 = vld [vmem:[%s2611_s26 + $0x1008] sm:$0xff] }
  0x52   : > { %401 = vst [vmem:[%s2619_s27 + $0x3e8] sm:$0xff] %v400_v61  ;;  %403 = vst [vmem:[%s2619_s27 + $0x3f0] sm:$0xff] %v402_v62  ;;  %v410_v2 = vld [vmem:[%s2611_s26 + $0x1010] sm:$0xff]  ;;  %v412_v3 = vld [vmem:[%s2611_s26 + $0x1018] sm:$0xff] }
  0x53   : > { %405 = vst [vmem:[%s2619_s27 + $0x3f8] sm:$0xff] %v404_v63  ;;  %407 = vst [vmem:[%s2619_s27 + $0x400] sm:$0xff] %v406_v0  ;;  %v414_v4 = vld [vmem:[%s2611_s26 + $0x1020] sm:$0xff]  ;;  %v416_v5 = vld [vmem:[%s2611_s26 + $0x1028] sm:$0xff] }
  0x54   : > { %409 = vst [vmem:[%s2619_s27 + $0x408] sm:$0xff] %v408_v1  ;;  %411 = vst [vmem:[%s2619_s27 + $0x410] sm:$0xff] %v410_v2  ;;  %v418_v6 = vld [vmem:[%s2611_s26 + $0x1030] sm:$0xff]  ;;  %v420_v7 = vld [vmem:[%s2611_s26 + $0x1038] sm:$0xff] }
  0x55   : > { %413 = vst [vmem:[%s2619_s27 + $0x418] sm:$0xff] %v412_v3  ;;  %415 = vst [vmem:[%s2619_s27 + $0x420] sm:$0xff] %v414_v4  ;;  %v422_v8 = vld [vmem:[%s2611_s26 + $0x1100] sm:$0xff]  ;;  %v424_v9 = vld [vmem:[%s2611_s26 + $0x1108] sm:$0xff] }
  0x56   : > { %417 = vst [vmem:[%s2619_s27 + $0x428] sm:$0xff] %v416_v5  ;;  %419 = vst [vmem:[%s2619_s27 + $0x430] sm:$0xff] %v418_v6  ;;  %v426_v10 = vld [vmem:[%s2611_s26 + $0x1110] sm:$0xff]  ;;  %v428_v11 = vld [vmem:[%s2611_s26 + $0x1118] sm:$0xff] }
  0x57   : > { %421 = vst [vmem:[%s2619_s27 + $0x438] sm:$0xff] %v420_v7  ;;  %423 = vst [vmem:[%s2619_s27 + $0x440] sm:$0xff] %v422_v8  ;;  %v430_v12 = vld [vmem:[%s2611_s26 + $0x1120] sm:$0xff]  ;;  %v432_v13 = vld [vmem:[%s2611_s26 + $0x1128] sm:$0xff] }
  0x58   : > { %425 = vst [vmem:[%s2619_s27 + $0x448] sm:$0xff] %v424_v9  ;;  %427 = vst [vmem:[%s2619_s27 + $0x450] sm:$0xff] %v426_v10  ;;  %v434_v14 = vld [vmem:[%s2611_s26 + $0x1130] sm:$0xff]  ;;  %v436_v15 = vld [vmem:[%s2611_s26 + $0x1138] sm:$0xff] }
  0x59   : > { %429 = vst [vmem:[%s2619_s27 + $0x458] sm:$0xff] %v428_v11  ;;  %431 = vst [vmem:[%s2619_s27 + $0x460] sm:$0xff] %v430_v12 }
  0x5a   : > { %433 = vst [vmem:[%s2619_s27 + $0x468] sm:$0xff] %v432_v13  ;;  %435 = vst [vmem:[%s2619_s27 + $0x470] sm:$0xff] %v434_v14 }
  0x5b   : > { %437 = vst [vmem:[%s2619_s27 + $0x478] sm:$0xff] %v436_v15 }
  0x5c PF: > { %p2254_p7 = scmp.ge.s32.totalorder %s2548_s14, 1  ;;  %p442_p8 = scmp.lt.s32.totalorder %s2548_s14, 5 }
  0x5e   : > { %p443_p9 = pnand %p2254_p7, %p442_p8 }
  0x5f   : > { %s449_s28 = sand.u32 (!%p443_p9), 1, %s2540_s12  }
  0x60   : > { %446 = sbr.rel (%p443_p9) target bundleno = 473 (0x1d9), region = 51  ;;  %s2255_s27 = sshll.u32 (!%p443_p9), %s449_s28, 8 }
  0x61   : > { %s2492_s4 = smul.u32 (!%p443_p9), 1152, %s449_s28  ;;  %s3150_s12 = scalar_lea.vmem (!%p443_p9), [#allocation3], %s2255_s27 }
  0x63   : > { %s2920_s7 = scalar_lea.vmem (!%p443_p9), [#allocation2], %s2492_s4 }
  0x65   : > { %v2909_v16 = vld [vmem:[%s3325_s0 + $0x4] ss:$8 sps:$4 sm:$0xff]   ;;  %vm1384_vm0 = vcmask 130048   ;;  %v2550_v18 = vmov 0   ;;  %s2490_s28 = sshll.u32 (%p2601_p5), %s2248_s15, 6 }
  0x66   : > { %2404 = vmatprep.mubr.msk.bf16.mxu0 %vm1384_vm0, %v2909_v16  ;;  %2406 = vmatprep.mubr.msk.bf16.mxu1 %vm1384_vm0, %v2909_v16  ;;  %v622_v17 = vld [vmem:[%s3327_s2] sm:$0xff]  ;;  %v591_v21 = vld [vmem:[%s2920_s7 + $0x388] sm:$0xff]  ;;  %s3252_s20 = scalar_lea.vmem (%p2601_p5), %s3328_s3, %s2490_s28 }
  0x67   : > { %2518 = vset.pattern.permute.xlu0 %v2550_v18  ;;  %2519 = vset.pattern.permute.xlu1 %v2550_v18  ;;  %v590_v19 = vld [vmem:[%s2920_s7 + $0x380] sm:$0xff]  ;;  %v599_v23 = vld [vmem:[%s2920_s7 + $0x3c8] sm:$0xff] }
  0x68   : > { %v598_v20 = vld [vmem:[%s2920_s7 + $0x3c0] sm:$0xff]  ;;  %628 = vperm.xlu0 %2518, %v622_v17   ;;  %v2375_v27 = vcombine.high %v591_v21, %v599_v23  ;;  %v2374_v28 = vcombine.low %v591_v21, %v599_v23  ;;  %v575_v30 = vld [vmem:[%s2920_s7 + $0x308] sm:$0xff] }
  0x69   : > { %v2373_v22 = vcombine.high %v590_v19, %v598_v20  ;;  %v2372_v24 = vcombine.low %v590_v19, %v598_v20  ;;  %v574_v25 = vld [vmem:[%s2920_s7 + $0x300] sm:$0xff]  ;;  %v583_v31 = vld [vmem:[%s2920_s7 + $0x348] sm:$0xff] }
  0x6a   : > { %v582_v26 = vld [vmem:[%s2920_s7 + $0x340] sm:$0xff]  ;;  %v2359_v33 = vcombine.high %v575_v30, %v583_v31  ;;  %v559_v35 = vld [vmem:[%s2920_s7 + $0x288] sm:$0xff]  ;;  %1444 = vmatprep.subr.bf16.mxu1 %v2375_v27  ;;  %v2358_v39 = vcombine.low %v575_v30, %v583_v31  ;;  %v592_v27 = vld [vmem:[%s2920_s7 + $0x390] sm:$0xff] }
  0x6b   : > { %v2357_v29 = vcombine.high %v574_v25, %v582_v26  ;;  %v558_v32 = vld [vmem:[%s2920_s7 + $0x280] sm:$0xff]  ;;  %1391 = vmatprep.subr.bf16.mxu0 %v2373_v22  ;;  %v567_v36 = vld [vmem:[%s2920_s7 + $0x2c8] sm:$0xff]  ;;  %v2356_v37 = vcombine.low %v574_v25, %v582_v26  ;;  %1445 = vmatpush1.bf16.msra.mxu1 %v2374_v28  ;;  %v600_v28 = vld [vmem:[%s2920_s7 + $0x3d0] sm:$0xff] }
  0x6c   : > { %v566_v34 = vld [vmem:[%s2920_s7 + $0x2c0] sm:$0xff]  ;;  %1392 = vmatpush1.bf16.msra.mxu0 %v2372_v24  ;;  %v623_v38 = vld [vmem:[%s3327_s2 + $0x8] sm:$0xff]  ;;  %1446 = vmatprep.subr.bf16.mxu1 %v2359_v33  ;;  %v2343_v41 = vcombine.high %v559_v35, %v567_v36  ;;  %v2342_v47 = vcombine.low %v559_v35, %v567_v36  ;;  %v601_v30 = vld [vmem:[%s2920_s7 + $0x3d8] sm:$0xff]  ;;  %v2377_v33 = vcombine.high %v592_v27, %v600_v28 }
  0x6d   : > { %1393 = vmatprep.subr.bf16.mxu0 %v2357_v29  ;;  %v2341_v40 = vcombine.high %v558_v32, %v566_v34  ;;  %v542_v42 = vld [vmem:[%s2920_s7 + $0x200] sm:$0xff]  ;;  %v543_v44 = vld [vmem:[%s2920_s7 + $0x208] sm:$0xff]  ;;  %633 = vperm.xlu0 %2518, %v623_v38   ;;  %v2340_v46 = vcombine.low %v558_v32, %v566_v34  ;;  %v593_v29 = vld [vmem:[%s2920_s7 + $0x398] sm:$0xff] }
  0x6e   : > { %v550_v43 = vld [vmem:[%s2920_s7 + $0x240] sm:$0xff]  ;;  %v551_v45 = vld [vmem:[%s2920_s7 + $0x248] sm:$0xff]  ;;  %v2379_v34 = vcombine.high %v593_v29, %v601_v30  ;;  %v576_v35 = vld [vmem:[%s2920_s7 + $0x310] sm:$0xff] }
  0x6f   : > { %1447 = vmatpush1.bf16.msra.mxu1 %v2358_v39  ;;  %v2325_v48 = vcombine.high %v542_v42, %v550_v43  ;;  %v2327_v49 = vcombine.high %v543_v44, %v551_v45  ;;  %v526_v50 = vld [vmem:[%s2920_s7 + $0x180] sm:$0xff]  ;;  %v527_v52 = vld [vmem:[%s2920_s7 + $0x188] sm:$0xff]  ;;  %v2324_v54 = vcombine.low %v542_v42, %v550_v43  ;;  %v2326_v55 = vcombine.low %v543_v44, %v551_v45  ;;  %v584_v36 = vld [vmem:[%s2920_s7 + $0x350] sm:$0xff] }
  0x70   : > { %1394 = vmatpush1.bf16.msra.mxu0 %v2356_v37  ;;  %1448 = vmatprep.subr.bf16.mxu1 %v2343_v41  ;;  %v534_v51 = vld [vmem:[%s2920_s7 + $0x1c0] sm:$0xff]  ;;  %v535_v53 = vld [vmem:[%s2920_s7 + $0x1c8] sm:$0xff]  ;;  %v577_v38 = vld [vmem:[%s2920_s7 + $0x318] sm:$0xff]  ;;  %v2378_v41 = vcombine.low %v593_v29, %v601_v30  ;;  %v2361_v42 = vcombine.high %v576_v35, %v584_v36 }
  0x71   : > { %1395 = vmatprep.subr.bf16.mxu0 %v2341_v40  ;;  %v2309_v56 = vcombine.high %v526_v50, %v534_v51  ;;  %v2311_v57 = vcombine.high %v527_v52, %v535_v53  ;;  %v510_v58 = vld [vmem:[%s2920_s7 + $0x100] sm:$0xff]  ;;  %v511_v60 = vld [vmem:[%s2920_s7 + $0x108] sm:$0xff]  ;;  %v2308_v62 = vcombine.low %v526_v50, %v534_v51  ;;  %v2310_v63 = vcombine.low %v527_v52, %v535_v53  ;;  %v585_v39 = vld [vmem:[%s2920_s7 + $0x358] sm:$0xff] }
  0x72   : > { %v518_v59 = vld [vmem:[%s2920_s7 + $0x140] sm:$0xff]  ;;  %v519_v61 = vld [vmem:[%s2920_s7 + $0x148] sm:$0xff]  ;;  %v2376_v40 = vcombine.low %v592_v27, %v600_v28  ;;  %v2363_v43 = vcombine.high %v577_v38, %v585_v39  ;;  %v560_v44 = vld [vmem:[%s2920_s7 + $0x290] sm:$0xff]  ;;  %v2362_v50 = vcombine.low %v577_v38, %v585_v39 }
  0x73   : > { %1449 = vmatpush1.bf16.msra.mxu1 %v2342_v47  ;;  %v2293_v0 = vcombine.high %v510_v58, %v518_v59  ;;  %v2295_v1 = vcombine.high %v511_v60, %v519_v61  ;;  %v494_v2 = vld [vmem:[%s2920_s7 + $0x80] sm:$0xff]  ;;  %v495_v4 = vld [vmem:[%s2920_s7 + $0x88] sm:$0xff]  ;;  %v2292_v6 = vcombine.low %v510_v58, %v518_v59  ;;  %v2294_v7 = vcombine.low %v511_v60, %v519_v61  ;;  %v568_v45 = vld [vmem:[%s2920_s7 + $0x2d0] sm:$0xff] }
  0x74   : > { %1396 = vmatpush1.bf16.msra.mxu0 %v2340_v46  ;;  %1450 = vmatprep.subr.bf16.mxu1 %v2327_v49  ;;  %v502_v3 = vld [vmem:[%s2920_s7 + $0xc0] sm:$0xff]  ;;  %v503_v5 = vld [vmem:[%s2920_s7 + $0xc8] sm:$0xff]  ;;  %v2979_v46 = vld [vmem:[%s3325_s0 + $0x14] ss:$8 sps:$4 sm:$0xff]   ;;  %v2360_v49 = vcombine.low %v576_v35, %v584_v36  ;;  %v2345_v51 = vcombine.high %v560_v44, %v568_v45  ;;  %v2344_v58 = vcombine.low %v560_v44, %v568_v45 }
  0x75   : > { %1397 = vmatprep.subr.bf16.mxu0 %v2325_v48  ;;  %v2277_v8 = vcombine.high %v494_v2, %v502_v3  ;;  %v2279_v9 = vcombine.high %v495_v4, %v503_v5  ;;  %v478_v10 = vld [vmem:[%s2920_s7] sm:$0xff]  ;;  %v479_v12 = vld [vmem:[%s2920_s7 + $0x8] sm:$0xff]  ;;  %v2276_v14 = vcombine.low %v494_v2, %v502_v3  ;;  %v2278_v15 = vcombine.low %v495_v4, %v503_v5  ;;  %v561_v47 = vld [vmem:[%s2920_s7 + $0x298] sm:$0xff] }
  0x76   : > { %v486_v11 = vld [vmem:[%s2920_s7 + $0x40] sm:$0xff]  ;;  %v487_v13 = vld [vmem:[%s2920_s7 + $0x48] sm:$0xff]  ;;  %v569_v48 = vld [vmem:[%s2920_s7 + $0x2d8] sm:$0xff] }
  0x77   : > { %1451 = vmatpush1.bf16.msra.mxu1 %v2326_v55  ;;  %v2261_v17 = vcombine.high %v478_v10, %v486_v11  ;;  %v2263_v18 = vcombine.high %v479_v12, %v487_v13  ;;  %v606_v19 = vld [vmem:[%s2920_s7 + $0x400] sm:$0xff]  ;;  %v607_v21 = vld [vmem:[%s2920_s7 + $0x408] sm:$0xff]  ;;  %v2260_v23 = vcombine.low %v478_v10, %v486_v11  ;;  %v2262_v24 = vcombine.low %v479_v12, %v487_v13  ;;  %v544_v53 = vld [vmem:[%s2920_s7 + $0x210] sm:$0xff] }
  0x78   : > { %1398 = vmatpush1.bf16.msra.mxu0 %v2324_v54  ;;  %1452 = vmatprep.subr.bf16.mxu1 %v2311_v57  ;;  %v614_v20 = vld [vmem:[%s2920_s7 + $0x440] sm:$0xff]  ;;  %v615_v22 = vld [vmem:[%s2920_s7 + $0x448] sm:$0xff]  ;;  %v2347_v52 = vcombine.high %v561_v47, %v569_v48  ;;  %v552_v54 = vld [vmem:[%s2920_s7 + $0x250] sm:$0xff]  ;;  %v2346_v60 = vcombine.low %v561_v47, %v569_v48 }
  0x79   : > { %1399 = vmatprep.subr.bf16.mxu0 %v2309_v56  ;;  %v2389_v25 = vcombine.high %v606_v19, %v614_v20  ;;  %v2391_v26 = vcombine.high %v607_v21, %v615_v22  ;;  %v2388_v31 = vcombine.low %v606_v19, %v614_v20  ;;  %v2390_v32 = vcombine.low %v607_v21, %v615_v22  ;;  %v2970_v37 = vld [vmem:[%s3325_s0] ss:$8 sps:$4 sm:$0xff]   ;;  %v545_v55 = vld [vmem:[%s2920_s7 + $0x218] sm:$0xff]  ;;  %v624_v59 = vld [vmem:[%s3327_s2 + $0x10] sm:$0xff] }
  0x7a   : > { %v553_v56 = vld [vmem:[%s2920_s7 + $0x258] sm:$0xff]  ;;  %v2329_v61 = vcombine.high %v544_v53, %v552_v54  ;;  %638 = vperm.xlu1 %2519, %v624_v59   ;;  %v2328_v3 = vcombine.low %v544_v53, %v552_v54  ;;  %v595_v44 = vld [vmem:[%s2920_s7 + $0x3a8] sm:$0xff] }
  0x7b   : > { %1453 = vmatpush1.bf16.msra.mxu1 %v2310_v63  ;;  %v2996_v57 = vld [vmem:[%s3325_s0 + $0x10] ss:$8 sps:$4 sm:$0xff]   ;;  %v2330_v5 = vcombine.low %v545_v55, %v553_v56  ;;  %v603_v45 = vld [vmem:[%s2920_s7 + $0x3e8] sm:$0xff] }
  0x7c   : > { %1400 = vmatpush1.bf16.msra.mxu0 %v2308_v62  ;;  %1454 = vmatprep.subr.bf16.mxu1 %v2295_v1  ;;  %v2331_v62 = vcombine.high %v545_v55, %v553_v56  ;;  %v528_v63 = vld [vmem:[%s2920_s7 + $0x190] sm:$0xff]  ;;  %v529_v1 = vld [vmem:[%s2920_s7 + $0x198] sm:$0xff]  ;;  %v579_v53 = vld [vmem:[%s2920_s7 + $0x328] sm:$0xff]  ;;  %v2382_v56 = vcombine.low %v595_v44, %v603_v45 }
  0x7d   : > { %1401 = vmatprep.subr.bf16.mxu0 %v2293_v0  ;;  %v536_v0 = vld [vmem:[%s2920_s7 + $0x1d0] sm:$0xff]  ;;  %v537_v2 = vld [vmem:[%s2920_s7 + $0x1d8] sm:$0xff]  ;;  %v587_v54 = vld [vmem:[%s2920_s7 + $0x368] sm:$0xff] }
  0x7e   : > { %v625_v4 = vld [vmem:[%s3327_s2 + $0x18] sm:$0xff]  ;;  %v2312_v12 = vcombine.low %v528_v63, %v536_v0  ;;  %v2314_v13 = vcombine.low %v529_v1, %v537_v2  ;;  %v2367_v59 = vcombine.high %v579_v53, %v587_v54 }
  0x7f   : > { %1455 = vmatpush1.bf16.msra.mxu1 %v2294_v7  ;;  %v2315_v7 = vcombine.high %v529_v1, %v537_v2  ;;  %v513_v10 = vld [vmem:[%s2920_s7 + $0x118] sm:$0xff]  ;;  %643 = vperm.xlu1 %2519, %v625_v4   ;;  %v2366_v1 = vcombine.low %v579_v53, %v587_v54  ;;  %v546_v4 = vld [vmem:[%s2920_s7 + $0x220] sm:$0xff] }
  0x80   : > { %1402 = vmatpush1.bf16.msra.mxu0 %v2292_v6  ;;  %1456 = vmatprep.subr.bf16.mxu1 %v2279_v9  ;;  %v2313_v6 = vcombine.high %v528_v63, %v536_v0  ;;  %v520_v9 = vld [vmem:[%s2920_s7 + $0x150] sm:$0xff]  ;;  %v521_v11 = vld [vmem:[%s2920_s7 + $0x158] sm:$0xff]  ;;  %v571_v63 = vld [vmem:[%s2920_s7 + $0x2e8] sm:$0xff] }
  0x81   : > { %1403 = vmatprep.subr.bf16.mxu0 %v2277_v8  ;;  %v512_v8 = vld [vmem:[%s2920_s7 + $0x110] sm:$0xff]  ;;  %v497_v19 = vld [vmem:[%s2920_s7 + $0x98] sm:$0xff]  ;;  %v2298_v22 = vcombine.low %v513_v10, %v521_v11 }
  0x82   : > { %v505_v20 = vld [vmem:[%s2920_s7 + $0xd8] sm:$0xff]  ;;  %v2296_v21 = vcombine.low %v512_v8, %v520_v9 }
  0x83   : > { %1457 = vmatpush1.bf16.msra.mxu1 %v2278_v15  ;;  %v2299_v15 = vcombine.high %v513_v10, %v521_v11  ;;  %v481_v27 = vld [vmem:[%s2920_s7 + $0x18] sm:$0xff]  ;;  %v2282_v30 = vcombine.low %v497_v19, %v505_v20 }
  0x84   : > { %1404 = vmatpush1.bf16.msra.mxu0 %v2276_v14  ;;  %1458 = vmatprep.subr.bf16.mxu1 %v2263_v18  ;;  %v2297_v14 = vcombine.high %v512_v8, %v520_v9  ;;  %v504_v18 = vld [vmem:[%s2920_s7 + $0xd0] sm:$0xff]  ;;  %v489_v28 = vld [vmem:[%s2920_s7 + $0x58] sm:$0xff] }
  0x85   : > { %1405 = vmatprep.subr.bf16.mxu0 %v2261_v17  ;;  %v496_v17 = vld [vmem:[%s2920_s7 + $0x90] sm:$0xff]  ;;  %v609_v35 = vld [vmem:[%s2920_s7 + $0x418] sm:$0xff]  ;;  %v2266_v39 = vcombine.low %v481_v27, %v489_v28 }
  0x86   : > { %v2280_v29 = vcombine.low %v496_v17, %v504_v18  ;;  %v617_v36 = vld [vmem:[%s2920_s7 + $0x458] sm:$0xff] }
  0x87   : > { %1459 = vmatpush1.bf16.msra.mxu1 %v2262_v24  ;;  %v2283_v24 = vcombine.high %v497_v19, %v505_v20  ;;  %v2394_v48 = vcombine.low %v609_v35, %v617_v36 }
  0x88   : > { %1406 = vmatpush1.bf16.msra.mxu0 %v2260_v23  ;;  %1474 = vmatprep.subr.bf16.mxu1 %v2391_v26  ;;  %v2281_v23 = vcombine.high %v496_v17, %v504_v18  ;;  %v488_v26 = vld [vmem:[%s2920_s7 + $0x50] sm:$0xff] }
  0x89   : > { %1421 = vmatprep.subr.bf16.mxu0 %v2389_v25  ;;  %v480_v25 = vld [vmem:[%s2920_s7 + $0x10] sm:$0xff] }
  0x8a   : > { %v2264_v38 = vcombine.low %v480_v25, %v488_v26 }
  0x8b   : > { %1475 = vmatpush2.bf16.msra.mxu1 %v2390_v32  ;;  %v2267_v32 = vcombine.high %v481_v27, %v489_v28 }
  0x8c   : > { %1422 = vmatpush2.bf16.msra.mxu0 %v2388_v31  ;;  %1550 = vmatprep.subr.bf16.mxu1 %v2379_v34  ;;  %v2265_v31 = vcombine.high %v480_v25, %v488_v26  ;;  %v616_v34 = vld [vmem:[%s2920_s7 + $0x450] sm:$0xff] }
  0x8d   : > { %1497 = vmatprep.subr.bf16.mxu0 %v2377_v33  ;;  %v608_v33 = vld [vmem:[%s2920_s7 + $0x410] sm:$0xff] }
  0x8e   : > { %1477 = vmatmul.mubr.bf16.vlgmr.msra.gmra.mxu1 %v2970_v37  ;;  %v2392_v47 = vcombine.low %v608_v33, %v616_v34 }
  0x8f   : > { %1424 = vmatmul.mubr.bf16.vlgmr.msra.gmra.mxu0 %v2970_v37  ;;  %1551 = vmatpush1.bf16.msra.mxu1 %v2378_v41  ;;  %v2395_v41 = vcombine.high %v609_v35, %v617_v36 }
  0x90   : > { %1498 = vmatpush1.bf16.msra.mxu0 %v2376_v40  ;;  %1552 = vmatprep.subr.bf16.mxu1 %v2363_v43  ;;  %v2393_v40 = vcombine.high %v608_v33, %v616_v34  ;;  %v602_v43 = vld [vmem:[%s2920_s7 + $0x3e0] sm:$0xff] }
  0x91   : > { %1499 = vmatprep.subr.bf16.mxu0 %v2361_v42  ;;  %2405 = vmatprep.mubr.msk.bf16.mxu0 %vm1384_vm0, %v2979_v46  ;;  %v594_v42 = vld [vmem:[%s2920_s7 + $0x3a0] sm:$0xff] }
  0x92   : > { %2407 = vmatprep.mubr.msk.bf16.mxu1 %vm1384_vm0, %v2979_v46  ;;  %v2380_v55 = vcombine.low %v594_v42, %v602_v43 }
  0x93   : > { %1553 = vmatpush1.bf16.msra.mxu1 %v2362_v50  ;;  %v2383_v50 = vcombine.high %v595_v44, %v603_v45 }
  0x94   : > { %1500 = vmatpush1.bf16.msra.mxu0 %v2360_v49  ;;  %1554 = vmatprep.subr.bf16.mxu1 %v2347_v52  ;;  %v2381_v49 = vcombine.high %v594_v42, %v602_v43  ;;  %v586_v52 = vld [vmem:[%s2920_s7 + $0x360] sm:$0xff] }
  0x95   : > { %1501 = vmatprep.subr.bf16.mxu0 %v2345_v51  ;;  %v578_v51 = vld [vmem:[%s2920_s7 + $0x320] sm:$0xff] }
  0x96   : > { %1487 = vmatmul.mubr.bf16.gmra.mxu1 %v2996_v57  ;;  %v2364_v0 = vcombine.low %v578_v51, %v586_v52 }
  0x97   : > { %1434 = vmatmul.mubr.bf16.gmra.mxu0 %v2996_v57  ;;  %1555 = vmatpush1.bf16.msra.mxu1 %v2346_v60  ;;  %v562_v60 = vld [vmem:[%s2920_s7 + $0x2a0] sm:$0xff] }
  0x98   : > { %1502 = vmatpush1.bf16.msra.mxu0 %v2344_v58  ;;  %1556 = vmatprep.subr.bf16.mxu1 %v2331_v62  ;;  %v2365_v58 = vcombine.high %v578_v51, %v586_v52  ;;  %v563_v62 = vld [vmem:[%s2920_s7 + $0x2a8] sm:$0xff] }
  0x99   : > { %1503 = vmatprep.subr.bf16.mxu0 %v2329_v61  ;;  %2408 = vmatprep.mubr.msk.bf16.mxu0 %vm1384_vm0, %v2909_v16  ;;  %v570_v61 = vld [vmem:[%s2920_s7 + $0x2e0] sm:$0xff]  ;;  %v2350_v9 = vcombine.low %v563_v62, %v571_v63 }
  0x9a   : > { %2410 = vmatprep.mubr.msk.bf16.mxu1 %vm1384_vm0, %v2909_v16  ;;  %v2349_v2 = vcombine.high %v562_v60, %v570_v61  ;;  %v2348_v8 = vcombine.low %v562_v60, %v570_v61 }
  0x9b   : > { %1557 = vmatpush1.bf16.msra.mxu1 %v2330_v5  ;;  %v554_v5 = vld [vmem:[%s2920_s7 + $0x260] sm:$0xff] }
  0x9c   : > { %1504 = vmatpush1.bf16.msra.mxu0 %v2328_v3  ;;  %1558 = vmatprep.subr.bf16.mxu1 %v2315_v7  ;;  %v2351_v3 = vcombine.high %v563_v62, %v571_v63  ;;  %v555_v7 = vld [vmem:[%s2920_s7 + $0x268] sm:$0xff]  ;;  %v2333_v10 = vcombine.high %v546_v4, %v554_v5  ;;  %v2332_v17 = vcombine.low %v546_v4, %v554_v5 }
  0x9d   : > { %1505 = vmatprep.subr.bf16.mxu0 %v2313_v6  ;;  %v547_v6 = vld [vmem:[%s2920_s7 + $0x228] sm:$0xff] }
  0x9e   : > { %v2335_v11 = vcombine.high %v547_v6, %v555_v7  ;;  %v2334_v18 = vcombine.low %v547_v6, %v555_v7 }
  0x9f   : > { %1559 = vmatpush1.bf16.msra.mxu1 %v2314_v13  ;;  %v538_v13 = vld [vmem:[%s2920_s7 + $0x1e0] sm:$0xff] }
  0xa0   : > { %1506 = vmatpush1.bf16.msra.mxu0 %v2312_v12  ;;  %1560 = vmatprep.subr.bf16.mxu1 %v2299_v15  ;;  %v530_v12 = vld [vmem:[%s2920_s7 + $0x1a0] sm:$0xff]  ;;  %v539_v15 = vld [vmem:[%s2920_s7 + $0x1e8] sm:$0xff] }
  0xa1   : > { %1507 = vmatprep.subr.bf16.mxu0 %v2297_v14  ;;  %v531_v14 = vld [vmem:[%s2920_s7 + $0x1a8] sm:$0xff]  ;;  %v2317_v19 = vcombine.high %v530_v12, %v538_v13  ;;  %v2316_v25 = vcombine.low %v530_v12, %v538_v13 }
  0xa2   : > { %v2319_v20 = vcombine.high %v531_v14, %v539_v15  ;;  %v2318_v26 = vcombine.low %v531_v14, %v539_v15 }
  0xa3   : > { %1561 = vmatpush1.bf16.msra.mxu1 %v2298_v22  ;;  %v522_v22 = vld [vmem:[%s2920_s7 + $0x160] sm:$0xff] }
  0xa4   : > { %1508 = vmatpush1.bf16.msra.mxu0 %v2296_v21  ;;  %1562 = vmatprep.subr.bf16.mxu1 %v2283_v24  ;;  %v514_v21 = vld [vmem:[%s2920_s7 + $0x120] sm:$0xff]  ;;  %v523_v24 = vld [vmem:[%s2920_s7 + $0x168] sm:$0xff] }
  0xa5   : > { %1509 = vmatprep.subr.bf16.mxu0 %v2281_v23  ;;  %v515_v23 = vld [vmem:[%s2920_s7 + $0x128] sm:$0xff]  ;;  %v2301_v27 = vcombine.high %v514_v21, %v522_v22  ;;  %v2300_v33 = vcombine.low %v514_v21, %v522_v22 }
  0xa6   : > { %v2303_v28 = vcombine.high %v515_v23, %v523_v24  ;;  %v2302_v34 = vcombine.low %v515_v23, %v523_v24 }
  0xa7   : > { %1563 = vmatpush1.bf16.msra.mxu1 %v2282_v30  ;;  %v506_v30 = vld [vmem:[%s2920_s7 + $0xe0] sm:$0xff] }
  0xa8   : > { %1510 = vmatpush1.bf16.msra.mxu0 %v2280_v29  ;;  %1564 = vmatprep.subr.bf16.mxu1 %v2267_v32  ;;  %v498_v29 = vld [vmem:[%s2920_s7 + $0xa0] sm:$0xff]  ;;  %v507_v32 = vld [vmem:[%s2920_s7 + $0xe8] sm:$0xff] }
  0xa9   : > { %1511 = vmatprep.subr.bf16.mxu0 %v2265_v31  ;;  %v499_v31 = vld [vmem:[%s2920_s7 + $0xa8] sm:$0xff]  ;;  %v2285_v35 = vcombine.high %v498_v29, %v506_v30  ;;  %v2284_v42 = vcombine.low %v498_v29, %v506_v30 }
  0xaa   : > { %v2287_v36 = vcombine.high %v499_v31, %v507_v32  ;;  %v2286_v43 = vcombine.low %v499_v31, %v507_v32 }
  0xab   : > { %1565 = vmatpush1.bf16.msra.mxu1 %v2266_v39  ;;  %v490_v39 = vld [vmem:[%s2920_s7 + $0x60] sm:$0xff] }
  0xac   : > { %1512 = vmatpush1.bf16.msra.mxu0 %v2264_v38  ;;  %1580 = vmatprep.subr.bf16.mxu1 %v2395_v41  ;;  %v482_v38 = vld [vmem:[%s2920_s7 + $0x20] sm:$0xff]  ;;  %v491_v41 = vld [vmem:[%s2920_s7 + $0x68] sm:$0xff] }
  0xad   : > { %1527 = vmatprep.subr.bf16.mxu0 %v2393_v40  ;;  %v483_v40 = vld [vmem:[%s2920_s7 + $0x28] sm:$0xff]  ;;  %v2269_v44 = vcombine.high %v482_v38, %v490_v39  ;;  %v2268_v51 = vcombine.low %v482_v38, %v490_v39 }
  0xae   : > { %v2271_v45 = vcombine.high %v483_v40, %v491_v41  ;;  %v2270_v52 = vcombine.low %v483_v40, %v491_v41 }
  0xaf   : > { %1581 = vmatpush2.bf16.msra.mxu1 %v2394_v48  ;;  %v618_v48 = vld [vmem:[%s2920_s7 + $0x460] sm:$0xff] }
  0xb0   : > { %1528 = vmatpush2.bf16.msra.mxu0 %v2392_v47  ;;  %1656 = vmatprep.subr.bf16.mxu1 %v2383_v50  ;;  %v610_v47 = vld [vmem:[%s2920_s7 + $0x420] sm:$0xff]  ;;  %v619_v50 = vld [vmem:[%s2920_s7 + $0x468] sm:$0xff] }
  0xb1   : > { %1603 = vmatprep.subr.bf16.mxu0 %v2381_v49  ;;  %v611_v49 = vld [vmem:[%s2920_s7 + $0x428] sm:$0xff]  ;;  %v2397_v53 = vcombine.high %v610_v47, %v618_v48  ;;  %v2396_v60 = vcombine.low %v610_v47, %v618_v48 }
  0xb2   : > { %1583 = vmatmul.mubr.bf16.vlgmr.msra.gmra.mxu1 %v2970_v37  ;;  %v2399_v54 = vcombine.high %v611_v49, %v619_v50  ;;  %v2398_v61 = vcombine.low %v611_v49, %v619_v50  ;;  %v484_v50 = vld [vmem:[%s2920_s7 + $0x30] sm:$0xff] }
  0xb3   : > { %1530 = vmatmul.mubr.bf16.vlgmr.msra.gmra.mxu0 %v2970_v37  ;;  %1657 = vmatpush1.bf16.msra.mxu1 %v2382_v56  ;;  %v604_v56 = vld [vmem:[%s2920_s7 + $0x3f0] sm:$0xff] }
  0xb4   : > { %1604 = vmatpush1.bf16.msra.mxu0 %v2380_v55  ;;  %1658 = vmatprep.subr.bf16.mxu1 %v2367_v59  ;;  %v596_v55 = vld [vmem:[%s2920_s7 + $0x3b0] sm:$0xff]  ;;  %v605_v59 = vld [vmem:[%s2920_s7 + $0x3f8] sm:$0xff] }
  0xb5   : > { %1605 = vmatprep.subr.bf16.mxu0 %v2365_v58  ;;  %2409 = vmatprep.mubr.msk.bf16.mxu0 %vm1384_vm0, %v2979_v46  ;;  %v597_v58 = vld [vmem:[%s2920_s7 + $0x3b8] sm:$0xff]  ;;  %v2385_v62 = vcombine.high %v596_v55, %v604_v56  ;;  %v2384_v4 = vcombine.low %v596_v55, %v604_v56 }
  0xb6   : > { %2411 = vmatprep.mubr.msk.bf16.mxu1 %vm1384_vm0, %v2979_v46  ;;  %v2387_v63 = vcombine.high %v597_v58, %v605_v59  ;;  %v2386_v5 = vcombine.low %v597_v58, %v605_v59  ;;  %v612_v59 = vld [vmem:[%s2920_s7 + $0x430] sm:$0xff] }
  0xb7   : > { %1659 = vmatpush1.bf16.msra.mxu1 %v2366_v1  ;;  %v588_v1 = vld [vmem:[%s2920_s7 + $0x370] sm:$0xff] }
  0xb8   : > { %1606 = vmatpush1.bf16.msra.mxu0 %v2364_v0  ;;  %1660 = vmatprep.subr.bf16.mxu1 %v2351_v3  ;;  %v580_v0 = vld [vmem:[%s2920_s7 + $0x330] sm:$0xff]  ;;  %v589_v3 = vld [vmem:[%s2920_s7 + $0x378] sm:$0xff] }
  0xb9   : > { %1607 = vmatprep.subr.bf16.mxu0 %v2349_v2  ;;  %v581_v2 = vld [vmem:[%s2920_s7 + $0x338] sm:$0xff]  ;;  %v2369_v6 = vcombine.high %v580_v0, %v588_v1  ;;  %v2368_v12 = vcombine.low %v580_v0, %v588_v1 }
  0xba   : > { %1593 = vmatmul.mubr.bf16.gmra.mxu1 %v2996_v57  ;;  %v2371_v7 = vcombine.high %v581_v2, %v589_v3  ;;  %v2370_v13 = vcombine.low %v581_v2, %v589_v3 }
  0xbb   : > { %1540 = vmatmul.mubr.bf16.gmra.mxu0 %v2996_v57  ;;  %1661 = vmatpush1.bf16.msra.mxu1 %v2350_v9  ;;  %v572_v9 = vld [vmem:[%s2920_s7 + $0x2f0] sm:$0xff] }
  0xbc   : > { %1608 = vmatpush1.bf16.msra.mxu0 %v2348_v8  ;;  %1662 = vmatprep.subr.bf16.mxu1 %v2335_v11  ;;  %v564_v8 = vld [vmem:[%s2920_s7 + $0x2b0] sm:$0xff]  ;;  %v573_v11 = vld [vmem:[%s2920_s7 + $0x2f8] sm:$0xff] }
  0xbd   : > { %1609 = vmatprep.subr.bf16.mxu0 %v2333_v10  ;;  %2412 = vmatprep.mubr.msk.bf16.mxu0 %vm1384_vm0, %v2909_v16  ;;  %v565_v10 = vld [vmem:[%s2920_s7 + $0x2b8] sm:$0xff]  ;;  %v2353_v14 = vcombine.high %v564_v8, %v572_v9  ;;  %v2352_v21 = vcombine.low %v564_v8, %v572_v9 }
  0xbe   : > { %2414 = vmatprep.mubr.msk.bf16.mxu1 %vm1384_vm0, %v2909_v16  ;;  %v2355_v15 = vcombine.high %v565_v10, %v573_v11  ;;  %v2354_v22 = vcombine.low %v565_v10, %v573_v11 }
  0xbf   : > { %1663 = vmatpush1.bf16.msra.mxu1 %v2334_v18  ;;  %v556_v18 = vld [vmem:[%s2920_s7 + $0x270] sm:$0xff] }
  0xc0   : > { %1610 = vmatpush1.bf16.msra.mxu0 %v2332_v17  ;;  %1664 = vmatprep.subr.bf16.mxu1 %v2319_v20  ;;  %v548_v17 = vld [vmem:[%s2920_s7 + $0x230] sm:$0xff]  ;;  %v557_v20 = vld [vmem:[%s2920_s7 + $0x278] sm:$0xff] }
  0xc1   : > { %1611 = vmatprep.subr.bf16.mxu0 %v2317_v19  ;;  %v549_v19 = vld [vmem:[%s2920_s7 + $0x238] sm:$0xff]  ;;  %v2337_v23 = vcombine.high %v548_v17, %v556_v18  ;;  %v2336_v29 = vcombine.low %v548_v17, %v556_v18 }
  0xc2   : > { %v2339_v24 = vcombine.high %v549_v19, %v557_v20  ;;  %v2338_v30 = vcombine.low %v549_v19, %v557_v20 }
  0xc3   : > { %1665 = vmatpush1.bf16.msra.mxu1 %v2318_v26  ;;  %v540_v26 = vld [vmem:[%s2920_s7 + $0x1f0] sm:$0xff] }
  0xc4   : > { %1612 = vmatpush1.bf16.msra.mxu0 %v2316_v25  ;;  %1666 = vmatprep.subr.bf16.mxu1 %v2303_v28  ;;  %v532_v25 = vld [vmem:[%s2920_s7 + $0x1b0] sm:$0xff]  ;;  %v541_v28 = vld [vmem:[%s2920_s7 + $0x1f8] sm:$0xff] }
  0xc5   : > { %1613 = vmatprep.subr.bf16.mxu0 %v2301_v27  ;;  %v533_v27 = vld [vmem:[%s2920_s7 + $0x1b8] sm:$0xff]  ;;  %v2321_v31 = vcombine.high %v532_v25, %v540_v26  ;;  %v2320_v38 = vcombine.low %v532_v25, %v540_v26 }
  0xc6   : > { %v2323_v32 = vcombine.high %v533_v27, %v541_v28  ;;  %v2322_v39 = vcombine.low %v533_v27, %v541_v28 }
  0xc7   : > { %1667 = vmatpush1.bf16.msra.mxu1 %v2302_v34  ;;  %v524_v34 = vld [vmem:[%s2920_s7 + $0x170] sm:$0xff] }
  0xc8   : > { %1614 = vmatpush1.bf16.msra.mxu0 %v2300_v33  ;;  %1668 = vmatprep.subr.bf16.mxu1 %v2287_v36  ;;  %v516_v33 = vld [vmem:[%s2920_s7 + $0x130] sm:$0xff]  ;;  %v525_v36 = vld [vmem:[%s2920_s7 + $0x178] sm:$0xff] }
  0xc9   : > { %1615 = vmatprep.subr.bf16.mxu0 %v2285_v35  ;;  %v517_v35 = vld [vmem:[%s2920_s7 + $0x138] sm:$0xff]  ;;  %v2305_v40 = vcombine.high %v516_v33, %v524_v34  ;;  %v2304_v47 = vcombine.low %v516_v33, %v524_v34 }
  0xca   : > { %v2307_v41 = vcombine.high %v517_v35, %v525_v36 }
  0xcb   : > { %1669 = vmatpush1.bf16.msra.mxu1 %v2286_v43  ;;  %v508_v43 = vld [vmem:[%s2920_s7 + $0xf0] sm:$0xff] }
  0xcc   : > { %1616 = vmatpush1.bf16.msra.mxu0 %v2284_v42  ;;  %1670 = vmatprep.subr.bf16.mxu1 %v2271_v45  ;;  %v500_v42 = vld [vmem:[%s2920_s7 + $0xb0] sm:$0xff]  ;;  %v509_v45 = vld [vmem:[%s2920_s7 + $0xf8] sm:$0xff] }
  0xcd   : > { %1617 = vmatprep.subr.bf16.mxu0 %v2269_v44  ;;  %v501_v44 = vld [vmem:[%s2920_s7 + $0xb8] sm:$0xff]  ;;  %v2289_v48 = vcombine.high %v500_v42, %v508_v43 }
  0xce   : > { %v2291_v49 = vcombine.high %v501_v44, %v509_v45  ;;  %v2290_v55 = vcombine.low %v501_v44, %v509_v45 }
  0xcf   : > { %1671 = vmatpush1.bf16.msra.mxu1 %v2270_v52  ;;  %v485_v52 = vld [vmem:[%s2920_s7 + $0x38] sm:$0xff] }
  0xd0   : > { %1618 = vmatpush1.bf16.msra.mxu0 %v2268_v51  ;;  %1686 = vmatprep.subr.bf16.mxu1 %v2399_v54  ;;  %v492_v51 = vld [vmem:[%s2920_s7 + $0x70] sm:$0xff]  ;;  %v2288_v54 = vcombine.low %v500_v42, %v508_v43 }
  0xd1   : > { %1633 = vmatprep.subr.bf16.mxu0 %v2397_v53  ;;  %v493_v53 = vld [vmem:[%s2920_s7 + $0x78] sm:$0xff]  ;;  %v2273_v56 = vcombine.high %v484_v50, %v492_v51 }
  0xd2   : > { %v2275_v58 = vcombine.high %v485_v52, %v493_v53  ;;  %v2274_v0 = vcombine.low %v485_v52, %v493_v53 }
  0xd3   : > { %1687 = vmatpush2.bf16.msra.mxu1 %v2398_v61  ;;  %v613_v61 = vld [vmem:[%s2920_s7 + $0x438] sm:$0xff] }
  0xd4   : > { %1634 = vmatpush2.bf16.msra.mxu0 %v2396_v60  ;;  %1762 = vmatprep.subr.bf16.mxu1 %v2387_v63  ;;  %v620_v60 = vld [vmem:[%s2920_s7 + $0x470] sm:$0xff]  ;;  %v2272_v63 = vcombine.low %v484_v50, %v492_v51 }
  0xd5   : > { %1709 = vmatprep.subr.bf16.mxu0 %v2385_v62  ;;  %v621_v62 = vld [vmem:[%s2920_s7 + $0x478] sm:$0xff]  ;;  %v2401_v1 = vcombine.high %v612_v59, %v620_v60  ;;  %v2400_v3 = vcombine.low %v612_v59, %v620_v60 }
  0xd6   : > { %1689 = vmatmul.mubr.bf16.vlgmr.msra.gmra.mxu1 %v2970_v37  ;;  %v2403_v2 = vcombine.high %v613_v61, %v621_v62 }
  0xd7   : > { %1636 = vmatmul.mubr.bf16.vlgmr.msra.gmra.mxu0 %v2970_v37  ;;  %1763 = vmatpush1.bf16.msra.mxu1 %v2386_v5 }
  0xd8   : > { %1710 = vmatpush1.bf16.msra.mxu0 %v2384_v4  ;;  %1764 = vmatprep.subr.bf16.mxu1 %v2371_v7  ;;  %v2402_v4 = vcombine.low %v613_v61, %v621_v62 }
  0xd9   : > { %1711 = vmatprep.subr.bf16.mxu0 %v2369_v6  ;;  %2413 = vmatprep.mubr.msk.bf16.mxu0 %vm1384_vm0, %v2979_v46 }
  0xda   : > { %2415 = vmatprep.mubr.msk.bf16.mxu1 %vm1384_vm0, %v2979_v46 }
  0xdb   : > { %1765 = vmatpush1.bf16.msra.mxu1 %v2370_v13 }
  0xdc   : > { %1712 = vmatpush1.bf16.msra.mxu0 %v2368_v12  ;;  %1766 = vmatprep.subr.bf16.mxu1 %v2355_v15 }
  0xdd   : > { %1713 = vmatprep.subr.bf16.mxu0 %v2353_v14 }
  0xde   : > { %1699 = vmatmul.mubr.bf16.gmra.mxu1 %v2996_v57 }
  0xdf   : > { %1646 = vmatmul.mubr.bf16.gmra.mxu0 %v2996_v57  ;;  %1767 = vmatpush1.bf16.msra.mxu1 %v2354_v22 }
  0xe0   : > { %1714 = vmatpush1.bf16.msra.mxu0 %v2352_v21  ;;  %1768 = vmatprep.subr.bf16.mxu1 %v2339_v24 }
  0xe1   : > { %1715 = vmatprep.subr.bf16.mxu0 %v2337_v23  ;;  %2416 = vmatprep.mubr.msk.bf16.mxu0 %vm1384_vm0, %v2909_v16 }
  0xe2   : > { %2418 = vmatprep.mubr.msk.bf16.mxu1 %vm1384_vm0, %v2909_v16  ;;  %v2306_v16 = vcombine.low %v517_v35, %v525_v36 }
  0xe3   : > { %1769 = vmatpush1.bf16.msra.mxu1 %v2338_v30  ;;  %v3134_v5 = vpop.permute.xlu0 %628 }
  0xe4   : > { %1716 = vmatpush1.bf16.msra.mxu0 %v2336_v29  ;;  %1770 = vmatprep.subr.bf16.mxu1 %v2323_v32 }
  0xe5   : > { %1717 = vmatprep.subr.bf16.mxu0 %v2321_v31 }
  0xe7   : > { %1771 = vmatpush1.bf16.msra.mxu1 %v2322_v39 }
  0xe8   : > { %1718 = vmatpush1.bf16.msra.mxu0 %v2320_v38  ;;  %1772 = vmatprep.subr.bf16.mxu1 %v2307_v41 }
  0xe9   : > { %1719 = vmatprep.subr.bf16.mxu0 %v2305_v40 }
  0xeb   : > { %1773 = vmatpush1.bf16.msra.mxu1 %v2306_v16 }
  0xec   : > { %1720 = vmatpush1.bf16.msra.mxu0 %v2304_v47  ;;  %1774 = vmatprep.subr.bf16.mxu1 %v2291_v49 }
  0xed   : > { %1721 = vmatprep.subr.bf16.mxu0 %v2289_v48 }
  0xef   : > { %1775 = vmatpush1.bf16.msra.mxu1 %v2290_v55 }
  0xf0   : > { %1722 = vmatpush1.bf16.msra.mxu0 %v2288_v54  ;;  %1776 = vmatprep.subr.bf16.mxu1 %v2275_v58 }
  0xf1   : > { %1723 = vmatprep.subr.bf16.mxu0 %v2273_v56 }
  0xf3   : > { %1777 = vmatpush1.bf16.msra.mxu1 %v2274_v0 }
  0xf4   : > { %1724 = vmatpush1.bf16.msra.mxu0 %v2272_v63  ;;  %1792 = vmatprep.subr.bf16.mxu1 %v2403_v2 }
  0xf5   : > { %1739 = vmatprep.subr.bf16.mxu0 %v2401_v1  ;;  %v3144_v15 = vpop.permute.xlu1 %638 }
  0xf7   : > { %1793 = vmatpush2.bf16.msra.mxu1 %v2402_v4 }
  0xf8   : > { %1740 = vmatpush2.bf16.msra.mxu0 %v2400_v3 }
  0xfa   : > { %1795 = vmatmul.mubr.bf16.vlgmr.msra.gmra.mxu1 %v2970_v37  ;;  %v3156_v38 = vpop.permute.xlu1 %643 }
  0xfb   : > { %1742 = vmatmul.mubr.bf16.vlgmr.msra.gmra.mxu0 %v2970_v37  ;;  %2419 = vmatprep.mubr.msk.bf16.mxu1 %vm1384_vm0, %v2979_v46  ;;  %v3138_v37 = vpop.permute.xlu0 %633 }
  0xfc   : > { %2417 = vmatprep.mubr.msk.bf16.mxu0 %vm1384_vm0, %v2979_v46 }
 0x102   : > { %1805 = vmatmul.mubr.bf16.gmra.mxu1 %v2996_v57 }
 0x103   : > { %1752 = vmatmul.mubr.bf16.gmra.mxu0 %v2996_v57 }
 0x14e   : > { %v1478_v8 = vpop.f32.mrf.mxu1 }
 0x14f   : > { %v1425_v6 = vpop.f32.mrf.mxu0  ;;  %v1479_v9 = vadd.f32 %v1478_v8, %v3134_v5 }
 0x150   : > { %v1426_v7 = vadd.f32 %v1425_v6, %v3134_v5  ;;  %v1480_v12 = vpop.f32.mrf.mxu1 }
 0x151   : > { %v1427_v10 = vpop.f32.mrf.mxu0  ;;  %v1817_v13 = vmax.f32 %v1479_v9, 0.0  ;;  %v1481_v57 = vadd.f32 %v1480_v12, %v3134_v5 }
 0x152   : > { %v1815_v11 = vmax.f32 %v1426_v7, 0.0  ;;  %v1428_v46 = vadd.f32 %v1427_v10, %v3134_v5  ;;  %v1482_v19 = vpop.f32.mrf.mxu1 }
 0x153   : > { %v1429_v14 = vpop.f32.mrf.mxu0  ;;  %v1818_v20 = vmax.f32 %v1481_v57, 0.0  ;;  %v1483_v21 = vadd.f32 %v1482_v19, %v3138_v37 }
 0x154   : > { %v1816_v17 = vmax.f32 %v1428_v46, 0.0  ;;  %v1430_v18 = vadd.f32 %v1429_v14, %v3138_v37  ;;  %v1484_v25 = vpop.f32.mrf.mxu1 }
 0x155   : > { %v1431_v22 = vpop.f32.mrf.mxu0  ;;  %v2459_v26 = vpack.c.bf16 %v1818_v20, %v1817_v13  ;;  %v1485_v27 = vadd.f32 %v1484_v25, %v3138_v37  ;;  %v1833_v33 = vmax.f32 %v1483_v21, 0.0 }
 0x156   : > { %v2458_v23 = vpack.c.bf16 %v1816_v17, %v1815_v11  ;;  %v1432_v24 = vadd.f32 %v1431_v22, %v3138_v37  ;;  %v1831_v29 = vmax.f32 %v1430_v18, 0.0  ;;  %v1488_v31 = vpop.f32.mrf.mxu1 }
 0x157   : > { %v1435_v28 = vpop.f32.mrf.mxu0  ;;  %2072 = vst [vmem:[%s3150_s12 + $0x8] sm:$0xff] %v2459_v26  ;;  %v1834_v34 = vmax.f32 %v1485_v27, 0.0  ;;  %v1489_v36 = vadd.f32 %v1488_v31, %v3144_v15 }
 0x158   : > { %2071 = vst [vmem:[%s3150_s12] sm:$0xff] %v2458_v23  ;;  %v1832_v30 = vmax.f32 %v1432_v24, 0.0  ;;  %v1436_v32 = vadd.f32 %v1435_v28, %v3144_v15  ;;  %v1490_v42 = vpop.f32.mrf.mxu1 }
 0x159   : > { %v1437_v35 = vpop.f32.mrf.mxu0  ;;  %v2467_v43 = vpack.c.bf16 %v1834_v34, %v1833_v33  ;;  %v1491_v44 = vadd.f32 %v1490_v42, %v3144_v15  ;;  %v1849_v45 = vmax.f32 %v1489_v36, 0.0 }
 0x15a   : > { %v2466_v39 = vpack.c.bf16 %v1832_v30, %v1831_v29  ;;  %v1438_v40 = vadd.f32 %v1437_v35, %v3144_v15  ;;  %v1847_v41 = vmax.f32 %v1436_v32, 0.0  ;;  %v1492_v48 = vpop.f32.mrf.mxu1 }
 0x15b   : > { %v1439_v47 = vpop.f32.mrf.mxu0  ;;  %2080 = vst [vmem:[%s3150_s12 + $0x48] sm:$0xff] %v2467_v43  ;;  %v1850_v50 = vmax.f32 %v1491_v44, 0.0  ;;  %v1493_v52 = vadd.f32 %v1492_v48, %v3156_v38 }
 0x15c   : > { %2079 = vst [vmem:[%s3150_s12 + $0x40] sm:$0xff] %v2466_v39  ;;  %v1848_v16 = vmax.f32 %v1438_v40, 0.0  ;;  %v1440_v49 = vadd.f32 %v1439_v47, %v3156_v38  ;;  %v1494_v56 = vpop.f32.mrf.mxu1 }
 0x15d   : > { %v1441_v51 = vpop.f32.mrf.mxu0  ;;  %v2475_v58 = vpack.c.bf16 %v1850_v50, %v1849_v45  ;;  %v1495_v59 = vadd.f32 %v1494_v56, %v3156_v38  ;;  %v1865_v60 = vmax.f32 %v1493_v52, 0.0 }
 0x15e   : > { %v2474_v53 = vpack.c.bf16 %v1848_v16, %v1847_v41  ;;  %v1442_v54 = vadd.f32 %v1441_v51, %v3156_v38  ;;  %v1863_v55 = vmax.f32 %v1440_v49, 0.0 }
 0x15f   : > { %2088 = vst [vmem:[%s3150_s12 + $0x88] sm:$0xff] %v2475_v58  ;;  %v1866_v62 = vmax.f32 %v1495_v59, 0.0 }
 0x160   : > { %2087 = vst [vmem:[%s3150_s12 + $0x80] sm:$0xff] %v2474_v53  ;;  %v1864_v61 = vmax.f32 %v1442_v54, 0.0 }
 0x161   : > { %v2483_v0 = vpack.c.bf16 %v1866_v62, %v1865_v60 }
 0x162   : > { %v2482_v63 = vpack.c.bf16 %v1864_v61, %v1863_v55 }
 0x163   : > { %2096 = vst [vmem:[%s3150_s12 + $0xc8] sm:$0xff] %v2483_v0 }
 0x164   : > { %2095 = vst [vmem:[%s3150_s12 + $0xc0] sm:$0xff] %v2482_v63 }
 0x172   : > { %v1584_v3 = vpop.f32.mrf.mxu1 }
 0x173   : > { %v1531_v1 = vpop.f32.mrf.mxu0  ;;  %v1585_v4 = vadd.f32 %v1584_v3, %v3134_v5 }
 0x174   : > { %v1532_v2 = vadd.f32 %v1531_v1, %v3134_v5  ;;  %v1586_v9 = vpop.f32.mrf.mxu1 }
 0x175   : > { %v1533_v6 = vpop.f32.mrf.mxu0  ;;  %v1821_v10 = vmax.f32 %v1585_v4, 0.0  ;;  %v1587_v11 = vadd.f32 %v1586_v9, %v3134_v5 }
 0x176   : > { %v1819_v7 = vmax.f32 %v1532_v2, 0.0  ;;  %v1534_v8 = vadd.f32 %v1533_v6, %v3134_v5  ;;  %v1588_v57 = vpop.f32.mrf.mxu1 }
 0x177   : > { %v1535_v46 = vpop.f32.mrf.mxu0  ;;  %v1822_v14 = vmax.f32 %v1587_v11, 0.0  ;;  %v1589_v17 = vadd.f32 %v1588_v57, %v3138_v37 }
 0x178   : > { %v1820_v12 = vmax.f32 %v1534_v8, 0.0  ;;  %v1536_v13 = vadd.f32 %v1535_v46, %v3138_v37  ;;  %v1590_v21 = vpop.f32.mrf.mxu1 }
 0x179   : > { %v1537_v18 = vpop.f32.mrf.mxu0  ;;  %v2461_v22 = vpack.c.bf16 %v1822_v14, %v1821_v10  ;;  %v1591_v23 = vadd.f32 %v1590_v21, %v3138_v37  ;;  %v1837_v29 = vmax.f32 %v1589_v17, 0.0 }
 0x17a   : > { %v2460_v19 = vpack.c.bf16 %v1820_v12, %v1819_v7  ;;  %v1538_v20 = vadd.f32 %v1537_v18, %v3138_v37  ;;  %v1835_v25 = vmax.f32 %v1536_v13, 0.0  ;;  %v1594_v28 = vpop.f32.mrf.mxu1 }
 0x17b   : > { %v1541_v24 = vpop.f32.mrf.mxu0  ;;  %2074 = vst [vmem:[%s3150_s12 + $0x18] sm:$0xff] %v2461_v22  ;;  %v1838_v30 = vmax.f32 %v1591_v23, 0.0  ;;  %v1595_v31 = vadd.f32 %v1594_v28, %v3144_v15 }
 0x17c   : > { %2073 = vst [vmem:[%s3150_s12 + $0x10] sm:$0xff] %v2460_v19  ;;  %v1836_v26 = vmax.f32 %v1538_v20, 0.0  ;;  %v1542_v27 = vadd.f32 %v1541_v24, %v3144_v15  ;;  %v1596_v36 = vpop.f32.mrf.mxu1 }
 0x17d   : > { %v1543_v32 = vpop.f32.mrf.mxu0  ;;  %v2469_v39 = vpack.c.bf16 %v1838_v30, %v1837_v29  ;;  %v1853_v40 = vmax.f32 %v1595_v31, 0.0  ;;  %v1597_v41 = vadd.f32 %v1596_v36, %v3144_v15 }
 0x17e   : > { %v2468_v33 = vpack.c.bf16 %v1836_v26, %v1835_v25  ;;  %v1851_v34 = vmax.f32 %v1542_v27, 0.0  ;;  %v1544_v35 = vadd.f32 %v1543_v32, %v3144_v15  ;;  %v1598_v45 = vpop.f32.mrf.mxu1 }
 0x17f   : > { %v1545_v42 = vpop.f32.mrf.mxu0  ;;  %2082 = vst [vmem:[%s3150_s12 + $0x58] sm:$0xff] %v2469_v39  ;;  %v1854_v47 = vmax.f32 %v1597_v41, 0.0  ;;  %v1599_v16 = vadd.f32 %v1598_v45, %v3156_v38 }
 0x180   : > { %2081 = vst [vmem:[%s3150_s12 + $0x50] sm:$0xff] %v2468_v33  ;;  %v1852_v43 = vmax.f32 %v1544_v35, 0.0  ;;  %v1546_v44 = vadd.f32 %v1545_v42, %v3156_v38  ;;  %v1600_v52 = vpop.f32.mrf.mxu1 }
 0x181   : > { %v1547_v48 = vpop.f32.mrf.mxu0  ;;  %v2477_v53 = vpack.c.bf16 %v1854_v47, %v1853_v40  ;;  %v1869_v54 = vmax.f32 %v1599_v16, 0.0  ;;  %v1601_v55 = vadd.f32 %v1600_v52, %v3156_v38 }
 0x182   : > { %v2476_v49 = vpack.c.bf16 %v1852_v43, %v1851_v34  ;;  %v1867_v50 = vmax.f32 %v1546_v44, 0.0  ;;  %v1548_v51 = vadd.f32 %v1547_v48, %v3156_v38 }
 0x183   : > { %2090 = vst [vmem:[%s3150_s12 + $0x98] sm:$0xff] %v2477_v53  ;;  %v1870_v58 = vmax.f32 %v1601_v55, 0.0 }
 0x184   : > { %2089 = vst [vmem:[%s3150_s12 + $0x90] sm:$0xff] %v2476_v49  ;;  %v1868_v56 = vmax.f32 %v1548_v51, 0.0 }
 0x185   : > { %v2485_v60 = vpack.c.bf16 %v1870_v58, %v1869_v54 }
 0x186   : > { %v2484_v59 = vpack.c.bf16 %v1868_v56, %v1867_v50 }
 0x187   : > { %2098 = vst [vmem:[%s3150_s12 + $0xd8] sm:$0xff] %v2485_v60 }
 0x188   : > { %2097 = vst [vmem:[%s3150_s12 + $0xd0] sm:$0xff] %v2484_v59 }
 0x196   : > { %v1690_v63 = vpop.f32.mrf.mxu1 }
 0x197   : > { %v1637_v61 = vpop.f32.mrf.mxu0  ;;  %v1691_v0 = vadd.f32 %v1690_v63, %v3134_v5 }
 0x198   : > { %v1638_v62 = vadd.f32 %v1637_v61, %v3134_v5  ;;  %v1692_v4 = vpop.f32.mrf.mxu1 }
 0x199   : > { %v1639_v1 = vpop.f32.mrf.mxu0  ;;  %v1825_v6 = vmax.f32 %v1691_v0, 0.0  ;;  %v1693_v7 = vadd.f32 %v1692_v4, %v3134_v5 }
 0x19a   : > { %v1823_v2 = vmax.f32 %v1638_v62, 0.0  ;;  %v1640_v3 = vadd.f32 %v1639_v1, %v3134_v5  ;;  %v1694_v11 = vpop.f32.mrf.mxu1 }
 0x19b   : > { %v1641_v8 = vpop.f32.mrf.mxu0  ;;  %v1826_v46 = vmax.f32 %v1693_v7, 0.0  ;;  %v1695_v12 = vadd.f32 %v1694_v11, %v3138_v37 }
 0x19c   : > { %v1824_v9 = vmax.f32 %v1640_v3, 0.0  ;;  %v1642_v10 = vadd.f32 %v1641_v8, %v3138_v37  ;;  %v1696_v17 = vpop.f32.mrf.mxu1 }
 0x19d   : > { %v1643_v13 = vpop.f32.mrf.mxu0  ;;  %v2463_v18 = vpack.c.bf16 %v1826_v46, %v1825_v6  ;;  %v1697_v19 = vadd.f32 %v1696_v17, %v3138_v37  ;;  %v1841_v25 = vmax.f32 %v1695_v12, 0.0 }
 0x19e   : > { %v2462_v57 = vpack.c.bf16 %v1824_v9, %v1823_v2  ;;  %v1644_v14 = vadd.f32 %v1643_v13, %v3138_v37  ;;  %v1839_v21 = vmax.f32 %v1642_v10, 0.0  ;;  %v1700_v24 = vpop.f32.mrf.mxu1 }
 0x19f   : > { %v1647_v20 = vpop.f32.mrf.mxu0  ;;  %2076 = vst [vmem:[%s3150_s12 + $0x28] sm:$0xff] %v2463_v18  ;;  %v1842_v26 = vmax.f32 %v1697_v19, 0.0  ;;  %v1701_v27 = vadd.f32 %v1700_v24, %v3144_v15 }
 0x1a0   : > { %2075 = vst [vmem:[%s3150_s12 + $0x20] sm:$0xff] %v2462_v57  ;;  %v1840_v22 = vmax.f32 %v1644_v14, 0.0  ;;  %v1648_v23 = vadd.f32 %v1647_v20, %v3144_v15  ;;  %v1702_v32 = vpop.f32.mrf.mxu1 }
 0x1a1   : > { %v1649_v28 = vpop.f32.mrf.mxu0  ;;  %v2471_v33 = vpack.c.bf16 %v1842_v26, %v1841_v25  ;;  %v1857_v34 = vmax.f32 %v1701_v27, 0.0  ;;  %v1703_v35 = vadd.f32 %v1702_v32, %v3144_v15 }
 0x1a2   : > { %v2470_v29 = vpack.c.bf16 %v1840_v22, %v1839_v21  ;;  %v1855_v30 = vmax.f32 %v1648_v23, 0.0  ;;  %v1650_v31 = vadd.f32 %v1649_v28, %v3144_v15  ;;  %v1704_v41 = vpop.f32.mrf.mxu1 }
 0x1a3   : > { %v1651_v36 = vpop.f32.mrf.mxu0  ;;  %2084 = vst [vmem:[%s3150_s12 + $0x68] sm:$0xff] %v2471_v33  ;;  %v1858_v42 = vmax.f32 %v1703_v35, 0.0  ;;  %v1705_v43 = vadd.f32 %v1704_v41, %v3156_v38 }
 0x1a4   : > { %2083 = vst [vmem:[%s3150_s12 + $0x60] sm:$0xff] %v2470_v29  ;;  %v1856_v39 = vmax.f32 %v1650_v31, 0.0  ;;  %v1652_v40 = vadd.f32 %v1651_v36, %v3156_v38  ;;  %v1706_v48 = vpop.f32.mrf.mxu1 }
 0x1a5   : > { %v1653_v44 = vpop.f32.mrf.mxu0  ;;  %v2479_v49 = vpack.c.bf16 %v1858_v42, %v1857_v34  ;;  %v1873_v50 = vmax.f32 %v1705_v43, 0.0  ;;  %v1707_v51 = vadd.f32 %v1706_v48, %v3156_v38 }
 0x1a6   : > { %v2478_v45 = vpack.c.bf16 %v1856_v39, %v1855_v30  ;;  %v1871_v47 = vmax.f32 %v1652_v40, 0.0  ;;  %v1654_v16 = vadd.f32 %v1653_v44, %v3156_v38 }
 0x1a7   : > { %2092 = vst [vmem:[%s3150_s12 + $0xa8] sm:$0xff] %v2479_v49  ;;  %v1874_v53 = vmax.f32 %v1707_v51, 0.0  ;;  %v2127_v49 = vld [vmem:[%s3150_s12 + $0x8] sm:$0xff] (%p2601_p5)  ;;  %v2131_v51 = vld [vmem:[%s3150_s12 + $0x18] sm:$0xff] (%p2601_p5) }
 0x1a8   : > { %2091 = vst [vmem:[%s3150_s12 + $0xa0] sm:$0xff] %v2478_v45  ;;  %v1872_v52 = vmax.f32 %v1654_v16, 0.0  ;;  %2128 = vst [vmem:[%s3252_s20 + $0x8] sm:$0xff] (%p2601_p5), %v2127_v49 }
 0x1a9   : > { %v2487_v55 = vpack.c.bf16 %v1874_v53, %v1873_v50  ;;  %v2129_v50 = vld [vmem:[%s3150_s12 + $0x10] sm:$0xff] (%p2601_p5)  ;;  %v2135_v53 = vld [vmem:[%s3150_s12 + $0x28] sm:$0xff] (%p2601_p5)  ;;  %2132 = vst [vmem:[%s3252_s20 + $0x18] sm:$0xff] (%p2601_p5), %v2131_v51 }
 0x1aa   : > { %v2486_v54 = vpack.c.bf16 %v1872_v52, %v1871_v47  ;;  %v2133_v52 = vld [vmem:[%s3150_s12 + $0x20] sm:$0xff] (%p2601_p5)  ;;  %2130 = vst [vmem:[%s3252_s20 + $0x10] sm:$0xff] (%p2601_p5), %v2129_v50  ;;  %2136 = vst [vmem:[%s3252_s20 + $0x28] sm:$0xff] (%p2601_p5), %v2135_v53 }
 0x1ab   : > { %2100 = vst [vmem:[%s3150_s12 + $0xe8] sm:$0xff] %v2487_v55  ;;  %2134 = vst [vmem:[%s3252_s20 + $0x20] sm:$0xff] (%p2601_p5), %v2133_v52 }
 0x1ac   : > { %2099 = vst [vmem:[%s3150_s12 + $0xe0] sm:$0xff] %v2486_v54 }
 0x1ba   : > { %v1796_v59 = vpop.f32.mrf.mxu1 }
 0x1bb   : > { %v1743_v56 = vpop.f32.mrf.mxu0  ;;  %v1797_v60 = vadd.f32 %v1796_v59, %v3134_v5  ;;  %v2145_v59 = vld [vmem:[%s3150_s12 + $0x50] sm:$0xff] (%p2601_p5) }
 0x1bc   : > { %v1744_v58 = vadd.f32 %v1743_v56, %v3134_v5  ;;  %v1798_v63 = vpop.f32.mrf.mxu1  ;;  %v2141_v56 = vld [vmem:[%s3150_s12 + $0x40] sm:$0xff] (%p2601_p5)  ;;  %2146 = vst [vmem:[%s3252_s20 + $0x110] sm:$0xff] (%p2601_p5), %v2145_v59 }
 0x1bd   : > { %v1745_v61 = vpop.f32.mrf.mxu0  ;;  %v1799_v0 = vadd.f32 %v1798_v63, %v3134_v5  ;;  %v1829_v7 = vmax.f32 %v1797_v60, 0.0  ;;  %2142 = vst [vmem:[%s3252_s20 + $0x100] sm:$0xff] (%p2601_p5), %v2141_v56  ;;  %v2147_v60 = vld [vmem:[%s3150_s12 + $0x58] sm:$0xff] (%p2601_p5) }
 0x1be   : > { %v1746_v62 = vadd.f32 %v1745_v61, %v3134_v5  ;;  %v1827_v2 = vmax.f32 %v1744_v58, 0.0  ;;  %v1800_v6 = vpop.f32.mrf.mxu1  ;;  %v2143_v58 = vld [vmem:[%s3150_s12 + $0x48] sm:$0xff] (%p2601_p5)  ;;  %2148 = vst [vmem:[%s3252_s20 + $0x118] sm:$0xff] (%p2601_p5), %v2147_v60  ;;  %v2149_v61 = vld [vmem:[%s3150_s12 + $0x60] sm:$0xff] (%p2601_p5) }
 0x1bf   : > { %v1747_v1 = vpop.f32.mrf.mxu0  ;;  %v1830_v8 = vmax.f32 %v1799_v0, 0.0  ;;  %v1801_v9 = vadd.f32 %v1800_v6, %v3138_v37  ;;  %2144 = vst [vmem:[%s3252_s20 + $0x108] sm:$0xff] (%p2601_p5), %v2143_v58  ;;  %2150 = vst [vmem:[%s3252_s20 + $0x120] sm:$0xff] (%p2601_p5), %v2149_v61  ;;  %v2165_v6 = vld [vmem:[%s3150_s12 + $0xa0] sm:$0xff] (%p2601_p5) }
 0x1c0   : > { %v1828_v3 = vmax.f32 %v1746_v62, 0.0  ;;  %v1748_v4 = vadd.f32 %v1747_v1, %v3138_v37  ;;  %v1802_v12 = vpop.f32.mrf.mxu1  ;;  %v2151_v62 = vld [vmem:[%s3150_s12 + $0x68] sm:$0xff] (%p2601_p5)  ;;  %v2157_v1 = vld [vmem:[%s3150_s12 + $0x80] sm:$0xff] (%p2601_p5)  ;;  %2166 = vst [vmem:[%s3252_s20 + $0x220] sm:$0xff] (%p2601_p5), %v2165_v6 }
 0x1c1   : > { %v1749_v10 = vpop.f32.mrf.mxu0  ;;  %v2465_v13 = vpack.c.bf16 %v1830_v8, %v1829_v7  ;;  %v1803_v5 = vadd.f32 %v1802_v12, %v3138_v37  ;;  %v1845_v20 = vmax.f32 %v1801_v9, 0.0  ;;  %2152 = vst [vmem:[%s3252_s20 + $0x128] sm:$0xff] (%p2601_p5), %v2151_v62  ;;  %2158 = vst [vmem:[%s3252_s20 + $0x200] sm:$0xff] (%p2601_p5), %v2157_v1  ;;  %v2167_v7 = vld [vmem:[%s3150_s12 + $0xa8] sm:$0xff] (%p2601_p5)  ;;  %v2179_v12 = vld [vmem:[%s3150_s12 + $0xd8] sm:$0xff] (%p2601_p5) }
 0x1c2   : > { %v2464_v11 = vpack.c.bf16 %v1828_v3, %v1827_v2  ;;  %v1750_v46 = vadd.f32 %v1749_v10, %v3138_v37  ;;  %v1843_v14 = vmax.f32 %v1748_v4, 0.0  ;;  %v1806_v19 = vpop.f32.mrf.mxu1  ;;  %v2159_v2 = vld [vmem:[%s3150_s12 + $0x88] sm:$0xff] (%p2601_p5)  ;;  %v2161_v3 = vld [vmem:[%s3150_s12 + $0x90] sm:$0xff] (%p2601_p5)  ;;  %v2163_v4 = vld [vmem:[%s3150_s12 + $0x98] sm:$0xff] (%p2601_p5)  ;;  %2168 = vst [vmem:[%s3252_s20 + $0x228] sm:$0xff] (%p2601_p5), %v2167_v7 }
 0x1c3   : > { %v1753_v57 = vpop.f32.mrf.mxu0  ;;  %2078 = vst [vmem:[%s3150_s12 + $0x38] sm:$0xff] %v2465_v13  ;;  %v1846_v21 = vmax.f32 %v1803_v5, 0.0  ;;  %v1807_v22 = vadd.f32 %v1806_v19, %v3144_v15  ;;  %2160 = vst [vmem:[%s3252_s20 + $0x208] sm:$0xff] (%p2601_p5), %v2159_v2  ;;  %v2173_v10 = vld [vmem:[%s3150_s12 + $0xc0] sm:$0xff] (%p2601_p5)  ;;  %v2183_v5 = vld [vmem:[%s3150_s12 + $0xe8] sm:$0xff] (%p2601_p5) }
 0x1c4   : > { %2077 = vst [vmem:[%s3150_s12 + $0x30] sm:$0xff] %v2464_v11  ;;  %v1844_v17 = vmax.f32 %v1750_v46, 0.0  ;;  %v1754_v18 = vadd.f32 %v1753_v57, %v3144_v15  ;;  %v1808_v26 = vpop.f32.mrf.mxu1  ;;  %2162 = vst [vmem:[%s3252_s20 + $0x210] sm:$0xff] (%p2601_p5), %v2161_v3  ;;  %v2175_v11 = vld [vmem:[%s3150_s12 + $0xc8] sm:$0xff] (%p2601_p5)  ;;  %v2177_v46 = vld [vmem:[%s3150_s12 + $0xd0] sm:$0xff] (%p2601_p5) }
 0x1c5   : > { %v1755_v23 = vpop.f32.mrf.mxu0  ;;  %v2473_v37 = vpack.c.bf16 %v1846_v21, %v1845_v20  ;;  %v1809_v27 = vadd.f32 %v1808_v26, %v3144_v15  ;;  %v1861_v33 = vmax.f32 %v1807_v22, 0.0  ;;  %2164 = vst [vmem:[%s3252_s20 + $0x218] sm:$0xff] (%p2601_p5), %v2163_v4  ;;  %2174 = vst [vmem:[%s3252_s20 + $0x300] sm:$0xff] (%p2601_p5), %v2173_v10  ;;  %v2181_v13 = vld [vmem:[%s3150_s12 + $0xe0] sm:$0xff] (%p2601_p5) }
 0x1c6   : > { %v2472_v24 = vpack.c.bf16 %v1844_v17, %v1843_v14  ;;  %v1756_v25 = vadd.f32 %v1755_v23, %v3144_v15  ;;  %v1859_v29 = vmax.f32 %v1754_v18, 0.0  ;;  %v1810_v32 = vpop.f32.mrf.mxu1  ;;  %2176 = vst [vmem:[%s3252_s20 + $0x308] sm:$0xff] (%p2601_p5), %v2175_v11  ;;  %2178 = vst [vmem:[%s3252_s20 + $0x310] sm:$0xff] (%p2601_p5), %v2177_v46 }
 0x1c7   : > { %v1757_v28 = vpop.f32.mrf.mxu0  ;;  %2086 = vst [vmem:[%s3150_s12 + $0x78] sm:$0xff] %v2473_v37  ;;  %v1862_v34 = vmax.f32 %v1809_v27, 0.0  ;;  %v1811_v35 = vadd.f32 %v1810_v32, %v3156_v38  ;;  %2180 = vst [vmem:[%s3252_s20 + $0x318] sm:$0xff] (%p2601_p5), %v2179_v12 }
 0x1c8   : > { %2085 = vst [vmem:[%s3150_s12 + $0x70] sm:$0xff] %v2472_v24  ;;  %v1860_v30 = vmax.f32 %v1756_v25, 0.0  ;;  %v1758_v31 = vadd.f32 %v1757_v28, %v3156_v38  ;;  %v1812_v40 = vpop.f32.mrf.mxu1  ;;  %2182 = vst [vmem:[%s3252_s20 + $0x320] sm:$0xff] (%p2601_p5), %v2181_v13 }
 0x1c9   : > { %v1759_v36 = vpop.f32.mrf.mxu0  ;;  %v2481_v41 = vpack.c.bf16 %v1862_v34, %v1861_v33  ;;  %v1813_v42 = vadd.f32 %v1812_v40, %v3156_v38  ;;  %v1877_v45 = vmax.f32 %v1811_v35, 0.0  ;;  %2184 = vst [vmem:[%s3252_s20 + $0x328] sm:$0xff] (%p2601_p5), %v2183_v5 }
 0x1ca   : > { %v2480_v39 = vpack.c.bf16 %v1860_v30, %v1859_v29  ;;  %v1760_v15 = vadd.f32 %v1759_v36, %v3156_v38  ;;  %v1875_v43 = vmax.f32 %v1758_v31, 0.0  ;;  %v2125_v38 = vld [vmem:[%s3150_s12] sm:$0xff] (%p2601_p5)  ;;  %v2139_v55 = vld [vmem:[%s3150_s12 + $0x38] sm:$0xff] (%p2601_p5) }
 0x1cb   : > { %2094 = vst [vmem:[%s3150_s12 + $0xb8] sm:$0xff] %v2481_v41  ;;  %v1878_v47 = vmax.f32 %v1813_v42, 0.0  ;;  %2126 = vst [vmem:[%s3252_s20] sm:$0xff] (%p2601_p5), %v2125_v38  ;;  %v2137_v54 = vld [vmem:[%s3150_s12 + $0x30] sm:$0xff] (%p2601_p5) }
 0x1cc   : > { %2093 = vst [vmem:[%s3150_s12 + $0xb0] sm:$0xff] %v2480_v39  ;;  %v1876_v44 = vmax.f32 %v1760_v15, 0.0  ;;  %2109 = sbr.rel (!%p2601_p5) target bundleno = 473 (0x1d9), region = 59  ;;  %2138 = vst [vmem:[%s3252_s20 + $0x30] sm:$0xff] (%p2601_p5), %v2137_v54 }
 0x1cd   : > { %v2489_v48 = vpack.c.bf16 %v1878_v47, %v1877_v45  ;;  %2140 = vst [vmem:[%s3252_s20 + $0x38] sm:$0xff] (%p2601_p5), %v2139_v55 }
 0x1ce   : > { %v2488_v16 = vpack.c.bf16 %v1876_v44, %v1875_v43  ;;  %v2155_v0 = vld [vmem:[%s3150_s12 + $0x78] sm:$0xff] (%p2601_p5) }
 0x1cf   : > { %2102 = vst [vmem:[%s3150_s12 + $0xf8] sm:$0xff] %v2489_v48  ;;  %v2153_v63 = vld [vmem:[%s3150_s12 + $0x70] sm:$0xff] (%p2601_p5)  ;;  %2156 = vst [vmem:[%s3252_s20 + $0x138] sm:$0xff] (%p2601_p5), %v2155_v0 }
 0x1d0   : > { %2101 = vst [vmem:[%s3150_s12 + $0xf0] sm:$0xff] %v2488_v16  ;;  %2154 = vst [vmem:[%s3252_s20 + $0x130] sm:$0xff] (%p2601_p5), %v2153_v63 }
 0x1d2   : > { %v2171_v9 = vld [vmem:[%s3150_s12 + $0xb8] sm:$0xff] }
 0x1d3   : > { %v2169_v8 = vld [vmem:[%s3150_s12 + $0xb0] sm:$0xff]  ;;  %2172 = vst [vmem:[%s3252_s20 + $0x238] sm:$0xff] %v2171_v9 }
 0x1d4   : > { %2170 = vst [vmem:[%s3252_s20 + $0x230] sm:$0xff] %v2169_v8 }
 0x1d6   : > { %v2187_v14 = vld [vmem:[%s3150_s12 + $0xf8] sm:$0xff] }
 0x1d7   : > { %v2185_v57 = vld [vmem:[%s3150_s12 + $0xf0] sm:$0xff]  ;;  %2188 = vst [vmem:[%s3252_s20 + $0x338] sm:$0xff] %v2187_v14 }
 0x1d8   : > { %2186 = vst [vmem:[%s3252_s20 + $0x330] sm:$0xff] %v2185_v57 }
 0x1d9 PF: > { %p10_p10 = scmp.ge.s32.totalorder %s2588_s16, 6   ;;  %s3330_s12 = smov %s2544_s13 }
 0x1da   : > { %s3331_s13 = smov %s2599_s19  ;;  %s3332_s14 = smov %s2588_s16 }
 0x1db   :  { %12 = sbr.rel (!%p10_p10) target bundleno = 2 (0x2), region = 113 }

// kernel: encoder_conv_forward.7
= control target key start
LH: loop header
LB: loop body
LE: loop exit
PB: predicated region body
PF: predicated region fallthrough
CT: control target
= control target key end

     0   :  { %v3343_v3 = vmov 0   ;;  %vm1805_vm0 = vcmask 261120   ;;  %s4594_s1 = inlined_call_operand.vmem [shape: bf16[288,2048], index: 1, kind: input, shape index: {}]   ;;  %s4595_s0 = inlined_call_operand.vmem [shape: bf16[32,288], index: 0, kind: input, shape index: {}]   ;;  %s4596_s2 = inlined_call_operand.vmem [shape: f32[32,1], index: 2, kind: input, shape index: {}]   ;;  %s4597_s3 = inlined_call_operand.vmem [shape: bf16[32,2048], index: 3, kind: output, shape index: {}]  }
   0x1   :  { %v135_v0 = vld [vmem:[%s4594_s1 + $0x380] sm:$0xff]  ;;  %1897 = vmatprep.mubr.bf16.mxu1 %v3343_v3  ;;  %3327 = vset.pattern.permute.xlu0 %v3343_v3  ;;  %v136_v17 = vld [vmem:[%s4594_s1 + $0x388] sm:$0xff] }
   0x2   :  { %v143_v1 = vld [vmem:[%s4594_s1 + $0x3c0] sm:$0xff]  ;;  %3328 = vset.pattern.permute.xlu1 %v3343_v3  ;;  %v144_v18 = vld [vmem:[%s4594_s1 + $0x3c8] sm:$0xff] }
   0x3   :  { %v295_v2 = vld [vmem:[%s4594_s1 + $0x880] sm:$0xff]  ;;  %v3071_v4 = vcombine.high %v135_v0, %v143_v1  ;;  %v3070_v6 = vcombine.low %v135_v0, %v143_v1  ;;  %v3073_v22 = vcombine.high %v136_v17, %v144_v18  ;;  %v120_v25 = vld [vmem:[%s4594_s1 + $0x308] sm:$0xff]  ;;  %v3072_v29 = vcombine.low %v136_v17, %v144_v18 }
   0x4   :  { %v303_v5 = vld [vmem:[%s4594_s1 + $0x8c0] sm:$0xff]  ;;  %v128_v26 = vld [vmem:[%s4594_s1 + $0x348] sm:$0xff] }
   0x5   :  { %v119_v7 = vld [vmem:[%s4594_s1 + $0x300] sm:$0xff]  ;;  %v3231_v9 = vcombine.high %v295_v2, %v303_v5  ;;  %v3230_v10 = vcombine.low %v295_v2, %v303_v5  ;;  %1812 = vmatprep.subr.bf16.mxu0 %v3071_v4  ;;  %v3418_v28 = vld [vmem:[%s4595_s0 + $0x8] ss:$12 sps:$4 sm:$0xff]   ;;  %v3057_v31 = vcombine.high %v120_v25, %v128_v26  ;;  %v3056_v37 = vcombine.low %v120_v25, %v128_v26 }
   0x6   :  { %v127_v8 = vld [vmem:[%s4594_s1 + $0x340] sm:$0xff]  ;;  %1813 = vmatpush1.bf16.msra.mxu0 %v3070_v6  ;;  %v104_v34 = vld [vmem:[%s4594_s1 + $0x288] sm:$0xff] }
   0x7   :  { %v3055_v11 = vcombine.high %v119_v7, %v127_v8  ;;  %v279_v12 = vld [vmem:[%s4594_s1 + $0x800] sm:$0xff]  ;;  %1877 = vmatprep.subr.bf16.mxu1 %v3231_v9  ;;  %v3054_v19 = vcombine.low %v119_v7, %v127_v8  ;;  %v112_v35 = vld [vmem:[%s4594_s1 + $0x2c8] sm:$0xff] }
   0x8   :  { %v287_v13 = vld [vmem:[%s4594_s1 + $0x840] sm:$0xff]  ;;  %1878 = vmatpush1.bf16.msra.mxu1 %v3230_v10  ;;  %v3041_v39 = vcombine.high %v104_v34, %v112_v35  ;;  %v88_v42 = vld [vmem:[%s4594_s1 + $0x208] sm:$0xff]  ;;  %v3040_v45 = vcombine.low %v104_v34, %v112_v35 }
   0x9   :  { %v103_v14 = vld [vmem:[%s4594_s1 + $0x280] sm:$0xff]  ;;  %v3215_v15 = vcombine.high %v279_v12, %v287_v13  ;;  %1814 = vmatprep.subr.bf16.mxu0 %v3055_v11  ;;  %v3214_v20 = vcombine.low %v279_v12, %v287_v13  ;;  %v96_v43 = vld [vmem:[%s4594_s1 + $0x248] sm:$0xff] }
   0xa   :  { %v111_v16 = vld [vmem:[%s4594_s1 + $0x2c0] sm:$0xff]  ;;  %1815 = vmatpush1.bf16.msra.mxu0 %v3054_v19  ;;  %v3025_v47 = vcombine.high %v88_v42, %v96_v43  ;;  %v72_v50 = vld [vmem:[%s4594_s1 + $0x188] sm:$0xff]  ;;  %v3024_v53 = vcombine.low %v88_v42, %v96_v43 }
   0xb   :  { %v3039_v21 = vcombine.high %v103_v14, %v111_v16  ;;  %1879 = vmatprep.subr.bf16.mxu1 %v3215_v15  ;;  %v87_v23 = vld [vmem:[%s4594_s1 + $0x200] sm:$0xff]  ;;  %v3038_v27 = vcombine.low %v103_v14, %v111_v16  ;;  %v80_v51 = vld [vmem:[%s4594_s1 + $0x1c8] sm:$0xff] }
   0xc   :  { %v95_v24 = vld [vmem:[%s4594_s1 + $0x240] sm:$0xff]  ;;  %1880 = vmatpush1.bf16.msra.mxu1 %v3214_v20  ;;  %v3009_v56 = vcombine.high %v72_v50, %v80_v51  ;;  %v56_v58 = vld [vmem:[%s4594_s1 + $0x108] sm:$0xff]  ;;  %v3008_v62 = vcombine.low %v72_v50, %v80_v51 }
   0xd   :  { %1816 = vmatprep.subr.bf16.mxu0 %v3039_v21  ;;  %v3023_v30 = vcombine.high %v87_v23, %v95_v24  ;;  %1918 = vmatprep.subr.bf16.mxu1 %v3073_v22  ;;  %v71_v32 = vld [vmem:[%s4594_s1 + $0x180] sm:$0xff]  ;;  %v3022_v36 = vcombine.low %v87_v23, %v95_v24  ;;  %v64_v59 = vld [vmem:[%s4594_s1 + $0x148] sm:$0xff] }
   0xe   :  { %v79_v33 = vld [vmem:[%s4594_s1 + $0x1c0] sm:$0xff]  ;;  %1817 = vmatpush1.bf16.msra.mxu0 %v3038_v27  ;;  %v2993_v1 = vcombine.high %v56_v58, %v64_v59  ;;  %v40_v5 = vld [vmem:[%s4594_s1 + $0x88] sm:$0xff]  ;;  %v2992_v8 = vcombine.low %v56_v58, %v64_v59  ;;  %v314_v59 = vld [vmem:[%s4596_s2 + $0x18] sm:$0xff] }
   0xf   :  { %3246 = vmatmul.mubr.msk.bf16.vlgmr.msra.gmra.mxu1 %vm1805_vm0, %v3418_v28  ;;  %1818 = vmatprep.subr.bf16.mxu0 %v3023_v30  ;;  %v3007_v38 = vcombine.high %v71_v32, %v79_v33  ;;  %v55_v40 = vld [vmem:[%s4594_s1 + $0x100] sm:$0xff]  ;;  %v3006_v44 = vcombine.low %v71_v32, %v79_v33  ;;  %v48_v6 = vld [vmem:[%s4594_s1 + $0xc8] sm:$0xff] }
  0x10   :  { %1919 = vmatpush1.bf16.msra.mxu1 %v3072_v29  ;;  %v63_v41 = vld [vmem:[%s4594_s1 + $0x140] sm:$0xff]  ;;  %1907 = vmatprep.mubr.bf16.mxu1 %v3343_v3  ;;  %v2977_v10 = vcombine.high %v40_v5, %v48_v6  ;;  %v24_v13 = vld [vmem:[%s4594_s1 + $0x8] sm:$0xff]  ;;  %v2976_v16 = vcombine.low %v40_v5, %v48_v6 }
  0x11   :  { %1920 = vmatprep.subr.bf16.mxu1 %v3057_v31  ;;  %v2991_v46 = vcombine.high %v55_v40, %v63_v41  ;;  %v39_v48 = vld [vmem:[%s4594_s1 + $0x80] sm:$0xff]  ;;  %v2990_v52 = vcombine.low %v55_v40, %v63_v41  ;;  %v32_v14 = vld [vmem:[%s4594_s1 + $0x48] sm:$0xff] }
  0x12   :  { %1819 = vmatpush1.bf16.msra.mxu0 %v3022_v36  ;;  %v47_v49 = vld [vmem:[%s4594_s1 + $0xc0] sm:$0xff]  ;;  %v2961_v18 = vcombine.high %v24_v13, %v32_v14  ;;  %v264_v21 = vld [vmem:[%s4594_s1 + $0x788] sm:$0xff]  ;;  %v2960_v24 = vcombine.low %v24_v13, %v32_v14 }
  0x13   :  { %1820 = vmatprep.subr.bf16.mxu0 %v3007_v38  ;;  %v2975_v54 = vcombine.high %v39_v48, %v47_v49  ;;  %v23_v55 = vld [vmem:[%s4594_s1] sm:$0xff]  ;;  %v2974_v61 = vcombine.low %v39_v48, %v47_v49  ;;  %v272_v22 = vld [vmem:[%s4594_s1 + $0x7c8] sm:$0xff] }
  0x14   :  { %1921 = vmatpush1.bf16.msra.mxu1 %v3056_v37  ;;  %v31_v57 = vld [vmem:[%s4594_s1 + $0x40] sm:$0xff]  ;;  %v3201_v26 = vcombine.high %v264_v21, %v272_v22  ;;  %v248_v30 = vld [vmem:[%s4594_s1 + $0x708] sm:$0xff]  ;;  %v3200_v33 = vcombine.low %v264_v21, %v272_v22 }
  0x15   :  { %1922 = vmatprep.subr.bf16.mxu1 %v3041_v39  ;;  %v3474_v60 = vld [vmem:[%s4595_s0 + $0x4] ss:$12 sps:$4 sm:$0xff]   ;;  %v2959_v63 = vcombine.high %v23_v55, %v31_v57  ;;  %v3479_v0 = vld [vmem:[%s4595_s0 + $0x20] ss:$12 sps:$4 sm:$0xff]   ;;  %v2958_v7 = vcombine.low %v23_v55, %v31_v57 }
  0x16   :  { %1821 = vmatpush1.bf16.msra.mxu0 %v3006_v44  ;;  %v263_v2 = vld [vmem:[%s4594_s1 + $0x780] sm:$0xff]  ;;  %1844 = vmatprep.mubr.bf16.mxu0 %v3474_v60  ;;  %v256_v31 = vld [vmem:[%s4594_s1 + $0x748] sm:$0xff] }
  0x17   :  { %1822 = vmatprep.subr.bf16.mxu0 %v2991_v46  ;;  %v271_v4 = vld [vmem:[%s4594_s1 + $0x7c0] sm:$0xff]  ;;  %3247 = vmatmul.mubr.msk.bf16.gmra.mxu1 %vm1805_vm0, %v3479_v0  ;;  %v3185_v35 = vcombine.high %v248_v30, %v256_v31  ;;  %v232_v38 = vld [vmem:[%s4594_s1 + $0x688] sm:$0xff]  ;;  %v3184_v41 = vcombine.low %v248_v30, %v256_v31  ;;  %v297_v30 = vld [vmem:[%s4594_s1 + $0x890] sm:$0xff] }
  0x18   :  { %1923 = vmatpush1.bf16.msra.mxu1 %v3040_v45  ;;  %1950 = vmatprep.mubr.bf16.mxu1 %v3474_v60  ;;  %v3199_v9 = vcombine.high %v263_v2, %v271_v4  ;;  %v247_v11 = vld [vmem:[%s4594_s1 + $0x700] sm:$0xff]  ;;  %v3198_v15 = vcombine.low %v263_v2, %v271_v4  ;;  %v240_v39 = vld [vmem:[%s4594_s1 + $0x6c8] sm:$0xff]  ;;  %v305_v31 = vld [vmem:[%s4594_s1 + $0x8d0] sm:$0xff] }
  0x19   :  { %1924 = vmatprep.subr.bf16.mxu1 %v3025_v47  ;;  %v255_v12 = vld [vmem:[%s4594_s1 + $0x740] sm:$0xff]  ;;  %v3169_v43 = vcombine.high %v232_v38, %v240_v39  ;;  %v216_v46 = vld [vmem:[%s4594_s1 + $0x608] sm:$0xff]  ;;  %v3168_v50 = vcombine.low %v232_v38, %v240_v39  ;;  %v121_v39 = vld [vmem:[%s4594_s1 + $0x310] sm:$0xff] }
  0x1a   :  { %1823 = vmatpush1.bf16.msra.mxu0 %v2990_v52  ;;  %v3183_v17 = vcombine.high %v247_v11, %v255_v12  ;;  %v231_v19 = vld [vmem:[%s4594_s1 + $0x680] sm:$0xff]  ;;  %v3182_v23 = vcombine.low %v247_v11, %v255_v12  ;;  %v224_v47 = vld [vmem:[%s4594_s1 + $0x648] sm:$0xff] }
  0x1b   :  { %1824 = vmatprep.subr.bf16.mxu0 %v2975_v54  ;;  %v239_v20 = vld [vmem:[%s4594_s1 + $0x6c0] sm:$0xff]  ;;  %v312_v52 = vld [vmem:[%s4596_s2 + $0x8] sm:$0xff]  ;;  %v3153_v54 = vcombine.high %v216_v46, %v224_v47 }
  0x1c   :  { %1925 = vmatpush1.bf16.msra.mxu1 %v3024_v53  ;;  %v3167_v25 = vcombine.high %v231_v19, %v239_v20  ;;  %v215_v27 = vld [vmem:[%s4594_s1 + $0x600] sm:$0xff]  ;;  %v3166_v32 = vcombine.low %v231_v19, %v239_v20  ;;  %v313_v53 = vld [vmem:[%s4596_s2 + $0x10] sm:$0xff]  ;;  %v200_v57 = vld [vmem:[%s4594_s1 + $0x588] sm:$0xff] }
  0x1d   :  { %1926 = vmatprep.subr.bf16.mxu1 %v3009_v56  ;;  %v223_v29 = vld [vmem:[%s4594_s1 + $0x640] sm:$0xff]  ;;  %327 = vperm.xlu1 %3328, %v313_v53   ;;  %v208_v58 = vld [vmem:[%s4594_s1 + $0x5c8] sm:$0xff] }
  0x1e   :  { %1825 = vmatpush1.bf16.msra.mxu0 %v2974_v61  ;;  %v3151_v34 = vcombine.high %v215_v27, %v223_v29  ;;  %v199_v36 = vld [vmem:[%s4594_s1 + $0x580] sm:$0xff]  ;;  %v3150_v40 = vcombine.low %v215_v27, %v223_v29  ;;  %v184_v5 = vld [vmem:[%s4594_s1 + $0x508] sm:$0xff] }
  0x1f   :  { %1826 = vmatprep.subr.bf16.mxu0 %v2959_v63  ;;  %v207_v37 = vld [vmem:[%s4594_s1 + $0x5c0] sm:$0xff]  ;;  %v192_v6 = vld [vmem:[%s4594_s1 + $0x548] sm:$0xff] }
  0x20   :  { %1927 = vmatpush1.bf16.msra.mxu1 %v3008_v62  ;;  %v3135_v42 = vcombine.high %v199_v36, %v207_v37  ;;  %v183_v44 = vld [vmem:[%s4594_s1 + $0x500] sm:$0xff]  ;;  %v3134_v49 = vcombine.low %v199_v36, %v207_v37  ;;  %v3152_v62 = vcombine.low %v216_v46, %v224_v47  ;;  %v296_v11 = vld [vmem:[%s4594_s1 + $0x888] sm:$0xff]  ;;  %v3235_v36 = vcombine.high %v297_v30, %v305_v31  ;;  %v89_v47 = vld [vmem:[%s4594_s1 + $0x210] sm:$0xff] }
  0x21   :  { %1928 = vmatprep.subr.bf16.mxu1 %v2993_v1  ;;  %v191_v45 = vld [vmem:[%s4594_s1 + $0x540] sm:$0xff]  ;;  %v3137_v1 = vcombine.high %v200_v57, %v208_v58  ;;  %332 = vperm.xlu1 %3328, %v314_v59   ;;  %v304_v12 = vld [vmem:[%s4594_s1 + $0x8c8] sm:$0xff] }
  0x22   :  { %1827 = vmatpush1.bf16.msra.mxu0 %v2958_v7  ;;  %v311_v48 = vld [vmem:[%s4596_s2] sm:$0xff]  ;;  %v3119_v51 = vcombine.high %v183_v44, %v191_v45  ;;  %v3118_v61 = vcombine.low %v183_v44, %v191_v45  ;;  %v168_v13 = vld [vmem:[%s4594_s1 + $0x488] sm:$0xff]  ;;  %v113_v44 = vld [vmem:[%s4594_s1 + $0x2d0] sm:$0xff] }
  0x23   :  { %1828 = vmatprep.subr.bf16.mxu0 %v3199_v9  ;;  %317 = vperm.xlu0 %3327, %v311_v48   ;;  %v167_v55 = vld [vmem:[%s4594_s1 + $0x480] sm:$0xff]  ;;  %v176_v14 = vld [vmem:[%s4594_s1 + $0x4c8] sm:$0xff]  ;;  %v97_v48 = vld [vmem:[%s4594_s1 + $0x250] sm:$0xff] }
  0x24   :  { %1929 = vmatpush1.bf16.msra.mxu1 %v2992_v8  ;;  %v175_v56 = vld [vmem:[%s4594_s1 + $0x4c0] sm:$0xff]  ;;  %v3136_v8 = vcombine.low %v200_v57, %v208_v58  ;;  %v280_v19 = vld [vmem:[%s4594_s1 + $0x808] sm:$0xff]  ;;  %v3027_v53 = vcombine.high %v89_v47, %v97_v48  ;;  %v73_v57 = vld [vmem:[%s4594_s1 + $0x190] sm:$0xff] }
  0x25   :  { %1930 = vmatprep.subr.bf16.mxu1 %v2977_v10  ;;  %v3103_v63 = vcombine.high %v167_v55, %v175_v56  ;;  %v151_v2 = vld [vmem:[%s4594_s1 + $0x400] sm:$0xff]  ;;  %v3102_v7 = vcombine.low %v167_v55, %v175_v56  ;;  %v3121_v10 = vcombine.high %v184_v5, %v192_v6  ;;  %v288_v20 = vld [vmem:[%s4594_s1 + $0x848] sm:$0xff]  ;;  %v138_v55 = vld [vmem:[%s4594_s1 + $0x398] sm:$0xff] }
  0x26   :  { %1829 = vmatpush2.bf16.msra.mxu0 %v3198_v15  ;;  %v159_v4 = vld [vmem:[%s4594_s1 + $0x440] sm:$0xff]  ;;  %v152_v22 = vld [vmem:[%s4594_s1 + $0x408] sm:$0xff]  ;;  %v3217_v27 = vcombine.high %v280_v19, %v288_v20  ;;  %v146_v56 = vld [vmem:[%s4594_s1 + $0x3d8] sm:$0xff] }
  0x27   :  { %1830 = vmatprep.subr.bf16.mxu0 %v3183_v17  ;;  %322 = vperm.xlu0 %3327, %v312_v52   ;;  %v3087_v9 = vcombine.high %v151_v2, %v159_v4  ;;  %v3086_v15 = vcombine.low %v151_v2, %v159_v4  ;;  %v3233_v17 = vcombine.high %v296_v11, %v304_v12  ;;  %v3614_v21 = vld [vmem:[%s4595_s0] ss:$12 sps:$4 sm:$0xff]   ;;  %v3644_v38 = vld [vmem:[%s4595_s0 + $0x18] ss:$12 sps:$4 sm:$0xff]   ;;  %v81_v58 = vld [vmem:[%s4594_s1 + $0x1d0] sm:$0xff] }
  0x28   :  { %1931 = vmatpush1.bf16.msra.mxu1 %v2976_v16  ;;  %v3120_v16 = vcombine.low %v184_v5, %v192_v6  ;;  %v65_v2 = vld [vmem:[%s4594_s1 + $0x150] sm:$0xff]  ;;  %v3010_v4 = vcombine.low %v73_v57, %v81_v58 }
  0x29   :  { %1932 = vmatprep.subr.bf16.mxu1 %v2961_v18  ;;  %v3105_v18 = vcombine.high %v168_v13, %v176_v14  ;;  %v41_v6 = vld [vmem:[%s4594_s1 + $0x90] sm:$0xff] }
  0x2a   :  { %1831 = vmatpush2.bf16.msra.mxu0 %v3182_v23  ;;  %v160_v23 = vld [vmem:[%s4594_s1 + $0x448] sm:$0xff] }
  0x2b   :  { %1832 = vmatprep.subr.bf16.mxu0 %v3167_v25  ;;  %v3625_v25 = vld [vmem:[%s4595_s0 + $0x1c] ss:$12 sps:$4 sm:$0xff]   ;;  %v3089_v29 = vcombine.high %v152_v22, %v160_v23 }
  0x2c   :  { %1933 = vmatpush1.bf16.msra.mxu1 %v2960_v24  ;;  %v3232_v24 = vcombine.low %v296_v11, %v304_v12  ;;  %v130_v11 = vld [vmem:[%s4594_s1 + $0x358] sm:$0xff]  ;;  %v25_v12 = vld [vmem:[%s4594_s1 + $0x10] sm:$0xff] }
  0x2d   :  { %1934 = vmatprep.subr.bf16.mxu1 %v3201_v26  ;;  %v3104_v26 = vcombine.low %v168_v13, %v176_v14  ;;  %v33_v13 = vld [vmem:[%s4594_s1 + $0x50] sm:$0xff]  ;;  %v3076_v14 = vcombine.low %v138_v55, %v146_v56 }
  0x2e   :  { %1833 = vmatpush2.bf16.msra.mxu0 %v3166_v32  ;;  %v137_v32 = vld [vmem:[%s4594_s1 + $0x390] sm:$0xff] }
  0x2f   :  { %1834 = vmatprep.subr.bf16.mxu0 %v3151_v34  ;;  %v3216_v34 = vcombine.low %v280_v19, %v288_v20  ;;  %v114_v19 = vld [vmem:[%s4594_s1 + $0x2d8] sm:$0xff]  ;;  %v265_v20 = vld [vmem:[%s4594_s1 + $0x790] sm:$0xff] }
  0x30   :  { %1935 = vmatpush2.bf16.msra.mxu1 %v3200_v33  ;;  %v145_v33 = vld [vmem:[%s4594_s1 + $0x3d0] sm:$0xff] }
  0x31   :  { %1936 = vmatprep.subr.bf16.mxu1 %v3185_v35  ;;  %v3088_v35 = vcombine.low %v152_v22, %v160_v23  ;;  %v3075_v37 = vcombine.high %v137_v32, %v145_v33  ;;  %v273_v22 = vld [vmem:[%s4594_s1 + $0x7d0] sm:$0xff] }
  0x32   :  { %1835 = vmatpush2.bf16.msra.mxu0 %v3150_v40  ;;  %v129_v40 = vld [vmem:[%s4594_s1 + $0x350] sm:$0xff] }
  0x33   :  { %1836 = vmatprep.subr.bf16.mxu0 %v3135_v42  ;;  %v3059_v42 = vcombine.high %v121_v39, %v129_v40  ;;  %v3058_v45 = vcombine.low %v121_v39, %v129_v40  ;;  %v82_v39 = vld [vmem:[%s4594_s1 + $0x1d8] sm:$0xff]  ;;  %v233_v40 = vld [vmem:[%s4594_s1 + $0x690] sm:$0xff] }
  0x34   :  { %1937 = vmatpush2.bf16.msra.mxu1 %v3184_v41  ;;  %v3074_v41 = vcombine.low %v137_v32, %v145_v33  ;;  %v257_v32 = vld [vmem:[%s4594_s1 + $0x750] sm:$0xff] }
  0x35   :  { %1938 = vmatprep.subr.bf16.mxu1 %v3169_v43  ;;  %v105_v43 = vld [vmem:[%s4594_s1 + $0x290] sm:$0xff] }
  0x36   :  { %1837 = vmatpush2.bf16.msra.mxu0 %v3134_v49  ;;  %v3043_v46 = vcombine.high %v105_v43, %v113_v44  ;;  %v281_v49 = vld [vmem:[%s4594_s1 + $0x810] sm:$0xff]  ;;  %v3042_v52 = vcombine.low %v105_v43, %v113_v44 }
  0x37   :  { %1838 = vmatprep.subr.bf16.mxu0 %v3119_v51  ;;  %v3234_v51 = vcombine.low %v297_v30, %v305_v31  ;;  %v98_v30 = vld [vmem:[%s4594_s1 + $0x258] sm:$0xff]  ;;  %v249_v31 = vld [vmem:[%s4594_s1 + $0x710] sm:$0xff] }
  0x38   :  { %1939 = vmatpush2.bf16.msra.mxu1 %v3168_v50  ;;  %v289_v50 = vld [vmem:[%s4594_s1 + $0x850] sm:$0xff]  ;;  %v3186_v43 = vcombine.low %v249_v31, %v257_v32 }
  0x39   :  { %1940 = vmatprep.subr.bf16.mxu1 %v3153_v54  ;;  %v3219_v54 = vcombine.high %v281_v49, %v289_v50  ;;  %v3218_v59 = vcombine.low %v281_v49, %v289_v50  ;;  %v225_v49 = vld [vmem:[%s4594_s1 + $0x650] sm:$0xff] }
  0x3a   :  { %1839 = vmatpush2.bf16.msra.mxu0 %v3118_v61  ;;  %v3026_v61 = vcombine.low %v89_v47, %v97_v48  ;;  %v66_v47 = vld [vmem:[%s4594_s1 + $0x158] sm:$0xff]  ;;  %v217_v48 = vld [vmem:[%s4594_s1 + $0x610] sm:$0xff] }
  0x3b   :  { %1840 = vmatprep.subr.bf16.mxu0 %v3103_v63  ;;  %v3011_v63 = vcombine.high %v73_v57, %v81_v58  ;;  %v209_v57 = vld [vmem:[%s4594_s1 + $0x5d0] sm:$0xff] }
  0x3c   :  { %1941 = vmatpush2.bf16.msra.mxu1 %v3152_v62  ;;  %v3077_v62 = vcombine.high %v138_v55, %v146_v56  ;;  %v50_v55 = vld [vmem:[%s4594_s1 + $0xd8] sm:$0xff]  ;;  %v201_v56 = vld [vmem:[%s4594_s1 + $0x590] sm:$0xff] }
  0x3d   :  { %1942 = vmatprep.subr.bf16.mxu1 %v3137_v1  ;;  %v57_v1 = vld [vmem:[%s4594_s1 + $0x110] sm:$0xff] }
  0x3e   :  { %1841 = vmatpush2.bf16.msra.mxu0 %v3102_v7  ;;  %v2995_v5 = vcombine.high %v57_v1, %v65_v2  ;;  %v49_v7 = vld [vmem:[%s4594_s1 + $0xd0] sm:$0xff] }
  0x3f   :  { %1842 = vmatprep.subr.bf16.mxu0 %v3087_v9  ;;  %v2979_v9 = vcombine.high %v41_v6, %v49_v7 }
  0x40   :  { %1943 = vmatpush2.bf16.msra.mxu1 %v3136_v8  ;;  %v2994_v8 = vcombine.low %v57_v1, %v65_v2  ;;  %v34_v1 = vld [vmem:[%s4594_s1 + $0x58] sm:$0xff]  ;;  %v185_v2 = vld [vmem:[%s4594_s1 + $0x510] sm:$0xff] }
  0x41   :  { %1944 = vmatprep.subr.bf16.mxu1 %v3121_v10  ;;  %v122_v10 = vld [vmem:[%s4594_s1 + $0x318] sm:$0xff] }
  0x42   :  { %1843 = vmatpush2.bf16.msra.mxu0 %v3086_v15  ;;  %v2978_v15 = vcombine.low %v41_v6, %v49_v7  ;;  %v3060_v23 = vcombine.low %v122_v10, %v130_v11  ;;  %v3138_v6 = vcombine.low %v201_v56, %v209_v57 }
  0x43   :  { %1983 = vmatprep.subr.bf16.mxu0 %v3233_v17  ;;  %v2963_v17 = vcombine.high %v25_v12, %v33_v13 }
  0x44   :  { %1945 = vmatpush2.bf16.msra.mxu1 %v3120_v16  ;;  %v3061_v16 = vcombine.high %v122_v10, %v130_v11  ;;  %v274_v10 = vld [vmem:[%s4594_s1 + $0x7d8] sm:$0xff]  ;;  %v169_v11 = vld [vmem:[%s4594_s1 + $0x490] sm:$0xff] }
  0x45   :  { %1946 = vmatprep.subr.bf16.mxu1 %v3105_v18  ;;  %1845 = vmatmul.mubr.bf16.vlgmr.msra.gmra.mxu0 %v3614_v21  ;;  %v106_v18 = vld [vmem:[%s4594_s1 + $0x298] sm:$0xff] }
  0x46   :  { %1984 = vmatpush1.bf16.msra.mxu0 %v3232_v24  ;;  %1854 = vmatprep.mubr.bf16.mxu0 %v3625_v25  ;;  %v2962_v24 = vcombine.low %v25_v12, %v33_v13  ;;  %v3044_v33 = vcombine.low %v106_v18, %v114_v19  ;;  %v177_v12 = vld [vmem:[%s4594_s1 + $0x4d0] sm:$0xff] }
  0x47   :  { %1985 = vmatprep.subr.bf16.mxu0 %v3217_v27  ;;  %v3203_v27 = vcombine.high %v265_v20, %v273_v22 }
  0x48   :  { %1947 = vmatpush2.bf16.msra.mxu1 %v3104_v26  ;;  %v3045_v26 = vcombine.high %v106_v18, %v114_v19  ;;  %v258_v18 = vld [vmem:[%s4594_s1 + $0x758] sm:$0xff]  ;;  %v153_v19 = vld [vmem:[%s4594_s1 + $0x410] sm:$0xff] }
  0x49   :  { %1948 = vmatprep.subr.bf16.mxu1 %v3089_v29  ;;  %v90_v29 = vld [vmem:[%s4594_s1 + $0x218] sm:$0xff] }
  0x4a   :  { %1986 = vmatpush1.bf16.msra.mxu0 %v3216_v34  ;;  %v3202_v34 = vcombine.low %v265_v20, %v273_v22  ;;  %v161_v20 = vld [vmem:[%s4594_s1 + $0x450] sm:$0xff] }
  0x4b   :  { %2089 = vmatprep.subr.bf16.mxu0 %v3235_v36  ;;  %v3187_v36 = vcombine.high %v249_v31, %v257_v32  ;;  %v306_v31 = vld [vmem:[%s4594_s1 + $0x8d8] sm:$0xff] }
  0x4c   :  { %1949 = vmatpush2.bf16.msra.mxu1 %v3088_v35  ;;  %v3029_v35 = vcombine.high %v90_v29, %v98_v30 }
  0x4d   :  { %2024 = vmatprep.subr.bf16.mxu1 %v3075_v37  ;;  %1855 = vmatmul.mubr.bf16.gmra.mxu0 %v3644_v38  ;;  %v74_v37 = vld [vmem:[%s4594_s1 + $0x198] sm:$0xff] }
  0x4e   :  { %2003 = vmatprep.mubr.bf16.mxu0 %v3343_v3  ;;  %v3013_v44 = vcombine.high %v74_v37, %v82_v39  ;;  %v3012_v50 = vcombine.low %v74_v37, %v82_v39 }
  0x4f   :  { %1951 = vmatmul.mubr.bf16.vlgmr.msra.gmra.mxu1 %v3614_v21 }
  0x50   :  { %2025 = vmatpush1.bf16.msra.mxu1 %v3074_v41  ;;  %1960 = vmatprep.mubr.bf16.mxu1 %v3625_v25  ;;  %v241_v41 = vld [vmem:[%s4594_s1 + $0x6d0] sm:$0xff] }
  0x51   :  { %2026 = vmatprep.subr.bf16.mxu1 %v3059_v42  ;;  %v3028_v42 = vcombine.low %v90_v29, %v98_v30  ;;  %v242_v29 = vld [vmem:[%s4594_s1 + $0x6d8] sm:$0xff] }
  0x52   :  { %v298_v30 = vld [vmem:[%s4594_s1 + $0x898] sm:$0xff] }
  0x53   :  { %v3237_v37 = vcombine.high %v298_v30, %v306_v31 }
  0x54   :  { %2027 = vmatpush1.bf16.msra.mxu1 %v3058_v45  ;;  %v3171_v45 = vcombine.high %v233_v40, %v241_v41 }
  0x55   :  { %2028 = vmatprep.subr.bf16.mxu1 %v3043_v46  ;;  %3248 = vmatmul.mubr.msk.bf16.vlgmr.msra.gmra.mxu0 %vm1805_vm0, %v3418_v28  ;;  %v58_v46 = vld [vmem:[%s4594_s1 + $0x118] sm:$0xff] }
  0x56   :  { %2090 = vmatpush1.bf16.msra.mxu0 %v3234_v51  ;;  %2013 = vmatprep.mubr.bf16.mxu0 %v3343_v3  ;;  %v3170_v51 = vcombine.low %v233_v40, %v241_v41  ;;  %v2996_v58 = vcombine.low %v58_v46, %v66_v47  ;;  %v282_v40 = vld [vmem:[%s4594_s1 + $0x818] sm:$0xff] }
  0x57   :  { %1961 = vmatmul.mubr.bf16.gmra.mxu1 %v3644_v38  ;;  %2091 = vmatprep.subr.bf16.mxu0 %v3219_v54  ;;  %v42_v54 = vld [vmem:[%s4594_s1 + $0x98] sm:$0xff] }
  0x58   :  { %2029 = vmatpush1.bf16.msra.mxu1 %v3042_v52  ;;  %2056 = vmatprep.mubr.bf16.mxu1 %v3474_v60  ;;  %v2997_v52 = vcombine.high %v58_v46, %v66_v47  ;;  %v290_v41 = vld [vmem:[%s4594_s1 + $0x858] sm:$0xff] }
  0x59   :  { %2030 = vmatprep.subr.bf16.mxu1 %v3027_v53  ;;  %v3155_v53 = vcombine.high %v217_v48, %v225_v49  ;;  %v3221_v46 = vcombine.high %v282_v40, %v290_v41 }
  0x5a   :  { %2092 = vmatpush1.bf16.msra.mxu0 %v3218_v59  ;;  %v3154_v59 = vcombine.low %v217_v48, %v225_v49  ;;  %v139_v48 = vld [vmem:[%s4594_s1 + $0x3a0] sm:$0xff] }
  0x5b   :  { %2130 = vmatprep.subr.bf16.mxu0 %v3077_v62  ;;  %v3139_v62 = vcombine.high %v201_v56, %v209_v57  ;;  %v147_v49 = vld [vmem:[%s4594_s1 + $0x3e0] sm:$0xff]  ;;  %v170_v57 = vld [vmem:[%s4594_s1 + $0x498] sm:$0xff] }
  0x5c   :  { %2031 = vmatpush1.bf16.msra.mxu1 %v3026_v61  ;;  %v2981_v61 = vcombine.high %v42_v54, %v50_v55 }
  0x5d   :  { %2032 = vmatprep.subr.bf16.mxu1 %v3011_v63  ;;  %3249 = vmatmul.mubr.msk.bf16.gmra.mxu0 %vm1805_vm0, %v3479_v0  ;;  %v26_v63 = vld [vmem:[%s4594_s1 + $0x18] sm:$0xff] }
  0x5e   :  { %2109 = vmatprep.mubr.bf16.mxu0 %v3343_v3  ;;  %v2965_v7 = vcombine.high %v26_v63, %v34_v1  ;;  %v2964_v13 = vcombine.low %v26_v63, %v34_v1  ;;  %v162_v63 = vld [vmem:[%s4594_s1 + $0x458] sm:$0xff]  ;;  %v123_v1 = vld [vmem:[%s4594_s1 + $0x320] sm:$0xff] }
  0x60   :  { %2033 = vmatpush1.bf16.msra.mxu1 %v3010_v4  ;;  %v193_v4 = vld [vmem:[%s4594_s1 + $0x550] sm:$0xff] }
  0x61   :  { %2034 = vmatprep.subr.bf16.mxu1 %v2995_v5  ;;  %v2980_v5 = vcombine.low %v42_v54, %v50_v55  ;;  %v3079_v54 = vcombine.high %v139_v48, %v147_v49 }
  0x64   :  { %2035 = vmatpush1.bf16.msra.mxu1 %v2994_v8  ;;  %v3123_v8 = vcombine.high %v185_v2, %v193_v4 }
  0x65   :  { %2036 = vmatprep.subr.bf16.mxu1 %v2979_v9  ;;  %3250 = vmatmul.mubr.msk.bf16.vlgmr.msra.gmra.mxu0 %vm1805_vm0, %v3418_v28  ;;  %v266_v9 = vld [vmem:[%s4594_s1 + $0x798] sm:$0xff] }
  0x66   :  { %2131 = vmatpush1.bf16.msra.mxu0 %v3076_v14  ;;  %2119 = vmatprep.mubr.bf16.mxu0 %v3343_v3  ;;  %v3122_v14 = vcombine.low %v185_v2, %v193_v4  ;;  %v3204_v22 = vcombine.low %v266_v9, %v274_v10  ;;  %v131_v2 = vld [vmem:[%s4594_s1 + $0x360] sm:$0xff] }
  0x67   :  { %2132 = vmatprep.subr.bf16.mxu0 %v3061_v16  ;;  %v3107_v16 = vcombine.high %v169_v11, %v177_v12 }
  0x68   :  { %2037 = vmatpush1.bf16.msra.mxu1 %v2978_v15  ;;  %v3205_v15 = vcombine.high %v266_v9, %v274_v10  ;;  %v307_v9 = vld [vmem:[%s4594_s1 + $0x8e0] sm:$0xff] }
  0x69   :  { %2038 = vmatprep.subr.bf16.mxu1 %v2963_v17  ;;  %v250_v17 = vld [vmem:[%s4594_s1 + $0x718] sm:$0xff]  ;;  %v107_v10 = vld [vmem:[%s4594_s1 + $0x2a0] sm:$0xff] }
  0x6a   :  { %2133 = vmatpush1.bf16.msra.mxu0 %v3060_v23  ;;  %v3106_v23 = vcombine.low %v169_v11, %v177_v12  ;;  %v3188_v32 = vcombine.low %v250_v17, %v258_v18  ;;  %v115_v11 = vld [vmem:[%s4594_s1 + $0x2e0] sm:$0xff] }
  0x6b   :  { %2134 = vmatprep.subr.bf16.mxu0 %v3045_v26  ;;  %v3091_v26 = vcombine.high %v153_v19, %v161_v20 }
  0x6c   :  { %2039 = vmatpush1.bf16.msra.mxu1 %v2962_v24  ;;  %v3189_v24 = vcombine.high %v250_v17, %v258_v18  ;;  %v291_v17 = vld [vmem:[%s4594_s1 + $0x860] sm:$0xff] }
  0x6d   :  { %2040 = vmatprep.subr.bf16.mxu1 %v3203_v27  ;;  %3251 = vmatmul.mubr.msk.bf16.gmra.mxu0 %vm1805_vm0, %v3479_v0  ;;  %v234_v27 = vld [vmem:[%s4594_s1 + $0x698] sm:$0xff]  ;;  %v99_v18 = vld [vmem:[%s4594_s1 + $0x260] sm:$0xff] }
  0x6e   :  { %2135 = vmatpush1.bf16.msra.mxu0 %v3044_v33  ;;  %2162 = vmatprep.mubr.bf16.mxu0 %v3474_v60  ;;  %v3090_v33 = vcombine.low %v153_v19, %v161_v20  ;;  %v3172_v39 = vcombine.low %v234_v27, %v242_v29  ;;  %v3046_v20 = vcombine.low %v107_v10, %v115_v11 }
  0x6f   :  { %2136 = vmatprep.subr.bf16.mxu0 %v3029_v35  ;;  %v218_v35 = vld [vmem:[%s4594_s1 + $0x618] sm:$0xff] }
  0x70   :  { %2041 = vmatpush2.bf16.msra.mxu1 %v3202_v34  ;;  %v3173_v34 = vcombine.high %v234_v27, %v242_v29  ;;  %v75_v27 = vld [vmem:[%s4594_s1 + $0x1a0] sm:$0xff] }
  0x71   :  { %2042 = vmatprep.subr.bf16.mxu1 %v3187_v36  ;;  %v226_v36 = vld [vmem:[%s4594_s1 + $0x658] sm:$0xff]  ;;  %v83_v29 = vld [vmem:[%s4594_s1 + $0x1e0] sm:$0xff] }
  0x72   :  { %2137 = vmatpush1.bf16.msra.mxu0 %v3028_v42  ;;  %v3157_v42 = vcombine.high %v218_v35, %v226_v36  ;;  %v3156_v47 = vcombine.low %v218_v35, %v226_v36  ;;  %v67_v35 = vld [vmem:[%s4594_s1 + $0x160] sm:$0xff]  ;;  %v3014_v36 = vcombine.low %v75_v27, %v83_v29 }
  0x73   :  { %2138 = vmatprep.subr.bf16.mxu0 %v3013_v44  ;;  %v210_v44 = vld [vmem:[%s4594_s1 + $0x5d8] sm:$0xff] }
  0x74   :  { %2043 = vmatpush2.bf16.msra.mxu1 %v3186_v43  ;;  %v202_v43 = vld [vmem:[%s4594_s1 + $0x598] sm:$0xff] }
  0x75   :  { %2044 = vmatprep.subr.bf16.mxu1 %v3171_v45  ;;  %v3236_v45 = vcombine.low %v298_v30, %v306_v31  ;;  %v3140_v55 = vcombine.low %v202_v43, %v210_v44 }
  0x76   :  { %2139 = vmatpush1.bf16.msra.mxu0 %v3012_v50  ;;  %v3141_v50 = vcombine.high %v202_v43, %v210_v44  ;;  %v124_v43 = vld [vmem:[%s4594_s1 + $0x328] sm:$0xff] }
  0x77   :  { %2140 = vmatprep.subr.bf16.mxu0 %v2997_v52  ;;  %v194_v52 = vld [vmem:[%s4594_s1 + $0x558] sm:$0xff]  ;;  %v132_v44 = vld [vmem:[%s4594_s1 + $0x368] sm:$0xff] }
  0x78   :  { %2045 = vmatpush2.bf16.msra.mxu1 %v3170_v51  ;;  %v186_v51 = vld [vmem:[%s4594_s1 + $0x518] sm:$0xff] }
  0x79   :  { %2046 = vmatprep.subr.bf16.mxu1 %v3155_v53  ;;  %v3220_v53 = vcombine.low %v282_v40, %v290_v41  ;;  %v3125_v56 = vcombine.high %v186_v51, %v194_v52  ;;  %v51_v40 = vld [vmem:[%s4594_s1 + $0xe0] sm:$0xff] }
  0x7a   :  { %2141 = vmatpush1.bf16.msra.mxu0 %v2996_v58  ;;  %v178_v58 = vld [vmem:[%s4594_s1 + $0x4d8] sm:$0xff] }
  0x7b   :  { %2142 = vmatprep.subr.bf16.mxu0 %v2981_v61  ;;  %v3109_v61 = vcombine.high %v170_v57, %v178_v58  ;;  %v3108_v4 = vcombine.low %v170_v57, %v178_v58 }
  0x7c   :  { %2047 = vmatpush2.bf16.msra.mxu1 %v3154_v59  ;;  %v3124_v59 = vcombine.low %v186_v51, %v194_v52  ;;  %v108_v51 = vld [vmem:[%s4594_s1 + $0x2a8] sm:$0xff] }
  0x7d   :  { %2048 = vmatprep.subr.bf16.mxu1 %v3139_v62  ;;  %v154_v62 = vld [vmem:[%s4594_s1 + $0x418] sm:$0xff]  ;;  %v116_v52 = vld [vmem:[%s4594_s1 + $0x2e8] sm:$0xff] }
  0x7e   :  { %2143 = vmatpush1.bf16.msra.mxu0 %v2980_v5  ;;  %v3078_v5 = vcombine.low %v139_v48, %v147_v49  ;;  %v3092_v12 = vcombine.low %v154_v62, %v162_v63  ;;  %v3065_v49 = vcombine.high %v124_v43, %v132_v44  ;;  %v3049_v58 = vcombine.high %v108_v51, %v116_v52 }
  0x7f   :  { %2144 = vmatprep.subr.bf16.mxu0 %v2965_v7  ;;  %v3063_v7 = vcombine.high %v123_v1, %v131_v2 }
  0x80   :  { %2049 = vmatpush2.bf16.msra.mxu1 %v3138_v6  ;;  %v3093_v6 = vcombine.high %v154_v62, %v162_v63  ;;  %v100_v62 = vld [vmem:[%s4594_s1 + $0x268] sm:$0xff]  ;;  %v251_v63 = vld [vmem:[%s4594_s1 + $0x720] sm:$0xff] }
  0x81   :  { %2050 = vmatprep.subr.bf16.mxu1 %v3123_v8  ;;  %v299_v8 = vld [vmem:[%s4594_s1 + $0x8a0] sm:$0xff] }
  0x82   :  { %2145 = vmatpush1.bf16.msra.mxu0 %v2964_v13  ;;  %v3062_v13 = vcombine.low %v123_v1, %v131_v2  ;;  %v3238_v19 = vcombine.low %v299_v8, %v307_v9  ;;  %v259_v1 = vld [vmem:[%s4594_s1 + $0x760] sm:$0xff]  ;;  %v3048_v2 = vcombine.low %v108_v51, %v116_v52 }
  0x83   :  { %2146 = vmatprep.subr.bf16.mxu0 %v3205_v15  ;;  %v3047_v15 = vcombine.high %v107_v10, %v115_v11  ;;  %v243_v10 = vld [vmem:[%s4594_s1 + $0x6e0] sm:$0xff] }
  0x84   :  { %2051 = vmatpush2.bf16.msra.mxu1 %v3122_v14  ;;  %v3239_v14 = vcombine.high %v299_v8, %v307_v9  ;;  %v84_v8 = vld [vmem:[%s4594_s1 + $0x1e8] sm:$0xff]  ;;  %v235_v9 = vld [vmem:[%s4594_s1 + $0x6a0] sm:$0xff] }
  0x85   :  { %2052 = vmatprep.subr.bf16.mxu1 %v3107_v16  ;;  %v283_v16 = vld [vmem:[%s4594_s1 + $0x820] sm:$0xff] }
  0x86   :  { %2147 = vmatpush2.bf16.msra.mxu0 %v3204_v22  ;;  %v3223_v22 = vcombine.high %v283_v16, %v291_v17  ;;  %v3222_v30 = vcombine.low %v283_v16, %v291_v17  ;;  %v68_v16 = vld [vmem:[%s4594_s1 + $0x168] sm:$0xff]  ;;  %v163_v51 = vld [vmem:[%s4594_s1 + $0x460] sm:$0xff] }
  0x87   :  { %2148 = vmatprep.subr.bf16.mxu0 %v3189_v24  ;;  %v140_v24 = vld [vmem:[%s4594_s1 + $0x3a8] sm:$0xff] }
  0x88   :  { %2053 = vmatpush2.bf16.msra.mxu1 %v3106_v23 }
  0x89   :  { %2054 = vmatprep.subr.bf16.mxu1 %v3091_v26  ;;  %v148_v26 = vld [vmem:[%s4594_s1 + $0x3e8] sm:$0xff] }
  0x8a   :  { %2149 = vmatpush2.bf16.msra.mxu0 %v3188_v32  ;;  %v3081_v32 = vcombine.high %v140_v24, %v148_v26 }
  0x8b   :  { %2150 = vmatprep.subr.bf16.mxu0 %v3173_v34  ;;  %v59_v34 = vld [vmem:[%s4594_s1 + $0x120] sm:$0xff] }
  0x8c   :  { %2055 = vmatpush2.bf16.msra.mxu1 %v3090_v33  ;;  %v3015_v33 = vcombine.high %v75_v27, %v83_v29  ;;  %v2998_v41 = vcombine.low %v59_v34, %v67_v35 }
  0x8d   :  { %2195 = vmatprep.subr.bf16.mxu1 %v3237_v37  ;;  %v2999_v37 = vcombine.high %v59_v34, %v67_v35  ;;  %v195_v34 = vld [vmem:[%s4594_s1 + $0x560] sm:$0xff] }
  0x8e   :  { %2151 = vmatpush2.bf16.msra.mxu0 %v3172_v39  ;;  %v43_v39 = vld [vmem:[%s4594_s1 + $0xa0] sm:$0xff] }
  0x8f   :  { %2057 = vmatmul.mubr.bf16.vlgmr.msra.gmra.mxu1 %v3614_v21  ;;  %2152 = vmatprep.subr.bf16.mxu0 %v3157_v42  ;;  %v2983_v42 = vcombine.high %v43_v39, %v51_v40  ;;  %v2982_v48 = vcombine.low %v43_v39, %v51_v40  ;;  %v268_v40 = vld [vmem:[%s4594_s1 + $0x7a8] sm:$0xff] }
  0x90   :  { %2066 = vmatprep.mubr.bf16.mxu1 %v3625_v25  ;;  %2196 = vmatpush1.bf16.msra.mxu1 %v3236_v45  ;;  %v27_v45 = vld [vmem:[%s4594_s1 + $0x20] sm:$0xff] }
  0x91   :  { %2197 = vmatprep.subr.bf16.mxu1 %v3221_v46  ;;  %v35_v46 = vld [vmem:[%s4594_s1 + $0x60] sm:$0xff] }
  0x92   :  { %2153 = vmatpush2.bf16.msra.mxu0 %v3156_v47  ;;  %v3080_v47 = vcombine.low %v140_v24, %v148_v26  ;;  %v2966_v57 = vcombine.low %v27_v45, %v35_v46  ;;  %v211_v24 = vld [vmem:[%s4594_s1 + $0x5e0] sm:$0xff] }
  0x93   :  { %2154 = vmatprep.subr.bf16.mxu0 %v3141_v50  ;;  %v2967_v50 = vcombine.high %v27_v45, %v35_v46 }
  0x94   :  { %2198 = vmatpush1.bf16.msra.mxu1 %v3220_v53  ;;  %v3963_v53 = vld [vmem:[%s4595_s0 + $0x8] ss:$12 sps:$4 sm:$0xff]  }
  0x95   :  { %2236 = vmatprep.subr.bf16.mxu1 %v3079_v54  ;;  %v267_v54 = vld [vmem:[%s4594_s1 + $0x7a0] sm:$0xff] }
  0x96   :  { %2155 = vmatpush2.bf16.msra.mxu0 %v3140_v55  ;;  %v275_v55 = vld [vmem:[%s4594_s1 + $0x7e0] sm:$0xff] }
  0x97   :  { %2067 = vmatmul.mubr.bf16.gmra.mxu1 %v3644_v38  ;;  %2156 = vmatprep.subr.bf16.mxu0 %v3125_v56  ;;  %v3064_v56 = vcombine.low %v124_v43, %v132_v44  ;;  %v179_v43 = vld [vmem:[%s4594_s1 + $0x4e0] sm:$0xff] }
  0x98   :  { %2215 = vmatprep.mubr.bf16.mxu1 %v3343_v3 }
  0x9a   :  { %2157 = vmatpush2.bf16.msra.mxu0 %v3124_v59  ;;  %v3207_v59 = vcombine.high %v267_v54, %v275_v55 }
  0x9b   :  { %2158 = vmatprep.subr.bf16.mxu0 %v3109_v61  ;;  %v92_v61 = vld [vmem:[%s4594_s1 + $0x228] sm:$0xff] }
  0x9c   :  { %v3032_v11 = vcombine.low %v92_v61, %v100_v62 }
  0x9e   :  { %2159 = vmatpush2.bf16.msra.mxu0 %v3108_v4  ;;  %v3206_v4 = vcombine.low %v267_v54, %v275_v55 }
  0x9f   :  { %3252 = vmatmul.mubr.msk.bf16.vlgmr.msra.gmra.mxu1 %vm1805_vm0, %v3418_v28  ;;  %2160 = vmatprep.subr.bf16.mxu0 %v3093_v6  ;;  %v91_v28 = vld [vmem:[%s4594_s1 + $0x220] sm:$0xff]  ;;  %v3191_v6 = vcombine.high %v251_v63, %v259_v1 }
  0xa0   :  { %2237 = vmatpush1.bf16.msra.mxu1 %v3078_v5  ;;  %2225 = vmatprep.mubr.bf16.mxu1 %v3343_v3  ;;  %v3031_v23 = vcombine.high %v91_v28, %v99_v18  ;;  %v3030_v31 = vcombine.low %v91_v28, %v99_v18  ;;  %v3033_v5 = vcombine.high %v92_v61, %v100_v62  ;;  %v308_v61 = vld [vmem:[%s4594_s1 + $0x8e8] sm:$0xff] }
  0xa1   :  { %2238 = vmatprep.subr.bf16.mxu1 %v3063_v7  ;;  %v76_v7 = vld [vmem:[%s4594_s1 + $0x1a8] sm:$0xff]  ;;  %v3174_v28 = vcombine.low %v235_v9, %v243_v10 }
  0xa2   :  { %2161 = vmatpush2.bf16.msra.mxu0 %v3092_v12  ;;  %v3190_v12 = vcombine.low %v251_v63, %v259_v1  ;;  %v3016_v17 = vcombine.low %v76_v7, %v84_v8 }
  0xa3   :  { %2301 = vmatprep.subr.bf16.mxu0 %v3239_v14  ;;  %v3175_v14 = vcombine.high %v235_v9, %v243_v10  ;;  %v204_v10 = vld [vmem:[%s4594_s1 + $0x5a8] sm:$0xff] }
  0xa4   :  { %2239 = vmatpush1.bf16.msra.mxu1 %v3062_v13  ;;  %v3017_v13 = vcombine.high %v76_v7, %v84_v8  ;;  %v284_v7 = vld [vmem:[%s4594_s1 + $0x828] sm:$0xff] }
  0xa5   :  { %2240 = vmatprep.subr.bf16.mxu1 %v3047_v15  ;;  %2163 = vmatmul.mubr.bf16.vlgmr.msra.gmra.mxu0 %v3614_v21  ;;  %v60_v15 = vld [vmem:[%s4594_s1 + $0x128] sm:$0xff] }
  0xa6   :  { %2302 = vmatpush1.bf16.msra.mxu0 %v3238_v19  ;;  %2172 = vmatprep.mubr.bf16.mxu0 %v3625_v25  ;;  %v3001_v18 = vcombine.high %v60_v15, %v68_v16  ;;  %v3000_v26 = vcombine.low %v60_v15, %v68_v16  ;;  %v292_v8 = vld [vmem:[%s4594_s1 + $0x868] sm:$0xff]  ;;  %v141_v15 = vld [vmem:[%s4594_s1 + $0x3b0] sm:$0xff] }
  0xa7   :  { %2303 = vmatprep.subr.bf16.mxu0 %v3223_v22  ;;  %3253 = vmatmul.mubr.msk.bf16.gmra.mxu1 %vm1805_vm0, %v3479_v0  ;;  %v52_v22 = vld [vmem:[%s4594_s1 + $0xe8] sm:$0xff]  ;;  %v149_v16 = vld [vmem:[%s4594_s1 + $0x3f0] sm:$0xff] }
  0xa8   :  { %2241 = vmatpush1.bf16.msra.mxu1 %v3046_v20  ;;  %2268 = vmatprep.mubr.bf16.mxu1 %v3474_v60  ;;  %v44_v20 = vld [vmem:[%s4594_s1 + $0xa8] sm:$0xff] }
  0xa9   :  { %2242 = vmatprep.subr.bf16.mxu1 %v3031_v23  ;;  %v203_v23 = vld [vmem:[%s4594_s1 + $0x5a0] sm:$0xff]  ;;  %v2985_v29 = vcombine.high %v44_v20, %v52_v22  ;;  %v2984_v35 = vcombine.low %v44_v20, %v52_v22  ;;  %v180_v20 = vld [vmem:[%s4594_s1 + $0x4e8] sm:$0xff] }
  0xaa   :  { %2304 = vmatpush1.bf16.msra.mxu0 %v3222_v30  ;;  %v3143_v30 = vcombine.high %v203_v23, %v211_v24 }
  0xab   :  { %2342 = vmatprep.subr.bf16.mxu0 %v3081_v32  ;;  %v36_v32 = vld [vmem:[%s4594_s1 + $0x68] sm:$0xff] }
  0xac   :  { %2243 = vmatpush1.bf16.msra.mxu1 %v3030_v31  ;;  %v28_v31 = vld [vmem:[%s4594_s1 + $0x28] sm:$0xff] }
  0xad   :  { %2244 = vmatprep.subr.bf16.mxu1 %v3015_v33  ;;  %2173 = vmatmul.mubr.bf16.gmra.mxu0 %v3644_v38  ;;  %v187_v33 = vld [vmem:[%s4594_s1 + $0x520] sm:$0xff]  ;;  %v2968_v44 = vcombine.low %v28_v31, %v36_v32 }
  0xae   :  { %2321 = vmatprep.mubr.bf16.mxu0 %v3343_v3  ;;  %v3127_v39 = vcombine.high %v187_v33, %v195_v34  ;;  %v3126_v45 = vcombine.low %v187_v33, %v195_v34  ;;  %v301_v33 = vld [vmem:[%s4594_s1 + $0x8b0] sm:$0xff] }
  0xaf   :  { %v309_v34 = vld [vmem:[%s4594_s1 + $0x8f0] sm:$0xff] }
  0xb0   :  { %2245 = vmatpush1.bf16.msra.mxu1 %v3014_v36  ;;  %v3142_v36 = vcombine.low %v203_v23, %v211_v24  ;;  %v156_v24 = vld [vmem:[%s4594_s1 + $0x428] sm:$0xff] }
  0xb1   :  { %2246 = vmatprep.subr.bf16.mxu1 %v2999_v37  ;;  %v2969_v37 = vcombine.high %v28_v31, %v36_v32 }
  0xb4   :  { %2247 = vmatpush1.bf16.msra.mxu1 %v2998_v41  ;;  %v276_v41 = vld [vmem:[%s4594_s1 + $0x7e8] sm:$0xff] }
  0xb5   :  { %2248 = vmatprep.subr.bf16.mxu1 %v2983_v42  ;;  %3254 = vmatmul.mubr.msk.bf16.vlgmr.msra.gmra.mxu0 %vm1805_vm0, %v3963_v53  ;;  %v171_v42 = vld [vmem:[%s4594_s1 + $0x4a0] sm:$0xff]  ;;  %v3209_v46 = vcombine.high %v268_v40, %v276_v41  ;;  %v3208_v52 = vcombine.low %v268_v40, %v276_v41  ;;  %v3243_v40 = vcombine.high %v301_v33, %v309_v34 }
  0xb6   :  { %2343 = vmatpush1.bf16.msra.mxu0 %v3080_v47  ;;  %2331 = vmatprep.mubr.bf16.mxu0 %v3343_v3  ;;  %v3111_v47 = vcombine.high %v171_v42, %v179_v43  ;;  %v3110_v54 = vcombine.low %v171_v42, %v179_v43  ;;  %v285_v43 = vld [vmem:[%s4594_s1 + $0x830] sm:$0xff] }
  0xb7   :  { %2344 = vmatprep.subr.bf16.mxu0 %v3065_v49  ;;  %v260_v49 = vld [vmem:[%s4594_s1 + $0x768] sm:$0xff] }
  0xb8   :  { %2249 = vmatpush1.bf16.msra.mxu1 %v2982_v48  ;;  %v252_v48 = vld [vmem:[%s4594_s1 + $0x728] sm:$0xff] }
  0xb9   :  { %2250 = vmatprep.subr.bf16.mxu1 %v2967_v50  ;;  %v155_v50 = vld [vmem:[%s4594_s1 + $0x420] sm:$0xff]  ;;  %v3193_v55 = vcombine.high %v252_v48, %v260_v49  ;;  %v3192_v62 = vcombine.low %v252_v48, %v260_v49 }
  0xba   :  { %2345 = vmatpush1.bf16.msra.mxu0 %v3064_v56  ;;  %v3095_v56 = vcombine.high %v155_v50, %v163_v51  ;;  %v3094_v63 = vcombine.low %v155_v50, %v163_v51 }
  0xbb   :  { %2346 = vmatprep.subr.bf16.mxu0 %v3049_v58  ;;  %v244_v58 = vld [vmem:[%s4594_s1 + $0x6e8] sm:$0xff] }
  0xbc   :  { %2251 = vmatpush1.bf16.msra.mxu1 %v2966_v57  ;;  %v236_v57 = vld [vmem:[%s4594_s1 + $0x6a8] sm:$0xff] }
  0xbd   :  { %2252 = vmatprep.subr.bf16.mxu1 %v3207_v59  ;;  %3255 = vmatmul.mubr.msk.bf16.gmra.mxu0 %vm1805_vm0, %v3479_v0  ;;  %v219_v0 = vld [vmem:[%s4594_s1 + $0x620] sm:$0xff]  ;;  %v300_v59 = vld [vmem:[%s4594_s1 + $0x8a8] sm:$0xff]  ;;  %v3177_v1 = vcombine.high %v236_v57, %v244_v58 }
  0xbe   :  { %2347 = vmatpush1.bf16.msra.mxu0 %v3048_v2  ;;  %2374 = vmatprep.mubr.bf16.mxu0 %v3474_v60  ;;  %v227_v60 = vld [vmem:[%s4594_s1 + $0x660] sm:$0xff]  ;;  %v220_v2 = vld [vmem:[%s4594_s1 + $0x628] sm:$0xff] }
  0xbf   :  { %2348 = vmatprep.subr.bf16.mxu0 %v3033_v5  ;;  %v3159_v19 = vcombine.high %v219_v0, %v227_v60  ;;  %v3158_v27 = vcombine.low %v219_v0, %v227_v60  ;;  %v3241_v5 = vcombine.high %v300_v59, %v308_v61  ;;  %v188_v60 = vld [vmem:[%s4594_s1 + $0x528] sm:$0xff] }
  0xc0   :  { %2253 = vmatpush2.bf16.msra.mxu1 %v3206_v4  ;;  %v228_v4 = vld [vmem:[%s4594_s1 + $0x668] sm:$0xff] }
  0xc1   :  { %2254 = vmatprep.subr.bf16.mxu1 %v3191_v6  ;;  %v3176_v6 = vcombine.low %v236_v57, %v244_v58  ;;  %v3161_v9 = vcombine.high %v220_v2, %v228_v4  ;;  %v85_v57 = vld [vmem:[%s4594_s1 + $0x1f0] sm:$0xff]  ;;  %v4177_v58 = vld [vmem:[%s4595_s0 + $0x1c] ss:$12 sps:$4 sm:$0xff]  }
  0xc2   :  { %2349 = vmatpush1.bf16.msra.mxu0 %v3032_v11  ;;  %v212_v11 = vld [vmem:[%s4594_s1 + $0x5e8] sm:$0xff] }
  0xc3   :  { %2350 = vmatprep.subr.bf16.mxu0 %v3017_v13  ;;  %v3225_v13 = vcombine.high %v284_v7, %v292_v8  ;;  %v3145_v0 = vcombine.high %v204_v10, %v212_v11 }
  0xc4   :  { %2255 = vmatpush2.bf16.msra.mxu1 %v3190_v12  ;;  %v3240_v12 = vcombine.low %v300_v59, %v308_v61 }
  0xc5   :  { %2256 = vmatprep.subr.bf16.mxu1 %v3175_v14  ;;  %v3160_v14 = vcombine.low %v220_v2, %v228_v4  ;;  %v4185_v2 = vld [vmem:[%s4595_s0 + $0x20] ss:$12 sps:$4 sm:$0xff]   ;;  %v61_v4 = vld [vmem:[%s4594_s1 + $0x130] sm:$0xff] }
  0xc6   :  { %2351 = vmatpush1.bf16.msra.mxu0 %v3016_v17  ;;  %v3224_v17 = vcombine.low %v284_v7, %v292_v8 }
  0xc7   :  { %2352 = vmatprep.subr.bf16.mxu0 %v3001_v18  ;;  %v3144_v18 = vcombine.low %v204_v10, %v212_v11  ;;  %v4206_v10 = vld [vmem:[%s4595_s0 + $0x18] ss:$12 sps:$4 sm:$0xff]   ;;  %v45_v11 = vld [vmem:[%s4594_s1 + $0xb0] sm:$0xff] }
  0xc8   :  { %2257 = vmatpush2.bf16.msra.mxu1 %v3174_v28  ;;  %v3083_v28 = vcombine.high %v141_v15, %v149_v16 }
  0xc9   :  { %2258 = vmatprep.subr.bf16.mxu1 %v3159_v19 }
  0xca   :  { %2353 = vmatpush1.bf16.msra.mxu0 %v3000_v26  ;;  %v164_v26 = vld [vmem:[%s4594_s1 + $0x468] sm:$0xff] }
  0xcb   :  { %2354 = vmatprep.subr.bf16.mxu0 %v2985_v29  ;;  %v3097_v31 = vcombine.high %v156_v24, %v164_v26 }
  0xcc   :  { %2259 = vmatpush2.bf16.msra.mxu1 %v3158_v27  ;;  %v125_v27 = vld [vmem:[%s4594_s1 + $0x330] sm:$0xff] }
  0xcd   :  { %2260 = vmatprep.subr.bf16.mxu1 %v3143_v30  ;;  %v3082_v30 = vcombine.low %v141_v15, %v149_v16  ;;  %v126_v16 = vld [vmem:[%s4594_s1 + $0x338] sm:$0xff] }
  0xce   :  { %2355 = vmatpush1.bf16.msra.mxu0 %v2984_v35  ;;  %v109_v35 = vld [vmem:[%s4594_s1 + $0x2b0] sm:$0xff] }
  0xcf   :  { %2356 = vmatprep.subr.bf16.mxu0 %v2969_v37  ;;  %v3096_v37 = vcombine.low %v156_v24, %v164_v26  ;;  %v4139_v41 = vpop.f32.mrf.mxu1  ;;  %v269_v26 = vld [vmem:[%s4594_s1 + $0x7b0] sm:$0xff] }
  0xd0   :  { %2261 = vmatpush2.bf16.msra.mxu1 %v3142_v36  ;;  %v117_v36 = vld [vmem:[%s4594_s1 + $0x2f0] sm:$0xff] }
  0xd1   :  { %2262 = vmatprep.subr.bf16.mxu1 %v3127_v39  ;;  %v3051_v42 = vcombine.high %v109_v35, %v117_v36  ;;  %v3050_v48 = vcombine.low %v109_v35, %v117_v36  ;;  %v4154_v50 = vpop.f32.mrf.mxu1  ;;  %v4257_v35 = vld [vmem:[%s4594_s1 + $0x238] sm:$0xff] }
  0xd2   :  { %2357 = vmatpush1.bf16.msra.mxu0 %v2968_v44  ;;  %v293_v44 = vld [vmem:[%s4594_s1 + $0x870] sm:$0xff] }
  0xd3   :  { %2358 = vmatprep.subr.bf16.mxu0 %v3209_v46  ;;  %v101_v46 = vld [vmem:[%s4594_s1 + $0x270] sm:$0xff]  ;;  %v3227_v49 = vcombine.high %v285_v43, %v293_v44  ;;  %v3226_v59 = vcombine.low %v285_v43, %v293_v44 }
  0xd4   :  { %2263 = vmatpush2.bf16.msra.mxu1 %v3126_v45  ;;  %v93_v45 = vld [vmem:[%s4594_s1 + $0x230] sm:$0xff] }
  0xd5   :  { %2264 = vmatprep.subr.bf16.mxu1 %v3111_v47  ;;  %v3242_v47 = vcombine.low %v301_v33, %v309_v34  ;;  %v3035_v51 = vcombine.high %v93_v45, %v101_v46  ;;  %v3034_v61 = vcombine.low %v93_v45, %v101_v46  ;;  %v261_v43 = vld [vmem:[%s4594_s1 + $0x770] sm:$0xff]  ;;  %v4270_v45 = vpop.permute.xlu1 %327 }
  0xd6   :  { %2359 = vmatpush2.bf16.msra.mxu0 %v3208_v52  ;;  %v142_v52 = vld [vmem:[%s4594_s1 + $0x3b8] sm:$0xff] }
  0xd7   :  { %2360 = vmatprep.subr.bf16.mxu0 %v3193_v55  ;;  %v4165_v55 = vld [vmem:[%s4595_s0] ss:$12 sps:$4 sm:$0xff]  }
  0xd8   :  { %2265 = vmatpush2.bf16.msra.mxu1 %v3110_v54  ;;  %v150_v54 = vld [vmem:[%s4594_s1 + $0x3f8] sm:$0xff] }
  0xd9   :  { %2266 = vmatprep.subr.bf16.mxu1 %v3095_v56  ;;  %v77_v56 = vld [vmem:[%s4594_s1 + $0x1b0] sm:$0xff] }
  0xda   :  { %2361 = vmatpush2.bf16.msra.mxu0 %v3192_v62  ;;  %v3085_v62 = vcombine.high %v142_v52, %v150_v54  ;;  %v3018_v7 = vcombine.low %v77_v56, %v85_v57 }
  0xdb   :  { %2362 = vmatprep.subr.bf16.mxu0 %v3177_v1  ;;  %v3019_v1 = vcombine.high %v77_v56, %v85_v57  ;;  %v4280_v56 = vld [vmem:[%s4594_s1 + $0x1b8] sm:$0xff] }
  0xdc   :  { %2267 = vmatpush2.bf16.msra.mxu1 %v3094_v63  ;;  %v4180_v63 = vpop.f32.mrf.mxu1 }
  0xdd   :  { %2407 = vmatprep.subr.bf16.mxu1 %v3241_v5  ;;  %v69_v5 = vld [vmem:[%s4594_s1 + $0x170] sm:$0xff] }
  0xde   :  { %2363 = vmatpush2.bf16.msra.mxu0 %v3176_v6  ;;  %v4198_v6 = vld [vmem:[%s4595_s0 + $0x4] ss:$12 sps:$4 sm:$0xff]   ;;  %v4201_v8 = vpop.f32.mrf.mxu1 }
  0xdf   :  { %2269 = vmatmul.mubr.bf16.vlgmr.msra.gmra.mxu1 %v3614_v21  ;;  %2364 = vmatprep.subr.bf16.mxu0 %v3161_v9  ;;  %v196_v21 = vld [vmem:[%s4594_s1 + $0x568] sm:$0xff]  ;;  %v3003_v9 = vcombine.high %v61_v4, %v69_v5 }
  0xe0   :  { %2278 = vmatprep.mubr.bf16.mxu1 %v3625_v25  ;;  %2408 = vmatpush1.bf16.msra.mxu1 %v3240_v12  ;;  %v3129_v19 = vcombine.high %v188_v60, %v196_v21  ;;  %v172_v25 = vld [vmem:[%s4594_s1 + $0x4a8] sm:$0xff]  ;;  %v3128_v22 = vcombine.low %v188_v60, %v196_v21  ;;  %v53_v12 = vld [vmem:[%s4594_s1 + $0xf0] sm:$0xff]  ;;  %v4224_v60 = vpop.permute.xlu0 %317 }
  0xe1   :  { %2409 = vmatprep.subr.bf16.mxu1 %v3225_v13  ;;  %v3113_v23 = vcombine.high %v172_v25, %v180_v20  ;;  %v3112_v29 = vcombine.low %v172_v25, %v180_v20  ;;  %v4216_v13 = vpop.f32.mrf.mxu1  ;;  %v2987_v15 = vcombine.high %v45_v11, %v53_v12  ;;  %v29_v21 = vld [vmem:[%s4594_s1 + $0x30] sm:$0xff] }
  0xe2   :  { %2365 = vmatpush2.bf16.msra.mxu0 %v3160_v14  ;;  %v3002_v14 = vcombine.low %v61_v4, %v69_v5  ;;  %v4295_v4 = vld [vmem:[%s4594_s1 + $0x6f0] sm:$0xff] }
  0xe3   :  { %2366 = vmatprep.subr.bf16.mxu0 %v3145_v0  ;;  %v134_v0 = vld [vmem:[%s4594_s1 + $0x378] sm:$0xff] }
  0xe4   :  { %2410 = vmatpush1.bf16.msra.mxu1 %v3224_v17  ;;  %v37_v17 = vld [vmem:[%s4594_s1 + $0x70] sm:$0xff]  ;;  %v3069_v25 = vcombine.high %v126_v16, %v134_v0  ;;  %v4252_v33 = vpop.permute.xlu0 %322 }
  0xe5   :  { %2448 = vmatprep.subr.bf16.mxu1 %v3083_v28  ;;  %v3084_v28 = vcombine.low %v142_v52, %v150_v54  ;;  %v2971_v20 = vcombine.high %v29_v21, %v37_v17 }
  0xe6   :  { %2367 = vmatpush2.bf16.msra.mxu0 %v3144_v18  ;;  %v4232_v18 = vpop.f32.mrf.mxu1 }
  0xe7   :  { %2279 = vmatmul.mubr.bf16.gmra.mxu1 %v3644_v38  ;;  %2368 = vmatprep.subr.bf16.mxu0 %v3129_v19  ;;  %v133_v38 = vld [vmem:[%s4594_s1 + $0x370] sm:$0xff]  ;;  %v2986_v19 = vcombine.low %v45_v11, %v53_v12 }
  0xe8   :  { %2427 = vmatprep.mubr.bf16.mxu1 %v3343_v3  ;;  %v3067_v32 = vcombine.high %v125_v27, %v133_v38  ;;  %v3066_v39 = vcombine.low %v125_v27, %v133_v38  ;;  %v277_v27 = vld [vmem:[%s4594_s1 + $0x7f0] sm:$0xff] }
  0xea   :  { %2369 = vmatpush2.bf16.msra.mxu0 %v3128_v22  ;;  %v110_v22 = vld [vmem:[%s4594_s1 + $0x2b8] sm:$0xff] }
  0xeb   :  { %2370 = vmatprep.subr.bf16.mxu0 %v3113_v23  ;;  %v118_v23 = vld [vmem:[%s4594_s1 + $0x2f8] sm:$0xff] }
  0xec   :  { %v3053_v34 = vcombine.high %v110_v22, %v118_v23 }
  0xee   :  { %2371 = vmatpush2.bf16.msra.mxu0 %v3112_v29  ;;  %v3068_v29 = vcombine.low %v126_v16, %v134_v0  ;;  %v4303_v16 = vpop.permute.xlu1 %332 }
  0xef   :  { %3256 = vmatmul.mubr.msk.bf16.vlgmr.msra.gmra.mxu1 %vm1805_vm0, %v3963_v53  ;;  %2372 = vmatprep.subr.bf16.mxu0 %v3097_v31 }
  0xf0   :  { %2449 = vmatpush1.bf16.msra.mxu1 %v3082_v30  ;;  %2437 = vmatprep.mubr.bf16.mxu1 %v3343_v3  ;;  %v4249_v30 = vpop.f32.mrf.mxu1 }
  0xf1   :  { %2450 = vmatprep.subr.bf16.mxu1 %v3067_v32  ;;  %v2970_v32 = vcombine.low %v29_v21, %v37_v17 }
  0xf2   :  { %2373 = vmatpush2.bf16.msra.mxu0 %v3096_v37 }
  0xf3   :  { %2513 = vmatprep.subr.bf16.mxu0 %v3243_v40  ;;  %v102_v40 = vld [vmem:[%s4594_s1 + $0x278] sm:$0xff] }
  0xf4   :  { %2451 = vmatpush1.bf16.msra.mxu1 %v3066_v39  ;;  %v3211_v39 = vcombine.high %v269_v26, %v277_v27  ;;  %v3037_v52 = vcombine.high %v4257_v35, %v102_v40 }
  0xf5   :  { %2452 = vmatprep.subr.bf16.mxu1 %v3051_v42  ;;  %2375 = vmatmul.mubr.bf16.vlgmr.msra.gmra.mxu0 %v4165_v55  ;;  %v253_v42 = vld [vmem:[%s4594_s1 + $0x730] sm:$0xff] }
  0xf6   :  { %2514 = vmatpush1.bf16.msra.mxu0 %v3242_v47  ;;  %2384 = vmatprep.mubr.bf16.mxu0 %v4177_v58  ;;  %v3052_v47 = vcombine.low %v110_v22, %v118_v23  ;;  %v3195_v54 = vcombine.high %v253_v42, %v261_v43  ;;  %v221_v22 = vld [vmem:[%s4594_s1 + $0x630] sm:$0xff] }
  0xf7   :  { %2515 = vmatprep.subr.bf16.mxu0 %v3227_v49  ;;  %3257 = vmatmul.mubr.msk.bf16.gmra.mxu1 %vm1805_vm0, %v4185_v2  ;;  %v229_v23 = vld [vmem:[%s4594_s1 + $0x670] sm:$0xff] }
  0xf8   :  { %2453 = vmatpush1.bf16.msra.mxu1 %v3050_v48  ;;  %2480 = vmatprep.mubr.bf16.mxu1 %v4198_v6  ;;  %v4274_v48 = vpop.f32.mrf.mxu1 }
  0xf9   :  { %2454 = vmatprep.subr.bf16.mxu1 %v3035_v51  ;;  %v3210_v51 = vcombine.low %v269_v26, %v277_v27 }
  0xfa   :  { %2516 = vmatpush1.bf16.msra.mxu0 %v3226_v59 }
  0xfb   :  { %2554 = vmatprep.subr.bf16.mxu0 %v3085_v62  ;;  %v86_v62 = vld [vmem:[%s4594_s1 + $0x1f8] sm:$0xff] }
  0xfc   :  { %2455 = vmatpush1.bf16.msra.mxu1 %v3034_v61  ;;  %v3021_v0 = vcombine.high %v4280_v56, %v86_v62  ;;  %v3020_v26 = vcombine.low %v4280_v56, %v86_v62 }
  0xfd   :  { %2456 = vmatprep.subr.bf16.mxu1 %v3019_v1  ;;  %2385 = vmatmul.mubr.bf16.gmra.mxu0 %v4206_v10  ;;  %v4290_v1 = vld [vmem:[%s4594_s1 + $0x6b0] sm:$0xff] }
  0xfe   :  { %2533 = vmatprep.mubr.bf16.mxu0 %v3343_v3  ;;  %v3179_v21 = vcombine.high %v4290_v1, %v4295_v4 }
 0x100   :  { %2457 = vmatpush1.bf16.msra.mxu1 %v3018_v7 }
 0x101   :  { %2458 = vmatprep.subr.bf16.mxu1 %v3003_v9 }
 0x104   :  { %2459 = vmatpush1.bf16.msra.mxu1 %v3002_v14 }
 0x105   :  { %2460 = vmatprep.subr.bf16.mxu1 %v2987_v15  ;;  %3258 = vmatmul.mubr.msk.bf16.vlgmr.msra.gmra.mxu0 %vm1805_vm0, %v3963_v53  ;;  %v1846_v24 = vpop.f32.mrf.mxu0  ;;  %v3194_v15 = vcombine.low %v253_v42, %v261_v43 }
 0x106   :  { %2555 = vmatpush1.bf16.msra.mxu0 %v3084_v28  ;;  %v1847_v38 = vadd.f32 %v1846_v24, %v4224_v60  ;;  %2543 = vmatprep.mubr.bf16.mxu0 %v3343_v3 }
 0x107   :  { %2556 = vmatprep.subr.bf16.mxu0 %v3069_v25  ;;  %v1848_v31 = vpop.f32.mrf.mxu0 }
 0x108   :  { %2461 = vmatpush1.bf16.msra.mxu1 %v2986_v19  ;;  %v1900_v36 = vadd.f32 %v4139_v41, %v1847_v38  ;;  %v1849_v37 = vadd.f32 %v1848_v31, %v4224_v60 }
 0x109   :  { %2462 = vmatprep.subr.bf16.mxu1 %v2971_v20  ;;  %v1850_v44 = vpop.f32.mrf.mxu0  ;;  %v70_v20 = vld [vmem:[%s4594_s1 + $0x178] sm:$0xff] }
 0x10a   :  { %v1902_v41 = vadd.f32 %v4154_v50, %v1849_v37  ;;  %2557 = vmatpush1.bf16.msra.mxu0 %v3068_v29  ;;  %v1851_v46 = vadd.f32 %v1850_v44, %v4252_v33  ;;  %v2660_v57 = vmax.f32 %v1900_v36, 0.0  ;;  %v3163_v37 = vcombine.high %v221_v22, %v229_v23  ;;  %v46_v44 = vld [vmem:[%s4594_s1 + $0xb8] sm:$0xff] }
 0x10b   :  { %2558 = vmatprep.subr.bf16.mxu0 %v3053_v34  ;;  %v1852_v49 = vpop.f32.mrf.mxu0 }
 0x10c   :  { %2463 = vmatpush1.bf16.msra.mxu1 %v2970_v32  ;;  %v2661_v50 = vmax.f32 %v1902_v41, 0.0  ;;  %v1904_v59 = vadd.f32 %v4180_v63, %v1851_v46  ;;  %v1853_v61 = vadd.f32 %v1852_v49, %v4252_v33  ;;  %v3036_v63 = vcombine.low %v4257_v35, %v102_v40  ;;  %v54_v41 = vld [vmem:[%s4594_s1 + $0xf8] sm:$0xff]  ;;  %v205_v49 = vld [vmem:[%s4594_s1 + $0x5b0] sm:$0xff] }
 0x10d   :  { %2464 = vmatprep.subr.bf16.mxu1 %v3211_v39  ;;  %v1856_v5 = vpop.f32.mrf.mxu0  ;;  %3259 = vmatmul.mubr.msk.bf16.gmra.mxu0 %vm1805_vm0, %v4185_v2 }
 0x10e   :  { %v3294_v7 = vpack.c.bf16 %v2661_v50, %v2660_v57  ;;  %v1906_v9 = vadd.f32 %v4201_v8, %v1853_v61  ;;  %2559 = vmatpush1.bf16.msra.mxu0 %v3052_v47  ;;  %v1857_v11 = vadd.f32 %v1856_v5, %v4270_v45  ;;  %2586 = vmatprep.mubr.bf16.mxu0 %v4198_v6  ;;  %v4311_v8 = vld [vmem:[%s4594_s1 + $0x138] sm:$0xff]  ;;  %v2676_v6 = vmax.f32 %v1904_v59, 0.0 }
 0x10f   :  { %v1952_v12 = vpop.f32.mrf.mxu1  ;;  %2560 = vmatprep.subr.bf16.mxu0 %v3037_v52  ;;  %v1858_v14 = vpop.f32.mrf.mxu0  ;;  %v3005_v36 = vcombine.high %v4311_v8, %v70_v20  ;;  %v3004_v47 = vcombine.low %v4311_v8, %v70_v20  ;;  %v3162_v59 = vcombine.low %v221_v22, %v229_v23  ;;  %v2989_v61 = vcombine.high %v46_v44, %v54_v41 }
 0x110   :  { %2465 = vmatpush2.bf16.msra.mxu1 %v3210_v51  ;;  %2916 = vst [vmem:[%s4597_s3] sm:$0xff] %v3294_v7  ;;  %v2677_v17 = vmax.f32 %v1906_v9, 0.0  ;;  %v1910_v28 = vadd.f32 %v4216_v13, %v1857_v11  ;;  %v1859_v19 = vadd.f32 %v1858_v14, %v4270_v45  ;;  %v3178_v13 = vcombine.low %v4290_v1, %v4295_v4  ;;  %v38_v7 = vld [vmem:[%s4594_s1 + $0x78] sm:$0xff] }
 0x111   :  { %2466 = vmatprep.subr.bf16.mxu1 %v3195_v54  ;;  %v1954_v25 = vpop.f32.mrf.mxu1  ;;  %v1860_v24 = vpop.f32.mrf.mxu0  ;;  %v1953_v31 = vadd.f32 %v1952_v12, %v4224_v60  ;;  %v2988_v12 = vcombine.low %v46_v44, %v54_v41 }
 0x112   :  { %v3302_v27 = vpack.c.bf16 %v2677_v17, %v2676_v6  ;;  %v1912_v38 = vadd.f32 %v4232_v18, %v1859_v19  ;;  %2561 = vmatpush1.bf16.msra.mxu0 %v3036_v63  ;;  %v1861_v29 = vadd.f32 %v1860_v24, %v4303_v16  ;;  %v1955_v35 = vadd.f32 %v1954_v25, %v4224_v60  ;;  %v30_v63 = vld [vmem:[%s4594_s1 + $0x38] sm:$0xff] }
 0x113   :  { %v1956_v32 = vpop.f32.mrf.mxu1  ;;  %2562 = vmatprep.subr.bf16.mxu0 %v3021_v0  ;;  %v1862_v34 = vpop.f32.mrf.mxu0  ;;  %v2692_v39 = vmax.f32 %v1910_v28, 0.0  ;;  %v197_v0 = vld [vmem:[%s4594_s1 + $0x570] sm:$0xff]  ;;  %v2973_v20 = vcombine.high %v30_v63, %v38_v7 }
 0x114   :  { %2467 = vmatpush2.bf16.msra.mxu1 %v3194_v15  ;;  %2924 = vst [vmem:[%s4597_s3 + $0x40] sm:$0xff] %v3302_v27  ;;  %v2693_v18 = vmax.f32 %v1912_v38, 0.0  ;;  %v1914_v40 = vadd.f32 %v4249_v30, %v1861_v29  ;;  %v1863_v42 = vadd.f32 %v1862_v34, %v4303_v16  ;;  %v213_v30 = vld [vmem:[%s4594_s1 + $0x5f0] sm:$0xff]  ;;  %v1957_v54 = vadd.f32 %v1956_v32, %v4252_v33  ;;  %v278_v27 = vld [vmem:[%s4594_s1 + $0x7f8] sm:$0xff] }
 0x115   :  { %2468 = vmatprep.subr.bf16.mxu1 %v3179_v21  ;;  %v1958_v43 = vpop.f32.mrf.mxu1  ;;  %v2005_v46 = vpop.f32.mrf.mxu0  ;;  %v3147_v5 = vcombine.high %v205_v49, %v213_v30  ;;  %v189_v15 = vld [vmem:[%s4594_s1 + $0x530] sm:$0xff]  ;;  %v3146_v25 = vcombine.low %v205_v49, %v213_v30  ;;  %v2972_v29 = vcombine.low %v30_v63, %v38_v7  ;;  %v262_v49 = vld [vmem:[%s4594_s1 + $0x778] sm:$0xff] }
 0x116   :  { %v3310_v51 = vpack.c.bf16 %v2693_v18, %v2692_v39  ;;  %v1916_v52 = vadd.f32 %v4274_v48, %v1863_v42  ;;  %2563 = vmatpush1.bf16.msra.mxu0 %v3020_v26  ;;  %v2006_v56 = vadd.f32 %v2005_v46, %v1953_v31  ;;  %v2708_v62 = vmax.f32 %v1914_v40, 0.0  ;;  %v173_v32 = vld [vmem:[%s4594_s1 + $0x4b0] sm:$0xff]  ;;  %v246_v63 = vld [vmem:[%s4594_s1 + $0x6f8] sm:$0xff] }
 0x117   :  { %v1962_v57 = vpop.f32.mrf.mxu1  ;;  %2564 = vmatprep.subr.bf16.mxu0 %v3005_v36  ;;  %v2007_v50 = vpop.f32.mrf.mxu0  ;;  %v1959_v9 = vadd.f32 %v1958_v43, %v4252_v33  ;;  %v3131_v26 = vcombine.high %v189_v15, %v197_v0  ;;  %v181_v34 = vld [vmem:[%s4594_s1 + $0x4f0] sm:$0xff]  ;;  %v3130_v40 = vcombine.low %v189_v15, %v197_v0  ;;  %v302_v7 = vld [vmem:[%s4594_s1 + $0x8b8] sm:$0xff] }
 0x118   :  { %2469 = vmatpush2.bf16.msra.mxu1 %v3178_v13  ;;  %2932 = vst [vmem:[%s4597_s3 + $0x80] sm:$0xff] %v3310_v51  ;;  %v2709_v1 = vmax.f32 %v1916_v52, 0.0  ;;  %v2008_v4 = vadd.f32 %v2007_v50, %v1955_v35  ;;  %v1963_v14 = vadd.f32 %v1962_v57, %v4270_v45  ;;  %v2662_v8 = vmax.f32 %v2006_v56, 0.0  ;;  %v270_v13 = vld [vmem:[%s4594_s1 + $0x7b8] sm:$0xff]  ;;  %v157_v51 = vld [vmem:[%s4594_s1 + $0x430] sm:$0xff] }
 0x119   :  { %2470 = vmatprep.subr.bf16.mxu1 %v3163_v37  ;;  %v1964_v48 = vpop.f32.mrf.mxu1  ;;  %v2009_v11 = vpop.f32.mrf.mxu0  ;;  %v3213_v42 = vcombine.high %v270_v13, %v278_v27  ;;  %v3115_v46 = vcombine.high %v173_v32, %v181_v34  ;;  %v165_v52 = vld [vmem:[%s4594_s1 + $0x470] sm:$0xff]  ;;  %v3212_v50 = vcombine.low %v270_v13, %v278_v27 }
 0x11a   :  { %v3318_v21 = vpack.c.bf16 %v2709_v1, %v2708_v62  ;;  %v2663_v6 = vmax.f32 %v2008_v4, 0.0  ;;  %2565 = vmatpush1.bf16.msra.mxu0 %v3004_v47  ;;  %v2010_v17 = vadd.f32 %v2009_v11, %v1957_v54  ;;  %v1965_v24 = vadd.f32 %v1964_v48, %v4270_v45  ;;  %v254_v47 = vld [vmem:[%s4594_s1 + $0x738] sm:$0xff] }
 0x11b   :  { %v1966_v28 = vpop.f32.mrf.mxu1  ;;  %2566 = vmatprep.subr.bf16.mxu0 %v2989_v61  ;;  %v2011_v19 = vpop.f32.mrf.mxu0  ;;  %v3114_v61 = vcombine.low %v173_v32, %v181_v34  ;;  %v3197_v62 = vcombine.high %v254_v47, %v262_v49  ;;  %v238_v48 = vld [vmem:[%s4594_s1 + $0x6b8] sm:$0xff]  ;;  %v3098_v15 = vcombine.low %v157_v51, %v165_v52 }
 0x11c   :  { %2471 = vmatpush2.bf16.msra.mxu1 %v3162_v59  ;;  %2940 = vst [vmem:[%s4597_s3 + $0xc0] sm:$0xff] %v3318_v21  ;;  %v3295_v22 = vpack.c.bf16 %v2663_v6, %v2662_v8  ;;  %v2012_v23 = vadd.f32 %v2011_v19, %v1959_v9  ;;  %v2678_v35 = vmax.f32 %v2010_v17, 0.0  ;;  %v1967_v39 = vadd.f32 %v1966_v28, %v4303_v16  ;;  %v310_v9 = vld [vmem:[%s4594_s1 + $0x8f8] sm:$0xff] }
 0x11d   :  { %2472 = vmatprep.subr.bf16.mxu1 %v3147_v5  ;;  %v2015_v38 = vpop.f32.mrf.mxu0  ;;  %v1968_v31 = vpop.f32.mrf.mxu1  ;;  %v3099_v5 = vcombine.high %v157_v51, %v165_v52  ;;  %v3181_v0 = vcombine.high %v238_v48, %v246_v63  ;;  %v222_v8 = vld [vmem:[%s4594_s1 + $0x638] sm:$0xff]  ;;  %v3245_v17 = vcombine.high %v302_v7, %v310_v9  ;;  %v3180_v28 = vcombine.low %v238_v48, %v246_v63 }
 0x11e   :  { %2917 = vst [vmem:[%s4597_s3 + $0x8] sm:$0xff] %v3295_v22  ;;  %v2679_v36 = vmax.f32 %v2012_v23, 0.0  ;;  %2567 = vmatpush1.bf16.msra.mxu0 %v2988_v12  ;;  %v2016_v37 = vadd.f32 %v2015_v38, %v1963_v14  ;;  %v1969_v41 = vadd.f32 %v1968_v31, %v4303_v16  ;;  %v3196_v14 = vcombine.low %v254_v47, %v262_v49  ;;  %v230_v6 = vld [vmem:[%s4594_s1 + $0x678] sm:$0xff] }
 0x11f   :  { %2568 = vmatprep.subr.bf16.mxu0 %v2973_v20  ;;  %v2017_v18 = vpop.f32.mrf.mxu0  ;;  %v286_v19 = vld [vmem:[%s4594_s1 + $0x838] sm:$0xff]  ;;  %v3165_v20 = vcombine.high %v222_v8, %v230_v6  ;;  %v3164_v13 = vcombine.low %v222_v8, %v230_v6 }
 0x120   :  { %2473 = vmatpush2.bf16.msra.mxu1 %v3146_v25  ;;  %v3303_v43 = vpack.c.bf16 %v2679_v36, %v2678_v35  ;;  %v2018_v44 = vadd.f32 %v2017_v18, %v1965_v24  ;;  %v2694_v54 = vmax.f32 %v2016_v37, 0.0  ;;  %v294_v25 = vld [vmem:[%s4594_s1 + $0x878] sm:$0xff]  ;;  %v3244_v24 = vcombine.low %v302_v7, %v310_v9 }
 0x121   :  { %2474 = vmatprep.subr.bf16.mxu1 %v3131_v26  ;;  %v2019_v30 = vpop.f32.mrf.mxu0  ;;  %v206_v22 = vld [vmem:[%s4594_s1 + $0x5b8] sm:$0xff]  ;;  %v3229_v26 = vcombine.high %v286_v19, %v294_v25  ;;  %v3228_v31 = vcombine.low %v286_v19, %v294_v25 }
 0x122   :  { %2925 = vst [vmem:[%s4597_s3 + $0x48] sm:$0xff] %v3303_v43  ;;  %v2695_v56 = vmax.f32 %v2018_v44, 0.0  ;;  %2569 = vmatpush1.bf16.msra.mxu0 %v2972_v29  ;;  %v2020_v57 = vadd.f32 %v2019_v30, %v1967_v39  ;;  %v214_v23 = vld [vmem:[%s4594_s1 + $0x5f8] sm:$0xff] }
 0x123   :  { %2570 = vmatprep.subr.bf16.mxu0 %v3213_v42  ;;  %v2021_v59 = vpop.f32.mrf.mxu0  ;;  %v3149_v27 = vcombine.high %v206_v22, %v214_v23  ;;  %v190_v38 = vld [vmem:[%s4594_s1 + $0x538] sm:$0xff]  ;;  %v3148_v32 = vcombine.low %v206_v22, %v214_v23 }
 0x124   :  { %2475 = vmatpush2.bf16.msra.mxu1 %v3130_v40  ;;  %v3311_v1 = vpack.c.bf16 %v2695_v56, %v2694_v54  ;;  %v2022_v4 = vadd.f32 %v2021_v59, %v1969_v41  ;;  %v2710_v11 = vmax.f32 %v2020_v57, 0.0  ;;  %v198_v29 = vld [vmem:[%s4594_s1 + $0x578] sm:$0xff] }
 0x125   :  { %2476 = vmatprep.subr.bf16.mxu1 %v3115_v46  ;;  %v3133_v34 = vcombine.high %v190_v38, %v198_v29  ;;  %v174_v35 = vld [vmem:[%s4594_s1 + $0x4b8] sm:$0xff]  ;;  %v3132_v37 = vcombine.low %v190_v38, %v198_v29  ;;  %v2111_v41 = vpop.f32.mrf.mxu0 }
 0x126   :  { %2933 = vst [vmem:[%s4597_s3 + $0x88] sm:$0xff] %v3311_v1  ;;  %v2711_v12 = vmax.f32 %v2022_v4, 0.0  ;;  %2571 = vmatpush2.bf16.msra.mxu0 %v3212_v50  ;;  %v182_v36 = vld [vmem:[%s4594_s1 + $0x4f8] sm:$0xff] }
 0x127   :  { %2572 = vmatprep.subr.bf16.mxu0 %v3197_v62  ;;  %v3117_v39 = vcombine.high %v174_v35, %v182_v36  ;;  %v158_v18 = vld [vmem:[%s4594_s1 + $0x438] sm:$0xff]  ;;  %v3116_v42 = vcombine.low %v174_v35, %v182_v36  ;;  %v2113_v46 = vpop.f32.mrf.mxu0 }
 0x128   :  { %2477 = vmatpush2.bf16.msra.mxu1 %v3114_v61  ;;  %v3319_v21 = vpack.c.bf16 %v2711_v12, %v2710_v11  ;;  %v166_v40 = vld [vmem:[%s4594_s1 + $0x478] sm:$0xff] }
 0x129   :  { %2478 = vmatprep.subr.bf16.mxu1 %v3099_v5  ;;  %v3101_v43 = vcombine.high %v158_v18, %v166_v40  ;;  %v3100_v44 = vcombine.low %v158_v18, %v166_v40  ;;  %v2115_v47 = vpop.f32.mrf.mxu0 }
 0x12a   :  { %2941 = vst [vmem:[%s4597_s3 + $0xc8] sm:$0xff] %v3319_v21  ;;  %2573 = vmatpush2.bf16.msra.mxu0 %v3196_v14 }
 0x12b   :  { %2574 = vmatprep.subr.bf16.mxu0 %v3181_v0  ;;  %v2117_v49 = vpop.f32.mrf.mxu0 }
 0x12c   :  { %2479 = vmatpush2.bf16.msra.mxu1 %v3098_v15 }
 0x12d   :  { %2619 = vmatprep.subr.bf16.mxu1 %v3245_v17  ;;  %v2121_v52 = vpop.f32.mrf.mxu0 }
 0x12e   :  { %2575 = vmatpush2.bf16.msra.mxu0 %v3180_v28 }
 0x12f   :  { %2481 = vmatmul.mubr.bf16.vlgmr.msra.gmra.mxu1 %v4165_v55  ;;  %2576 = vmatprep.subr.bf16.mxu0 %v3165_v20 }
 0x130   :  { %2490 = vmatprep.mubr.bf16.mxu1 %v4177_v58  ;;  %2620 = vmatpush1.bf16.msra.mxu1 %v3244_v24 }
 0x131   :  { %2621 = vmatprep.subr.bf16.mxu1 %v3229_v26 }
 0x132   :  { %2577 = vmatpush2.bf16.msra.mxu0 %v3164_v13 }
 0x133   :  { %2578 = vmatprep.subr.bf16.mxu0 %v3149_v27 }
 0x134   :  { %2622 = vmatpush1.bf16.msra.mxu1 %v3228_v31 }
 0x136   :  { %2579 = vmatpush2.bf16.msra.mxu0 %v3148_v32 }
 0x137   :  { %2491 = vmatmul.mubr.bf16.gmra.mxu1 %v4206_v10  ;;  %2580 = vmatprep.subr.bf16.mxu0 %v3133_v34 }
 0x138   :  { %2639 = vmatprep.mubr.bf16.mxu1 %v3343_v3 }
 0x13a   :  { %2581 = vmatpush2.bf16.msra.mxu0 %v3132_v37 }
 0x13b   :  { %2582 = vmatprep.subr.bf16.mxu0 %v3117_v39 }
 0x13e   :  { %2583 = vmatpush2.bf16.msra.mxu0 %v3116_v42 }
 0x13f   :  { %3260 = vmatmul.mubr.msk.bf16.vlgmr.msra.gmra.mxu1 %vm1805_vm0, %v3963_v53  ;;  %2584 = vmatprep.subr.bf16.mxu0 %v3101_v43 }
 0x140   :  { %2649 = vmatprep.mubr.bf16.mxu1 %v3343_v3 }
 0x142   :  { %2585 = vmatpush2.bf16.msra.mxu0 %v3100_v44 }
 0x145   :  { %2587 = vmatmul.mubr.bf16.vlgmr.msra.gmra.mxu0 %v4165_v55 }
 0x146   :  { %2596 = vmatprep.mubr.bf16.mxu0 %v4177_v58 }
 0x147   :  { %3261 = vmatmul.mubr.msk.bf16.gmra.mxu1 %vm1805_vm0, %v4185_v2  ;;  %v2123_v2 = vpop.f32.mrf.mxu0 }
 0x149   :  { %v2125_v63 = vpop.f32.mrf.mxu0 }
 0x14b   :  { %v2127_v17 = vpop.f32.mrf.mxu0 }
 0x14d   :  { %2597 = vmatmul.mubr.bf16.gmra.mxu0 %v4206_v10 }
 0x14f   :  { %v2058_v30 = vpop.f32.mrf.mxu1 }
 0x150   :  { %v2059_v53 = vadd.f32 %v2058_v30, %v4224_v60 }
 0x151   :  { %v2060_v51 = vpop.f32.mrf.mxu1 }
 0x152   :  { %v2112_v3 = vadd.f32 %v2111_v41, %v2059_v53  ;;  %v2061_v54 = vadd.f32 %v2060_v51, %v4224_v60 }
 0x153   :  { %v2062_v56 = vpop.f32.mrf.mxu1 }
 0x154   :  { %v2114_v55 = vadd.f32 %v2113_v46, %v2061_v54  ;;  %v2063_v57 = vadd.f32 %v2062_v56, %v4252_v33  ;;  %v2664_v59 = vmax.f32 %v2112_v3, 0.0 }
 0x155   :  { %v2064_v50 = vpop.f32.mrf.mxu1 }
 0x156   :  { %v2665_v58 = vmax.f32 %v2114_v55, 0.0  ;;  %v2116_v61 = vadd.f32 %v2115_v47, %v2063_v57  ;;  %v2065_v10 = vadd.f32 %v2064_v50, %v4252_v33 }
 0x157   :  { %v2068_v62 = vpop.f32.mrf.mxu1 }
 0x158   :  { %v3296_v1 = vpack.c.bf16 %v2665_v58, %v2664_v59  ;;  %v2118_v4 = vadd.f32 %v2117_v49, %v2065_v10  ;;  %v2069_v5 = vadd.f32 %v2068_v62, %v4270_v45  ;;  %v2680_v7 = vmax.f32 %v2116_v61, 0.0 }
 0x159   :  { %v2070_v48 = vpop.f32.mrf.mxu1 }
 0x15a   :  { %2918 = vst [vmem:[%s4597_s3 + $0x10] sm:$0xff] %v3296_v1  ;;  %v2681_v9 = vmax.f32 %v2118_v4, 0.0  ;;  %v2122_v11 = vadd.f32 %v2121_v52, %v2069_v5  ;;  %v2071_v12 = vadd.f32 %v2070_v48, %v4270_v45 }
 0x15b   :  { %v2072_v14 = vpop.f32.mrf.mxu1 }
 0x15c   :  { %v3304_v15 = vpack.c.bf16 %v2681_v9, %v2680_v7  ;;  %v2696_v0 = vmax.f32 %v2122_v11, 0.0  ;;  %v2124_v21 = vadd.f32 %v2123_v2, %v2071_v12  ;;  %v2073_v8 = vadd.f32 %v2072_v14, %v4303_v16 }
 0x15d   :  { %v2074_v6 = vpop.f32.mrf.mxu1 }
 0x15e   :  { %2926 = vst [vmem:[%s4597_s3 + $0x50] sm:$0xff] %v3304_v15  ;;  %v2697_v28 = vmax.f32 %v2124_v21, 0.0  ;;  %v2126_v19 = vadd.f32 %v2125_v63, %v2073_v8  ;;  %v2075_v25 = vadd.f32 %v2074_v6, %v4303_v16 }
 0x15f   :  { %v2217_v20 = vpop.f32.mrf.mxu1 }
 0x160   :  { %v3312_v22 = vpack.c.bf16 %v2697_v28, %v2696_v0  ;;  %v2712_v23 = vmax.f32 %v2126_v19, 0.0  ;;  %v2128_v24 = vadd.f32 %v2127_v17, %v2075_v25 }
 0x161   :  { %v2219_v26 = vpop.f32.mrf.mxu1 }
 0x162   :  { %2934 = vst [vmem:[%s4597_s3 + $0x90] sm:$0xff] %v3312_v22  ;;  %v2713_v13 = vmax.f32 %v2128_v24, 0.0 }
 0x163   :  { %v2221_v27 = vpop.f32.mrf.mxu1 }
 0x164   :  { %v3320_v38 = vpack.c.bf16 %v2713_v13, %v2712_v23 }
 0x165   :  { %v2164_v29 = vpop.f32.mrf.mxu0  ;;  %v2223_v32 = vpop.f32.mrf.mxu1 }
 0x166   :  { %2942 = vst [vmem:[%s4597_s3 + $0xd0] sm:$0xff] %v3320_v38  ;;  %v2165_v31 = vadd.f32 %v2164_v29, %v4224_v60 }
 0x167   :  { %v2166_v34 = vpop.f32.mrf.mxu0  ;;  %v2227_v37 = vpop.f32.mrf.mxu1 }
 0x168   :  { %v2218_v35 = vadd.f32 %v2217_v20, %v2165_v31  ;;  %v2167_v36 = vadd.f32 %v2166_v34, %v4224_v60 }
 0x169   :  { %v2168_v39 = vpop.f32.mrf.mxu0  ;;  %v2229_v43 = vpop.f32.mrf.mxu1 }
 0x16a   :  { %v2220_v18 = vadd.f32 %v2219_v26, %v2167_v36  ;;  %v2169_v40 = vadd.f32 %v2168_v39, %v4252_v33  ;;  %v2666_v44 = vmax.f32 %v2218_v35, 0.0 }
 0x16b   :  { %v2170_v42 = vpop.f32.mrf.mxu0  ;;  %v2231_v3 = vpop.f32.mrf.mxu1 }
 0x16c   :  { %v2667_v41 = vmax.f32 %v2220_v18, 0.0  ;;  %v2222_v46 = vadd.f32 %v2221_v27, %v2169_v40  ;;  %v2171_v47 = vadd.f32 %v2170_v42, %v4252_v33 }
 0x16d   :  { %v2174_v49 = vpop.f32.mrf.mxu0  ;;  %v2233_v10 = vpop.f32.mrf.mxu1 }
 0x16e   :  { %v3297_v30 = vpack.c.bf16 %v2667_v41, %v2666_v44  ;;  %v2224_v53 = vadd.f32 %v2223_v32, %v2171_v47  ;;  %v2175_v51 = vadd.f32 %v2174_v49, %v4270_v45  ;;  %v2682_v54 = vmax.f32 %v2222_v46, 0.0 }
 0x16f   :  { %v2176_v52 = vpop.f32.mrf.mxu0 }
 0x170   :  { %2919 = vst [vmem:[%s4597_s3 + $0x18] sm:$0xff] %v3297_v30  ;;  %v2683_v56 = vmax.f32 %v2224_v53, 0.0  ;;  %v2177_v55 = vadd.f32 %v2176_v52, %v4270_v45  ;;  %v2228_v57 = vadd.f32 %v2227_v37, %v2175_v51 }
 0x171   :  { %v2178_v50 = vpop.f32.mrf.mxu0 }
 0x172   :  { %v3305_v2 = vpack.c.bf16 %v2683_v56, %v2682_v54  ;;  %v2179_v59 = vadd.f32 %v2178_v50, %v4303_v16  ;;  %v2230_v58 = vadd.f32 %v2229_v43, %v2177_v55  ;;  %v2698_v62 = vmax.f32 %v2228_v57, 0.0 }
 0x173   :  { %v2180_v61 = vpop.f32.mrf.mxu0 }
 0x174   :  { %2927 = vst [vmem:[%s4597_s3 + $0x58] sm:$0xff] %v3305_v2  ;;  %v2699_v1 = vmax.f32 %v2230_v58, 0.0  ;;  %v2181_v4 = vadd.f32 %v2180_v61, %v4303_v16  ;;  %v2232_v5 = vadd.f32 %v2231_v3, %v2179_v59 }
 0x175   :  { %v2323_v12 = vpop.f32.mrf.mxu0 }
 0x176   :  { %v3313_v48 = vpack.c.bf16 %v2699_v1, %v2698_v62  ;;  %v2234_v63 = vadd.f32 %v2233_v10, %v2181_v4  ;;  %v2714_v7 = vmax.f32 %v2232_v5, 0.0 }
 0x177   :  { %v2325_v14 = vpop.f32.mrf.mxu0 }
 0x178   :  { %2935 = vst [vmem:[%s4597_s3 + $0x98] sm:$0xff] %v3313_v48  ;;  %v2715_v9 = vmax.f32 %v2234_v63, 0.0 }
 0x179   :  { %v2327_v15 = vpop.f32.mrf.mxu0 }
 0x17a   :  { %v3321_v11 = vpack.c.bf16 %v2715_v9, %v2714_v7 }
 0x17b   :  { %v2329_v0 = vpop.f32.mrf.mxu0 }
 0x17c   :  { %2943 = vst [vmem:[%s4597_s3 + $0xd8] sm:$0xff] %v3321_v11 }
 0x17d   :  { %v2333_v17 = vpop.f32.mrf.mxu0 }
 0x17f   :  { %v2335_v24 = vpop.f32.mrf.mxu0 }
 0x181   :  { %v2337_v36 = vpop.f32.mrf.mxu0 }
 0x183   :  { %v2339_v49 = vpop.f32.mrf.mxu0 }
 0x19f   :  { %v2270_v21 = vpop.f32.mrf.mxu1 }
 0x1a0   :  { %v2271_v8 = vadd.f32 %v2270_v21, %v4224_v60 }
 0x1a1   :  { %v2272_v6 = vpop.f32.mrf.mxu1 }
 0x1a2   :  { %v2324_v28 = vadd.f32 %v2323_v12, %v2271_v8  ;;  %v2273_v19 = vadd.f32 %v2272_v6, %v4224_v60 }
 0x1a3   :  { %v2274_v25 = vpop.f32.mrf.mxu1 }
 0x1a4   :  { %v2326_v20 = vadd.f32 %v2325_v14, %v2273_v19  ;;  %v2275_v22 = vadd.f32 %v2274_v25, %v4252_v33  ;;  %v2668_v26 = vmax.f32 %v2324_v28, 0.0 }
 0x1a5   :  { %v2276_v23 = vpop.f32.mrf.mxu1 }
 0x1a6   :  { %v2669_v13 = vmax.f32 %v2326_v20, 0.0  ;;  %v2328_v27 = vadd.f32 %v2327_v15, %v2275_v22  ;;  %v2277_v38 = vadd.f32 %v2276_v23, %v4252_v33 }
 0x1a7   :  { %v2280_v29 = vpop.f32.mrf.mxu1 }
 0x1a8   :  { %v3298_v31 = vpack.c.bf16 %v2669_v13, %v2668_v26  ;;  %v2330_v32 = vadd.f32 %v2329_v0, %v2277_v38  ;;  %v2281_v34 = vadd.f32 %v2280_v29, %v4270_v45  ;;  %v2684_v37 = vmax.f32 %v2328_v27, 0.0 }
 0x1a9   :  { %v2282_v35 = vpop.f32.mrf.mxu1 }
 0x1aa   :  { %2920 = vst [vmem:[%s4597_s3 + $0x20] sm:$0xff] %v3298_v31  ;;  %v2685_v39 = vmax.f32 %v2330_v32, 0.0  ;;  %v2283_v18 = vadd.f32 %v2282_v35, %v4270_v45  ;;  %v2334_v40 = vadd.f32 %v2333_v17, %v2281_v34 }
 0x1ab   :  { %v2284_v42 = vpop.f32.mrf.mxu1 }
 0x1ac   :  { %v3306_v43 = vpack.c.bf16 %v2685_v39, %v2684_v37  ;;  %v2700_v44 = vmax.f32 %v2334_v40, 0.0  ;;  %v2285_v41 = vadd.f32 %v2284_v42, %v4303_v16  ;;  %v2336_v46 = vadd.f32 %v2335_v24, %v2283_v18 }
 0x1ad   :  { %v2286_v47 = vpop.f32.mrf.mxu1 }
 0x1ae   :  { %2928 = vst [vmem:[%s4597_s3 + $0x60] sm:$0xff] %v3306_v43  ;;  %v2701_v30 = vmax.f32 %v2336_v46, 0.0  ;;  %v2287_v53 = vadd.f32 %v2286_v47, %v4303_v16  ;;  %v2338_v51 = vadd.f32 %v2337_v36, %v2285_v41 }
 0x1af   :  { %v2429_v52 = vpop.f32.mrf.mxu1 }
 0x1b0   :  { %v3314_v3 = vpack.c.bf16 %v2701_v30, %v2700_v44  ;;  %v2716_v54 = vmax.f32 %v2338_v51, 0.0  ;;  %v2340_v56 = vadd.f32 %v2339_v49, %v2287_v53 }
 0x1b1   :  { %v2431_v55 = vpop.f32.mrf.mxu1 }
 0x1b2   :  { %2936 = vst [vmem:[%s4597_s3 + $0xa0] sm:$0xff] %v3314_v3  ;;  %v2717_v57 = vmax.f32 %v2340_v56, 0.0 }
 0x1b3   :  { %v2433_v50 = vpop.f32.mrf.mxu1 }
 0x1b4   :  { %v3322_v2 = vpack.c.bf16 %v2717_v57, %v2716_v54 }
 0x1b5   :  { %v2376_v59 = vpop.f32.mrf.mxu0  ;;  %v2435_v61 = vpop.f32.mrf.mxu1 }
 0x1b6   :  { %2944 = vst [vmem:[%s4597_s3 + $0xe0] sm:$0xff] %v3322_v2  ;;  %v2377_v58 = vadd.f32 %v2376_v59, %v4224_v60 }
 0x1b7   :  { %v2378_v10 = vpop.f32.mrf.mxu0  ;;  %v2439_v4 = vpop.f32.mrf.mxu1 }
 0x1b8   :  { %v2430_v62 = vadd.f32 %v2429_v52, %v2377_v58  ;;  %v2379_v1 = vadd.f32 %v2378_v10, %v4224_v60 }
 0x1b9   :  { %v2380_v5 = vpop.f32.mrf.mxu0  ;;  %v2441_v9 = vpop.f32.mrf.mxu1 }
 0x1ba   :  { %v2432_v48 = vadd.f32 %v2431_v55, %v2379_v1  ;;  %v2381_v63 = vadd.f32 %v2380_v5, %v4252_v33  ;;  %v2670_v11 = vmax.f32 %v2430_v62, 0.0 }
 0x1bb   :  { %v2382_v7 = vpop.f32.mrf.mxu0  ;;  %v2443_v28 = vpop.f32.mrf.mxu1 }
 0x1bc   :  { %v2671_v12 = vmax.f32 %v2432_v48, 0.0  ;;  %v2434_v14 = vadd.f32 %v2433_v50, %v2381_v63  ;;  %v2383_v15 = vadd.f32 %v2382_v7, %v4252_v33 }
 0x1bd   :  { %v2386_v0 = vpop.f32.mrf.mxu0  ;;  %v2445_v38 = vpop.f32.mrf.mxu1 }
 0x1be   :  { %v3299_v21 = vpack.c.bf16 %v2671_v12, %v2670_v11  ;;  %v2436_v8 = vadd.f32 %v2435_v61, %v2383_v15  ;;  %v2387_v6 = vadd.f32 %v2386_v0, %v4270_v45  ;;  %v2686_v19 = vmax.f32 %v2434_v14, 0.0 }
 0x1bf   :  { %v2388_v17 = vpop.f32.mrf.mxu0 }
 0x1c0   :  { %2921 = vst [vmem:[%s4597_s3 + $0x28] sm:$0xff] %v3299_v21  ;;  %v2687_v25 = vmax.f32 %v2436_v8, 0.0  ;;  %v2389_v20 = vadd.f32 %v2388_v17, %v4270_v45  ;;  %v2440_v22 = vadd.f32 %v2439_v4, %v2387_v6 }
 0x1c1   :  { %v2390_v23 = vpop.f32.mrf.mxu0 }
 0x1c2   :  { %v3307_v24 = vpack.c.bf16 %v2687_v25, %v2686_v19  ;;  %v2391_v26 = vadd.f32 %v2390_v23, %v4303_v16  ;;  %v2442_v13 = vadd.f32 %v2441_v9, %v2389_v20  ;;  %v2702_v29 = vmax.f32 %v2440_v22, 0.0 }
 0x1c3   :  { %v2392_v27 = vpop.f32.mrf.mxu0 }
 0x1c4   :  { %2929 = vst [vmem:[%s4597_s3 + $0x68] sm:$0xff] %v3307_v24  ;;  %v2703_v31 = vmax.f32 %v2442_v13, 0.0  ;;  %v2393_v32 = vadd.f32 %v2392_v27, %v4303_v16  ;;  %v2444_v34 = vadd.f32 %v2443_v28, %v2391_v26 }
 0x1c5   :  { %v2535_v40 = vpop.f32.mrf.mxu0 }
 0x1c6   :  { %v3315_v35 = vpack.c.bf16 %v2703_v31, %v2702_v29  ;;  %v2446_v36 = vadd.f32 %v2445_v38, %v2393_v32  ;;  %v2718_v37 = vmax.f32 %v2444_v34, 0.0 }
 0x1c7   :  { %v2537_v42 = vpop.f32.mrf.mxu0 }
 0x1c8   :  { %2937 = vst [vmem:[%s4597_s3 + $0xa8] sm:$0xff] %v3315_v35  ;;  %v2719_v39 = vmax.f32 %v2446_v36, 0.0 }
 0x1c9   :  { %v2539_v43 = vpop.f32.mrf.mxu0 }
 0x1ca   :  { %v3323_v18 = vpack.c.bf16 %v2719_v39, %v2718_v37 }
 0x1cb   :  { %v2541_v44 = vpop.f32.mrf.mxu0 }
 0x1cc   :  { %2945 = vst [vmem:[%s4597_s3 + $0xe8] sm:$0xff] %v3323_v18 }
 0x1cd   :  { %v2545_v49 = vpop.f32.mrf.mxu0 }
 0x1cf   :  { %v2547_v56 = vpop.f32.mrf.mxu0 }
 0x1d1   :  { %v2549_v1 = vpop.f32.mrf.mxu0 }
 0x1d3   :  { %v2551_v0 = vpop.f32.mrf.mxu0 }
 0x1ef   :  { %v2482_v41 = vpop.f32.mrf.mxu1 }
 0x1f0   :  { %v2483_v46 = vadd.f32 %v2482_v41, %v4224_v60 }
 0x1f1   :  { %v2484_v47 = vpop.f32.mrf.mxu1 }
 0x1f2   :  { %v2536_v30 = vadd.f32 %v2535_v40, %v2483_v46  ;;  %v2485_v53 = vadd.f32 %v2484_v47, %v4224_v60 }
 0x1f3   :  { %v2486_v51 = vpop.f32.mrf.mxu1 }
 0x1f4   :  { %v2538_v52 = vadd.f32 %v2537_v42, %v2485_v53  ;;  %v2487_v3 = vadd.f32 %v2486_v51, %v4252_v33  ;;  %v2672_v55 = vmax.f32 %v2536_v30, 0.0 }
 0x1f5   :  { %v2488_v54 = vpop.f32.mrf.mxu1 }
 0x1f6   :  { %v2673_v57 = vmax.f32 %v2538_v52, 0.0  ;;  %v2540_v50 = vadd.f32 %v2539_v43, %v2487_v3  ;;  %v2489_v2 = vadd.f32 %v2488_v54, %v4252_v33 }
 0x1f7   :  { %v2492_v59 = vpop.f32.mrf.mxu1 }
 0x1f8   :  { %v3300_v58 = vpack.c.bf16 %v2673_v57, %v2672_v55  ;;  %v2542_v61 = vadd.f32 %v2541_v44, %v2489_v2  ;;  %v2493_v10 = vadd.f32 %v2492_v59, %v4270_v45  ;;  %v2688_v4 = vmax.f32 %v2540_v50, 0.0 }
 0x1f9   :  { %v2494_v62 = vpop.f32.mrf.mxu1 }
 0x1fa   :  { %2922 = vst [vmem:[%s4597_s3 + $0x30] sm:$0xff] %v3300_v58  ;;  %v2689_v5 = vmax.f32 %v2542_v61, 0.0  ;;  %v2495_v48 = vadd.f32 %v2494_v62, %v4270_v45  ;;  %v2546_v63 = vadd.f32 %v2545_v49, %v2493_v10 }
 0x1fb   :  { %v2496_v7 = vpop.f32.mrf.mxu1 }
 0x1fc   :  { %v3308_v9 = vpack.c.bf16 %v2689_v5, %v2688_v4  ;;  %v2704_v11 = vmax.f32 %v2546_v63, 0.0  ;;  %v2497_v12 = vadd.f32 %v2496_v7, %v4303_v16  ;;  %v2548_v14 = vadd.f32 %v2547_v56, %v2495_v48 }
 0x1fd   :  { %v2498_v15 = vpop.f32.mrf.mxu1 }
 0x1fe   :  { %2930 = vst [vmem:[%s4597_s3 + $0x70] sm:$0xff] %v3308_v9  ;;  %v2705_v21 = vmax.f32 %v2548_v14, 0.0  ;;  %v2499_v8 = vadd.f32 %v2498_v15, %v4303_v16  ;;  %v2550_v6 = vadd.f32 %v2549_v1, %v2497_v12 }
 0x1ff   :  { %v2641_v17 = vpop.f32.mrf.mxu1 }
 0x200   :  { %v3316_v28 = vpack.c.bf16 %v2705_v21, %v2704_v11  ;;  %v2720_v19 = vmax.f32 %v2550_v6, 0.0  ;;  %v2552_v25 = vadd.f32 %v2551_v0, %v2499_v8 }
 0x201   :  { %v2643_v20 = vpop.f32.mrf.mxu1 }
 0x202   :  { %2938 = vst [vmem:[%s4597_s3 + $0xb0] sm:$0xff] %v3316_v28  ;;  %v2721_v22 = vmax.f32 %v2552_v25, 0.0 }
 0x203   :  { %v2645_v23 = vpop.f32.mrf.mxu1 }
 0x204   :  { %v3324_v24 = vpack.c.bf16 %v2721_v22, %v2720_v19 }
 0x205   :  { %v2588_v26 = vpop.f32.mrf.mxu0  ;;  %v2647_v13 = vpop.f32.mrf.mxu1 }
 0x206   :  { %2946 = vst [vmem:[%s4597_s3 + $0xf0] sm:$0xff] %v3324_v24  ;;  %v2589_v27 = vadd.f32 %v2588_v26, %v4224_v60 }
 0x207   :  { %v2590_v38 = vpop.f32.mrf.mxu0  ;;  %v2651_v34 = vpop.f32.mrf.mxu1 }
 0x208   :  { %v2642_v29 = vadd.f32 %v2641_v17, %v2589_v27  ;;  %v2591_v31 = vadd.f32 %v2590_v38, %v4224_v60 }
 0x209   :  { %v2592_v32 = vpop.f32.mrf.mxu0  ;;  %v2653_v43 = vpop.f32.mrf.mxu1 }
 0x20a   :  { %v2644_v35 = vadd.f32 %v2643_v20, %v2591_v31  ;;  %v2593_v36 = vadd.f32 %v2592_v32, %v4252_v33  ;;  %v2674_v39 = vmax.f32 %v2642_v29, 0.0 }
 0x20b   :  { %v2594_v37 = vpop.f32.mrf.mxu0  ;;  %v2655_v52 = vpop.f32.mrf.mxu1 }
 0x20c   :  { %v2675_v18 = vmax.f32 %v2644_v35, 0.0  ;;  %v2646_v40 = vadd.f32 %v2645_v23, %v2593_v36  ;;  %v2595_v42 = vadd.f32 %v2594_v37, %v4252_v33 }
 0x20d   :  { %v2598_v44 = vpop.f32.mrf.mxu0  ;;  %v2657_v58 = vpop.f32.mrf.mxu1 }
 0x20e   :  { %v3301_v41 = vpack.c.bf16 %v2675_v18, %v2674_v39  ;;  %v2648_v46 = vadd.f32 %v2647_v13, %v2595_v42  ;;  %v2599_v47 = vadd.f32 %v2598_v44, %v4270_v45  ;;  %v2690_v60 = vmax.f32 %v2646_v40, 0.0 }
 0x20f   :  { %v2600_v49 = vpop.f32.mrf.mxu0 }
 0x210   :  { %2923 = vst [vmem:[%s4597_s3 + $0x38] sm:$0xff] %v3301_v41  ;;  %v2691_v30 = vmax.f32 %v2648_v46, 0.0  ;;  %v2652_v53 = vadd.f32 %v2651_v34, %v2599_v47  ;;  %v2601_v51 = vadd.f32 %v2600_v49, %v4270_v45 }
 0x211   :  { %v2602_v3 = vpop.f32.mrf.mxu0 }
 0x212   :  { %v3309_v54 = vpack.c.bf16 %v2691_v30, %v2690_v60  ;;  %v2654_v33 = vadd.f32 %v2653_v43, %v2601_v51  ;;  %v2603_v56 = vadd.f32 %v2602_v3, %v4303_v16  ;;  %v2706_v57 = vmax.f32 %v2652_v53, 0.0 }
 0x213   :  { %v2604_v55 = vpop.f32.mrf.mxu0 }
 0x214   :  { %2931 = vst [vmem:[%s4597_s3 + $0x78] sm:$0xff] %v3309_v54  ;;  %v2707_v50 = vmax.f32 %v2654_v33, 0.0  ;;  %v2656_v2 = vadd.f32 %v2655_v52, %v2603_v56  ;;  %v2605_v59 = vadd.f32 %v2604_v55, %v4303_v16 }
 0x216   :  { %v3317_v61 = vpack.c.bf16 %v2707_v50, %v2706_v57  ;;  %v2658_v10 = vadd.f32 %v2657_v58, %v2605_v59  ;;  %v2722_v45 = vmax.f32 %v2656_v2, 0.0 }
 0x218   :  { %2939 = vst [vmem:[%s4597_s3 + $0xb8] sm:$0xff] %v3317_v61  ;;  %v2723_v62 = vmax.f32 %v2658_v10, 0.0 }
 0x21a   :  { %v3325_v1 = vpack.c.bf16 %v2723_v62, %v2722_v45 }
 0x21c   :  { %2947 = vst [vmem:[%s4597_s3 + $0xf8] sm:$0xff] %v3325_v1 }

// kernel: encoder_conv_forward.8
= control target key start
LH: loop header
LB: loop body
LE: loop exit
PB: predicated region body
PF: predicated region fallthrough
CT: control target
= control target key end

     0   :  { %v1021_v1 = vmov 0   ;;  %vm509_vm0 = vcmask 261120   ;;  %s1330_s1 = inlined_call_operand.vmem [shape: bf16[288,512], index: 1, kind: input, shape index: {}]   ;;  %s1331_s0 = inlined_call_operand.vmem [shape: bf16[32,288], index: 0, kind: input, shape index: {}]   ;;  %s1332_s2 = inlined_call_operand.vmem [shape: f32[32,1], index: 2, kind: input, shape index: {}]   ;;  %s1333_s3 = inlined_call_operand.vmem [shape: bf16[32,512], index: 3, kind: output, shape index: {}]  }
   0x1   :  { %v905_v0 = vld [vmem:[%s1330_s1 + $0xe4] ss:$16 sps:$4 sm:$0xff]   ;;  %601 = vmatprep.mubr.bf16.mxu1 %v1021_v1  ;;  %903 = vset.pattern.permute.xlu0 %v1021_v1  ;;  %v907_v2 = vld [vmem:[%s1330_s1 + $0xe0] ss:$16 sps:$4 sm:$0xff]   ;;  %v920_v11 = vld [vmem:[%s1330_s1 + $0xe8] ss:$16 sps:$4 sm:$0xff]  }
   0x2   :  { %904 = vset.pattern.permute.xlu1 %v1021_v1  ;;  %516 = vmatprep.subr.bf16.mxu0 %v905_v0  ;;  %v908_v3 = vld [vmem:[%s1330_s1 + $0x224] ss:$16 sps:$4 sm:$0xff]   ;;  %v910_v4 = vld [vmem:[%s1330_s1 + $0x220] ss:$16 sps:$4 sm:$0xff]   ;;  %v922_v12 = vld [vmem:[%s1330_s1 + $0xec] ss:$16 sps:$4 sm:$0xff]  }
   0x3   :  { %517 = vmatpush1.bf16.msra.mxu0 %v907_v2  ;;  %v911_v5 = vld [vmem:[%s1330_s1 + $0xc4] ss:$16 sps:$4 sm:$0xff]   ;;  %v913_v6 = vld [vmem:[%s1330_s1 + $0xc0] ss:$16 sps:$4 sm:$0xff]   ;;  %581 = vmatprep.subr.bf16.mxu1 %v908_v3  ;;  %v929_v16 = vld [vmem:[%s1330_s1 + $0xcc] ss:$16 sps:$4 sm:$0xff]  }
   0x4   :  { %v914_v7 = vld [vmem:[%s1330_s1 + $0x204] ss:$16 sps:$4 sm:$0xff]   ;;  %582 = vmatpush1.bf16.msra.mxu1 %v910_v4  ;;  %518 = vmatprep.subr.bf16.mxu0 %v911_v5  ;;  %v916_v8 = vld [vmem:[%s1330_s1 + $0x200] ss:$16 sps:$4 sm:$0xff]   ;;  %v927_v18 = vld [vmem:[%s1330_s1 + $0xc8] ss:$16 sps:$4 sm:$0xff]  }
   0x5   :  { %583 = vmatprep.subr.bf16.mxu1 %v914_v7  ;;  %v917_v9 = vld [vmem:[%s1330_s1 + $0xa4] ss:$16 sps:$4 sm:$0xff]   ;;  %v919_v10 = vld [vmem:[%s1330_s1 + $0xa0] ss:$16 sps:$4 sm:$0xff]   ;;  %v935_v19 = vld [vmem:[%s1330_s1 + $0xac] ss:$16 sps:$4 sm:$0xff]  }
   0x6   :  { %v1084_v13 = vld [vmem:[%s1331_s0 + $0x8] ss:$12 sps:$4 sm:$0xff]   ;;  %v926_v15 = vld [vmem:[%s1330_s1 + $0x80] ss:$16 sps:$4 sm:$0xff]   ;;  %v941_v23 = vld [vmem:[%s1330_s1 + $0x8c] ss:$16 sps:$4 sm:$0xff]  }
   0x7   :  { %519 = vmatpush1.bf16.msra.mxu0 %v913_v6  ;;  %v924_v14 = vld [vmem:[%s1330_s1 + $0x84] ss:$16 sps:$4 sm:$0xff]   ;;  %v932_v20 = vld [vmem:[%s1330_s1 + $0x60] ss:$16 sps:$4 sm:$0xff]   ;;  %v933_v22 = vld [vmem:[%s1330_s1 + $0xa8] ss:$16 sps:$4 sm:$0xff]  }
   0x8   :  { %520 = vmatprep.subr.bf16.mxu0 %v917_v9  ;;  %584 = vmatpush1.bf16.msra.mxu1 %v916_v8  ;;  %v930_v17 = vld [vmem:[%s1330_s1 + $0x64] ss:$16 sps:$4 sm:$0xff]   ;;  %v938_v24 = vld [vmem:[%s1330_s1 + $0x40] ss:$16 sps:$4 sm:$0xff]   ;;  %v939_v26 = vld [vmem:[%s1330_s1 + $0x88] ss:$16 sps:$4 sm:$0xff]  }
   0x9   :  { %622 = vmatprep.subr.bf16.mxu1 %v922_v12  ;;  %v936_v21 = vld [vmem:[%s1330_s1 + $0x44] ss:$16 sps:$4 sm:$0xff]   ;;  %v947_v27 = vld [vmem:[%s1330_s1 + $0x6c] ss:$16 sps:$4 sm:$0xff]   ;;  %v944_v28 = vld [vmem:[%s1330_s1 + $0x20] ss:$16 sps:$4 sm:$0xff]  }
   0xa   :  { %v942_v25 = vld [vmem:[%s1330_s1 + $0x24] ss:$16 sps:$4 sm:$0xff]   ;;  %v945_v30 = vld [vmem:[%s1330_s1 + $0x68] ss:$16 sps:$4 sm:$0xff]   ;;  %v953_v31 = vld [vmem:[%s1330_s1 + $0x4c] ss:$16 sps:$4 sm:$0xff]  }
   0xb   :  { %521 = vmatpush1.bf16.msra.mxu0 %v919_v10  ;;  %882 = vmatmul.mubr.msk.bf16.vlgmr.msra.gmra.mxu1 %vm509_vm0, %v1084_v13  ;;  %v948_v29 = vld [vmem:[%s1330_s1 + $0x4] ss:$16 sps:$4 sm:$0xff]   ;;  %v950_v32 = vld [vmem:[%s1330_s1] ss:$16 sps:$4 sm:$0xff]   ;;  %v951_v34 = vld [vmem:[%s1330_s1 + $0x48] ss:$16 sps:$4 sm:$0xff]  }
   0xc   :  { %522 = vmatprep.subr.bf16.mxu0 %v924_v14  ;;  %623 = vmatpush1.bf16.msra.mxu1 %v920_v11  ;;  %v954_v33 = vld [vmem:[%s1330_s1 + $0x1e4] ss:$16 sps:$4 sm:$0xff]   ;;  %v959_v35 = vld [vmem:[%s1330_s1 + $0x2c] ss:$16 sps:$4 sm:$0xff]   ;;  %v956_v36 = vld [vmem:[%s1330_s1 + $0x1e0] ss:$16 sps:$4 sm:$0xff]  }
   0xd   :  { %611 = vmatprep.mubr.bf16.mxu1 %v1021_v1  ;;  %624 = vmatprep.subr.bf16.mxu1 %v929_v16  ;;  %v960_v37 = vld [vmem:[%s1330_s1 + $0x1c4] ss:$16 sps:$4 sm:$0xff]   ;;  %v957_v38 = vld [vmem:[%s1330_s1 + $0x28] ss:$16 sps:$4 sm:$0xff]   ;;  %v965_v39 = vld [vmem:[%s1330_s1 + $0xc] ss:$16 sps:$4 sm:$0xff]  }
   0xe   :  { %v962_v40 = vld [vmem:[%s1330_s1 + $0x1c0] ss:$16 sps:$4 sm:$0xff]   ;;  %v966_v41 = vld [vmem:[%s1330_s1 + $0x1a4] ss:$16 sps:$4 sm:$0xff]   ;;  %v963_v42 = vld [vmem:[%s1330_s1 + $0x8] ss:$16 sps:$4 sm:$0xff]  }
   0xf   :  { %523 = vmatpush1.bf16.msra.mxu0 %v926_v15  ;;  %v971_v43 = vld [vmem:[%s1330_s1 + $0x1ec] ss:$16 sps:$4 sm:$0xff]   ;;  %v968_v44 = vld [vmem:[%s1330_s1 + $0x1a0] ss:$16 sps:$4 sm:$0xff]   ;;  %v972_v45 = vld [vmem:[%s1330_s1 + $0x184] ss:$16 sps:$4 sm:$0xff]  }
  0x10   :  { %524 = vmatprep.subr.bf16.mxu0 %v930_v17  ;;  %625 = vmatpush1.bf16.msra.mxu1 %v927_v18  ;;  %v969_v46 = vld [vmem:[%s1330_s1 + $0x1e8] ss:$16 sps:$4 sm:$0xff]   ;;  %v977_v47 = vld [vmem:[%s1330_s1 + $0x1cc] ss:$16 sps:$4 sm:$0xff]   ;;  %v974_v48 = vld [vmem:[%s1330_s1 + $0x180] ss:$16 sps:$4 sm:$0xff]  }
  0x11   :  { %626 = vmatprep.subr.bf16.mxu1 %v935_v19  ;;  %v975_v49 = vld [vmem:[%s1330_s1 + $0x1c8] ss:$16 sps:$4 sm:$0xff]   ;;  %v978_v50 = vld [vmem:[%s1330_s1 + $0x164] ss:$16 sps:$4 sm:$0xff]   ;;  %v980_v52 = vld [vmem:[%s1330_s1 + $0x160] ss:$16 sps:$4 sm:$0xff]  }
  0x12   :  { %v1004_v51 = vld [vmem:[%s1331_s0 + $0x4] ss:$12 sps:$4 sm:$0xff]   ;;  %v983_v53 = vld [vmem:[%s1330_s1 + $0x1ac] ss:$16 sps:$4 sm:$0xff]   ;;  %v981_v56 = vld [vmem:[%s1330_s1 + $0x1a8] ss:$16 sps:$4 sm:$0xff]  }
  0x13   :  { %525 = vmatpush1.bf16.msra.mxu0 %v932_v20  ;;  %548 = vmatprep.mubr.bf16.mxu0 %v1004_v51  ;;  %v1212_v54 = vld [vmem:[%s1331_s0 + $0x20] ss:$12 sps:$4 sm:$0xff]   ;;  %v984_v55 = vld [vmem:[%s1330_s1 + $0x144] ss:$16 sps:$4 sm:$0xff]   ;;  %v987_v61 = vld [vmem:[%s1330_s1 + $0x188] ss:$16 sps:$4 sm:$0xff]  }
  0x14   :  { %526 = vmatprep.subr.bf16.mxu0 %v936_v21  ;;  %627 = vmatpush1.bf16.msra.mxu1 %v933_v22  ;;  %v989_v57 = vld [vmem:[%s1330_s1 + $0x18c] ss:$16 sps:$4 sm:$0xff]   ;;  %v986_v58 = vld [vmem:[%s1330_s1 + $0x140] ss:$16 sps:$4 sm:$0xff]   ;;  %v990_v59 = vld [vmem:[%s1330_s1 + $0x124] ss:$16 sps:$4 sm:$0xff]  }
  0x15   :  { %628 = vmatprep.subr.bf16.mxu1 %v941_v23  ;;  %883 = vmatmul.mubr.msk.bf16.gmra.mxu1 %vm509_vm0, %v1212_v54  ;;  %v95_v60 = vld [vmem:[%s1332_s2] sm:$0xff]  ;;  %v97_v62 = vld [vmem:[%s1332_s2 + $0x10] sm:$0xff]  ;;  %v995_v63 = vld [vmem:[%s1330_s1 + $0x16c] ss:$16 sps:$4 sm:$0xff]  }
  0x16   :  { %654 = vmatprep.mubr.bf16.mxu1 %v1004_v51  ;;  %101 = vperm.xlu0 %903, %v95_v60   ;;  %v96_v0 = vld [vmem:[%s1332_s2 + $0x8] sm:$0xff]  ;;  %v992_v2 = vld [vmem:[%s1330_s1 + $0x120] ss:$16 sps:$4 sm:$0xff]   ;;  %v98_v3 = vld [vmem:[%s1332_s2 + $0x18] sm:$0xff] }
  0x17   :  { %527 = vmatpush1.bf16.msra.mxu0 %v938_v24  ;;  %111 = vperm.xlu1 %904, %v97_v62   ;;  %v996_v4 = vld [vmem:[%s1330_s1 + $0x104] ss:$16 sps:$4 sm:$0xff]   ;;  %v993_v5 = vld [vmem:[%s1330_s1 + $0x168] ss:$16 sps:$4 sm:$0xff]   ;;  %v1001_v6 = vld [vmem:[%s1330_s1 + $0x14c] ss:$16 sps:$4 sm:$0xff]  }
  0x18   :  { %528 = vmatprep.subr.bf16.mxu0 %v942_v25  ;;  %629 = vmatpush1.bf16.msra.mxu1 %v939_v26  ;;  %v998_v7 = vld [vmem:[%s1330_s1 + $0x100] ss:$16 sps:$4 sm:$0xff]   ;;  %v1007_v8 = vld [vmem:[%s1330_s1 + $0x22c] ss:$16 sps:$4 sm:$0xff]   ;;  %v999_v9 = vld [vmem:[%s1330_s1 + $0x148] ss:$16 sps:$4 sm:$0xff]  }
  0x19   :  { %630 = vmatprep.subr.bf16.mxu1 %v947_v27  ;;  %v1002_v10 = vld [vmem:[%s1331_s0] ss:$12 sps:$4 sm:$0xff]   ;;  %v1005_v12 = vld [vmem:[%s1330_s1 + $0x228] ss:$16 sps:$4 sm:$0xff]  }
  0x1a   :  { %106 = vperm.xlu0 %903, %v96_v0   ;;  %v1011_v11 = vld [vmem:[%s1330_s1 + $0x12c] ss:$16 sps:$4 sm:$0xff]   ;;  %v1009_v16 = vld [vmem:[%s1330_s1 + $0x128] ss:$16 sps:$4 sm:$0xff]  }
  0x1b   :  { %529 = vmatpush1.bf16.msra.mxu0 %v944_v28  ;;  %116 = vperm.xlu1 %904, %v98_v3   ;;  %v1015_v14 = vld [vmem:[%s1331_s0 + $0x1c] ss:$12 sps:$4 sm:$0xff]   ;;  %v1017_v20 = vld [vmem:[%s1331_s0 + $0x18] ss:$12 sps:$4 sm:$0xff]  }
  0x1c   :  { %530 = vmatprep.subr.bf16.mxu0 %v948_v29  ;;  %631 = vmatpush1.bf16.msra.mxu1 %v945_v30  ;;  %v1020_v15 = vld [vmem:[%s1330_s1 + $0x20c] ss:$16 sps:$4 sm:$0xff]   ;;  %v1018_v18 = vld [vmem:[%s1330_s1 + $0x208] ss:$16 sps:$4 sm:$0xff]  }
  0x1d   :  { %632 = vmatprep.subr.bf16.mxu1 %v953_v31  ;;  %v1014_v17 = vld [vmem:[%s1330_s1 + $0x10c] ss:$16 sps:$4 sm:$0xff]   ;;  %v1012_v19 = vld [vmem:[%s1330_s1 + $0x108] ss:$16 sps:$4 sm:$0xff]  }
  0x1f   :  { %531 = vmatpush1.bf16.msra.mxu0 %v950_v32 }
  0x20   :  { %532 = vmatprep.subr.bf16.mxu0 %v954_v33  ;;  %633 = vmatpush1.bf16.msra.mxu1 %v951_v34 }
  0x21   :  { %634 = vmatprep.subr.bf16.mxu1 %v959_v35 }
  0x23   :  { %533 = vmatpush2.bf16.msra.mxu0 %v956_v36 }
  0x24   :  { %534 = vmatprep.subr.bf16.mxu0 %v960_v37  ;;  %635 = vmatpush1.bf16.msra.mxu1 %v957_v38 }
  0x25   :  { %636 = vmatprep.subr.bf16.mxu1 %v965_v39 }
  0x27   :  { %535 = vmatpush2.bf16.msra.mxu0 %v962_v40 }
  0x28   :  { %536 = vmatprep.subr.bf16.mxu0 %v966_v41  ;;  %637 = vmatpush1.bf16.msra.mxu1 %v963_v42 }
  0x29   :  { %638 = vmatprep.subr.bf16.mxu1 %v971_v43 }
  0x2b   :  { %537 = vmatpush2.bf16.msra.mxu0 %v968_v44 }
  0x2c   :  { %538 = vmatprep.subr.bf16.mxu0 %v972_v45  ;;  %639 = vmatpush2.bf16.msra.mxu1 %v969_v46 }
  0x2d   :  { %640 = vmatprep.subr.bf16.mxu1 %v977_v47 }
  0x2f   :  { %539 = vmatpush2.bf16.msra.mxu0 %v974_v48 }
  0x30   :  { %540 = vmatprep.subr.bf16.mxu0 %v978_v50  ;;  %641 = vmatpush2.bf16.msra.mxu1 %v975_v49 }
  0x31   :  { %642 = vmatprep.subr.bf16.mxu1 %v983_v53 }
  0x33   :  { %541 = vmatpush2.bf16.msra.mxu0 %v980_v52 }
  0x34   :  { %542 = vmatprep.subr.bf16.mxu0 %v984_v55  ;;  %643 = vmatpush2.bf16.msra.mxu1 %v981_v56 }
  0x35   :  { %644 = vmatprep.subr.bf16.mxu1 %v989_v57 }
  0x37   :  { %543 = vmatpush2.bf16.msra.mxu0 %v986_v58 }
  0x38   :  { %544 = vmatprep.subr.bf16.mxu0 %v990_v59  ;;  %645 = vmatpush2.bf16.msra.mxu1 %v987_v61 }
  0x39   :  { %646 = vmatprep.subr.bf16.mxu1 %v995_v63 }
  0x3b   :  { %545 = vmatpush2.bf16.msra.mxu0 %v992_v2 }
  0x3c   :  { %546 = vmatprep.subr.bf16.mxu0 %v996_v4  ;;  %647 = vmatpush2.bf16.msra.mxu1 %v993_v5 }
  0x3d   :  { %648 = vmatprep.subr.bf16.mxu1 %v1001_v6 }
  0x3f   :  { %547 = vmatpush2.bf16.msra.mxu0 %v998_v7 }
  0x40   :  { %687 = vmatprep.subr.bf16.mxu0 %v1007_v8  ;;  %649 = vmatpush2.bf16.msra.mxu1 %v999_v9 }
  0x41   :  { %650 = vmatprep.subr.bf16.mxu1 %v1011_v11 }
  0x42   :  { %549 = vmatmul.mubr.bf16.vlgmr.msra.gmra.mxu0 %v1002_v10 }
  0x43   :  { %688 = vmatpush1.bf16.msra.mxu0 %v1005_v12  ;;  %558 = vmatprep.mubr.bf16.mxu0 %v1015_v14 }
  0x44   :  { %689 = vmatprep.subr.bf16.mxu0 %v1020_v15  ;;  %651 = vmatpush2.bf16.msra.mxu1 %v1009_v16 }
  0x45   :  { %652 = vmatprep.subr.bf16.mxu1 %v1014_v17 }
  0x47   :  { %690 = vmatpush1.bf16.msra.mxu0 %v1018_v18 }
  0x48   :  { %653 = vmatpush2.bf16.msra.mxu1 %v1012_v19 }
  0x4a   :  { %559 = vmatmul.mubr.bf16.gmra.mxu0 %v1017_v20 }
  0x4b   :  { %707 = vmatprep.mubr.bf16.mxu0 %v1021_v1  ;;  %655 = vmatmul.mubr.bf16.vlgmr.msra.gmra.mxu1 %v1002_v10 }
  0x4c   :  { %664 = vmatprep.mubr.bf16.mxu1 %v1015_v14 }
  0x52   :  { %884 = vmatmul.mubr.msk.bf16.vlgmr.msra.gmra.mxu0 %vm509_vm0, %v1084_v13 }
  0x53   :  { %717 = vmatprep.mubr.bf16.mxu0 %v1021_v1  ;;  %665 = vmatmul.mubr.bf16.gmra.mxu1 %v1017_v20 }
  0x5a   :  { %885 = vmatmul.mubr.msk.bf16.gmra.mxu0 %vm509_vm0, %v1212_v54 }
  0x91   :  { %v102_v26 = vpop.permute.xlu0 %101 }
  0x92   :  { %v112_v36 = vpop.permute.xlu1 %111 }
  0x95   :  { %v107_v30 = vpop.permute.xlu0 %106 }
  0x96   :  { %v117_v53 = vpop.permute.xlu1 %116 }
  0xcb   :  { %v603_v21 = vpop.f32.mrf.mxu1 }
  0xcd   :  { %v605_v22 = vpop.f32.mrf.mxu1 }
  0xcf   :  { %v607_v23 = vpop.f32.mrf.mxu1 }
  0xd1   :  { %v609_v24 = vpop.f32.mrf.mxu1 }
  0xd5   :  { %v613_v25 = vpop.f32.mrf.mxu1 }
  0xd7   :  { %v615_v27 = vpop.f32.mrf.mxu1 }
  0xd9   :  { %v617_v32 = vpop.f32.mrf.mxu1 }
  0xdb   :  { %v619_v38 = vpop.f32.mrf.mxu1 }
 0x102   :  { %v550_v28 = vpop.f32.mrf.mxu0 }
 0x103   :  { %v551_v29 = vadd.f32 %v550_v28, %v102_v26 }
 0x104   :  { %v552_v31 = vpop.f32.mrf.mxu0 }
 0x105   :  { %v604_v33 = vadd.f32 %v603_v21, %v551_v29  ;;  %v553_v13 = vadd.f32 %v552_v31, %v102_v26 }
 0x106   :  { %v554_v34 = vpop.f32.mrf.mxu0 }
 0x107   :  { %v606_v1 = vadd.f32 %v605_v22, %v553_v13  ;;  %v555_v35 = vadd.f32 %v554_v34, %v107_v30  ;;  %v728_v39 = vmax.f32 %v604_v33, 0.0 }
 0x108   :  { %v556_v37 = vpop.f32.mrf.mxu0 }
 0x109   :  { %v729_v40 = vmax.f32 %v606_v1, 0.0  ;;  %v608_v41 = vadd.f32 %v607_v23, %v555_v35  ;;  %v557_v42 = vadd.f32 %v556_v37, %v107_v30 }
 0x10a   :  { %v560_v43 = vpop.f32.mrf.mxu0 }
 0x10b   :  { %v894_v44 = vpack.c.bf16 %v729_v40, %v728_v39  ;;  %v610_v45 = vadd.f32 %v609_v24, %v557_v42  ;;  %v561_v46 = vadd.f32 %v560_v43, %v112_v36  ;;  %v656_v47 = vpop.f32.mrf.mxu1  ;;  %v732_v49 = vmax.f32 %v608_v41, 0.0 }
 0x10c   :  { %v562_v48 = vpop.f32.mrf.mxu0  ;;  %v657_v57 = vadd.f32 %v656_v47, %v102_v26 }
 0x10d   :  { %792 = vst [vmem:[%s1333_s3] sm:$0xff] %v894_v44  ;;  %v733_v50 = vmax.f32 %v610_v45, 0.0  ;;  %v614_v51 = vadd.f32 %v613_v25, %v561_v46  ;;  %v563_v52 = vadd.f32 %v562_v48, %v112_v36  ;;  %v658_v54 = vpop.f32.mrf.mxu1 }
 0x10e   :  { %v564_v55 = vpop.f32.mrf.mxu0  ;;  %v659_v6 = vadd.f32 %v658_v54, %v102_v26 }
 0x10f   :  { %v896_v56 = vpack.c.bf16 %v733_v50, %v732_v49  ;;  %v616_v58 = vadd.f32 %v615_v27, %v563_v52  ;;  %v565_v59 = vadd.f32 %v564_v55, %v117_v53  ;;  %v660_v60 = vpop.f32.mrf.mxu1  ;;  %v736_v62 = vmax.f32 %v614_v51, 0.0 }
 0x110   :  { %v566_v61 = vpop.f32.mrf.mxu0  ;;  %v661_v12 = vadd.f32 %v660_v60, %v107_v30 }
 0x111   :  { %794 = vst [vmem:[%s1333_s3 + $0x10] sm:$0xff] %v896_v56  ;;  %v737_v63 = vmax.f32 %v616_v58, 0.0  ;;  %v567_v0 = vadd.f32 %v566_v61, %v117_v53  ;;  %v618_v2 = vadd.f32 %v617_v32, %v565_v59  ;;  %v662_v3 = vpop.f32.mrf.mxu1 }
 0x112   :  { %v709_v4 = vpop.f32.mrf.mxu0  ;;  %v663_v16 = vadd.f32 %v662_v3, %v107_v30 }
 0x113   :  { %v898_v5 = vpack.c.bf16 %v737_v63, %v736_v62  ;;  %v620_v7 = vadd.f32 %v619_v38, %v567_v0  ;;  %v710_v8 = vadd.f32 %v709_v4, %v657_v57  ;;  %v666_v9 = vpop.f32.mrf.mxu1  ;;  %v740_v11 = vmax.f32 %v618_v2, 0.0 }
 0x114   :  { %v711_v10 = vpop.f32.mrf.mxu0  ;;  %v667_v21 = vadd.f32 %v666_v9, %v112_v36 }
 0x115   :  { %796 = vst [vmem:[%s1333_s3 + $0x20] sm:$0xff] %v898_v5  ;;  %v741_v14 = vmax.f32 %v620_v7, 0.0  ;;  %v712_v15 = vadd.f32 %v711_v10, %v659_v6  ;;  %v730_v17 = vmax.f32 %v710_v8, 0.0  ;;  %v668_v18 = vpop.f32.mrf.mxu1 }
 0x116   :  { %v713_v19 = vpop.f32.mrf.mxu0  ;;  %v669_v29 = vadd.f32 %v668_v18, %v112_v36 }
 0x117   :  { %v900_v20 = vpack.c.bf16 %v741_v14, %v740_v11  ;;  %v731_v22 = vmax.f32 %v712_v15, 0.0  ;;  %v714_v23 = vadd.f32 %v713_v19, %v661_v12  ;;  %v670_v24 = vpop.f32.mrf.mxu1 }
 0x118   :  { %v715_v25 = vpop.f32.mrf.mxu0  ;;  %v671_v34 = vadd.f32 %v670_v24, %v117_v53 }
 0x119   :  { %798 = vst [vmem:[%s1333_s3 + $0x30] sm:$0xff] %v900_v20  ;;  %v895_v26 = vpack.c.bf16 %v731_v22, %v730_v17  ;;  %v716_v27 = vadd.f32 %v715_v25, %v663_v16  ;;  %v734_v30 = vmax.f32 %v714_v23, 0.0  ;;  %v672_v33 = vpop.f32.mrf.mxu1 }
 0x11a   :  { %v719_v28 = vpop.f32.mrf.mxu0  ;;  %v673_v38 = vadd.f32 %v672_v33, %v117_v53 }
 0x11b   :  { %793 = vst [vmem:[%s1333_s3 + $0x8] sm:$0xff] %v895_v26  ;;  %v735_v31 = vmax.f32 %v716_v27, 0.0  ;;  %v720_v32 = vadd.f32 %v719_v28, %v667_v21 }
 0x11c   :  { %v721_v13 = vpop.f32.mrf.mxu0 }
 0x11d   :  { %v897_v1 = vpack.c.bf16 %v735_v31, %v734_v30  ;;  %v722_v35 = vadd.f32 %v721_v13, %v669_v29  ;;  %v738_v39 = vmax.f32 %v720_v32, 0.0 }
 0x11e   :  { %v723_v37 = vpop.f32.mrf.mxu0 }
 0x11f   :  { %795 = vst [vmem:[%s1333_s3 + $0x18] sm:$0xff] %v897_v1  ;;  %v739_v40 = vmax.f32 %v722_v35, 0.0  ;;  %v724_v41 = vadd.f32 %v723_v37, %v671_v34 }
 0x120   :  { %v725_v42 = vpop.f32.mrf.mxu0 }
 0x121   :  { %v899_v43 = vpack.c.bf16 %v739_v40, %v738_v39  ;;  %v726_v36 = vadd.f32 %v725_v42, %v673_v38  ;;  %v742_v44 = vmax.f32 %v724_v41, 0.0 }
 0x123   :  { %797 = vst [vmem:[%s1333_s3 + $0x28] sm:$0xff] %v899_v43  ;;  %v743_v45 = vmax.f32 %v726_v36, 0.0 }
 0x125   :  { %v901_v46 = vpack.c.bf16 %v743_v45, %v742_v44 }
 0x127   :  { %799 = vst [vmem:[%s1333_s3 + $0x38] sm:$0xff] %v901_v46 }

// kernel: encoder_conv_forward.9
= control target key start
LH: loop header
LB: loop body
LE: loop exit
PB: predicated region body
PF: predicated region fallthrough
CT: control target
= control target key end

     0   :  { %s5429_s21 = smov 0   ;;  %s6215_s0 = inlined_call_operand.vmem [shape: bf16[8,8064], index: 0, kind: input, shape index: {}]   ;;  %s6216_s1 = inlined_call_operand.vmem [shape: bf16[8064,1024], index: 1, kind: input, shape index: {}]   ;;  %s6217_s2 = inlined_call_operand.vmem [shape: f32[1,1024], index: 2, kind: input, shape index: {}]   ;;  %s6218_s3 = inlined_call_operand.vmem [shape: f32[8,512], index: 3, kind: input, shape index: {}]   ;;  %s6219_s4 = inlined_call_operand.vmem [shape: f32[8,512], index: 4, kind: output, shape index: {0}]   ;;  %s6220_s5 = inlined_call_operand.vmem [shape: f32[8,512], index: 5, kind: output, shape index: {1}]   ;;  %s6221_s6 = inlined_call_operand.vmem [shape: f32[8,512], index: 6, kind: output, shape index: {2}]  }
   0x1 LB: > { %s5435_s22 = sadd.s32 4294967295, %s5390_s21   ;;  %p4762_p0 = scmp.ge.s32.totalorder %s5390_s21, 1  ;;  %s5390_s21 = sphi %s5429_s21, %s17_s21  }
   0x2   : > { %p215_p1 = scmp.lt.s32.totalorder %s5390_s21, 8 }
   0x4   : > { %p216_p2 = pnand %p4762_p0, %p215_p1 }
   0x5   : > { %s246_s23 = smul.u32 (!%p216_p2), 9, %s5435_s22  ;;  %p4766_p5 = scmp.ne.s32.totalorder (!%p216_p2), %s5435_s22, 0 }
   0x6   : > { %219 = sbr.rel (%p216_p2) target bundleno = 845 (0x34d), region = 36 }
   0x7   : > { %s252_s24 = smul.u32 (!%p216_p2), 144, %s5435_s22  ;;  %p247_p3 = scmp.lt.s32.totalorder (!%p216_p2), %s246_s23, 62 }
   0x9   : > { %p253_p4 = scmp.lt.s32.totalorder (!%p216_p2), %s252_s24, 1007 }
   0xb   : > { %s6223_s23 = smov (!%p247_p3, %s246_s23), 62  ;;  %s6225_s24 = smov (!%p253_p4, %s252_s24), 1007 }
   0xc   : > { %s4763_s25 = sshll.u32 %s6223_s23, 2  ;;  %s5355_s29 = sshll.u32 %s6225_s24, 5 }
   0xd   : > { %s5444_s28 = scalar_lea.vmem %s6215_s0, %s4763_s25  ;;  %s5449_s8 = scalar_lea.vmem %s6216_s1, %s5355_s29 }
   0xe   : > { %263 = sbr.rel (%p4766_p5) target bundleno = 24 (0x18), region = 40 }
  0x13   : > { %v5392_v0 = vmov 0.0  }
  0x14   : > { %264 = vst [vmem:[#allocation2 + $0x30] sm:$0xff] %v5392_v0  ;;  %265 = vst [vmem:[#allocation2] sm:$0xff] %v5392_v0 }
  0x15   : > { %266 = vst [vmem:[#allocation2 + $0x18] sm:$0xff] %v5392_v0  ;;  %267 = vst [vmem:[#allocation2 + $0x10] sm:$0xff] %v5392_v0 }
  0x16   : > { %268 = vst [vmem:[#allocation2 + $0x8] sm:$0xff] %v5392_v0  ;;  %269 = vst [vmem:[#allocation2 + $0x20] sm:$0xff] %v5392_v0 }
  0x17   : > { %270 = vst [vmem:[#allocation2 + $0x28] sm:$0xff] %v5392_v0  ;;  %271 = vst [vmem:[#allocation2 + $0x38] sm:$0xff] %v5392_v0 }
  0x18 PF: > { %v341_v1 = vld [vmem:[%s5449_s8 + $0x1c0] sm:$0xff]  ;;  %v5484_v55 = vld [vmem:[%s5444_s28 + $0x8] sm:$0xff]  ;;  %p5352_p6 = scmp.ne.s32.totalorder %s5435_s22, 6 }
  0x19   : > { %v345_v2 = vld [vmem:[%s5449_s8 + $0x1e0] sm:$0xff]  ;;  %v5494_v60 = vcombine.high %v5484_v55, %v5484_v55 }
  0x1a   : > { %v469_v3 = vld [vmem:[%s5449_s8 + $0x5c0] sm:$0xff]  ;;  %v4833_v4 = vcombine.high %v341_v1, %v345_v2  ;;  %v4832_v6 = vcombine.low %v341_v1, %v345_v2 }
  0x1b   : > { %v473_v5 = vld [vmem:[%s5449_s8 + $0x5e0] sm:$0xff]  ;;  %3846 = vmatprep.mubr.bf16.mxu1 %v5494_v60 }
  0x1c   : > { %v333_v7 = vld [vmem:[%s5449_s8 + $0x180] sm:$0xff]  ;;  %v4961_v9 = vcombine.high %v469_v3, %v473_v5  ;;  %v4960_v10 = vcombine.low %v469_v3, %v473_v5  ;;  %3773 = vmatprep.subr.bf16.mxu0 %v4833_v4 }
  0x1d   : > { %v337_v8 = vld [vmem:[%s5449_s8 + $0x1a0] sm:$0xff]  ;;  %3774 = vmatpush1.bf16.msra.mxu0 %v4832_v6 }
  0x1e   : > { %v4825_v11 = vcombine.high %v333_v7, %v337_v8  ;;  %v461_v12 = vld [vmem:[%s5449_s8 + $0x580] sm:$0xff]  ;;  %3814 = vmatprep.subr.bf16.mxu1 %v4961_v9  ;;  %v4824_v19 = vcombine.low %v333_v7, %v337_v8 }
  0x1f   : > { %v465_v13 = vld [vmem:[%s5449_s8 + $0x5a0] sm:$0xff]  ;;  %3815 = vmatpush1.bf16.msra.mxu1 %v4960_v10 }
  0x20   : > { %v325_v14 = vld [vmem:[%s5449_s8 + $0x140] sm:$0xff]  ;;  %v4953_v15 = vcombine.high %v461_v12, %v465_v13  ;;  %3775 = vmatprep.subr.bf16.mxu0 %v4825_v11  ;;  %v4952_v20 = vcombine.low %v461_v12, %v465_v13 }
  0x21   : > { %v329_v16 = vld [vmem:[%s5449_s8 + $0x160] sm:$0xff]  ;;  %3776 = vmatpush1.bf16.msra.mxu0 %v4824_v19 }
  0x22   : > { %v453_v17 = vld [vmem:[%s5449_s8 + $0x540] sm:$0xff]  ;;  %v4817_v21 = vcombine.high %v325_v14, %v329_v16  ;;  %3816 = vmatprep.subr.bf16.mxu1 %v4953_v15  ;;  %v4816_v27 = vcombine.low %v325_v14, %v329_v16 }
  0x23   : > { %v457_v18 = vld [vmem:[%s5449_s8 + $0x560] sm:$0xff]  ;;  %3817 = vmatpush1.bf16.msra.mxu1 %v4952_v20 }
  0x24   : > { %v4945_v22 = vcombine.high %v453_v17, %v457_v18  ;;  %v317_v23 = vld [vmem:[%s5449_s8 + $0x100] sm:$0xff]  ;;  %3777 = vmatprep.subr.bf16.mxu0 %v4817_v21  ;;  %v4944_v28 = vcombine.low %v453_v17, %v457_v18 }
  0x25   : > { %v321_v24 = vld [vmem:[%s5449_s8 + $0x120] sm:$0xff]  ;;  %3778 = vmatpush1.bf16.msra.mxu0 %v4816_v27 }
  0x26   : > { %v445_v25 = vld [vmem:[%s5449_s8 + $0x500] sm:$0xff]  ;;  %v4809_v29 = vcombine.high %v317_v23, %v321_v24  ;;  %3818 = vmatprep.subr.bf16.mxu1 %v4945_v22  ;;  %v4808_v35 = vcombine.low %v317_v23, %v321_v24 }
  0x27   : > { %v449_v26 = vld [vmem:[%s5449_s8 + $0x520] sm:$0xff]  ;;  %3819 = vmatpush1.bf16.msra.mxu1 %v4944_v28 }
  0x28   : > { %v4937_v30 = vcombine.high %v445_v25, %v449_v26  ;;  %v309_v31 = vld [vmem:[%s5449_s8 + $0xc0] sm:$0xff]  ;;  %3779 = vmatprep.subr.bf16.mxu0 %v4809_v29  ;;  %v4936_v36 = vcombine.low %v445_v25, %v449_v26 }
  0x29   : > { %v313_v32 = vld [vmem:[%s5449_s8 + $0xe0] sm:$0xff]  ;;  %3780 = vmatpush1.bf16.msra.mxu0 %v4808_v35 }
  0x2a   : > { %v437_v33 = vld [vmem:[%s5449_s8 + $0x4c0] sm:$0xff]  ;;  %v4801_v37 = vcombine.high %v309_v31, %v313_v32  ;;  %3820 = vmatprep.subr.bf16.mxu1 %v4937_v30  ;;  %v4800_v43 = vcombine.low %v309_v31, %v313_v32 }
  0x2b   : > { %v441_v34 = vld [vmem:[%s5449_s8 + $0x4e0] sm:$0xff]  ;;  %3821 = vmatpush1.bf16.msra.mxu1 %v4936_v36 }
  0x2c   : > { %v4929_v38 = vcombine.high %v437_v33, %v441_v34  ;;  %v301_v39 = vld [vmem:[%s5449_s8 + $0x80] sm:$0xff]  ;;  %3781 = vmatprep.subr.bf16.mxu0 %v4801_v37  ;;  %v4928_v44 = vcombine.low %v437_v33, %v441_v34 }
  0x2d   : > { %v305_v40 = vld [vmem:[%s5449_s8 + $0xa0] sm:$0xff]  ;;  %3782 = vmatpush1.bf16.msra.mxu0 %v4800_v43 }
  0x2e   : > { %v429_v41 = vld [vmem:[%s5449_s8 + $0x480] sm:$0xff]  ;;  %v4793_v45 = vcombine.high %v301_v39, %v305_v40  ;;  %3822 = vmatprep.subr.bf16.mxu1 %v4929_v38  ;;  %v4792_v51 = vcombine.low %v301_v39, %v305_v40 }
  0x2f   : > { %v433_v42 = vld [vmem:[%s5449_s8 + $0x4a0] sm:$0xff]  ;;  %3823 = vmatpush1.bf16.msra.mxu1 %v4928_v44 }
  0x30   : > { %v4921_v46 = vcombine.high %v429_v41, %v433_v42  ;;  %v293_v47 = vld [vmem:[%s5449_s8 + $0x40] sm:$0xff]  ;;  %3783 = vmatprep.subr.bf16.mxu0 %v4793_v45  ;;  %v4920_v52 = vcombine.low %v429_v41, %v433_v42 }
  0x31   : > { %v297_v48 = vld [vmem:[%s5449_s8 + $0x60] sm:$0xff]  ;;  %3784 = vmatpush1.bf16.msra.mxu0 %v4792_v51 }
  0x32   : > { %v421_v49 = vld [vmem:[%s5449_s8 + $0x440] sm:$0xff]  ;;  %v4785_v53 = vcombine.high %v293_v47, %v297_v48  ;;  %3824 = vmatprep.subr.bf16.mxu1 %v4921_v46  ;;  %v4784_v63 = vcombine.low %v293_v47, %v297_v48 }
  0x33   : > { %v425_v50 = vld [vmem:[%s5449_s8 + $0x460] sm:$0xff]  ;;  %3825 = vmatpush1.bf16.msra.mxu1 %v4920_v52 }
  0x34   : > { %v5481_v54 = vld [vmem:[%s5444_s28] sm:$0xff]  ;;  %v4913_v56 = vcombine.high %v421_v49, %v425_v50  ;;  %3785 = vmatprep.subr.bf16.mxu0 %v4785_v53  ;;  %v4912_v0 = vcombine.low %v421_v49, %v425_v50 }
  0x35   : > { %v285_v57 = vld [vmem:[%s5449_s8] sm:$0xff]  ;;  %v5490_v59 = vcombine.high %v5481_v54, %v5481_v54  ;;  %3786 = vmatpush1.bf16.msra.mxu0 %v4784_v63 }
  0x36   : > { %v289_v58 = vld [vmem:[%s5449_s8 + $0x20] sm:$0xff]  ;;  %3826 = vmatprep.subr.bf16.mxu1 %v4913_v56 }
  0x37   : > { %v413_v61 = vld [vmem:[%s5449_s8 + $0x400] sm:$0xff]  ;;  %3805 = vmatprep.mubr.bf16.mxu0 %v5490_v59  ;;  %v4777_v1 = vcombine.high %v285_v57, %v289_v58  ;;  %v4776_v7 = vcombine.low %v285_v57, %v289_v58  ;;  %3827 = vmatpush1.bf16.msra.mxu1 %v4912_v0 }
  0x38   : > { %v417_v62 = vld [vmem:[%s5449_s8 + $0x420] sm:$0xff] }
  0x39   : > { %v4905_v2 = vcombine.high %v413_v61, %v417_v62  ;;  %v405_v3 = vld [vmem:[%s5449_s8 + $0x3c0] sm:$0xff]  ;;  %3787 = vmatprep.subr.bf16.mxu0 %v4777_v1  ;;  %v4904_v8 = vcombine.low %v413_v61, %v417_v62 }
  0x3a   : > { %v409_v4 = vld [vmem:[%s5449_s8 + $0x3e0] sm:$0xff]  ;;  %3788 = vmatpush1.bf16.msra.mxu0 %v4776_v7 }
  0x3b   : > { %v533_v5 = vld [vmem:[%s5449_s8 + $0x7c0] sm:$0xff]  ;;  %v4897_v9 = vcombine.high %v405_v3, %v409_v4  ;;  %3828 = vmatprep.subr.bf16.mxu1 %v4905_v2  ;;  %v4896_v15 = vcombine.low %v405_v3, %v409_v4 }
  0x3c   : > { %v537_v6 = vld [vmem:[%s5449_s8 + $0x7e0] sm:$0xff]  ;;  %3829 = vmatpush1.bf16.msra.mxu1 %v4904_v8 }
  0x3d   : > { %v5025_v10 = vcombine.high %v533_v5, %v537_v6  ;;  %v397_v11 = vld [vmem:[%s5449_s8 + $0x380] sm:$0xff]  ;;  %3789 = vmatprep.subr.bf16.mxu0 %v4897_v9  ;;  %v5024_v16 = vcombine.low %v533_v5, %v537_v6 }
  0x3e   : > { %v401_v12 = vld [vmem:[%s5449_s8 + $0x3a0] sm:$0xff]  ;;  %3790 = vmatpush2.bf16.msra.mxu0 %v4896_v15 }
  0x3f   : > { %v525_v13 = vld [vmem:[%s5449_s8 + $0x780] sm:$0xff]  ;;  %v4889_v17 = vcombine.high %v397_v11, %v401_v12  ;;  %3830 = vmatprep.subr.bf16.mxu1 %v5025_v10  ;;  %v4888_v23 = vcombine.low %v397_v11, %v401_v12 }
  0x40   : > { %v529_v14 = vld [vmem:[%s5449_s8 + $0x7a0] sm:$0xff]  ;;  %3831 = vmatpush2.bf16.msra.mxu1 %v5024_v16 }
  0x41   : > { %v5017_v18 = vcombine.high %v525_v13, %v529_v14  ;;  %v389_v19 = vld [vmem:[%s5449_s8 + $0x340] sm:$0xff]  ;;  %3791 = vmatprep.subr.bf16.mxu0 %v4889_v17  ;;  %v5016_v24 = vcombine.low %v525_v13, %v529_v14  ;;  %v5540_v17 = vcombine.low %v5481_v54, %v5481_v54 }
  0x42   : > { %v393_v20 = vld [vmem:[%s5449_s8 + $0x360] sm:$0xff]  ;;  %3792 = vmatpush2.bf16.msra.mxu0 %v4888_v23  ;;  %v5552_v23 = vld [vmem:[%s5444_s28 + $0x18] sm:$0xff] }
  0x43   : > { %v517_v21 = vld [vmem:[%s5449_s8 + $0x740] sm:$0xff]  ;;  %v4881_v25 = vcombine.high %v389_v19, %v393_v20  ;;  %3832 = vmatprep.subr.bf16.mxu1 %v5017_v18  ;;  %v4880_v31 = vcombine.low %v389_v19, %v393_v20  ;;  %v5545_v20 = vld [vmem:[%s5444_s28 + $0x10] sm:$0xff] }
  0x44   : > { %v521_v22 = vld [vmem:[%s5449_s8 + $0x760] sm:$0xff]  ;;  %3833 = vmatpush2.bf16.msra.mxu1 %v5016_v24 }
  0x45   : > { %v5009_v26 = vcombine.high %v517_v21, %v521_v22  ;;  %v381_v27 = vld [vmem:[%s5449_s8 + $0x300] sm:$0xff]  ;;  %3793 = vmatprep.subr.bf16.mxu0 %v4881_v25  ;;  %v5008_v32 = vcombine.low %v517_v21, %v521_v22  ;;  %v5549_v21 = vcombine.low %v5484_v55, %v5484_v55 }
  0x46   : > { %v385_v28 = vld [vmem:[%s5449_s8 + $0x320] sm:$0xff]  ;;  %3794 = vmatpush2.bf16.msra.mxu0 %v4880_v31 }
  0x47   : > { %v509_v29 = vld [vmem:[%s5449_s8 + $0x700] sm:$0xff]  ;;  %v4873_v33 = vcombine.high %v381_v27, %v385_v28  ;;  %3834 = vmatprep.subr.bf16.mxu1 %v5009_v26  ;;  %v4872_v39 = vcombine.low %v381_v27, %v385_v28  ;;  %v5558_v28 = vcombine.high %v5545_v20, %v5545_v20 }
  0x48   : > { %v513_v30 = vld [vmem:[%s5449_s8 + $0x720] sm:$0xff]  ;;  %3835 = vmatpush2.bf16.msra.mxu1 %v5008_v32 }
  0x49   : > { %v5001_v34 = vcombine.high %v509_v29, %v513_v30  ;;  %v373_v35 = vld [vmem:[%s5449_s8 + $0x2c0] sm:$0xff]  ;;  %3795 = vmatprep.subr.bf16.mxu0 %v4873_v33  ;;  %v5000_v40 = vcombine.low %v509_v29, %v513_v30  ;;  %v5565_v30 = vcombine.high %v5552_v23, %v5552_v23 }
  0x4a   : > { %v377_v36 = vld [vmem:[%s5449_s8 + $0x2e0] sm:$0xff]  ;;  %3796 = vmatpush2.bf16.msra.mxu0 %v4872_v39 }
  0x4b   : > { %v501_v37 = vld [vmem:[%s5449_s8 + $0x6c0] sm:$0xff]  ;;  %v4865_v41 = vcombine.high %v373_v35, %v377_v36  ;;  %3836 = vmatprep.subr.bf16.mxu1 %v5001_v34  ;;  %v4864_v47 = vcombine.low %v373_v35, %v377_v36 }
  0x4c   : > { %v505_v38 = vld [vmem:[%s5449_s8 + $0x6e0] sm:$0xff]  ;;  %3837 = vmatpush2.bf16.msra.mxu1 %v5000_v40 }
  0x4d   : > { %v4993_v42 = vcombine.high %v501_v37, %v505_v38  ;;  %v365_v43 = vld [vmem:[%s5449_s8 + $0x280] sm:$0xff]  ;;  %3797 = vmatprep.subr.bf16.mxu0 %v4865_v41  ;;  %v4992_v48 = vcombine.low %v501_v37, %v505_v38 }
  0x4e   : > { %v369_v44 = vld [vmem:[%s5449_s8 + $0x2a0] sm:$0xff]  ;;  %3798 = vmatpush2.bf16.msra.mxu0 %v4864_v47 }
  0x4f   : > { %v493_v45 = vld [vmem:[%s5449_s8 + $0x680] sm:$0xff]  ;;  %v4857_v49 = vcombine.high %v365_v43, %v369_v44  ;;  %3838 = vmatprep.subr.bf16.mxu1 %v4993_v42  ;;  %v4856_v57 = vcombine.low %v365_v43, %v369_v44 }
  0x50   : > { %v497_v46 = vld [vmem:[%s5449_s8 + $0x6a0] sm:$0xff]  ;;  %3839 = vmatpush2.bf16.msra.mxu1 %v4992_v48 }
  0x51   : > { %v4985_v50 = vcombine.high %v493_v45, %v497_v46  ;;  %v357_v51 = vld [vmem:[%s5449_s8 + $0x240] sm:$0xff]  ;;  %3799 = vmatprep.subr.bf16.mxu0 %v4857_v49  ;;  %v4984_v58 = vcombine.low %v493_v45, %v497_v46 }
  0x52   : > { %v361_v52 = vld [vmem:[%s5449_s8 + $0x260] sm:$0xff]  ;;  %3800 = vmatpush2.bf16.msra.mxu0 %v4856_v57 }
  0x53   : > { %v485_v53 = vld [vmem:[%s5449_s8 + $0x640] sm:$0xff]  ;;  %v4849_v61 = vcombine.high %v357_v51, %v361_v52  ;;  %3840 = vmatprep.subr.bf16.mxu1 %v4985_v50  ;;  %v4848_v3 = vcombine.low %v357_v51, %v361_v52 }
  0x54   : > { %v489_v56 = vld [vmem:[%s5449_s8 + $0x660] sm:$0xff]  ;;  %3841 = vmatpush2.bf16.msra.mxu1 %v4984_v58 }
  0x55   : > { %v4977_v62 = vcombine.high %v485_v53, %v489_v56  ;;  %v349_v63 = vld [vmem:[%s5449_s8 + $0x200] sm:$0xff]  ;;  %3801 = vmatprep.subr.bf16.mxu0 %v4849_v61  ;;  %v4976_v4 = vcombine.low %v485_v53, %v489_v56 }
  0x56   : > { %v353_v0 = vld [vmem:[%s5449_s8 + $0x220] sm:$0xff]  ;;  %3802 = vmatpush2.bf16.msra.mxu0 %v4848_v3 }
  0x57   : > { %v477_v1 = vld [vmem:[%s5449_s8 + $0x600] sm:$0xff]  ;;  %v4841_v5 = vcombine.high %v349_v63, %v353_v0  ;;  %3842 = vmatprep.subr.bf16.mxu1 %v4977_v62  ;;  %v4840_v11 = vcombine.low %v349_v63, %v353_v0 }
  0x58   : > { %v481_v2 = vld [vmem:[%s5449_s8 + $0x620] sm:$0xff]  ;;  %3843 = vmatpush2.bf16.msra.mxu1 %v4976_v4 }
  0x59   : > { %v4969_v6 = vcombine.high %v477_v1, %v481_v2  ;;  %v597_v7 = vld [vmem:[%s5449_s8 + $0x9c0] sm:$0xff]  ;;  %3803 = vmatprep.subr.bf16.mxu0 %v4841_v5  ;;  %v4968_v12 = vcombine.low %v477_v1, %v481_v2 }
  0x5a   : > { %v601_v8 = vld [vmem:[%s5449_s8 + $0x9e0] sm:$0xff]  ;;  %3804 = vmatpush2.bf16.msra.mxu0 %v4840_v11 }
  0x5b   : > { %v725_v9 = vld [vmem:[%s5449_s8 + $0xdc0] sm:$0xff]  ;;  %v5089_v13 = vcombine.high %v597_v7, %v601_v8  ;;  %3844 = vmatprep.subr.bf16.mxu1 %v4969_v6  ;;  %v5088_v22 = vcombine.low %v597_v7, %v601_v8 }
  0x5c   : > { %v729_v10 = vld [vmem:[%s5449_s8 + $0xde0] sm:$0xff]  ;;  %3845 = vmatpush2.bf16.msra.mxu1 %v4968_v12 }
  0x5d   : > { %v5217_v14 = vcombine.high %v725_v9, %v729_v10  ;;  %v589_v15 = vld [vmem:[%s5449_s8 + $0x980] sm:$0xff]  ;;  %3855 = vmatprep.subr.bf16.mxu0 %v5089_v13  ;;  %v5216_v24 = vcombine.low %v725_v9, %v729_v10  ;;  %3806 = vmatmul.mubr.bf16.vlgmr.msra.gmra.mxu0 %v5540_v17 }
  0x5e   : > { %v593_v16 = vld [vmem:[%s5449_s8 + $0x9a0] sm:$0xff]  ;;  %3856 = vmatpush1.bf16.msra.mxu0 %v5088_v22  ;;  %3887 = vmatprep.mubr.bf16.mxu0 %v5558_v28 }
  0x5f   : > { %v717_v18 = vld [vmem:[%s5449_s8 + $0xd80] sm:$0xff]  ;;  %v5081_v25 = vcombine.high %v589_v15, %v593_v16  ;;  %3896 = vmatprep.subr.bf16.mxu1 %v5217_v14  ;;  %3847 = vmatmul.mubr.bf16.vlgmr.msra.gmra.mxu1 %v5549_v21  ;;  %v5080_v31 = vcombine.low %v589_v15, %v593_v16 }
  0x60   : > { %v721_v19 = vld [vmem:[%s5449_s8 + $0xda0] sm:$0xff]  ;;  %3897 = vmatpush1.bf16.msra.mxu1 %v5216_v24  ;;  %3928 = vmatprep.mubr.bf16.mxu1 %v5565_v30 }
  0x61   : > { %v5209_v54 = vcombine.high %v717_v18, %v721_v19  ;;  %v581_v26 = vld [vmem:[%s5449_s8 + $0x940] sm:$0xff]  ;;  %3857 = vmatprep.subr.bf16.mxu0 %v5081_v25  ;;  %v5208_v32 = vcombine.low %v717_v18, %v721_v19 }
  0x62   : > { %v585_v27 = vld [vmem:[%s5449_s8 + $0x960] sm:$0xff]  ;;  %3858 = vmatpush1.bf16.msra.mxu0 %v5080_v31 }
  0x63   : > { %v709_v55 = vld [vmem:[%s5449_s8 + $0xd40] sm:$0xff]  ;;  %v5073_v33 = vcombine.high %v581_v26, %v585_v27  ;;  %3898 = vmatprep.subr.bf16.mxu1 %v5209_v54  ;;  %v5072_v39 = vcombine.low %v581_v26, %v585_v27 }
  0x64   : > { %v713_v29 = vld [vmem:[%s5449_s8 + $0xd60] sm:$0xff]  ;;  %3899 = vmatpush1.bf16.msra.mxu1 %v5208_v32 }
  0x65   : > { %v5201_v34 = vcombine.high %v709_v55, %v713_v29  ;;  %v573_v35 = vld [vmem:[%s5449_s8 + $0x900] sm:$0xff]  ;;  %3859 = vmatprep.subr.bf16.mxu0 %v5073_v33  ;;  %v5200_v40 = vcombine.low %v709_v55, %v713_v29 }
  0x66   : > { %v577_v36 = vld [vmem:[%s5449_s8 + $0x920] sm:$0xff]  ;;  %3860 = vmatpush1.bf16.msra.mxu0 %v5072_v39 }
  0x67   : > { %v701_v37 = vld [vmem:[%s5449_s8 + $0xd00] sm:$0xff]  ;;  %v5065_v41 = vcombine.high %v573_v35, %v577_v36  ;;  %3900 = vmatprep.subr.bf16.mxu1 %v5201_v34  ;;  %v5064_v47 = vcombine.low %v573_v35, %v577_v36 }
  0x68   : > { %v705_v38 = vld [vmem:[%s5449_s8 + $0xd20] sm:$0xff]  ;;  %3901 = vmatpush1.bf16.msra.mxu1 %v5200_v40 }
  0x69   : > { %v5193_v42 = vcombine.high %v701_v37, %v705_v38  ;;  %v565_v43 = vld [vmem:[%s5449_s8 + $0x8c0] sm:$0xff]  ;;  %3861 = vmatprep.subr.bf16.mxu0 %v5065_v41  ;;  %v5192_v48 = vcombine.low %v701_v37, %v705_v38 }
  0x6a   : > { %v569_v44 = vld [vmem:[%s5449_s8 + $0x8e0] sm:$0xff]  ;;  %3862 = vmatpush1.bf16.msra.mxu0 %v5064_v47 }
  0x6b   : > { %v693_v45 = vld [vmem:[%s5449_s8 + $0xcc0] sm:$0xff]  ;;  %v5057_v49 = vcombine.high %v565_v43, %v569_v44  ;;  %3902 = vmatprep.subr.bf16.mxu1 %v5193_v42  ;;  %v5056_v57 = vcombine.low %v565_v43, %v569_v44 }
  0x6c   : > { %v697_v46 = vld [vmem:[%s5449_s8 + $0xce0] sm:$0xff]  ;;  %3903 = vmatpush1.bf16.msra.mxu1 %v5192_v48 }
  0x6d   : > { %v5185_v50 = vcombine.high %v693_v45, %v697_v46  ;;  %v557_v51 = vld [vmem:[%s5449_s8 + $0x880] sm:$0xff]  ;;  %3863 = vmatprep.subr.bf16.mxu0 %v5057_v49  ;;  %v5184_v58 = vcombine.low %v693_v45, %v697_v46 }
  0x6e   : > { %v561_v52 = vld [vmem:[%s5449_s8 + $0x8a0] sm:$0xff]  ;;  %3864 = vmatpush1.bf16.msra.mxu0 %v5056_v57 }
  0x6f   : > { %v685_v53 = vld [vmem:[%s5449_s8 + $0xc80] sm:$0xff]  ;;  %v5049_v61 = vcombine.high %v557_v51, %v561_v52  ;;  %3904 = vmatprep.subr.bf16.mxu1 %v5185_v50  ;;  %v5048_v3 = vcombine.low %v557_v51, %v561_v52 }
  0x70   : > { %v689_v56 = vld [vmem:[%s5449_s8 + $0xca0] sm:$0xff]  ;;  %3905 = vmatpush1.bf16.msra.mxu1 %v5184_v58 }
  0x71   : > { %v5177_v62 = vcombine.high %v685_v53, %v689_v56  ;;  %v549_v63 = vld [vmem:[%s5449_s8 + $0x840] sm:$0xff]  ;;  %3865 = vmatprep.subr.bf16.mxu0 %v5049_v61  ;;  %v5176_v4 = vcombine.low %v685_v53, %v689_v56 }
  0x72   : > { %v553_v0 = vld [vmem:[%s5449_s8 + $0x860] sm:$0xff]  ;;  %3866 = vmatpush1.bf16.msra.mxu0 %v5048_v3 }
  0x73   : > { %v677_v1 = vld [vmem:[%s5449_s8 + $0xc40] sm:$0xff]  ;;  %v5041_v5 = vcombine.high %v549_v63, %v553_v0  ;;  %3906 = vmatprep.subr.bf16.mxu1 %v5177_v62  ;;  %v5040_v11 = vcombine.low %v549_v63, %v553_v0 }
  0x74   : > { %v681_v2 = vld [vmem:[%s5449_s8 + $0xc60] sm:$0xff]  ;;  %3907 = vmatpush1.bf16.msra.mxu1 %v5176_v4 }
  0x75   : > { %v5169_v6 = vcombine.high %v677_v1, %v681_v2  ;;  %v541_v7 = vld [vmem:[%s5449_s8 + $0x800] sm:$0xff]  ;;  %3867 = vmatprep.subr.bf16.mxu0 %v5041_v5  ;;  %v5168_v12 = vcombine.low %v677_v1, %v681_v2 }
  0x76   : > { %v545_v8 = vld [vmem:[%s5449_s8 + $0x820] sm:$0xff]  ;;  %3868 = vmatpush1.bf16.msra.mxu0 %v5040_v11 }
  0x77   : > { %v669_v9 = vld [vmem:[%s5449_s8 + $0xc00] sm:$0xff]  ;;  %v5033_v13 = vcombine.high %v541_v7, %v545_v8  ;;  %3908 = vmatprep.subr.bf16.mxu1 %v5169_v6  ;;  %v5032_v22 = vcombine.low %v541_v7, %v545_v8 }
  0x78   : > { %v673_v10 = vld [vmem:[%s5449_s8 + $0xc20] sm:$0xff]  ;;  %3909 = vmatpush1.bf16.msra.mxu1 %v5168_v12 }
  0x79   : > { %v5161_v14 = vcombine.high %v669_v9, %v673_v10  ;;  %v661_v15 = vld [vmem:[%s5449_s8 + $0xbc0] sm:$0xff]  ;;  %3869 = vmatprep.subr.bf16.mxu0 %v5033_v13  ;;  %v5160_v24 = vcombine.low %v669_v9, %v673_v10 }
  0x7a   : > { %v665_v16 = vld [vmem:[%s5449_s8 + $0xbe0] sm:$0xff]  ;;  %3870 = vmatpush1.bf16.msra.mxu0 %v5032_v22 }
  0x7b   : > { %v789_v18 = vld [vmem:[%s5449_s8 + $0xfc0] sm:$0xff]  ;;  %v5153_v25 = vcombine.high %v661_v15, %v665_v16  ;;  %3910 = vmatprep.subr.bf16.mxu1 %v5161_v14  ;;  %v5152_v31 = vcombine.low %v661_v15, %v665_v16 }
  0x7c   : > { %v793_v19 = vld [vmem:[%s5449_s8 + $0xfe0] sm:$0xff]  ;;  %3911 = vmatpush1.bf16.msra.mxu1 %v5160_v24 }
  0x7d   : > { %v5281_v54 = vcombine.high %v789_v18, %v793_v19  ;;  %v653_v26 = vld [vmem:[%s5449_s8 + $0xb80] sm:$0xff]  ;;  %3871 = vmatprep.subr.bf16.mxu0 %v5153_v25  ;;  %v5280_v32 = vcombine.low %v789_v18, %v793_v19 }
  0x7e   : > { %v657_v27 = vld [vmem:[%s5449_s8 + $0xba0] sm:$0xff]  ;;  %3872 = vmatpush2.bf16.msra.mxu0 %v5152_v31 }
  0x7f   : > { %v781_v55 = vld [vmem:[%s5449_s8 + $0xf80] sm:$0xff]  ;;  %v5145_v33 = vcombine.high %v653_v26, %v657_v27  ;;  %3912 = vmatprep.subr.bf16.mxu1 %v5281_v54  ;;  %v5144_v39 = vcombine.low %v653_v26, %v657_v27 }
  0x80   : > { %v785_v29 = vld [vmem:[%s5449_s8 + $0xfa0] sm:$0xff]  ;;  %3913 = vmatpush2.bf16.msra.mxu1 %v5280_v32 }
  0x81   : > { %v5273_v34 = vcombine.high %v781_v55, %v785_v29  ;;  %v645_v35 = vld [vmem:[%s5449_s8 + $0xb40] sm:$0xff]  ;;  %3873 = vmatprep.subr.bf16.mxu0 %v5145_v33  ;;  %v5272_v40 = vcombine.low %v781_v55, %v785_v29  ;;  %v342_v55 = vld [vmem:[%s5449_s8 + $0x1c8] sm:$0xff] }
  0x82   : > { %v649_v36 = vld [vmem:[%s5449_s8 + $0xb60] sm:$0xff]  ;;  %3874 = vmatpush2.bf16.msra.mxu0 %v5144_v39  ;;  %v346_v29 = vld [vmem:[%s5449_s8 + $0x1e8] sm:$0xff] }
  0x83   : > { %v773_v37 = vld [vmem:[%s5449_s8 + $0xf40] sm:$0xff]  ;;  %v5137_v41 = vcombine.high %v645_v35, %v649_v36  ;;  %3914 = vmatprep.subr.bf16.mxu1 %v5273_v34  ;;  %v5136_v47 = vcombine.low %v645_v35, %v649_v36  ;;  %v4835_v34 = vcombine.high %v342_v55, %v346_v29  ;;  %v338_v39 = vld [vmem:[%s5449_s8 + $0x1a8] sm:$0xff] }
  0x84   : > { %v777_v38 = vld [vmem:[%s5449_s8 + $0xf60] sm:$0xff]  ;;  %3915 = vmatpush2.bf16.msra.mxu1 %v5272_v40  ;;  %v5636_v40 = vcombine.low %v5552_v23, %v5552_v23 }
  0x85   : > { %v5265_v42 = vcombine.high %v773_v37, %v777_v38  ;;  %v637_v43 = vld [vmem:[%s5449_s8 + $0xb00] sm:$0xff]  ;;  %3875 = vmatprep.subr.bf16.mxu0 %v5137_v41  ;;  %v5264_v48 = vcombine.low %v773_v37, %v777_v38  ;;  %v5630_v37 = vcombine.low %v5545_v20, %v5545_v20  ;;  %v334_v38 = vld [vmem:[%s5449_s8 + $0x188] sm:$0xff] }
  0x86   : > { %v641_v44 = vld [vmem:[%s5449_s8 + $0xb20] sm:$0xff]  ;;  %3876 = vmatpush2.bf16.msra.mxu0 %v5136_v47  ;;  %v330_v47 = vld [vmem:[%s5449_s8 + $0x168] sm:$0xff] }
  0x87   : > { %v765_v45 = vld [vmem:[%s5449_s8 + $0xf00] sm:$0xff]  ;;  %v5129_v49 = vcombine.high %v637_v43, %v641_v44  ;;  %3916 = vmatprep.subr.bf16.mxu1 %v5265_v42  ;;  %v5128_v57 = vcombine.low %v637_v43, %v641_v44  ;;  %v4834_v42 = vcombine.low %v342_v55, %v346_v29  ;;  %v4827_v44 = vcombine.high %v334_v38, %v338_v39  ;;  %v286_v29 = vld [vmem:[%s5449_s8 + $0x8] sm:$0xff] }
  0x88   : > { %v769_v46 = vld [vmem:[%s5449_s8 + $0xf20] sm:$0xff]  ;;  %3917 = vmatpush2.bf16.msra.mxu1 %v5264_v48  ;;  %v4826_v48 = vcombine.low %v334_v38, %v338_v39  ;;  %v474_v38 = vld [vmem:[%s5449_s8 + $0x5e8] sm:$0xff] }
  0x89   : > { %v5257_v50 = vcombine.high %v765_v45, %v769_v46  ;;  %v629_v51 = vld [vmem:[%s5449_s8 + $0xac0] sm:$0xff]  ;;  %3877 = vmatprep.subr.bf16.mxu0 %v5129_v49  ;;  %v5256_v58 = vcombine.low %v765_v45, %v769_v46  ;;  %v326_v46 = vld [vmem:[%s5449_s8 + $0x148] sm:$0xff] }
  0x8a   : > { %v633_v52 = vld [vmem:[%s5449_s8 + $0xae0] sm:$0xff]  ;;  %3878 = vmatpush2.bf16.msra.mxu0 %v5128_v57  ;;  %v322_v57 = vld [vmem:[%s5449_s8 + $0x128] sm:$0xff] }
  0x8b   : > { %v757_v53 = vld [vmem:[%s5449_s8 + $0xec0] sm:$0xff]  ;;  %v5121_v61 = vcombine.high %v629_v51, %v633_v52  ;;  %3918 = vmatprep.subr.bf16.mxu1 %v5257_v50  ;;  %v5120_v3 = vcombine.low %v629_v51, %v633_v52  ;;  %v4819_v50 = vcombine.high %v326_v46, %v330_v47  ;;  %v406_v39 = vld [vmem:[%s5449_s8 + $0x3c8] sm:$0xff] }
  0x8c   : > { %v761_v56 = vld [vmem:[%s5449_s8 + $0xee0] sm:$0xff]  ;;  %3919 = vmatpush2.bf16.msra.mxu1 %v5256_v58 }
  0x8d   : > { %v5249_v62 = vcombine.high %v757_v53, %v761_v56  ;;  %v621_v63 = vld [vmem:[%s5449_s8 + $0xa80] sm:$0xff]  ;;  %3879 = vmatprep.subr.bf16.mxu0 %v5121_v61  ;;  %v5248_v4 = vcombine.low %v757_v53, %v761_v56  ;;  %v5393_v53 = vmov 0   ;;  %v318_v56 = vld [vmem:[%s5449_s8 + $0x108] sm:$0xff]  ;;  %v4818_v61 = vcombine.low %v326_v46, %v330_v47 }
  0x8e   : > { %v625_v0 = vld [vmem:[%s5449_s8 + $0xaa0] sm:$0xff]  ;;  %3880 = vmatpush2.bf16.msra.mxu0 %v5120_v3  ;;  %v314_v3 = vld [vmem:[%s5449_s8 + $0xe8] sm:$0xff] }
  0x8f   : > { %v749_v1 = vld [vmem:[%s5449_s8 + $0xe80] sm:$0xff]  ;;  %v5113_v5 = vcombine.high %v621_v63, %v625_v0  ;;  %3920 = vmatprep.subr.bf16.mxu1 %v5249_v62  ;;  %v5112_v11 = vcombine.low %v621_v63, %v625_v0  ;;  %v4811_v63 = vcombine.high %v318_v56, %v322_v57  ;;  %v466_v46 = vld [vmem:[%s5449_s8 + $0x5a8] sm:$0xff] }
  0x90   : > { %v753_v2 = vld [vmem:[%s5449_s8 + $0xea0] sm:$0xff]  ;;  %3921 = vmatpush2.bf16.msra.mxu1 %v5248_v4 }
  0x91   : > { %v5241_v6 = vcombine.high %v749_v1, %v753_v2  ;;  %v613_v7 = vld [vmem:[%s5449_s8 + $0xa40] sm:$0xff]  ;;  %3881 = vmatprep.subr.bf16.mxu0 %v5113_v5  ;;  %v5240_v12 = vcombine.low %v749_v1, %v753_v2  ;;  %v310_v2 = vld [vmem:[%s5449_s8 + $0xc8] sm:$0xff]  ;;  %v4810_v5 = vcombine.low %v318_v56, %v322_v57 }
  0x92   : > { %v617_v8 = vld [vmem:[%s5449_s8 + $0xa60] sm:$0xff]  ;;  %3882 = vmatpush2.bf16.msra.mxu0 %v5112_v11  ;;  %v306_v11 = vld [vmem:[%s5449_s8 + $0xa8] sm:$0xff] }
  0x93   : > { %v741_v9 = vld [vmem:[%s5449_s8 + $0xe40] sm:$0xff]  ;;  %v5105_v13 = vcombine.high %v613_v7, %v617_v8  ;;  %3922 = vmatprep.subr.bf16.mxu1 %v5241_v6  ;;  %v5104_v22 = vcombine.low %v613_v7, %v617_v8  ;;  %v4803_v7 = vcombine.high %v310_v2, %v314_v3  ;;  %v454_v56 = vld [vmem:[%s5449_s8 + $0x548] sm:$0xff] }
  0x94   : > { %v745_v10 = vld [vmem:[%s5449_s8 + $0xe60] sm:$0xff]  ;;  %3923 = vmatpush2.bf16.msra.mxu1 %v5240_v12  ;;  %v458_v57 = vld [vmem:[%s5449_s8 + $0x568] sm:$0xff] }
  0x95   : > { %v5233_v14 = vcombine.high %v741_v9, %v745_v10  ;;  %v605_v15 = vld [vmem:[%s5449_s8 + $0xa00] sm:$0xff]  ;;  %3883 = vmatprep.subr.bf16.mxu0 %v5105_v13  ;;  %v5232_v24 = vcombine.low %v741_v9, %v745_v10  ;;  %v302_v10 = vld [vmem:[%s5449_s8 + $0x88] sm:$0xff]  ;;  %v4802_v13 = vcombine.low %v310_v2, %v314_v3 }
  0x96   : > { %v609_v16 = vld [vmem:[%s5449_s8 + $0xa20] sm:$0xff]  ;;  %3884 = vmatpush2.bf16.msra.mxu0 %v5104_v22  ;;  %v298_v22 = vld [vmem:[%s5449_s8 + $0x68] sm:$0xff] }
  0x97   : > { %v733_v18 = vld [vmem:[%s5449_s8 + $0xe00] sm:$0xff]  ;;  %v5097_v25 = vcombine.high %v605_v15, %v609_v16  ;;  %3924 = vmatprep.subr.bf16.mxu1 %v5233_v14  ;;  %v5096_v31 = vcombine.low %v605_v15, %v609_v16  ;;  %v4795_v15 = vcombine.high %v302_v10, %v306_v11  ;;  %v446_v2 = vld [vmem:[%s5449_s8 + $0x508] sm:$0xff] }
  0x98   : > { %v737_v19 = vld [vmem:[%s5449_s8 + $0xe20] sm:$0xff]  ;;  %3925 = vmatpush2.bf16.msra.mxu1 %v5232_v24  ;;  %v450_v3 = vld [vmem:[%s5449_s8 + $0x528] sm:$0xff] }
  0x99   : > { %v5225_v54 = vcombine.high %v733_v18, %v737_v19  ;;  %v853_v26 = vld [vmem:[%s5449_s8 + $0x11c0] sm:$0xff]  ;;  %3885 = vmatprep.subr.bf16.mxu0 %v5097_v25  ;;  %v5224_v32 = vcombine.low %v733_v18, %v737_v19  ;;  %v294_v19 = vld [vmem:[%s5449_s8 + $0x48] sm:$0xff]  ;;  %v4794_v25 = vcombine.low %v302_v10, %v306_v11 }
  0x9a   : > { %v857_v27 = vld [vmem:[%s5449_s8 + $0x11e0] sm:$0xff]  ;;  %3886 = vmatpush2.bf16.msra.mxu0 %v5096_v31  ;;  %v290_v31 = vld [vmem:[%s5449_s8 + $0x28] sm:$0xff] }
  0x9b   : > { %v5345_v33 = vcombine.high %v853_v26, %v857_v27  ;;  %3926 = vmatprep.subr.bf16.mxu1 %v5225_v54  ;;  %v845_v35 = vld [vmem:[%s5449_s8 + $0x1180] sm:$0xff]  ;;  %v5344_v41 = vcombine.low %v853_v26, %v857_v27  ;;  %v4787_v26 = vcombine.high %v294_v19, %v298_v22  ;;  %v438_v10 = vld [vmem:[%s5449_s8 + $0x4c8] sm:$0xff] }
  0x9c   : > { %v849_v36 = vld [vmem:[%s5449_s8 + $0x11a0] sm:$0xff]  ;;  %3927 = vmatpush2.bf16.msra.mxu1 %v5224_v32  ;;  %v442_v11 = vld [vmem:[%s5449_s8 + $0x4e8] sm:$0xff] }
  0x9d   : > { %3937 = vmatprep.subr.bf16.mxu0 %v5345_v33  ;;  %v5337_v43 = vcombine.high %v845_v35, %v849_v36  ;;  %3978 = vmatprep.subr.bf16.mxu1 %v4835_v34  ;;  %v837_v45 = vld [vmem:[%s5449_s8 + $0x1140] sm:$0xff]  ;;  %v5336_v23 = vcombine.low %v845_v35, %v849_v36  ;;  %v4786_v33 = vcombine.low %v294_v19, %v298_v22  ;;  %v470_v36 = vld [vmem:[%s5449_s8 + $0x5c8] sm:$0xff] }
  0x9e   : > { %v841_v20 = vld [vmem:[%s5449_s8 + $0x1160] sm:$0xff]  ;;  %3888 = vmatmul.mubr.bf16.vlgmr.msra.gmra.mxu0 %v5630_v37  ;;  %v4779_v35 = vcombine.high %v286_v29, %v290_v31  ;;  %v430_v19 = vld [vmem:[%s5449_s8 + $0x488] sm:$0xff] }
  0x9f   : > { %3929 = vmatmul.mubr.bf16.vlgmr.msra.gmra.mxu1 %v5636_v40  ;;  %3938 = vmatpush1.bf16.msra.mxu0 %v5344_v41  ;;  %v5329_v49 = vcombine.high %v837_v45, %v841_v20  ;;  %v829_v51 = vld [vmem:[%s5449_s8 + $0x1100] sm:$0xff]  ;;  %v5328_v58 = vcombine.low %v837_v45, %v841_v20  ;;  %v410_v41 = vld [vmem:[%s5449_s8 + $0x3e8] sm:$0xff] }
  0xa0   : > { %3979 = vmatpush1.bf16.msra.mxu1 %v4834_v42  ;;  %3939 = vmatprep.subr.bf16.mxu0 %v5337_v43  ;;  %v833_v52 = vld [vmem:[%s5449_s8 + $0x1120] sm:$0xff]  ;;  %v4778_v43 = vcombine.low %v286_v29, %v290_v31  ;;  %v4899_v45 = vcombine.high %v406_v39, %v410_v41  ;;  %v462_v20 = vld [vmem:[%s5449_s8 + $0x588] sm:$0xff] }
  0xa1   : > { %3980 = vmatprep.subr.bf16.mxu1 %v4827_v44  ;;  %3969 = vmatprep.mubr.bf16.mxu0 %v5393_v53  ;;  %v5321_v62 = vcombine.high %v829_v51, %v833_v52  ;;  %v821_v0 = vld [vmem:[%s5449_s8 + $0x10c0] sm:$0xff]  ;;  %v5320_v4 = vcombine.low %v829_v51, %v833_v52  ;;  %v4963_v44 = vcombine.high %v470_v36, %v474_v38  ;;  %v434_v22 = vld [vmem:[%s5449_s8 + $0x4a8] sm:$0xff] }
  0xa2   : > { %4010 = vmatprep.mubr.bf16.mxu1 %v5490_v59  ;;  %v825_v1 = vld [vmem:[%s5449_s8 + $0x10e0] sm:$0xff]  ;;  %v4955_v51 = vcombine.high %v462_v20, %v466_v46  ;;  %v422_v29 = vld [vmem:[%s5449_s8 + $0x448] sm:$0xff] }
  0xa3   : > { %3940 = vmatpush1.bf16.msra.mxu0 %v5336_v23  ;;  %v5313_v6 = vcombine.high %v821_v0, %v825_v1  ;;  %v813_v8 = vld [vmem:[%s5449_s8 + $0x1080] sm:$0xff]  ;;  %v5312_v12 = vcombine.low %v821_v0, %v825_v1  ;;  %v398_v23 = vld [vmem:[%s5449_s8 + $0x388] sm:$0xff]  ;;  %v4947_v0 = vcombine.high %v454_v56, %v458_v57 }
  0xa4   : > { %3981 = vmatpush1.bf16.msra.mxu1 %v4826_v48  ;;  %3941 = vmatprep.subr.bf16.mxu0 %v5329_v49  ;;  %v817_v9 = vld [vmem:[%s5449_s8 + $0x10a0] sm:$0xff]  ;;  %v402_v48 = vld [vmem:[%s5449_s8 + $0x3a8] sm:$0xff]  ;;  %v4962_v49 = vcombine.low %v470_v36, %v474_v38 }
  0xa5   : > { %3982 = vmatprep.subr.bf16.mxu1 %v4819_v50  ;;  %v5305_v14 = vcombine.high %v813_v8, %v817_v9  ;;  %v805_v16 = vld [vmem:[%s5449_s8 + $0x1040] sm:$0xff]  ;;  %v5304_v24 = vcombine.low %v813_v8, %v817_v9  ;;  %v4898_v50 = vcombine.low %v406_v39, %v410_v41  ;;  %v4891_v52 = vcombine.high %v398_v23, %v402_v48  ;;  %v426_v31 = vld [vmem:[%s5449_s8 + $0x468] sm:$0xff] }
  0xa6   : > { %v809_v18 = vld [vmem:[%s5449_s8 + $0x1060] sm:$0xff]  ;;  %v4939_v8 = vcombine.high %v446_v2, %v450_v3  ;;  %v4915_v36 = vcombine.high %v422_v29, %v426_v31  ;;  %v414_v39 = vld [vmem:[%s5449_s8 + $0x408] sm:$0xff] }
  0xa7   : > { %3942 = vmatpush1.bf16.msra.mxu0 %v5328_v58  ;;  %v5297_v54 = vcombine.high %v805_v16, %v809_v18  ;;  %v797_v27 = vld [vmem:[%s5449_s8 + $0x1000] sm:$0xff]  ;;  %v5296_v32 = vcombine.low %v805_v16, %v809_v18  ;;  %v390_v58 = vld [vmem:[%s5449_s8 + $0x348] sm:$0xff]  ;;  %v4931_v16 = vcombine.high %v438_v10, %v442_v11 }
  0xa8   : > { %3983 = vmatpush1.bf16.msra.mxu1 %v4818_v61  ;;  %3943 = vmatprep.subr.bf16.mxu0 %v5321_v62  ;;  %v801_v55 = vld [vmem:[%s5449_s8 + $0x1020] sm:$0xff]  ;;  %v394_v61 = vld [vmem:[%s5449_s8 + $0x368] sm:$0xff]  ;;  %v4954_v62 = vcombine.low %v462_v20, %v466_v46 }
  0xa9   : > { %3984 = vmatprep.subr.bf16.mxu1 %v4811_v63  ;;  %v5289_v34 = vcombine.high %v797_v27, %v801_v55  ;;  %v5288_v42 = vcombine.low %v797_v27, %v801_v55  ;;  %v5673_v47 = vld [vmem:[%s5444_s28 + $0x20] ss:$0 sps:$4 sm:$0xff]   ;;  %v4890_v63 = vcombine.low %v398_v23, %v402_v48  ;;  %v4883_v1 = vcombine.high %v390_v58, %v394_v61  ;;  %v418_v41 = vld [vmem:[%s5449_s8 + $0x428] sm:$0xff] }
  0xaa   : > { %v4923_v27 = vcombine.high %v430_v19, %v434_v22  ;;  %v4907_v20 = vcombine.high %v414_v39, %v418_v41  ;;  %v534_v23 = vld [vmem:[%s5449_s8 + $0x7c8] sm:$0xff] }
  0xab   : > { %3944 = vmatpush1.bf16.msra.mxu0 %v5320_v4  ;;  %v382_v4 = vld [vmem:[%s5449_s8 + $0x308] sm:$0xff] }
  0xac   : > { %3985 = vmatpush1.bf16.msra.mxu1 %v4810_v5  ;;  %3945 = vmatprep.subr.bf16.mxu0 %v5313_v6  ;;  %v386_v5 = vld [vmem:[%s5449_s8 + $0x328] sm:$0xff]  ;;  %v4946_v6 = vcombine.low %v454_v56, %v458_v57 }
  0xad   : > { %3986 = vmatprep.subr.bf16.mxu1 %v4803_v7  ;;  %v4882_v7 = vcombine.low %v390_v58, %v394_v61  ;;  %v4875_v9 = vcombine.high %v382_v4, %v386_v5  ;;  %v538_v48 = vld [vmem:[%s5449_s8 + $0x7e8] sm:$0xff] }
  0xae   : > { %v5027_v56 = vcombine.high %v534_v23, %v538_v48  ;;  %v526_v58 = vld [vmem:[%s5449_s8 + $0x788] sm:$0xff] }
  0xaf   : > { %3946 = vmatpush1.bf16.msra.mxu0 %v5312_v12  ;;  %v374_v12 = vld [vmem:[%s5449_s8 + $0x2c8] sm:$0xff] }
  0xb0   : > { %3987 = vmatpush1.bf16.msra.mxu1 %v4802_v13  ;;  %3947 = vmatprep.subr.bf16.mxu0 %v5305_v14  ;;  %v378_v13 = vld [vmem:[%s5449_s8 + $0x2e8] sm:$0xff]  ;;  %v4938_v14 = vcombine.low %v446_v2, %v450_v3 }
  0xb1   : > { %3988 = vmatprep.subr.bf16.mxu1 %v4795_v15  ;;  %v4874_v15 = vcombine.low %v382_v4, %v386_v5  ;;  %v4867_v18 = vcombine.high %v374_v12, %v378_v13  ;;  %v530_v61 = vld [vmem:[%s5449_s8 + $0x7a8] sm:$0xff] }
  0xb2   : > { %v5019_v2 = vcombine.high %v526_v58, %v530_v61  ;;  %v518_v4 = vld [vmem:[%s5449_s8 + $0x748] sm:$0xff] }
  0xb3   : > { %3948 = vmatpush1.bf16.msra.mxu0 %v5304_v24  ;;  %v366_v24 = vld [vmem:[%s5449_s8 + $0x288] sm:$0xff] }
  0xb4   : > { %3989 = vmatpush1.bf16.msra.mxu1 %v4794_v25  ;;  %3949 = vmatprep.subr.bf16.mxu0 %v5297_v54  ;;  %v370_v25 = vld [vmem:[%s5449_s8 + $0x2a8] sm:$0xff]  ;;  %v4930_v54 = vcombine.low %v438_v10, %v442_v11 }
  0xb5   : > { %3990 = vmatprep.subr.bf16.mxu1 %v4787_v26  ;;  %v4866_v26 = vcombine.low %v374_v12, %v378_v13  ;;  %v4859_v55 = vcombine.high %v366_v24, %v370_v25  ;;  %v522_v5 = vld [vmem:[%s5449_s8 + $0x768] sm:$0xff] }
  0xb6   : > { %v5011_v10 = vcombine.high %v518_v4, %v522_v5  ;;  %v510_v12 = vld [vmem:[%s5449_s8 + $0x708] sm:$0xff] }
  0xb7   : > { %3950 = vmatpush1.bf16.msra.mxu0 %v5296_v32  ;;  %v358_v32 = vld [vmem:[%s5449_s8 + $0x248] sm:$0xff] }
  0xb8   : > { %3991 = vmatpush1.bf16.msra.mxu1 %v4786_v33  ;;  %3951 = vmatprep.subr.bf16.mxu0 %v5289_v34  ;;  %v362_v33 = vld [vmem:[%s5449_s8 + $0x268] sm:$0xff]  ;;  %v4922_v34 = vcombine.low %v430_v19, %v434_v22 }
  0xb9   : > { %3992 = vmatprep.subr.bf16.mxu1 %v4779_v35  ;;  %v4858_v35 = vcombine.low %v366_v24, %v370_v25  ;;  %v4851_v38 = vcombine.high %v358_v32, %v362_v33  ;;  %v514_v13 = vld [vmem:[%s5449_s8 + $0x728] sm:$0xff] }
  0xba   : > { %v5003_v19 = vcombine.high %v510_v12, %v514_v13  ;;  %v502_v24 = vld [vmem:[%s5449_s8 + $0x6c8] sm:$0xff] }
  0xbb   : > { %3952 = vmatpush1.bf16.msra.mxu0 %v5288_v42  ;;  %v350_v42 = vld [vmem:[%s5449_s8 + $0x208] sm:$0xff] }
  0xbc   : > { %3993 = vmatpush1.bf16.msra.mxu1 %v4778_v43  ;;  %4019 = vmatprep.subr.bf16.mxu0 %v4963_v44  ;;  %v354_v43 = vld [vmem:[%s5449_s8 + $0x228] sm:$0xff]  ;;  %v4914_v44 = vcombine.low %v422_v29, %v426_v31 }
  0xbd   : > { %3994 = vmatprep.subr.bf16.mxu1 %v4899_v45  ;;  %v4850_v45 = vcombine.low %v358_v32, %v362_v33  ;;  %v4843_v46 = vcombine.high %v350_v42, %v354_v43  ;;  %v506_v25 = vld [vmem:[%s5449_s8 + $0x6e8] sm:$0xff] }
  0xbe   : > { %3970 = vmatmul.mubr.bf16.vlgmr.msra.gmra.mxu0 %v5673_v47  ;;  %v4995_v29 = vcombine.high %v502_v24, %v506_v25  ;;  %v494_v32 = vld [vmem:[%s5449_s8 + $0x688] sm:$0xff] }
  0xbf   : > { %4020 = vmatpush1.bf16.msra.mxu0 %v4962_v49  ;;  %4051 = vmatprep.mubr.bf16.mxu0 %v5494_v60  ;;  %v598_v49 = vld [vmem:[%s5449_s8 + $0x9c8] sm:$0xff] }
  0xc0   : > { %3995 = vmatpush2.bf16.msra.mxu1 %v4898_v50  ;;  %4021 = vmatprep.subr.bf16.mxu0 %v4955_v51  ;;  %v602_v50 = vld [vmem:[%s5449_s8 + $0x9e8] sm:$0xff]  ;;  %v4906_v51 = vcombine.low %v414_v39, %v418_v41 }
  0xc1   : > { %3996 = vmatprep.subr.bf16.mxu1 %v4891_v52  ;;  %v4842_v52 = vcombine.low %v350_v42, %v354_v43  ;;  %v5091_v57 = vcombine.high %v598_v49, %v602_v50  ;;  %v498_v33 = vld [vmem:[%s5449_s8 + $0x6a8] sm:$0xff] }
  0xc2   : > { %v4987_v39 = vcombine.high %v494_v32, %v498_v33  ;;  %v486_v42 = vld [vmem:[%s5449_s8 + $0x648] sm:$0xff] }
  0xc3   : > { %4022 = vmatpush1.bf16.msra.mxu0 %v4954_v62  ;;  %v590_v62 = vld [vmem:[%s5449_s8 + $0x988] sm:$0xff] }
  0xc4   : > { %3997 = vmatpush2.bf16.msra.mxu1 %v4890_v63  ;;  %4023 = vmatprep.subr.bf16.mxu0 %v4947_v0  ;;  %v594_v63 = vld [vmem:[%s5449_s8 + $0x9a8] sm:$0xff]  ;;  %v5026_v0 = vcombine.low %v534_v23, %v538_v48 }
  0xc5   : > { %3998 = vmatprep.subr.bf16.mxu1 %v4883_v1  ;;  %v5090_v1 = vcombine.low %v598_v49, %v602_v50  ;;  %v5083_v3 = vcombine.high %v590_v62, %v594_v63  ;;  %v490_v43 = vld [vmem:[%s5449_s8 + $0x668] sm:$0xff] }
  0xc6   : > { %v4979_v23 = vcombine.high %v486_v42, %v490_v43  ;;  %v478_v49 = vld [vmem:[%s5449_s8 + $0x608] sm:$0xff] }
  0xc7   : > { %4024 = vmatpush1.bf16.msra.mxu0 %v4946_v6  ;;  %v582_v6 = vld [vmem:[%s5449_s8 + $0x948] sm:$0xff] }
  0xc8   : > { %3999 = vmatpush2.bf16.msra.mxu1 %v4882_v7  ;;  %4025 = vmatprep.subr.bf16.mxu0 %v4939_v8  ;;  %v586_v7 = vld [vmem:[%s5449_s8 + $0x968] sm:$0xff]  ;;  %v5018_v8 = vcombine.low %v526_v58, %v530_v61 }
  0xc9   : > { %4000 = vmatprep.subr.bf16.mxu1 %v4875_v9  ;;  %v5082_v9 = vcombine.low %v590_v62, %v594_v63  ;;  %v5075_v11 = vcombine.high %v582_v6, %v586_v7  ;;  %v482_v50 = vld [vmem:[%s5449_s8 + $0x628] sm:$0xff] }
  0xca   : > { %v4971_v58 = vcombine.high %v478_v49, %v482_v50  ;;  %v726_v62 = vld [vmem:[%s5449_s8 + $0xdc8] sm:$0xff] }
  0xcb   : > { %4026 = vmatpush1.bf16.msra.mxu0 %v4938_v14  ;;  %v574_v14 = vld [vmem:[%s5449_s8 + $0x908] sm:$0xff] }
  0xcc   : > { %4001 = vmatpush2.bf16.msra.mxu1 %v4874_v15  ;;  %4027 = vmatprep.subr.bf16.mxu0 %v4931_v16  ;;  %v578_v15 = vld [vmem:[%s5449_s8 + $0x928] sm:$0xff]  ;;  %v5010_v16 = vcombine.low %v518_v4, %v522_v5 }
  0xcd   : > { %4002 = vmatprep.subr.bf16.mxu1 %v4867_v18  ;;  %v5074_v18 = vcombine.low %v582_v6, %v586_v7  ;;  %v5067_v22 = vcombine.high %v574_v14, %v578_v15  ;;  %v730_v63 = vld [vmem:[%s5449_s8 + $0xde8] sm:$0xff] }
  0xce   : > { %v5219_v4 = vcombine.high %v726_v62, %v730_v63  ;;  %v718_v6 = vld [vmem:[%s5449_s8 + $0xd88] sm:$0xff] }
  0xcf   : > { %4028 = vmatpush1.bf16.msra.mxu0 %v4930_v54  ;;  %v566_v54 = vld [vmem:[%s5449_s8 + $0x8c8] sm:$0xff] }
  0xd0   : > { %4003 = vmatpush2.bf16.msra.mxu1 %v4866_v26  ;;  %4029 = vmatprep.subr.bf16.mxu0 %v4923_v27  ;;  %v570_v26 = vld [vmem:[%s5449_s8 + $0x8e8] sm:$0xff]  ;;  %v5002_v27 = vcombine.low %v510_v12, %v514_v13 }
  0xd1   : > { %4004 = vmatprep.subr.bf16.mxu1 %v4859_v55  ;;  %v5066_v55 = vcombine.low %v574_v14, %v578_v15  ;;  %v5059_v31 = vcombine.high %v566_v54, %v570_v26  ;;  %v722_v7 = vld [vmem:[%s5449_s8 + $0xda8] sm:$0xff] }
  0xd2   : > { %v5211_v12 = vcombine.high %v718_v6, %v722_v7  ;;  %v710_v14 = vld [vmem:[%s5449_s8 + $0xd48] sm:$0xff] }
  0xd3   : > { %4030 = vmatpush1.bf16.msra.mxu0 %v4922_v34  ;;  %v558_v34 = vld [vmem:[%s5449_s8 + $0x888] sm:$0xff] }
  0xd4   : > { %4005 = vmatpush2.bf16.msra.mxu1 %v4858_v35  ;;  %4031 = vmatprep.subr.bf16.mxu0 %v4915_v36  ;;  %v562_v35 = vld [vmem:[%s5449_s8 + $0x8a8] sm:$0xff]  ;;  %v4994_v36 = vcombine.low %v502_v24, %v506_v25 }
  0xd5   : > { %4006 = vmatprep.subr.bf16.mxu1 %v4851_v38  ;;  %v5058_v38 = vcombine.low %v566_v54, %v570_v26  ;;  %v5051_v41 = vcombine.high %v558_v34, %v562_v35  ;;  %v714_v15 = vld [vmem:[%s5449_s8 + $0xd68] sm:$0xff] }
  0xd6   : > { %v5203_v24 = vcombine.high %v710_v14, %v714_v15  ;;  %v702_v54 = vld [vmem:[%s5449_s8 + $0xd08] sm:$0xff] }
  0xd7   : > { %4032 = vmatpush1.bf16.msra.mxu0 %v4914_v44  ;;  %v550_v44 = vld [vmem:[%s5449_s8 + $0x848] sm:$0xff] }
  0xd8   : > { %4007 = vmatpush2.bf16.msra.mxu1 %v4850_v45  ;;  %4033 = vmatprep.subr.bf16.mxu0 %v4907_v20  ;;  %v554_v45 = vld [vmem:[%s5449_s8 + $0x868] sm:$0xff]  ;;  %v4986_v20 = vcombine.low %v494_v32, %v498_v33 }
  0xd9   : > { %4008 = vmatprep.subr.bf16.mxu1 %v4843_v46  ;;  %v5050_v46 = vcombine.low %v558_v34, %v562_v35  ;;  %v5043_v48 = vcombine.high %v550_v44, %v554_v45  ;;  %v706_v26 = vld [vmem:[%s5449_s8 + $0xd28] sm:$0xff] }
  0xda   : > { %v5195_v32 = vcombine.high %v702_v54, %v706_v26  ;;  %v694_v34 = vld [vmem:[%s5449_s8 + $0xcc8] sm:$0xff] }
  0xdb   : > { %4034 = vmatpush1.bf16.msra.mxu0 %v4906_v51  ;;  %v542_v51 = vld [vmem:[%s5449_s8 + $0x808] sm:$0xff] }
  0xdc   : > { %4009 = vmatpush2.bf16.msra.mxu1 %v4842_v52  ;;  %4035 = vmatprep.subr.bf16.mxu0 %v5027_v56  ;;  %v546_v52 = vld [vmem:[%s5449_s8 + $0x828] sm:$0xff]  ;;  %v4978_v56 = vcombine.low %v486_v42, %v490_v43 }
  0xdd   : > { %4060 = vmatprep.subr.bf16.mxu1 %v5091_v57  ;;  %v5042_v57 = vcombine.low %v550_v44, %v554_v45  ;;  %v5035_v61 = vcombine.high %v542_v51, %v546_v52  ;;  %v698_v35 = vld [vmem:[%s5449_s8 + $0xce8] sm:$0xff] }
  0xde   : > { %v5187_v42 = vcombine.high %v694_v34, %v698_v35  ;;  %v686_v44 = vld [vmem:[%s5449_s8 + $0xc88] sm:$0xff] }
  0xdf   : > { %4011 = vmatmul.mubr.bf16.vlgmr.msra.gmra.mxu1 %v5540_v17  ;;  %4036 = vmatpush2.bf16.msra.mxu0 %v5026_v0  ;;  %v662_v0 = vld [vmem:[%s5449_s8 + $0xbc8] sm:$0xff] }
  0xe0   : > { %4061 = vmatpush1.bf16.msra.mxu1 %v5090_v1  ;;  %4037 = vmatprep.subr.bf16.mxu0 %v5019_v2  ;;  %v666_v1 = vld [vmem:[%s5449_s8 + $0xbe8] sm:$0xff]  ;;  %v4970_v2 = vcombine.low %v478_v49, %v482_v50 }
  0xe1   : > { %4062 = vmatprep.subr.bf16.mxu1 %v5083_v3  ;;  %4092 = vmatprep.mubr.bf16.mxu1 %v5558_v28  ;;  %v5034_v3 = vcombine.low %v542_v51, %v546_v52  ;;  %v5155_v5 = vcombine.high %v662_v0, %v666_v1  ;;  %v690_v45 = vld [vmem:[%s5449_s8 + $0xca8] sm:$0xff] }
  0xe2   : > { %v5179_v49 = vcombine.high %v686_v44, %v690_v45  ;;  %v678_v51 = vld [vmem:[%s5449_s8 + $0xc48] sm:$0xff] }
  0xe3   : > { %4038 = vmatpush2.bf16.msra.mxu0 %v5018_v8  ;;  %v654_v8 = vld [vmem:[%s5449_s8 + $0xb88] sm:$0xff] }
  0xe4   : > { %4063 = vmatpush1.bf16.msra.mxu1 %v5082_v9  ;;  %4039 = vmatprep.subr.bf16.mxu0 %v5011_v10  ;;  %v658_v9 = vld [vmem:[%s5449_s8 + $0xba8] sm:$0xff]  ;;  %v5218_v10 = vcombine.low %v726_v62, %v730_v63 }
  0xe5   : > { %4064 = vmatprep.subr.bf16.mxu1 %v5075_v11  ;;  %v5154_v11 = vcombine.low %v662_v0, %v666_v1  ;;  %v5147_v13 = vcombine.high %v654_v8, %v658_v9  ;;  %v682_v52 = vld [vmem:[%s5449_s8 + $0xc68] sm:$0xff] }
  0xe6   : > { %v5171_v62 = vcombine.high %v678_v51, %v682_v52  ;;  %v670_v0 = vld [vmem:[%s5449_s8 + $0xc08] sm:$0xff] }
  0xe7   : > { %4040 = vmatpush2.bf16.msra.mxu0 %v5010_v16  ;;  %v646_v16 = vld [vmem:[%s5449_s8 + $0xb48] sm:$0xff] }
  0xe8   : > { %4065 = vmatpush1.bf16.msra.mxu1 %v5074_v18  ;;  %4041 = vmatprep.subr.bf16.mxu0 %v5003_v19  ;;  %v650_v18 = vld [vmem:[%s5449_s8 + $0xb68] sm:$0xff]  ;;  %v5210_v19 = vcombine.low %v718_v6, %v722_v7 }
  0xe9   : > { %4066 = vmatprep.subr.bf16.mxu1 %v5067_v22  ;;  %v5146_v22 = vcombine.low %v654_v8, %v658_v9  ;;  %v5139_v25 = vcombine.high %v646_v16, %v650_v18  ;;  %v674_v1 = vld [vmem:[%s5449_s8 + $0xc28] sm:$0xff] }
  0xea   : > { %v5163_v6 = vcombine.high %v670_v0, %v674_v1  ;;  %v790_v8 = vld [vmem:[%s5449_s8 + $0xfc8] sm:$0xff] }
  0xeb   : > { %4042 = vmatpush2.bf16.msra.mxu0 %v5002_v27  ;;  %v638_v27 = vld [vmem:[%s5449_s8 + $0xb08] sm:$0xff] }
  0xec   : > { %4067 = vmatpush1.bf16.msra.mxu1 %v5066_v55  ;;  %4043 = vmatprep.subr.bf16.mxu0 %v4995_v29  ;;  %v642_v55 = vld [vmem:[%s5449_s8 + $0xb28] sm:$0xff]  ;;  %v5202_v29 = vcombine.low %v710_v14, %v714_v15 }
  0xed   : > { %4068 = vmatprep.subr.bf16.mxu1 %v5059_v31  ;;  %v5138_v31 = vcombine.low %v646_v16, %v650_v18  ;;  %v5131_v33 = vcombine.high %v638_v27, %v642_v55  ;;  %v794_v9 = vld [vmem:[%s5449_s8 + $0xfe8] sm:$0xff] }
  0xee   : > { %v5283_v14 = vcombine.high %v790_v8, %v794_v9  ;;  %v782_v16 = vld [vmem:[%s5449_s8 + $0xf88] sm:$0xff] }
  0xef   : > { %4044 = vmatpush2.bf16.msra.mxu0 %v4994_v36  ;;  %v630_v36 = vld [vmem:[%s5449_s8 + $0xac8] sm:$0xff] }
  0xf0   : > { %4069 = vmatpush1.bf16.msra.mxu1 %v5058_v38  ;;  %4045 = vmatprep.subr.bf16.mxu0 %v4987_v39  ;;  %v634_v38 = vld [vmem:[%s5449_s8 + $0xae8] sm:$0xff]  ;;  %v5194_v39 = vcombine.low %v702_v54, %v706_v26 }
  0xf1   : > { %4070 = vmatprep.subr.bf16.mxu1 %v5051_v41  ;;  %v5130_v41 = vcombine.low %v638_v27, %v642_v55  ;;  %v5123_v43 = vcombine.high %v630_v36, %v634_v38  ;;  %v786_v18 = vld [vmem:[%s5449_s8 + $0xfa8] sm:$0xff] }
  0xf2   : > { %v5275_v54 = vcombine.high %v782_v16, %v786_v18  ;;  %v774_v27 = vld [vmem:[%s5449_s8 + $0xf48] sm:$0xff] }
  0xf3   : > { %4046 = vmatpush2.bf16.msra.mxu0 %v4986_v20  ;;  %v622_v20 = vld [vmem:[%s5449_s8 + $0xa88] sm:$0xff] }
  0xf4   : > { %4071 = vmatpush1.bf16.msra.mxu1 %v5050_v46  ;;  %4047 = vmatprep.subr.bf16.mxu0 %v4979_v23  ;;  %v626_v46 = vld [vmem:[%s5449_s8 + $0xaa8] sm:$0xff]  ;;  %v5186_v23 = vcombine.low %v694_v34, %v698_v35  ;;  %v5274_v34 = vcombine.low %v782_v16, %v786_v18 }
  0xf5   : > { %4072 = vmatprep.subr.bf16.mxu1 %v5043_v48  ;;  %v5122_v48 = vcombine.low %v630_v36, %v634_v38  ;;  %v5115_v50 = vcombine.high %v622_v20, %v626_v46  ;;  %v778_v55 = vld [vmem:[%s5449_s8 + $0xf68] sm:$0xff] }
  0xf7   : > { %4048 = vmatpush2.bf16.msra.mxu0 %v4978_v56  ;;  %v614_v56 = vld [vmem:[%s5449_s8 + $0xa48] sm:$0xff] }
  0xf8   : > { %4073 = vmatpush1.bf16.msra.mxu1 %v5042_v57  ;;  %4049 = vmatprep.subr.bf16.mxu0 %v4971_v58  ;;  %v618_v57 = vld [vmem:[%s5449_s8 + $0xa68] sm:$0xff]  ;;  %v5178_v58 = vcombine.low %v686_v44, %v690_v45 }
  0xf9   : > { %4074 = vmatprep.subr.bf16.mxu1 %v5035_v61  ;;  %v5114_v61 = vcombine.low %v622_v20, %v626_v46  ;;  %v5107_v63 = vcombine.high %v614_v56, %v618_v57  ;;  %v770_v44 = vld [vmem:[%s5449_s8 + $0xf28] sm:$0xff] }
  0xfa   : > { %v830_v46 = vld [vmem:[%s5449_s8 + $0x1108] sm:$0xff] }
  0xfb   : > { %4050 = vmatpush2.bf16.msra.mxu0 %v4970_v2  ;;  %v606_v2 = vld [vmem:[%s5449_s8 + $0xa08] sm:$0xff] }
  0xfc   : > { %4075 = vmatpush1.bf16.msra.mxu1 %v5034_v3  ;;  %4101 = vmatprep.subr.bf16.mxu0 %v5219_v4  ;;  %v610_v3 = vld [vmem:[%s5449_s8 + $0xa28] sm:$0xff]  ;;  %v5170_v4 = vcombine.low %v678_v51, %v682_v52 }
  0xfd   : > { %4076 = vmatprep.subr.bf16.mxu1 %v5155_v5  ;;  %v5106_v5 = vcombine.low %v614_v56, %v618_v57  ;;  %v5099_v7 = vcombine.high %v606_v2, %v610_v3 }
  0xfe   : > { %4052 = vmatmul.mubr.bf16.vlgmr.msra.gmra.mxu0 %v5549_v21 }
  0xff   : > { %4102 = vmatpush1.bf16.msra.mxu0 %v5218_v10  ;;  %4133 = vmatprep.mubr.bf16.mxu0 %v5565_v30  ;;  %v854_v10 = vld [vmem:[%s5449_s8 + $0x11c8] sm:$0xff] }
 0x100   : > { %4077 = vmatpush2.bf16.msra.mxu1 %v5154_v11  ;;  %4103 = vmatprep.subr.bf16.mxu0 %v5211_v12  ;;  %v858_v11 = vld [vmem:[%s5449_s8 + $0x11e8] sm:$0xff]  ;;  %v5162_v12 = vcombine.low %v670_v0, %v674_v1 }
 0x101   : > { %4078 = vmatprep.subr.bf16.mxu1 %v5147_v13  ;;  %v5098_v13 = vcombine.low %v606_v2, %v610_v3  ;;  %v5347_v15 = vcombine.high %v854_v10, %v858_v11 }
 0x103   : > { %4104 = vmatpush1.bf16.msra.mxu0 %v5210_v19  ;;  %v846_v19 = vld [vmem:[%s5449_s8 + $0x1188] sm:$0xff] }
 0x104   : > { %4079 = vmatpush2.bf16.msra.mxu1 %v5146_v22  ;;  %4105 = vmatprep.subr.bf16.mxu0 %v5203_v24  ;;  %v850_v22 = vld [vmem:[%s5449_s8 + $0x11a8] sm:$0xff]  ;;  %v5282_v24 = vcombine.low %v790_v8, %v794_v9 }
 0x105   : > { %4080 = vmatprep.subr.bf16.mxu1 %v5139_v25  ;;  %v5346_v25 = vcombine.low %v854_v10, %v858_v11  ;;  %v5339_v26 = vcombine.high %v846_v19, %v850_v22  ;;  %v5338_v38 = vcombine.low %v846_v19, %v850_v22 }
 0x107   : > { %4106 = vmatpush1.bf16.msra.mxu0 %v5202_v29 }
 0x108   : > { %4081 = vmatpush2.bf16.msra.mxu1 %v5138_v31  ;;  %4107 = vmatprep.subr.bf16.mxu0 %v5195_v32  ;;  %v838_v31 = vld [vmem:[%s5449_s8 + $0x1148] sm:$0xff] }
 0x109   : > { %4082 = vmatprep.subr.bf16.mxu1 %v5131_v33  ;;  %v842_v32 = vld [vmem:[%s5449_s8 + $0x1168] sm:$0xff] }
 0x10a   : > { %v5330_v51 = vcombine.low %v838_v31, %v842_v32 }
 0x10b   : > { %4108 = vmatpush1.bf16.msra.mxu0 %v5194_v39  ;;  %v5267_v39 = vcombine.high %v774_v27, %v778_v55 }
 0x10c   : > { %4083 = vmatpush2.bf16.msra.mxu1 %v5130_v41  ;;  %4109 = vmatprep.subr.bf16.mxu0 %v5187_v42  ;;  %v5331_v42 = vcombine.high %v838_v31, %v842_v32  ;;  %v343_v32 = vld [vmem:[%s5449_s8 + $0x1d0] sm:$0xff] }
 0x10d   : > { %4084 = vmatprep.subr.bf16.mxu1 %v5123_v43  ;;  %v766_v43 = vld [vmem:[%s5449_s8 + $0xf08] sm:$0xff] }
 0x10e   : > { %v5259_v52 = vcombine.high %v766_v43, %v770_v44  ;;  %v5258_v0 = vcombine.low %v766_v43, %v770_v44  ;;  %v335_v43 = vld [vmem:[%s5449_s8 + $0x190] sm:$0xff] }
 0x10f   : > { %4110 = vmatpush1.bf16.msra.mxu0 %v5186_v23  ;;  %v834_v23 = vld [vmem:[%s5449_s8 + $0x1128] sm:$0xff]  ;;  %v339_v44 = vld [vmem:[%s5449_s8 + $0x1b0] sm:$0xff] }
 0x110   : > { %4085 = vmatpush2.bf16.msra.mxu1 %v5122_v48  ;;  %4111 = vmatprep.subr.bf16.mxu0 %v5179_v49  ;;  %v5266_v49 = vcombine.low %v774_v27, %v778_v55  ;;  %v5323_v57 = vcombine.high %v830_v46, %v834_v23  ;;  %v5322_v1 = vcombine.low %v830_v46, %v834_v23  ;;  %v467_v46 = vld [vmem:[%s5449_s8 + $0x5b0] sm:$0xff] }
 0x111   : > { %4086 = vmatprep.subr.bf16.mxu1 %v5115_v50 }
 0x113   : > { %4112 = vmatpush1.bf16.msra.mxu0 %v5178_v58  ;;  %v758_v58 = vld [vmem:[%s5449_s8 + $0xec8] sm:$0xff] }
 0x114   : > { %4087 = vmatpush2.bf16.msra.mxu1 %v5114_v61  ;;  %4113 = vmatprep.subr.bf16.mxu0 %v5171_v62  ;;  %v762_v61 = vld [vmem:[%s5449_s8 + $0xee8] sm:$0xff] }
 0x115   : > { %4088 = vmatprep.subr.bf16.mxu1 %v5107_v63  ;;  %v822_v62 = vld [vmem:[%s5449_s8 + $0x10c8] sm:$0xff]  ;;  %v5251_v2 = vcombine.high %v758_v58, %v762_v61  ;;  %v5250_v8 = vcombine.low %v758_v58, %v762_v61  ;;  %v4828_v58 = vcombine.low %v335_v43, %v339_v44 }
 0x116   : > { %v826_v63 = vld [vmem:[%s5449_s8 + $0x10e8] sm:$0xff] }
 0x117   : > { %4114 = vmatpush1.bf16.msra.mxu0 %v5170_v4  ;;  %v5315_v3 = vcombine.high %v822_v62, %v826_v63  ;;  %v750_v4 = vld [vmem:[%s5449_s8 + $0xe88] sm:$0xff]  ;;  %v5314_v9 = vcombine.low %v822_v62, %v826_v63 }
 0x118   : > { %4089 = vmatpush2.bf16.msra.mxu1 %v5106_v5  ;;  %4115 = vmatprep.subr.bf16.mxu0 %v5163_v6  ;;  %v754_v5 = vld [vmem:[%s5449_s8 + $0xea8] sm:$0xff] }
 0x119   : > { %4090 = vmatprep.subr.bf16.mxu1 %v5099_v7  ;;  %v814_v6 = vld [vmem:[%s5449_s8 + $0x1088] sm:$0xff]  ;;  %v5243_v10 = vcombine.high %v750_v4, %v754_v5  ;;  %v5242_v16 = vcombine.low %v750_v4, %v754_v5 }
 0x11a   : > { %v818_v7 = vld [vmem:[%s5449_s8 + $0x10a8] sm:$0xff] }
 0x11b   : > { %4116 = vmatpush1.bf16.msra.mxu0 %v5162_v12  ;;  %v5307_v11 = vcombine.high %v814_v6, %v818_v7  ;;  %v742_v12 = vld [vmem:[%s5449_s8 + $0xe48] sm:$0xff]  ;;  %v5306_v18 = vcombine.low %v814_v6, %v818_v7  ;;  %v311_v7 = vld [vmem:[%s5449_s8 + $0xd0] sm:$0xff] }
 0x11c   : > { %4091 = vmatpush2.bf16.msra.mxu1 %v5098_v13  ;;  %4117 = vmatprep.subr.bf16.mxu0 %v5283_v14  ;;  %v746_v13 = vld [vmem:[%s5449_s8 + $0xe68] sm:$0xff] }
 0x11d   : > { %4142 = vmatprep.subr.bf16.mxu1 %v5347_v15  ;;  %v3807_v29 = vpop.f32.mrf.mxu0  ;;  %v806_v14 = vld [vmem:[%s5449_s8 + $0x1048] sm:$0xff]  ;;  %v5235_v19 = vcombine.high %v742_v12, %v746_v13  ;;  %v5234_v27 = vcombine.low %v742_v12, %v746_v13 }
 0x11e   : > { %v810_v15 = vld [vmem:[%s5449_s8 + $0x1068] sm:$0xff] }
 0x11f   : > { %v3848_v33 = vpop.f32.mrf.mxu1  ;;  %4093 = vmatmul.mubr.bf16.vlgmr.msra.gmra.mxu1 %v5630_v37  ;;  %4118 = vmatpush2.bf16.msra.mxu0 %v5282_v24  ;;  %v3809_v36 = vpop.f32.mrf.mxu0  ;;  %v5299_v22 = vcombine.high %v806_v14, %v810_v15  ;;  %v734_v24 = vld [vmem:[%s5449_s8 + $0xe08] sm:$0xff]  ;;  %v5298_v55 = vcombine.low %v806_v14, %v810_v15  ;;  %v303_v15 = vld [vmem:[%s5449_s8 + $0x90] sm:$0xff] }
 0x120   : > { %v5784_v35 = vadd.f32 %v3848_v33, %v3807_v29  ;;  %4143 = vmatpush1.bf16.msra.mxu1 %v5346_v25  ;;  %4119 = vmatprep.subr.bf16.mxu0 %v5275_v54  ;;  %v738_v25 = vld [vmem:[%s5449_s8 + $0xe28] sm:$0xff]  ;;  %v347_v33 = vld [vmem:[%s5449_s8 + $0x1f0] sm:$0xff] }
 0x121   : > { %v3850_v41 = vpop.f32.mrf.mxu1  ;;  %4144 = vmatprep.subr.bf16.mxu1 %v5339_v26  ;;  %4174 = vmatprep.mubr.bf16.mxu1 %v5393_v53  ;;  %v3811_v20 = vpop.f32.mrf.mxu0  ;;  %v798_v54 = vld [vmem:[%s5449_s8 + $0x1008] sm:$0xff]  ;;  %v5227_v29 = vcombine.high %v734_v24, %v738_v25  ;;  %v4836_v23 = vcombine.low %v343_v32, %v347_v33 }
 0x122   : > { %v5789_v45 = vadd.f32 %v3850_v41, %v3809_v36  ;;  %v802_v26 = vld [vmem:[%s5449_s8 + $0x1028] sm:$0xff]  ;;  %v475_v36 = vld [vmem:[%s5449_s8 + $0x5f0] sm:$0xff]  ;;  %v4837_v41 = vcombine.high %v343_v32, %v347_v33 }
 0x123   : > { %v3852_v48 = vpop.f32.mrf.mxu1  ;;  %4120 = vmatpush2.bf16.msra.mxu0 %v5274_v34  ;;  %v3812_v50 = vpop.f32.mrf.mxu0  ;;  %v5291_v31 = vcombine.high %v798_v54, %v802_v26  ;;  %v471_v34 = vld [vmem:[%s5449_s8 + $0x5d0] sm:$0xff] }
 0x124   : > { %4145 = vmatpush1.bf16.msra.mxu1 %v5338_v38  ;;  %4121 = vmatprep.subr.bf16.mxu0 %v5267_v39  ;;  %v5226_v38 = vcombine.low %v734_v24, %v738_v25  ;;  %v5290_v39 = vcombine.low %v798_v54, %v802_v26  ;;  %v463_v20 = vld [vmem:[%s5449_s8 + $0x590] sm:$0xff]  ;;  %v4964_v48 = vcombine.low %v471_v34, %v475_v36 }
 0x125   : > { %v3853_v56 = vpop.f32.mrf.mxu1  ;;  %4146 = vmatprep.subr.bf16.mxu1 %v5331_v42  ;;  %v4965_v42 = vcombine.high %v471_v34, %v475_v36  ;;  %v4957_v50 = vcombine.high %v463_v20, %v467_v46  ;;  %v4956_v61 = vcombine.low %v463_v20, %v467_v46  ;;  %v295_v26 = vld [vmem:[%s5449_s8 + $0x50] sm:$0xff] }
 0x126   : > { %v455_v56 = vld [vmem:[%s5449_s8 + $0x550] sm:$0xff] }
 0x127   : > { %4122 = vmatpush2.bf16.msra.mxu0 %v5266_v49  ;;  %v4829_v49 = vcombine.high %v335_v43, %v339_v44  ;;  %v287_v36 = vld [vmem:[%s5449_s8 + $0x10] sm:$0xff] }
 0x128   : > { %4147 = vmatpush1.bf16.msra.mxu1 %v5330_v51  ;;  %4123 = vmatprep.subr.bf16.mxu0 %v5259_v52  ;;  %v327_v51 = vld [vmem:[%s5449_s8 + $0x150] sm:$0xff] }
 0x129   : > { %4148 = vmatprep.subr.bf16.mxu1 %v5323_v57  ;;  %v331_v52 = vld [vmem:[%s5449_s8 + $0x170] sm:$0xff] }
 0x12a   : > { %v459_v57 = vld [vmem:[%s5449_s8 + $0x570] sm:$0xff]  ;;  %v4821_v62 = vcombine.high %v327_v51, %v331_v52 }
 0x12b   : > { %4124 = vmatpush2.bf16.msra.mxu0 %v5258_v0  ;;  %v4949_v63 = vcombine.high %v455_v56, %v459_v57  ;;  %v319_v0 = vld [vmem:[%s5449_s8 + $0x110] sm:$0xff]  ;;  %v4948_v4 = vcombine.low %v455_v56, %v459_v57 }
 0x12c   : > { %4149 = vmatpush1.bf16.msra.mxu1 %v5322_v1  ;;  %4125 = vmatprep.subr.bf16.mxu0 %v5251_v2  ;;  %v323_v1 = vld [vmem:[%s5449_s8 + $0x130] sm:$0xff] }
 0x12d   : > { %4150 = vmatprep.subr.bf16.mxu1 %v5315_v3  ;;  %v447_v2 = vld [vmem:[%s5449_s8 + $0x510] sm:$0xff]  ;;  %v4813_v5 = vcombine.high %v319_v0, %v323_v1 }
 0x12e   : > { %v451_v3 = vld [vmem:[%s5449_s8 + $0x530] sm:$0xff] }
 0x12f   : > { %4126 = vmatpush2.bf16.msra.mxu0 %v5250_v8  ;;  %v4941_v6 = vcombine.high %v447_v2, %v451_v3  ;;  %v315_v8 = vld [vmem:[%s5449_s8 + $0xf0] sm:$0xff]  ;;  %v4940_v12 = vcombine.low %v447_v2, %v451_v3 }
 0x130   : > { %4151 = vmatpush1.bf16.msra.mxu1 %v5314_v9  ;;  %4127 = vmatprep.subr.bf16.mxu0 %v5243_v10  ;;  %v439_v9 = vld [vmem:[%s5449_s8 + $0x4d0] sm:$0xff]  ;;  %v4805_v13 = vcombine.high %v311_v7, %v315_v8 }
 0x131   : > { %4152 = vmatprep.subr.bf16.mxu1 %v5307_v11  ;;  %v443_v10 = vld [vmem:[%s5449_s8 + $0x4f0] sm:$0xff]  ;;  %v4812_v11 = vcombine.low %v319_v0, %v323_v1 }
 0x132   : > { %v4933_v14 = vcombine.high %v439_v9, %v443_v10  ;;  %v4932_v24 = vcombine.low %v439_v9, %v443_v10  ;;  %v407_v46 = vld [vmem:[%s5449_s8 + $0x3d0] sm:$0xff] }
 0x133   : > { %4128 = vmatpush2.bf16.msra.mxu0 %v5242_v16  ;;  %v307_v16 = vld [vmem:[%s5449_s8 + $0xb0] sm:$0xff] }
 0x134   : > { %4153 = vmatpush1.bf16.msra.mxu1 %v5306_v18  ;;  %4129 = vmatprep.subr.bf16.mxu0 %v5235_v19  ;;  %v431_v18 = vld [vmem:[%s5449_s8 + $0x490] sm:$0xff]  ;;  %v4797_v25 = vcombine.high %v303_v15, %v307_v16 }
 0x135   : > { %4154 = vmatprep.subr.bf16.mxu1 %v5299_v22  ;;  %v435_v19 = vld [vmem:[%s5449_s8 + $0x4b0] sm:$0xff]  ;;  %v4804_v22 = vcombine.low %v311_v7, %v315_v8 }
 0x136   : > { %v4925_v54 = vcombine.high %v431_v18, %v435_v19  ;;  %v4924_v32 = vcombine.low %v431_v18, %v435_v19  ;;  %v399_v57 = vld [vmem:[%s5449_s8 + $0x390] sm:$0xff] }
 0x137   : > { %4130 = vmatpush2.bf16.msra.mxu0 %v5234_v27  ;;  %v299_v27 = vld [vmem:[%s5449_s8 + $0x70] sm:$0xff] }
 0x138   : > { %4155 = vmatpush1.bf16.msra.mxu1 %v5298_v55  ;;  %4131 = vmatprep.subr.bf16.mxu0 %v5227_v29  ;;  %v423_v55 = vld [vmem:[%s5449_s8 + $0x450] sm:$0xff]  ;;  %v4789_v33 = vcombine.high %v295_v26, %v299_v27 }
 0x139   : > { %4156 = vmatprep.subr.bf16.mxu1 %v5291_v31  ;;  %v427_v29 = vld [vmem:[%s5449_s8 + $0x470] sm:$0xff]  ;;  %v4796_v31 = vcombine.low %v303_v15, %v307_v16 }
 0x13a   : > { %v4917_v34 = vcombine.high %v423_v55, %v427_v29  ;;  %v4916_v43 = vcombine.low %v423_v55, %v427_v29  ;;  %v391_v3 = vld [vmem:[%s5449_s8 + $0x350] sm:$0xff] }
 0x13b   : > { %4132 = vmatpush2.bf16.msra.mxu0 %v5226_v38  ;;  %v291_v38 = vld [vmem:[%s5449_s8 + $0x30] sm:$0xff] }
 0x13c   : > { %4157 = vmatpush1.bf16.msra.mxu1 %v5290_v39  ;;  %4183 = vmatprep.subr.bf16.mxu0 %v4837_v41  ;;  %v415_v39 = vld [vmem:[%s5449_s8 + $0x410] sm:$0xff]  ;;  %v4781_v44 = vcombine.high %v287_v36, %v291_v38 }
 0x13d   : > { %4224 = vmatprep.subr.bf16.mxu1 %v4965_v42  ;;  %v419_v41 = vld [vmem:[%s5449_s8 + $0x430] sm:$0xff]  ;;  %v4788_v42 = vcombine.low %v295_v26, %v299_v27 }
 0x13e   : > { %4134 = vmatmul.mubr.bf16.vlgmr.msra.gmra.mxu0 %v5636_v40  ;;  %v4909_v20 = vcombine.high %v415_v39, %v419_v41  ;;  %v387_v15 = vld [vmem:[%s5449_s8 + $0x330] sm:$0xff] }
 0x13f   : > { %4175 = vmatmul.mubr.bf16.vlgmr.msra.gmra.mxu1 %v5673_v47  ;;  %4184 = vmatpush1.bf16.msra.mxu0 %v4836_v23  ;;  %v4820_v47 = vcombine.low %v327_v51, %v331_v52  ;;  %v411_v23 = vld [vmem:[%s5449_s8 + $0x3f0] sm:$0xff]  ;;  %v4908_v51 = vcombine.low %v415_v39, %v419_v41 }
 0x140   : > { %4225 = vmatpush1.bf16.msra.mxu1 %v4964_v48  ;;  %4185 = vmatprep.subr.bf16.mxu0 %v4829_v49  ;;  %v535_v48 = vld [vmem:[%s5449_s8 + $0x7d0] sm:$0xff]  ;;  %v4901_v52 = vcombine.high %v407_v46, %v411_v23 }
 0x141   : > { %4226 = vmatprep.subr.bf16.mxu1 %v4957_v50  ;;  %4215 = vmatprep.mubr.bf16.mxu0 %v5490_v59  ;;  %v539_v49 = vld [vmem:[%s5449_s8 + $0x7f0] sm:$0xff]  ;;  %v4780_v50 = vcombine.low %v287_v36, %v291_v38 }
 0x142   : > { %4256 = vmatprep.mubr.bf16.mxu1 %v5494_v60  ;;  %v5029_v56 = vcombine.high %v535_v48, %v539_v49  ;;  %v5028_v0 = vcombine.low %v535_v48, %v539_v49  ;;  %v511_v18 = vld [vmem:[%s5449_s8 + $0x710] sm:$0xff] }
 0x143   : > { %4186 = vmatpush1.bf16.msra.mxu0 %v4828_v58  ;;  %v403_v58 = vld [vmem:[%s5449_s8 + $0x3b0] sm:$0xff] }
 0x144   : > { %4227 = vmatpush1.bf16.msra.mxu1 %v4956_v61  ;;  %4187 = vmatprep.subr.bf16.mxu0 %v4821_v62  ;;  %v527_v61 = vld [vmem:[%s5449_s8 + $0x790] sm:$0xff]  ;;  %v4893_v1 = vcombine.high %v399_v57, %v403_v58  ;;  %v4892_v8 = vcombine.low %v399_v57, %v403_v58 }
 0x145   : > { %4228 = vmatprep.subr.bf16.mxu1 %v4949_v63  ;;  %v531_v62 = vld [vmem:[%s5449_s8 + $0x7b0] sm:$0xff]  ;;  %v4900_v63 = vcombine.low %v407_v46, %v411_v23 }
 0x146   : > { %v5021_v2 = vcombine.high %v527_v61, %v531_v62  ;;  %v5020_v10 = vcombine.low %v527_v61, %v531_v62  ;;  %v515_v19 = vld [vmem:[%s5449_s8 + $0x730] sm:$0xff] }
 0x147   : > { %4188 = vmatpush1.bf16.msra.mxu0 %v4820_v47  ;;  %v395_v47 = vld [vmem:[%s5449_s8 + $0x370] sm:$0xff]  ;;  %v5005_v55 = vcombine.high %v511_v18, %v515_v19  ;;  %v5004_v36 = vcombine.low %v511_v18, %v515_v19 }
 0x148   : > { %4229 = vmatpush1.bf16.msra.mxu1 %v4948_v4  ;;  %4189 = vmatprep.subr.bf16.mxu0 %v4813_v5  ;;  %v519_v5 = vld [vmem:[%s5449_s8 + $0x750] sm:$0xff] }
 0x149   : > { %4230 = vmatprep.subr.bf16.mxu1 %v4941_v6  ;;  %v523_v6 = vld [vmem:[%s5449_s8 + $0x770] sm:$0xff] }
 0x14a   : > { %v375_v29 = vld [vmem:[%s5449_s8 + $0x2d0] sm:$0xff] }
 0x14b   : > { %4190 = vmatpush1.bf16.msra.mxu0 %v4812_v11  ;;  %v4885_v11 = vcombine.high %v391_v3, %v395_v47  ;;  %v367_v41 = vld [vmem:[%s5449_s8 + $0x290] sm:$0xff] }
 0x14c   : > { %4231 = vmatpush1.bf16.msra.mxu1 %v4940_v12  ;;  %4191 = vmatprep.subr.bf16.mxu0 %v4805_v13  ;;  %v5013_v13 = vcombine.high %v519_v5, %v523_v6  ;;  %v359_v49 = vld [vmem:[%s5449_s8 + $0x250] sm:$0xff] }
 0x14d   : > { %4232 = vmatprep.subr.bf16.mxu1 %v4933_v14  ;;  %v383_v14 = vld [vmem:[%s5449_s8 + $0x310] sm:$0xff] }
 0x14e   : > { %v4877_v26 = vcombine.high %v383_v14, %v387_v15  ;;  %v351_v62 = vld [vmem:[%s5449_s8 + $0x210] sm:$0xff] }
 0x14f   : > { %4192 = vmatpush1.bf16.msra.mxu0 %v4804_v22  ;;  %v591_v19 = vld [vmem:[%s5449_s8 + $0x990] sm:$0xff] }
 0x150   : > { %4233 = vmatpush1.bf16.msra.mxu1 %v4932_v24  ;;  %4193 = vmatprep.subr.bf16.mxu0 %v4797_v25  ;;  %v4884_v24 = vcombine.low %v391_v3, %v395_v47 }
 0x151   : > { %4234 = vmatprep.subr.bf16.mxu1 %v4925_v54  ;;  %v5012_v54 = vcombine.low %v519_v5, %v523_v6  ;;  %v599_v6 = vld [vmem:[%s5449_s8 + $0x9d0] sm:$0xff] }
 0x153   : > { %4194 = vmatpush1.bf16.msra.mxu0 %v4796_v31  ;;  %v379_v31 = vld [vmem:[%s5449_s8 + $0x2f0] sm:$0xff] }
 0x154   : > { %4235 = vmatpush1.bf16.msra.mxu1 %v4924_v32  ;;  %4195 = vmatprep.subr.bf16.mxu0 %v4789_v33  ;;  %v503_v32 = vld [vmem:[%s5449_s8 + $0x6d0] sm:$0xff]  ;;  %v4869_v38 = vcombine.high %v375_v29, %v379_v31 }
 0x155   : > { %4236 = vmatprep.subr.bf16.mxu1 %v4917_v34  ;;  %v507_v33 = vld [vmem:[%s5449_s8 + $0x6f0] sm:$0xff]  ;;  %v4876_v34 = vcombine.low %v383_v14, %v387_v15 }
 0x156   : > { %v4997_v39 = vcombine.high %v503_v32, %v507_v33  ;;  %v4996_v46 = vcombine.low %v503_v32, %v507_v33  ;;  %v272_v32 = vld [vmem:[#allocation2 + $0x30] sm:$0xff] }
 0x157   : > { %4196 = vmatpush1.bf16.msra.mxu0 %v4788_v42  ;;  %v371_v42 = vld [vmem:[%s5449_s8 + $0x2b0] sm:$0xff] }
 0x158   : > { %4237 = vmatpush1.bf16.msra.mxu1 %v4916_v43  ;;  %4197 = vmatprep.subr.bf16.mxu0 %v4781_v44  ;;  %v495_v43 = vld [vmem:[%s5449_s8 + $0x690] sm:$0xff]  ;;  %v4861_v23 = vcombine.high %v367_v41, %v371_v42 }
 0x159   : > { %4238 = vmatprep.subr.bf16.mxu1 %v4909_v20  ;;  %v499_v44 = vld [vmem:[%s5449_s8 + $0x6b0] sm:$0xff]  ;;  %v4868_v20 = vcombine.low %v375_v29, %v379_v31 }
 0x15a   : > { %v4989_v48 = vcombine.high %v495_v43, %v499_v44  ;;  %v4988_v57 = vcombine.low %v495_v43, %v499_v44  ;;  %v583_v29 = vld [vmem:[%s5449_s8 + $0x950] sm:$0xff] }
 0x15b   : > { %4198 = vmatpush1.bf16.msra.mxu0 %v4780_v50  ;;  %v363_v50 = vld [vmem:[%s5449_s8 + $0x270] sm:$0xff] }
 0x15c   : > { %4239 = vmatpush1.bf16.msra.mxu1 %v4908_v51  ;;  %4199 = vmatprep.subr.bf16.mxu0 %v4901_v52  ;;  %v487_v51 = vld [vmem:[%s5449_s8 + $0x650] sm:$0xff]  ;;  %v4853_v58 = vcombine.high %v359_v49, %v363_v50 }
 0x15d   : > { %4240 = vmatprep.subr.bf16.mxu1 %v5029_v56  ;;  %v491_v52 = vld [vmem:[%s5449_s8 + $0x670] sm:$0xff]  ;;  %v4860_v56 = vcombine.low %v367_v41, %v371_v42 }
 0x15e   : > { %v5855_v4 = vpop.f32.mrf.mxu0  ;;  %v4981_v61 = vcombine.high %v487_v51, %v491_v52  ;;  %v4980_v3 = vcombine.low %v487_v51, %v491_v52  ;;  %v587_v31 = vld [vmem:[%s5449_s8 + $0x970] sm:$0xff] }
 0x15f   : > { %v5859_v7 = vpop.f32.mrf.mxu1  ;;  %4200 = vmatpush2.bf16.msra.mxu0 %v4900_v63  ;;  %v355_v63 = vld [vmem:[%s5449_s8 + $0x230] sm:$0xff]  ;;  %v5077_v42 = vcombine.high %v583_v29, %v587_v31  ;;  %v5076_v51 = vcombine.low %v583_v29, %v587_v31 }
 0x160   : > { %4241 = vmatpush2.bf16.msra.mxu1 %v5028_v0  ;;  %v5861_v9 = vpop.f32.mrf.mxu0  ;;  %4201 = vmatprep.subr.bf16.mxu0 %v4893_v1  ;;  %v479_v0 = vld [vmem:[%s5449_s8 + $0x610] sm:$0xff]  ;;  %v4845_v47 = vcombine.high %v351_v62, %v355_v63 }
 0x161   : > { %v5863_v12 = vpop.f32.mrf.mxu1  ;;  %4242 = vmatprep.subr.bf16.mxu1 %v5021_v2  ;;  %v483_v1 = vld [vmem:[%s5449_s8 + $0x630] sm:$0xff]  ;;  %v4852_v2 = vcombine.low %v359_v49, %v363_v50 }
 0x162   : > { %v3893_v16 = vpop.f32.mrf.mxu0  ;;  %v4973_v5 = vcombine.high %v479_v0, %v483_v1  ;;  %v4972_v14 = vcombine.low %v479_v0, %v483_v1  ;;  %v707_v49 = vld [vmem:[%s5449_s8 + $0xd30] sm:$0xff] }
 0x163   : > { %v3934_v22 = vpop.f32.mrf.mxu1  ;;  %4202 = vmatpush2.bf16.msra.mxu0 %v4892_v8  ;;  %v603_v8 = vld [vmem:[%s5449_s8 + $0x9f0] sm:$0xff]  ;;  %v3890_v16 = vadd.f32 %v5855_v4, %v5784_v35 }
 0x164   : > { %4243 = vmatpush2.bf16.msra.mxu1 %v5020_v10  ;;  %v3894_v25 = vpop.f32.mrf.mxu0  ;;  %4203 = vmatprep.subr.bf16.mxu0 %v4885_v11  ;;  %v727_v10 = vld [vmem:[%s5449_s8 + $0xdd0] sm:$0xff]  ;;  %v5093_v15 = vcombine.high %v599_v6, %v603_v8 }
 0x165   : > { %v3935_v27 = vpop.f32.mrf.mxu1  ;;  %4244 = vmatprep.subr.bf16.mxu1 %v5013_v13  ;;  %v731_v11 = vld [vmem:[%s5449_s8 + $0xdf0] sm:$0xff]  ;;  %v4844_v13 = vcombine.low %v351_v62, %v355_v63  ;;  %v3931_v35 = vadd.f32 %v5859_v7, %v3890_v16 }
 0x166   : > { %v5221_v18 = vcombine.high %v727_v10, %v731_v11  ;;  %v595_v22 = vld [vmem:[%s5449_s8 + $0x9b0] sm:$0xff]  ;;  %v5220_v27 = vcombine.low %v727_v10, %v731_v11 }
 0x167   : > { %4204 = vmatpush2.bf16.msra.mxu0 %v4884_v24  ;;  %v719_v24 = vld [vmem:[%s5449_s8 + $0xd90] sm:$0xff]  ;;  %v5084_v7 = vcombine.low %v591_v19, %v595_v22 }
 0x168   : > { %4245 = vmatpush2.bf16.msra.mxu1 %v5012_v54  ;;  %4205 = vmatprep.subr.bf16.mxu0 %v4877_v26  ;;  %v723_v25 = vld [vmem:[%s5449_s8 + $0xdb0] sm:$0xff]  ;;  %v3892_v54 = vadd.f32 %v5861_v9, %v5789_v45  ;;  %v5092_v26 = vcombine.low %v599_v6, %v603_v8 }
 0x169   : > { %4246 = vmatprep.subr.bf16.mxu1 %v5005_v55  ;;  %v5085_v55 = vcombine.high %v591_v19, %v595_v22  ;;  %v5213_v4 = vcombine.high %v719_v24, %v723_v25  ;;  %v5212_v41 = vcombine.low %v719_v24, %v723_v25  ;;  %v571_v62 = vld [vmem:[%s5449_s8 + $0x8f0] sm:$0xff] }
 0x16a   : > { %v3933_v45 = vadd.f32 %v5863_v12, %v3892_v54  ;;  %v579_v12 = vld [vmem:[%s5449_s8 + $0x930] sm:$0xff] }
 0x16b   : > { %4206 = vmatpush2.bf16.msra.mxu0 %v4876_v34  ;;  %v711_v34 = vld [vmem:[%s5449_s8 + $0xd50] sm:$0xff] }
 0x16c   : > { %4247 = vmatpush2.bf16.msra.mxu1 %v5004_v36  ;;  %4207 = vmatprep.subr.bf16.mxu0 %v4869_v38  ;;  %v715_v36 = vld [vmem:[%s5449_s8 + $0xd70] sm:$0xff]  ;;  %v273_v38 = vld [vmem:[#allocation2] sm:$0xff] }
 0x16d   : > { %4248 = vmatprep.subr.bf16.mxu1 %v4997_v39  ;;  %v695_v63 = vld [vmem:[%s5449_s8 + $0xcd0] sm:$0xff] }
 0x16e   : > { %v699_v0 = vld [vmem:[%s5449_s8 + $0xcf0] sm:$0xff] }
 0x16f   : > { %4208 = vmatpush2.bf16.msra.mxu0 %v4868_v20  ;;  %v5205_v20 = vcombine.high %v711_v34, %v715_v36  ;;  %v563_v6 = vld [vmem:[%s5449_s8 + $0x8b0] sm:$0xff] }
 0x170   : > { %4249 = vmatpush2.bf16.msra.mxu1 %v4996_v46  ;;  %4209 = vmatprep.subr.bf16.mxu0 %v4861_v23  ;;  %v575_v46 = vld [vmem:[%s5449_s8 + $0x910] sm:$0xff] }
 0x171   : > { %4250 = vmatprep.subr.bf16.mxu1 %v4989_v48  ;;  %v703_v48 = vld [vmem:[%s5449_s8 + $0xd10] sm:$0xff]  ;;  %v5068_v1 = vcombine.low %v575_v46, %v579_v12 }
 0x172   : > { %v687_v8 = vld [vmem:[%s5449_s8 + $0xc90] sm:$0xff] }
 0x173   : > { %4210 = vmatpush2.bf16.msra.mxu0 %v4860_v56  ;;  %v5204_v56 = vcombine.low %v711_v34, %v715_v36  ;;  %v691_v10 = vld [vmem:[%s5449_s8 + $0xcb0] sm:$0xff] }
 0x174   : > { %4251 = vmatpush2.bf16.msra.mxu1 %v4988_v57  ;;  %4211 = vmatprep.subr.bf16.mxu0 %v4853_v58  ;;  %v5069_v57 = vcombine.high %v575_v46, %v579_v12  ;;  %v5197_v58 = vcombine.high %v703_v48, %v707_v49  ;;  %v551_v16 = vld [vmem:[%s5449_s8 + $0x850] sm:$0xff]  ;;  %v5180_v25 = vcombine.low %v687_v8, %v691_v10 }
 0x175   : > { %4252 = vmatprep.subr.bf16.mxu1 %v4981_v61  ;;  %v567_v61 = vld [vmem:[%s5449_s8 + $0x8d0] sm:$0xff] }
 0x176   : > { %v5060_v11 = vcombine.low %v567_v61, %v571_v62  ;;  %v679_v19 = vld [vmem:[%s5449_s8 + $0xc50] sm:$0xff] }
 0x177   : > { %4212 = vmatpush2.bf16.msra.mxu0 %v4852_v2  ;;  %v5196_v2 = vcombine.low %v703_v48, %v707_v49  ;;  %v683_v22 = vld [vmem:[%s5449_s8 + $0xc70] sm:$0xff] }
 0x178   : > { %4253 = vmatpush2.bf16.msra.mxu1 %v4980_v3  ;;  %4213 = vmatprep.subr.bf16.mxu0 %v4845_v47  ;;  %v5061_v3 = vcombine.high %v567_v61, %v571_v62  ;;  %v5189_v47 = vcombine.high %v695_v63, %v699_v0  ;;  %v5172_v31 = vcombine.low %v679_v19, %v683_v22  ;;  %v663_v34 = vld [vmem:[%s5449_s8 + $0xbd0] sm:$0xff] }
 0x179   : > { %4254 = vmatprep.subr.bf16.mxu1 %v4973_v5  ;;  %v559_v5 = vld [vmem:[%s5449_s8 + $0x890] sm:$0xff] }
 0x17a   : > { %v5052_v24 = vcombine.low %v559_v5, %v563_v6  ;;  %v667_v36 = vld [vmem:[%s5449_s8 + $0xbf0] sm:$0xff] }
 0x17b   : > { %4214 = vmatpush2.bf16.msra.mxu0 %v4844_v13  ;;  %v5188_v13 = vcombine.low %v695_v63, %v699_v0  ;;  %v5156_v46 = vcombine.low %v663_v34, %v667_v36  ;;  %v647_v49 = vld [vmem:[%s5449_s8 + $0xb50] sm:$0xff] }
 0x17c   : > { %4255 = vmatpush2.bf16.msra.mxu1 %v4972_v14  ;;  %4265 = vmatprep.subr.bf16.mxu0 %v5093_v15  ;;  %v5053_v14 = vcombine.high %v559_v5, %v563_v6  ;;  %v5181_v15 = vcombine.high %v687_v8, %v691_v10  ;;  %v639_v0 = vld [vmem:[%s5449_s8 + $0xb10] sm:$0xff] }
 0x17d   : > { %4306 = vmatprep.subr.bf16.mxu1 %v5221_v18  ;;  %v555_v18 = vld [vmem:[%s5449_s8 + $0x870] sm:$0xff] }
 0x17e   : > { %v3971_v33 = vpop.f32.mrf.mxu0  ;;  %4216 = vmatmul.mubr.bf16.vlgmr.msra.gmra.mxu0 %v5540_v17  ;;  %v5045_v54 = vcombine.high %v551_v16, %v555_v18  ;;  %v5044_v29 = vcombine.low %v551_v16, %v555_v18  ;;  %v763_v16 = vld [vmem:[%s5449_s8 + $0xef0] sm:$0xff] }
 0x17f   : > { %v3972_v9 = vadd.f32 %v3971_v33, %v3931_v35  ;;  %4257 = vmatmul.mubr.bf16.vlgmr.msra.gmra.mxu1 %v5549_v21  ;;  %4266 = vmatpush1.bf16.msra.mxu0 %v5092_v26  ;;  %v5173_v26 = vcombine.high %v679_v19, %v683_v22  ;;  %v671_v35 = vld [vmem:[%s5449_s8 + $0xc10] sm:$0xff] }
 0x180   : > { %4307 = vmatpush1.bf16.msra.mxu1 %v5220_v27  ;;  %v3973_v39 = vpop.f32.mrf.mxu0  ;;  %4267 = vmatprep.subr.bf16.mxu0 %v5085_v55  ;;  %v543_v27 = vld [vmem:[%s5449_s8 + $0x810] sm:$0xff] }
 0x181   : > { %v4593_v43 = vadd.f32 %v3972_v9, %v272_v32  ;;  %v3974_v44 = vadd.f32 %v3973_v39, %v3933_v45  ;;  %4308 = vmatprep.subr.bf16.mxu1 %v5213_v4  ;;  %4297 = vmatprep.mubr.bf16.mxu0 %v5558_v28  ;;  %v547_v55 = vld [vmem:[%s5449_s8 + $0x830] sm:$0xff]  ;;  %v5157_v39 = vcombine.high %v663_v34, %v667_v36 }
 0x182   : > { %v3975_v23 = vpop.f32.mrf.mxu0  ;;  %4338 = vmatprep.mubr.bf16.mxu1 %v5565_v30  ;;  %v675_v4 = vld [vmem:[%s5449_s8 + $0xc30] sm:$0xff]  ;;  %v5037_v32 = vcombine.high %v543_v27, %v547_v55 }
 0x183   : > { %4601 = vst [vmem:[#allocation2 + $0x30] sm:$0xff] %v4593_v43  ;;  %v4594_v50 = vadd.f32 %v3974_v44, %v273_v38  ;;  %4268 = vmatpush1.bf16.msra.mxu0 %v5084_v7  ;;  %v5165_v33 = vcombine.high %v671_v35, %v675_v4  ;;  %v791_v45 = vld [vmem:[%s5449_s8 + $0xfd0] sm:$0xff]  ;;  %v5036_v7 = vcombine.low %v543_v27, %v547_v55 }
 0x184   : > { %4309 = vmatpush1.bf16.msra.mxu1 %v5212_v41  ;;  %v3976_v52 = vpop.f32.mrf.mxu0  ;;  %4269 = vmatprep.subr.bf16.mxu0 %v5077_v42  ;;  %v795_v9 = vld [vmem:[%s5449_s8 + $0xff0] sm:$0xff]  ;;  %v5164_v38 = vcombine.low %v671_v35, %v675_v4 }
 0x185   : > { %4602 = vst [vmem:[#allocation2] sm:$0xff] %v4594_v50  ;;  %4310 = vmatprep.subr.bf16.mxu1 %v5205_v20  ;;  %v5285_v41 = vcombine.high %v791_v45, %v795_v9  ;;  %v655_v42 = vld [vmem:[%s5449_s8 + $0xb90] sm:$0xff]  ;;  %v5284_v12 = vcombine.low %v791_v45, %v795_v9 }
 0x186   : > { %v659_v43 = vld [vmem:[%s5449_s8 + $0xbb0] sm:$0xff] }
 0x187   : > { %4270 = vmatpush1.bf16.msra.mxu0 %v5076_v51  ;;  %v783_v44 = vld [vmem:[%s5449_s8 + $0xf90] sm:$0xff]  ;;  %v5149_v23 = vcombine.high %v655_v42, %v659_v43 }
 0x188   : > { %4311 = vmatpush1.bf16.msra.mxu1 %v5204_v56  ;;  %4271 = vmatprep.subr.bf16.mxu0 %v5069_v57  ;;  %v787_v20 = vld [vmem:[%s5449_s8 + $0xfb0] sm:$0xff]  ;;  %v5148_v57 = vcombine.low %v655_v42, %v659_v43 }
 0x189   : > { %4312 = vmatprep.subr.bf16.mxu1 %v5197_v58  ;;  %v5277_v48 = vcombine.high %v783_v44, %v787_v20  ;;  %v651_v50 = vld [vmem:[%s5449_s8 + $0xb70] sm:$0xff]  ;;  %v5276_v58 = vcombine.low %v783_v44, %v787_v20 }
 0x18a   : > { %v775_v51 = vld [vmem:[%s5449_s8 + $0xf50] sm:$0xff]  ;;  %v5141_v61 = vcombine.high %v647_v49, %v651_v50  ;;  %v5140_v5 = vcombine.low %v647_v49, %v651_v50  ;;  %v348_v49 = vld [vmem:[%s5449_s8 + $0x1f8] sm:$0xff] }
 0x18b   : > { %4272 = vmatpush1.bf16.msra.mxu0 %v5068_v1  ;;  %v779_v52 = vld [vmem:[%s5449_s8 + $0xf70] sm:$0xff] }
 0x18c   : > { %4313 = vmatpush1.bf16.msra.mxu1 %v5196_v2  ;;  %4273 = vmatprep.subr.bf16.mxu0 %v5061_v3  ;;  %v5269_v63 = vcombine.high %v775_v51, %v779_v52  ;;  %v643_v1 = vld [vmem:[%s5449_s8 + $0xb30] sm:$0xff]  ;;  %v5268_v6 = vcombine.low %v775_v51, %v779_v52 }
 0x18d   : > { %4314 = vmatprep.subr.bf16.mxu1 %v5189_v47  ;;  %v767_v2 = vld [vmem:[%s5449_s8 + $0xf10] sm:$0xff]  ;;  %v5133_v8 = vcombine.high %v639_v0, %v643_v1  ;;  %v5132_v18 = vcombine.low %v639_v0, %v643_v1  ;;  %v340_v0 = vld [vmem:[%s5449_s8 + $0x1b8] sm:$0xff] }
 0x18e   : > { %v771_v3 = vld [vmem:[%s5449_s8 + $0xf30] sm:$0xff] }
 0x18f   : > { %4274 = vmatpush1.bf16.msra.mxu0 %v5060_v11  ;;  %v5261_v11 = vcombine.high %v767_v2, %v771_v3  ;;  %v5260_v19 = vcombine.low %v767_v2, %v771_v3  ;;  %v755_v27 = vld [vmem:[%s5449_s8 + $0xeb0] sm:$0xff] }
 0x190   : > { %4315 = vmatpush1.bf16.msra.mxu1 %v5188_v13  ;;  %4275 = vmatprep.subr.bf16.mxu0 %v5053_v14  ;;  %v631_v13 = vld [vmem:[%s5449_s8 + $0xad0] sm:$0xff] }
 0x191   : > { %4316 = vmatprep.subr.bf16.mxu1 %v5181_v15  ;;  %v635_v14 = vld [vmem:[%s5449_s8 + $0xaf0] sm:$0xff] }
 0x192   : > { %v759_v15 = vld [vmem:[%s5449_s8 + $0xed0] sm:$0xff]  ;;  %v5125_v22 = vcombine.high %v631_v13, %v635_v14  ;;  %v5124_v55 = vcombine.low %v631_v13, %v635_v14 }
 0x193   : > { %4276 = vmatpush1.bf16.msra.mxu0 %v5052_v24  ;;  %v5253_v24 = vcombine.high %v759_v15, %v763_v16  ;;  %v5252_v35 = vcombine.low %v759_v15, %v763_v16  ;;  %v747_v34 = vld [vmem:[%s5449_s8 + $0xe70] sm:$0xff] }
 0x194   : > { %4317 = vmatpush1.bf16.msra.mxu1 %v5180_v25  ;;  %4277 = vmatprep.subr.bf16.mxu0 %v5045_v54  ;;  %v623_v25 = vld [vmem:[%s5449_s8 + $0xa90] sm:$0xff] }
 0x195   : > { %4318 = vmatprep.subr.bf16.mxu1 %v5173_v26  ;;  %v627_v54 = vld [vmem:[%s5449_s8 + $0xab0] sm:$0xff] }
 0x196   : > { %v751_v26 = vld [vmem:[%s5449_s8 + $0xe90] sm:$0xff]  ;;  %v5117_v4 = vcombine.high %v623_v25, %v627_v54  ;;  %v5116_v36 = vcombine.low %v623_v25, %v627_v54  ;;  %v320_v25 = vld [vmem:[%s5449_s8 + $0x118] sm:$0xff] }
 0x197   : > { %4278 = vmatpush1.bf16.msra.mxu0 %v5044_v29  ;;  %v5245_v29 = vcombine.high %v751_v26, %v755_v27  ;;  %v5244_v45 = vcombine.low %v751_v26, %v755_v27  ;;  %v739_v42 = vld [vmem:[%s5449_s8 + $0xe30] sm:$0xff]  ;;  %v324_v54 = vld [vmem:[%s5449_s8 + $0x138] sm:$0xff] }
 0x198   : > { %4319 = vmatpush1.bf16.msra.mxu1 %v5172_v31  ;;  %4279 = vmatprep.subr.bf16.mxu0 %v5037_v32  ;;  %v615_v31 = vld [vmem:[%s5449_s8 + $0xa50] sm:$0xff] }
 0x199   : > { %4320 = vmatprep.subr.bf16.mxu1 %v5165_v33  ;;  %v619_v32 = vld [vmem:[%s5449_s8 + $0xa70] sm:$0xff] }
 0x19a   : > { %v743_v33 = vld [vmem:[%s5449_s8 + $0xe50] sm:$0xff]  ;;  %v5109_v9 = vcombine.high %v615_v31, %v619_v32  ;;  %v5108_v43 = vcombine.low %v615_v31, %v619_v32  ;;  %v312_v32 = vld [vmem:[%s5449_s8 + $0xd8] sm:$0xff] }
 0x19b   : > { %4280 = vmatpush1.bf16.msra.mxu0 %v5036_v7  ;;  %v5237_v7 = vcombine.high %v743_v33, %v747_v34  ;;  %v5236_v44 = vcombine.low %v743_v33, %v747_v34  ;;  %v827_v31 = vld [vmem:[%s5449_s8 + $0x10f0] sm:$0xff]  ;;  %v316_v33 = vld [vmem:[%s5449_s8 + $0xf8] sm:$0xff] }
 0x19c   : > { %4321 = vmatpush1.bf16.msra.mxu1 %v5164_v38  ;;  %4281 = vmatprep.subr.bf16.mxu0 %v5157_v39  ;;  %v607_v38 = vld [vmem:[%s5449_s8 + $0xa10] sm:$0xff] }
 0x19d   : > { %4322 = vmatprep.subr.bf16.mxu1 %v5285_v41  ;;  %v611_v39 = vld [vmem:[%s5449_s8 + $0xa30] sm:$0xff] }
 0x19e   : > { %v735_v41 = vld [vmem:[%s5449_s8 + $0xe10] sm:$0xff]  ;;  %v5101_v20 = vcombine.high %v607_v38, %v611_v39  ;;  %v5100_v50 = vcombine.low %v607_v38, %v611_v39  ;;  %v304_v38 = vld [vmem:[%s5449_s8 + $0x98] sm:$0xff] }
 0x19f   : > { %v5939_v56 = vpop.f32.mrf.mxu1  ;;  %4282 = vmatpush2.bf16.msra.mxu0 %v5156_v46  ;;  %v5229_v46 = vcombine.high %v735_v41, %v739_v42  ;;  %v5228_v51 = vcombine.low %v735_v41, %v739_v42  ;;  %v308_v39 = vld [vmem:[%s5449_s8 + $0xb8] sm:$0xff]  ;;  %v4806_v42 = vcombine.low %v312_v32, %v316_v33 }
 0x1a0   : > { %4323 = vmatpush2.bf16.msra.mxu1 %v5284_v12  ;;  %4283 = vmatprep.subr.bf16.mxu0 %v5149_v23  ;;  %v855_v12 = vld [vmem:[%s5449_s8 + $0x11d0] sm:$0xff] }
 0x1a1   : > { %v5941_v62 = vpop.f32.mrf.mxu1  ;;  %4324 = vmatprep.subr.bf16.mxu1 %v5277_v48  ;;  %v859_v23 = vld [vmem:[%s5449_s8 + $0x11f0] sm:$0xff]  ;;  %v344_v48 = vld [vmem:[%s5449_s8 + $0x1d8] sm:$0xff] }
 0x1a2   : > { %v5349_v52 = vcombine.high %v855_v12, %v859_v23  ;;  %v5348_v1 = vcombine.low %v855_v12, %v859_v23  ;;  %v4838_v2 = vcombine.low %v344_v48, %v348_v49  ;;  %v296_v12 = vld [vmem:[%s5449_s8 + $0x58] sm:$0xff] }
 0x1a3   : > { %v4016_v47 = vpop.f32.mrf.mxu1  ;;  %4284 = vmatpush2.bf16.msra.mxu0 %v5148_v57  ;;  %v4839_v57 = vcombine.high %v344_v48, %v348_v49  ;;  %v300_v23 = vld [vmem:[%s5449_s8 + $0x78] sm:$0xff]  ;;  %v4798_v49 = vcombine.low %v304_v38, %v308_v39 }
 0x1a4   : > { %4325 = vmatpush2.bf16.msra.mxu1 %v5276_v58  ;;  %4285 = vmatprep.subr.bf16.mxu0 %v5141_v61  ;;  %v847_v58 = vld [vmem:[%s5449_s8 + $0x1190] sm:$0xff] }
 0x1a5   : > { %v4017_v10 = vpop.f32.mrf.mxu1  ;;  %4326 = vmatprep.subr.bf16.mxu1 %v5269_v63  ;;  %v851_v61 = vld [vmem:[%s5449_s8 + $0x11b0] sm:$0xff]  ;;  %v336_v63 = vld [vmem:[%s5449_s8 + $0x198] sm:$0xff] }
 0x1a6   : > { %v5341_v3 = vcombine.high %v847_v58, %v851_v61  ;;  %v4831_v47 = vcombine.high %v336_v63, %v340_v0  ;;  %v328_v10 = vld [vmem:[%s5449_s8 + $0x158] sm:$0xff]  ;;  %v5340_v13 = vcombine.low %v847_v58, %v851_v61  ;;  %v4830_v15 = vcombine.low %v336_v63, %v340_v0 }
 0x1a7   : > { %4286 = vmatpush2.bf16.msra.mxu0 %v5140_v5  ;;  %v839_v5 = vld [vmem:[%s5449_s8 + $0x1150] sm:$0xff]  ;;  %v288_v58 = vld [vmem:[%s5449_s8 + $0x18] sm:$0xff]  ;;  %v4790_v0 = vcombine.low %v296_v12, %v300_v23 }
 0x1a8   : > { %4327 = vmatpush2.bf16.msra.mxu1 %v5268_v6  ;;  %4287 = vmatprep.subr.bf16.mxu0 %v5133_v8  ;;  %v843_v6 = vld [vmem:[%s5449_s8 + $0x1170] sm:$0xff]  ;;  %v292_v61 = vld [vmem:[%s5449_s8 + $0x38] sm:$0xff] }
 0x1a9   : > { %4328 = vmatprep.subr.bf16.mxu1 %v5261_v11  ;;  %v332_v11 = vld [vmem:[%s5449_s8 + $0x178] sm:$0xff]  ;;  %v5333_v16 = vcombine.high %v839_v5, %v843_v6  ;;  %v5332_v26 = vcombine.low %v839_v5, %v843_v6 }
 0x1aa   : > { %v408_v5 = vld [vmem:[%s5449_s8 + $0x3d8] sm:$0xff] }
 0x1ab   : > { %4288 = vmatpush2.bf16.msra.mxu0 %v5132_v18  ;;  %v4823_v18 = vcombine.high %v328_v10, %v332_v11  ;;  %v412_v6 = vld [vmem:[%s5449_s8 + $0x3f8] sm:$0xff] }
 0x1ac   : > { %4329 = vmatpush2.bf16.msra.mxu1 %v5260_v19  ;;  %4289 = vmatprep.subr.bf16.mxu0 %v5125_v22  ;;  %v831_v19 = vld [vmem:[%s5449_s8 + $0x1110] sm:$0xff] }
 0x1ad   : > { %4330 = vmatprep.subr.bf16.mxu1 %v5253_v24  ;;  %v835_v22 = vld [vmem:[%s5449_s8 + $0x1130] sm:$0xff] }
 0x1ae   : > { %v5324_v34 = vcombine.low %v831_v19, %v835_v22 }
 0x1af   : > { %4290 = vmatpush2.bf16.msra.mxu0 %v5124_v55  ;;  %v4822_v55 = vcombine.low %v328_v10, %v332_v11  ;;  %v4782_v11 = vcombine.low %v288_v58, %v292_v61 }
 0x1b0   : > { %4331 = vmatpush2.bf16.msra.mxu1 %v5252_v35  ;;  %4291 = vmatprep.subr.bf16.mxu0 %v5117_v4  ;;  %v5325_v35 = vcombine.high %v831_v19, %v835_v22  ;;  %v4815_v4 = vcombine.high %v320_v25, %v324_v54  ;;  %v400_v19 = vld [vmem:[%s5449_s8 + $0x398] sm:$0xff] }
 0x1b1   : > { %4332 = vmatprep.subr.bf16.mxu1 %v5245_v29  ;;  %v823_v29 = vld [vmem:[%s5449_s8 + $0x10d0] sm:$0xff]  ;;  %v404_v22 = vld [vmem:[%s5449_s8 + $0x3b8] sm:$0xff] }
 0x1b2   : > { %v5316_v41 = vcombine.low %v823_v29, %v827_v31 }
 0x1b3   : > { %4292 = vmatpush2.bf16.msra.mxu0 %v5116_v36  ;;  %v5317_v36 = vcombine.high %v823_v29, %v827_v31  ;;  %v396_v29 = vld [vmem:[%s5449_s8 + $0x378] sm:$0xff] }
 0x1b4   : > { %4333 = vmatpush2.bf16.msra.mxu1 %v5244_v45  ;;  %4293 = vmatprep.subr.bf16.mxu0 %v5109_v9  ;;  %v4807_v45 = vcombine.high %v312_v32, %v316_v33  ;;  %v815_v9 = vld [vmem:[%s5449_s8 + $0x1090] sm:$0xff]  ;;  %v4894_v33 = vcombine.low %v400_v19, %v404_v22 }
 0x1b5   : > { %4334 = vmatprep.subr.bf16.mxu1 %v5237_v7  ;;  %v819_v7 = vld [vmem:[%s5449_s8 + $0x10b0] sm:$0xff] }
 0x1b6   : > { %v5308_v48 = vcombine.low %v815_v9, %v819_v7 }
 0x1b7   : > { %4294 = vmatpush2.bf16.msra.mxu0 %v5108_v43  ;;  %v5309_v43 = vcombine.high %v815_v9, %v819_v7  ;;  %v452_v9 = vld [vmem:[%s5449_s8 + $0x538] sm:$0xff] }
 0x1b8   : > { %4335 = vmatpush2.bf16.msra.mxu1 %v5236_v44  ;;  %4295 = vmatprep.subr.bf16.mxu0 %v5101_v20  ;;  %v4799_v44 = vcombine.high %v304_v38, %v308_v39  ;;  %v807_v20 = vld [vmem:[%s5449_s8 + $0x1050] sm:$0xff]  ;;  %v384_v7 = vld [vmem:[%s5449_s8 + $0x318] sm:$0xff] }
 0x1b9   : > { %4336 = vmatprep.subr.bf16.mxu1 %v5229_v46  ;;  %v811_v46 = vld [vmem:[%s5449_s8 + $0x1070] sm:$0xff]  ;;  %v388_v38 = vld [vmem:[%s5449_s8 + $0x338] sm:$0xff] }
 0x1ba   : > { %v5300_v63 = vcombine.low %v807_v20, %v811_v46 }
 0x1bb   : > { %4296 = vmatpush2.bf16.msra.mxu0 %v5100_v50  ;;  %v5301_v50 = vcombine.high %v807_v20, %v811_v46  ;;  %v440_v20 = vld [vmem:[%s5449_s8 + $0x4d8] sm:$0xff] }
 0x1bc   : > { %4337 = vmatpush2.bf16.msra.mxu1 %v5228_v51  ;;  %4347 = vmatprep.subr.bf16.mxu0 %v5349_v52  ;;  %v4791_v51 = vcombine.high %v296_v12, %v300_v23  ;;  %v799_v52 = vld [vmem:[%s5449_s8 + $0x1010] sm:$0xff]  ;;  %v444_v46 = vld [vmem:[%s5449_s8 + $0x4f8] sm:$0xff] }
 0x1bd   : > { %4388 = vmatprep.subr.bf16.mxu1 %v4839_v57  ;;  %v803_v57 = vld [vmem:[%s5449_s8 + $0x1030] sm:$0xff]  ;;  %v376_v12 = vld [vmem:[%s5449_s8 + $0x2d8] sm:$0xff] }
 0x1be   : > { %v5973_v8 = vpop.f32.mrf.mxu0  ;;  %4298 = vmatmul.mubr.bf16.vlgmr.msra.gmra.mxu0 %v5630_v37  ;;  %v5292_v10 = vcombine.low %v799_v52, %v803_v57  ;;  %v380_v23 = vld [vmem:[%s5449_s8 + $0x2f8] sm:$0xff] }
 0x1bf   : > { %4339 = vmatmul.mubr.bf16.vlgmr.msra.gmra.mxu1 %v5636_v40  ;;  %4348 = vmatpush1.bf16.msra.mxu0 %v5348_v1  ;;  %v5293_v1 = vcombine.high %v799_v52, %v803_v57  ;;  %v432_v52 = vld [vmem:[%s5449_s8 + $0x498] sm:$0xff] }
 0x1c0   : > { %4389 = vmatpush1.bf16.msra.mxu1 %v4838_v2  ;;  %v5979_v14 = vpop.f32.mrf.mxu0  ;;  %4349 = vmatprep.subr.bf16.mxu0 %v5341_v3  ;;  %v4783_v2 = vcombine.high %v288_v58, %v292_v61  ;;  %v472_v3 = vld [vmem:[%s5449_s8 + $0x5d8] sm:$0xff] }
 0x1c1   : > { %4390 = vmatprep.subr.bf16.mxu1 %v4831_v47  ;;  %4379 = vmatprep.mubr.bf16.mxu0 %v5393_v53  ;;  %v476_v47 = vld [vmem:[%s5449_s8 + $0x5f8] sm:$0xff] }
 0x1c2   : > { %v4057_v24 = vpop.f32.mrf.mxu0  ;;  %4420 = vmatprep.mubr.bf16.mxu1 %v5490_v59  ;;  %v4814_v59 = vcombine.low %v320_v25, %v324_v54  ;;  %v4902_v25 = vcombine.low %v408_v5, %v412_v6  ;;  %v436_v57 = vld [vmem:[%s5449_s8 + $0x4b8] sm:$0xff] }
 0x1c3   : > { %4350 = vmatpush1.bf16.msra.mxu0 %v5340_v13  ;;  %v4967_v13 = vcombine.high %v472_v3, %v476_v47  ;;  %v4966_v24 = vcombine.low %v472_v3, %v476_v47  ;;  %v368_v58 = vld [vmem:[%s5449_s8 + $0x298] sm:$0xff] }
 0x1c4   : > { %4391 = vmatpush1.bf16.msra.mxu1 %v4830_v15  ;;  %v4058_v27 = vpop.f32.mrf.mxu0  ;;  %4351 = vmatprep.subr.bf16.mxu0 %v5333_v16  ;;  %v4903_v15 = vcombine.high %v408_v5, %v412_v6  ;;  %v464_v16 = vld [vmem:[%s5449_s8 + $0x598] sm:$0xff] }
 0x1c5   : > { %4392 = vmatprep.subr.bf16.mxu1 %v4823_v18  ;;  %v468_v18 = vld [vmem:[%s5449_s8 + $0x5b8] sm:$0xff] }
 0x1c6   : > { %v4959_v54 = vcombine.high %v464_v16, %v468_v18  ;;  %v456_v27 = vld [vmem:[%s5449_s8 + $0x558] sm:$0xff]  ;;  %v4958_v32 = vcombine.low %v464_v16, %v468_v18 }
 0x1c7   : > { %4352 = vmatpush1.bf16.msra.mxu0 %v5332_v26  ;;  %v4895_v26 = vcombine.high %v400_v19, %v404_v22  ;;  %v372_v61 = vld [vmem:[%s5449_s8 + $0x2b8] sm:$0xff] }
 0x1c8   : > { %4393 = vmatpush1.bf16.msra.mxu1 %v4822_v55  ;;  %4353 = vmatprep.subr.bf16.mxu0 %v5325_v35  ;;  %v460_v55 = vld [vmem:[%s5449_s8 + $0x578] sm:$0xff]  ;;  %v6014_v35 = vld [vmem:[%s5444_s28 + $0x20] ss:$0 sps:$4 sm:$0xff]  }
 0x1c9   : > { %4394 = vmatprep.subr.bf16.mxu1 %v4815_v4  ;;  %v392_v4 = vld [vmem:[%s5449_s8 + $0x358] sm:$0xff] }
 0x1ca   : > { %v424_v3 = vld [vmem:[%s5449_s8 + $0x458] sm:$0xff] }
 0x1cb   : > { %4354 = vmatpush1.bf16.msra.mxu0 %v5324_v34  ;;  %v4951_v34 = vcombine.high %v456_v27, %v460_v55  ;;  %v428_v47 = vld [vmem:[%s5449_s8 + $0x478] sm:$0xff] }
 0x1cc   : > { %4395 = vmatpush1.bf16.msra.mxu1 %v4814_v59  ;;  %4355 = vmatprep.subr.bf16.mxu0 %v5317_v36  ;;  %v4887_v36 = vcombine.high %v392_v4, %v396_v29  ;;  %v360_v5 = vld [vmem:[%s5449_s8 + $0x258] sm:$0xff] }
 0x1cd   : > { %4396 = vmatprep.subr.bf16.mxu1 %v4807_v45  ;;  %v448_v45 = vld [vmem:[%s5449_s8 + $0x518] sm:$0xff] }
 0x1ce   : > { %v364_v6 = vld [vmem:[%s5449_s8 + $0x278] sm:$0xff] }
 0x1cf   : > { %4356 = vmatpush1.bf16.msra.mxu0 %v5316_v41  ;;  %v4950_v41 = vcombine.low %v456_v27, %v460_v55  ;;  %v416_v16 = vld [vmem:[%s5449_s8 + $0x418] sm:$0xff] }
 0x1d0   : > { %4397 = vmatpush1.bf16.msra.mxu1 %v4806_v42  ;;  %4357 = vmatprep.subr.bf16.mxu0 %v5309_v43  ;;  %v4943_v42 = vcombine.high %v448_v45, %v452_v9  ;;  %v420_v18 = vld [vmem:[%s5449_s8 + $0x438] sm:$0xff] }
 0x1d1   : > { %4398 = vmatprep.subr.bf16.mxu1 %v4799_v44  ;;  %v4879_v44 = vcombine.high %v384_v7, %v388_v38  ;;  %v352_v19 = vld [vmem:[%s5449_s8 + $0x218] sm:$0xff] }
 0x1d2   : > { %v356_v22 = vld [vmem:[%s5449_s8 + $0x238] sm:$0xff] }
 0x1d3   : > { %4358 = vmatpush1.bf16.msra.mxu0 %v5308_v48  ;;  %v4942_v48 = vcombine.low %v448_v45, %v452_v9  ;;  %v536_v27 = vld [vmem:[%s5449_s8 + $0x7d8] sm:$0xff] }
 0x1d4   : > { %4399 = vmatpush1.bf16.msra.mxu1 %v4798_v49  ;;  %4359 = vmatprep.subr.bf16.mxu0 %v5301_v50  ;;  %v4878_v49 = vcombine.low %v384_v7, %v388_v38  ;;  %v4935_v50 = vcombine.high %v440_v20, %v444_v46  ;;  %v540_v55 = vld [vmem:[%s5449_s8 + $0x7f8] sm:$0xff] }
 0x1d5   : > { %4400 = vmatprep.subr.bf16.mxu1 %v4791_v51  ;;  %v4871_v51 = vcombine.high %v376_v12, %v380_v23  ;;  %v528_v45 = vld [vmem:[%s5449_s8 + $0x798] sm:$0xff] }
 0x1d6   : > { %v532_v9 = vld [vmem:[%s5449_s8 + $0x7b8] sm:$0xff] }
 0x1d7   : > { %4360 = vmatpush1.bf16.msra.mxu0 %v5300_v63  ;;  %v4934_v63 = vcombine.low %v440_v20, %v444_v46  ;;  %v592_v7 = vld [vmem:[%s5449_s8 + $0x998] sm:$0xff] }
 0x1d8   : > { %4401 = vmatpush1.bf16.msra.mxu1 %v4790_v0  ;;  %4361 = vmatprep.subr.bf16.mxu0 %v5293_v1  ;;  %v4870_v0 = vcombine.low %v376_v12, %v380_v23  ;;  %v4927_v1 = vcombine.high %v432_v52, %v436_v57  ;;  %v596_v38 = vld [vmem:[%s5449_s8 + $0x9b8] sm:$0xff] }
 0x1d9   : > { %4402 = vmatprep.subr.bf16.mxu1 %v4783_v2  ;;  %v4863_v2 = vcombine.high %v368_v58, %v372_v61  ;;  %v5087_v20 = vcombine.high %v592_v7, %v596_v38  ;;  %v520_v46 = vld [vmem:[%s5449_s8 + $0x758] sm:$0xff] }
 0x1da   : > { %v524_v12 = vld [vmem:[%s5449_s8 + $0x778] sm:$0xff] }
 0x1db   : > { %4362 = vmatpush1.bf16.msra.mxu0 %v5292_v10  ;;  %v4926_v10 = vcombine.low %v432_v52, %v436_v57  ;;  %v5015_v52 = vcombine.high %v520_v46, %v524_v12 }
 0x1dc   : > { %4403 = vmatpush1.bf16.msra.mxu1 %v4782_v11  ;;  %4429 = vmatprep.subr.bf16.mxu0 %v4967_v13  ;;  %v4862_v11 = vcombine.low %v368_v58, %v372_v61  ;;  %v4919_v13 = vcombine.high %v424_v3, %v428_v47 }
 0x1dd   : > { %4404 = vmatprep.subr.bf16.mxu1 %v4903_v15  ;;  %v4855_v15 = vcombine.high %v360_v5, %v364_v6 }
 0x1de   : > { %4380 = vmatmul.mubr.bf16.vlgmr.msra.gmra.mxu0 %v6014_v35 }
 0x1df   : > { %v6019_v31 = vpop.f32.mrf.mxu1  ;;  %4430 = vmatpush1.bf16.msra.mxu0 %v4966_v24  ;;  %4461 = vmatprep.mubr.bf16.mxu0 %v5494_v60  ;;  %v4886_v60 = vcombine.low %v392_v4, %v396_v29  ;;  %v4918_v24 = vcombine.low %v424_v3, %v428_v47  ;;  %v600_v4 = vld [vmem:[%s5449_s8 + $0x9d8] sm:$0xff] }
 0x1e0   : > { %4405 = vmatpush2.bf16.msra.mxu1 %v4902_v25  ;;  %4431 = vmatprep.subr.bf16.mxu0 %v4959_v54  ;;  %v4854_v25 = vcombine.low %v360_v5, %v364_v6  ;;  %v4911_v54 = vcombine.high %v416_v16, %v420_v18  ;;  %v604_v29 = vld [vmem:[%s5449_s8 + $0x9f8] sm:$0xff] }
 0x1e1   : > { %v6022_v59 = vpop.f32.mrf.mxu1  ;;  %4406 = vmatprep.subr.bf16.mxu1 %v4895_v26  ;;  %v4847_v26 = vcombine.high %v352_v19, %v356_v22  ;;  %v580_v3 = vld [vmem:[%s5449_s8 + $0x938] sm:$0xff] }
 0x1e3   : > { %v4098_v39 = vpop.f32.mrf.mxu1  ;;  %4432 = vmatpush1.bf16.msra.mxu0 %v4958_v32  ;;  %v4910_v32 = vcombine.low %v416_v16, %v420_v18 }
 0x1e4   : > { %4407 = vmatpush2.bf16.msra.mxu1 %v4894_v33  ;;  %4433 = vmatprep.subr.bf16.mxu0 %v4951_v34  ;;  %v4846_v33 = vcombine.low %v352_v19, %v356_v22  ;;  %v5031_v34 = vcombine.high %v536_v27, %v540_v55  ;;  %v4054_v39 = vadd.f32 %v5973_v8, %v5939_v56  ;;  %v504_v19 = vld [vmem:[%s5449_s8 + $0x6d8] sm:$0xff] }
 0x1e5   : > { %v4099_v43 = vpop.f32.mrf.mxu1  ;;  %4408 = vmatprep.subr.bf16.mxu1 %v4887_v36  ;;  %v5095_v36 = vcombine.high %v600_v4, %v604_v29  ;;  %v508_v22 = vld [vmem:[%s5449_s8 + $0x6f8] sm:$0xff] }
 0x1e6   : > { %v4056_v43 = vadd.f32 %v5979_v14, %v5941_v62  ;;  %v274_v62 = vld [vmem:[#allocation2 + $0x18] sm:$0xff] }
 0x1e7   : > { %4434 = vmatpush1.bf16.msra.mxu0 %v4950_v41  ;;  %v5030_v41 = vcombine.low %v536_v27, %v540_v55  ;;  %v4999_v27 = vcombine.high %v504_v19, %v508_v22 }
 0x1e8   : > { %4409 = vmatpush2.bf16.msra.mxu1 %v4886_v60  ;;  %4435 = vmatprep.subr.bf16.mxu0 %v4943_v42  ;;  %v5094_v60 = vcombine.low %v600_v4, %v604_v29  ;;  %v5023_v42 = vcombine.high %v528_v45, %v532_v9  ;;  %v4097_v56 = vadd.f32 %v6022_v59, %v4056_v43  ;;  %v496_v4 = vld [vmem:[%s5449_s8 + $0x698] sm:$0xff] }
 0x1e9   : > { %4410 = vmatprep.subr.bf16.mxu1 %v4879_v44  ;;  %v4095_v44 = vadd.f32 %v6019_v31, %v4054_v39  ;;  %v5086_v31 = vcombine.low %v592_v7, %v596_v38  ;;  %v500_v29 = vld [vmem:[%s5449_s8 + $0x6b8] sm:$0xff] }
 0x1ea   : > { %v488_v7 = vld [vmem:[%s5449_s8 + $0x658] sm:$0xff] }
 0x1eb   : > { %4436 = vmatpush1.bf16.msra.mxu0 %v4942_v48  ;;  %v584_v48 = vld [vmem:[%s5449_s8 + $0x958] sm:$0xff] }
 0x1ec   : > { %4411 = vmatpush2.bf16.msra.mxu1 %v4878_v49  ;;  %4437 = vmatprep.subr.bf16.mxu0 %v4935_v50  ;;  %v588_v49 = vld [vmem:[%s5449_s8 + $0x978] sm:$0xff] }
 0x1ed   : > { %4412 = vmatprep.subr.bf16.mxu1 %v4871_v51  ;;  %v5022_v51 = vcombine.low %v528_v45, %v532_v9  ;;  %v5079_v59 = vcombine.high %v584_v48, %v588_v49  ;;  %v4991_v45 = vcombine.high %v496_v4, %v500_v29  ;;  %v492_v38 = vld [vmem:[%s5449_s8 + $0x678] sm:$0xff] }
 0x1ee   : > { %v552_v39 = vld [vmem:[%s5449_s8 + $0x858] sm:$0xff]  ;;  %v4983_v43 = vcombine.high %v488_v7, %v492_v38 }
 0x1ef   : > { %4438 = vmatpush1.bf16.msra.mxu0 %v4934_v63  ;;  %v512_v63 = vld [vmem:[%s5449_s8 + $0x718] sm:$0xff] }
 0x1f0   : > { %4413 = vmatpush2.bf16.msra.mxu1 %v4870_v0  ;;  %4439 = vmatprep.subr.bf16.mxu0 %v4927_v1  ;;  %v516_v0 = vld [vmem:[%s5449_s8 + $0x738] sm:$0xff] }
 0x1f1   : > { %4414 = vmatprep.subr.bf16.mxu1 %v4863_v2  ;;  %v576_v2 = vld [vmem:[%s5449_s8 + $0x918] sm:$0xff] }
 0x1f2   : > { %v5071_v18 = vcombine.high %v576_v2, %v580_v3 }
 0x1f3   : > { %4440 = vmatpush1.bf16.msra.mxu0 %v4926_v10  ;;  %v5014_v10 = vcombine.low %v520_v46, %v524_v12  ;;  %v484_v46 = vld [vmem:[%s5449_s8 + $0x638] sm:$0xff] }
 0x1f4   : > { %4415 = vmatpush2.bf16.msra.mxu1 %v4862_v11  ;;  %4441 = vmatprep.subr.bf16.mxu0 %v4919_v13  ;;  %v5078_v13 = vcombine.low %v584_v48, %v588_v49  ;;  %v544_v12 = vld [vmem:[%s5449_s8 + $0x818] sm:$0xff]  ;;  %v4982_v48 = vcombine.low %v488_v7, %v492_v38 }
 0x1f5   : > { %4416 = vmatprep.subr.bf16.mxu1 %v4855_v15  ;;  %v5007_v15 = vcombine.high %v512_v63, %v516_v0 }
 0x1f7   : > { %4442 = vmatpush1.bf16.msra.mxu0 %v4918_v24  ;;  %v568_v24 = vld [vmem:[%s5449_s8 + $0x8d8] sm:$0xff] }
 0x1f8   : > { %4417 = vmatpush2.bf16.msra.mxu1 %v4854_v25  ;;  %4443 = vmatprep.subr.bf16.mxu0 %v4911_v54  ;;  %v572_v25 = vld [vmem:[%s5449_s8 + $0x8f8] sm:$0xff]  ;;  %v5006_v54 = vcombine.low %v512_v63, %v516_v0 }
 0x1f9   : > { %4418 = vmatprep.subr.bf16.mxu1 %v4847_v26  ;;  %v5070_v26 = vcombine.low %v576_v2, %v580_v3  ;;  %v5063_v55 = vcombine.high %v568_v24, %v572_v25  ;;  %v656_v63 = vld [vmem:[%s5449_s8 + $0xb98] sm:$0xff] }
 0x1fa   : > { %v660_v0 = vld [vmem:[%s5449_s8 + $0xbb8] sm:$0xff] }
 0x1fb   : > { %4444 = vmatpush1.bf16.msra.mxu0 %v4910_v32  ;;  %v560_v32 = vld [vmem:[%s5449_s8 + $0x898] sm:$0xff]  ;;  %v5151_v3 = vcombine.high %v656_v63, %v660_v0 }
 0x1fc   : > { %4419 = vmatpush2.bf16.msra.mxu1 %v4846_v33  ;;  %4445 = vmatprep.subr.bf16.mxu0 %v5031_v34  ;;  %v564_v33 = vld [vmem:[%s5449_s8 + $0x8b8] sm:$0xff]  ;;  %v4998_v34 = vcombine.low %v504_v19, %v508_v22 }
 0x1fd   : > { %4470 = vmatprep.subr.bf16.mxu1 %v5095_v36  ;;  %v5062_v36 = vcombine.low %v568_v24, %v572_v25  ;;  %v5055_v9 = vcombine.high %v560_v32, %v564_v33  ;;  %v640_v19 = vld [vmem:[%s5449_s8 + $0xb18] sm:$0xff] }
 0x1fe   : > { %v4135_v23 = vpop.f32.mrf.mxu0 }
 0x1ff   : > { %v4136_v8 = vadd.f32 %v4135_v23, %v4095_v44  ;;  %v4176_v50 = vpop.f32.mrf.mxu1  ;;  %4421 = vmatmul.mubr.bf16.vlgmr.msra.gmra.mxu1 %v5540_v17  ;;  %4446 = vmatpush2.bf16.msra.mxu0 %v5030_v41  ;;  %v275_v17 = vld [vmem:[#allocation2 + $0x10] sm:$0xff]  ;;  %v556_v41 = vld [vmem:[%s5449_s8 + $0x878] sm:$0xff] }
 0x200   : > { %4471 = vmatpush1.bf16.msra.mxu1 %v5094_v60  ;;  %v4137_v14 = vpop.f32.mrf.mxu0  ;;  %4447 = vmatprep.subr.bf16.mxu0 %v5023_v42  ;;  %v4990_v60 = vcombine.low %v496_v4, %v500_v29  ;;  %v5054_v42 = vcombine.low %v560_v32, %v564_v33  ;;  %v5047_v44 = vcombine.high %v552_v39, %v556_v41  ;;  %v548_v23 = vld [vmem:[%s5449_s8 + $0x838] sm:$0xff] }
 0x201   : > { %v4177_v57 = vadd.f32 %v4176_v50, %v4136_v8  ;;  %v4138_v58 = vadd.f32 %v4137_v14, %v4097_v56  ;;  %v4178_v61 = vpop.f32.mrf.mxu1  ;;  %4472 = vmatprep.subr.bf16.mxu1 %v5087_v20  ;;  %4502 = vmatprep.mubr.bf16.mxu1 %v5558_v28  ;;  %v480_v20 = vld [vmem:[%s5449_s8 + $0x618] sm:$0xff]  ;;  %v5046_v49 = vcombine.low %v552_v39, %v556_v41 }
 0x202   : > { %v4139_v1 = vpop.f32.mrf.mxu0  ;;  %v4975_v56 = vcombine.high %v480_v20, %v484_v46  ;;  %v5039_v8 = vcombine.high %v544_v12, %v548_v23  ;;  %v728_v50 = vld [vmem:[%s5449_s8 + $0xdd8] sm:$0xff] }
 0x203   : > { %v4595_v47 = vadd.f32 %v4177_v57, %v274_v62  ;;  %v4179_v5 = vadd.f32 %v4178_v61, %v4138_v58  ;;  %v4180_v6 = vpop.f32.mrf.mxu1  ;;  %4448 = vmatpush2.bf16.msra.mxu0 %v5022_v51  ;;  %v732_v51 = vld [vmem:[%s5449_s8 + $0xdf8] sm:$0xff] }
 0x204   : > { %4473 = vmatpush1.bf16.msra.mxu1 %v5086_v31  ;;  %v4140_v11 = vpop.f32.mrf.mxu0  ;;  %4449 = vmatprep.subr.bf16.mxu0 %v5015_v52  ;;  %v664_v62 = vld [vmem:[%s5449_s8 + $0xbd8] sm:$0xff]  ;;  %v4974_v31 = vcombine.low %v480_v20, %v484_v46  ;;  %v5038_v52 = vcombine.low %v544_v12, %v548_v23  ;;  %v5223_v57 = vcombine.high %v728_v50, %v732_v51 }
 0x205   : > { %4603 = vst [vmem:[#allocation2 + $0x18] sm:$0xff] %v4595_v47  ;;  %v4596_v28 = vadd.f32 %v4179_v5, %v275_v17  ;;  %v4181_v16 = vpop.f32.mrf.mxu1  ;;  %4474 = vmatprep.subr.bf16.mxu1 %v5079_v59  ;;  %v668_v14 = vld [vmem:[%s5449_s8 + $0xbf8] sm:$0xff]  ;;  %v5222_v17 = vcombine.low %v728_v50, %v732_v51 }
 0x206   : > { %v5159_v58 = vcombine.high %v664_v62, %v668_v14  ;;  %v720_v61 = vld [vmem:[%s5449_s8 + $0xd98] sm:$0xff]  ;;  %v5158_v1 = vcombine.low %v664_v62, %v668_v14 }
 0x207   : > { %4604 = vst [vmem:[#allocation2 + $0x10] sm:$0xff] %v4596_v28  ;;  %4450 = vmatpush2.bf16.msra.mxu0 %v5014_v10  ;;  %v724_v59 = vld [vmem:[%s5449_s8 + $0xdb8] sm:$0xff] }
 0x208   : > { %4475 = vmatpush1.bf16.msra.mxu1 %v5078_v13  ;;  %4451 = vmatprep.subr.bf16.mxu0 %v5007_v15  ;;  %v5215_v2 = vcombine.high %v720_v61, %v724_v59  ;;  %v712_v47 = vld [vmem:[%s5449_s8 + $0xd58] sm:$0xff]  ;;  %v5214_v11 = vcombine.low %v720_v61, %v724_v59  ;;  %v5150_v13 = vcombine.low %v656_v63, %v660_v0 }
 0x209   : > { %4476 = vmatprep.subr.bf16.mxu1 %v5071_v18  ;;  %v716_v5 = vld [vmem:[%s5449_s8 + $0xd78] sm:$0xff] }
 0x20a   : > { %v648_v6 = vld [vmem:[%s5449_s8 + $0xb58] sm:$0xff]  ;;  %v5207_v15 = vcombine.high %v712_v47, %v716_v5  ;;  %v5206_v22 = vcombine.low %v712_v47, %v716_v5 }
 0x20b   : > { %4452 = vmatpush2.bf16.msra.mxu0 %v5006_v54  ;;  %v652_v10 = vld [vmem:[%s5449_s8 + $0xb78] sm:$0xff] }
 0x20c   : > { %4477 = vmatpush1.bf16.msra.mxu1 %v5070_v26  ;;  %4453 = vmatprep.subr.bf16.mxu0 %v4999_v27  ;;  %v5143_v28 = vcombine.high %v648_v6, %v652_v10  ;;  %v704_v16 = vld [vmem:[%s5449_s8 + $0xd18] sm:$0xff]  ;;  %v5142_v24 = vcombine.low %v648_v6, %v652_v10 }
 0x20d   : > { %4478 = vmatprep.subr.bf16.mxu1 %v5063_v55  ;;  %v708_v18 = vld [vmem:[%s5449_s8 + $0xd38] sm:$0xff] }
 0x20e   : > { %v696_v54 = vld [vmem:[%s5449_s8 + $0xcd8] sm:$0xff]  ;;  %v5198_v4 = vcombine.low %v704_v16, %v708_v18 }
 0x20f   : > { %4454 = vmatpush2.bf16.msra.mxu0 %v4998_v34  ;;  %v700_v26 = vld [vmem:[%s5449_s8 + $0xcf8] sm:$0xff] }
 0x210   : > { %4479 = vmatpush1.bf16.msra.mxu1 %v5062_v36  ;;  %4455 = vmatprep.subr.bf16.mxu0 %v4991_v45  ;;  %v632_v27 = vld [vmem:[%s5449_s8 + $0xad8] sm:$0xff]  ;;  %v5191_v32 = vcombine.high %v696_v54, %v700_v26  ;;  %v5190_v7 = vcombine.low %v696_v54, %v700_v26 }
 0x211   : > { %4480 = vmatprep.subr.bf16.mxu1 %v5055_v9  ;;  %v636_v55 = vld [vmem:[%s5449_s8 + $0xaf8] sm:$0xff] }
 0x212   : > { %v5127_v33 = vcombine.high %v632_v27, %v636_v55  ;;  %v688_v34 = vld [vmem:[%s5449_s8 + $0xc98] sm:$0xff]  ;;  %v5126_v38 = vcombine.low %v632_v27, %v636_v55 }
 0x213   : > { %4456 = vmatpush2.bf16.msra.mxu0 %v4990_v60  ;;  %v692_v36 = vld [vmem:[%s5449_s8 + $0xcb8] sm:$0xff] }
 0x214   : > { %4481 = vmatpush1.bf16.msra.mxu1 %v5054_v42  ;;  %4457 = vmatprep.subr.bf16.mxu0 %v4983_v43  ;;  %v624_v45 = vld [vmem:[%s5449_s8 + $0xa98] sm:$0xff]  ;;  %v5183_v39 = vcombine.high %v688_v34, %v692_v36  ;;  %v5182_v20 = vcombine.low %v688_v34, %v692_v36 }
 0x215   : > { %4482 = vmatprep.subr.bf16.mxu1 %v5047_v44  ;;  %v628_v9 = vld [vmem:[%s5449_s8 + $0xab8] sm:$0xff] }
 0x216   : > { %v5119_v41 = vcombine.high %v624_v45, %v628_v9  ;;  %v680_v60 = vld [vmem:[%s5449_s8 + $0xc58] sm:$0xff]  ;;  %v5118_v46 = vcombine.low %v624_v45, %v628_v9 }
 0x217   : > { %4458 = vmatpush2.bf16.msra.mxu0 %v4982_v48  ;;  %v684_v42 = vld [vmem:[%s5449_s8 + $0xc78] sm:$0xff] }
 0x218   : > { %4483 = vmatpush1.bf16.msra.mxu1 %v5046_v49  ;;  %4459 = vmatprep.subr.bf16.mxu0 %v4975_v56  ;;  %v616_v43 = vld [vmem:[%s5449_s8 + $0xa58] sm:$0xff]  ;;  %v5175_v12 = vcombine.high %v680_v60, %v684_v42  ;;  %v5174_v50 = vcombine.low %v680_v60, %v684_v42 }
 0x219   : > { %4484 = vmatprep.subr.bf16.mxu1 %v5039_v8  ;;  %v620_v44 = vld [vmem:[%s5449_s8 + $0xa78] sm:$0xff] }
 0x21a   : > { %v5111_v23 = vcombine.high %v616_v43, %v620_v44  ;;  %v672_v48 = vld [vmem:[%s5449_s8 + $0xc18] sm:$0xff]  ;;  %v5110_v51 = vcombine.low %v616_v43, %v620_v44 }
 0x21b   : > { %4460 = vmatpush2.bf16.msra.mxu0 %v4974_v31  ;;  %v676_v49 = vld [vmem:[%s5449_s8 + $0xc38] sm:$0xff] }
 0x21c   : > { %4485 = vmatpush1.bf16.msra.mxu1 %v5038_v52  ;;  %4511 = vmatprep.subr.bf16.mxu0 %v5223_v57  ;;  %v608_v56 = vld [vmem:[%s5449_s8 + $0xa18] sm:$0xff]  ;;  %v5167_v62 = vcombine.high %v672_v48, %v676_v49  ;;  %v5166_v61 = vcombine.low %v672_v48, %v676_v49 }
 0x21d   : > { %4486 = vmatprep.subr.bf16.mxu1 %v5159_v58  ;;  %v612_v8 = vld [vmem:[%s5449_s8 + $0xa38] sm:$0xff] }
 0x21e   : > { %4462 = vmatmul.mubr.bf16.vlgmr.msra.gmra.mxu0 %v5549_v21  ;;  %v644_v21 = vld [vmem:[%s5449_s8 + $0xb38] sm:$0xff]  ;;  %v5103_v14 = vcombine.high %v608_v56, %v612_v8  ;;  %v5102_v59 = vcombine.low %v608_v56, %v612_v8 }
 0x21f   : > { %4512 = vmatpush1.bf16.msra.mxu0 %v5222_v17  ;;  %4543 = vmatprep.mubr.bf16.mxu0 %v5565_v30  ;;  %v5199_v30 = vcombine.high %v704_v16, %v708_v18  ;;  %v5135_v25 = vcombine.high %v640_v19, %v644_v21  ;;  %v5134_v29 = vcombine.low %v640_v19, %v644_v21  ;;  %v792_v31 = vld [vmem:[%s5449_s8 + $0xfd8] sm:$0xff] }
 0x220   : > { %4487 = vmatpush2.bf16.msra.mxu1 %v5158_v1  ;;  %4513 = vmatprep.subr.bf16.mxu0 %v5215_v2  ;;  %v796_v52 = vld [vmem:[%s5449_s8 + $0xff8] sm:$0xff] }
 0x221   : > { %4488 = vmatprep.subr.bf16.mxu1 %v5151_v3  ;;  %v856_v57 = vld [vmem:[%s5449_s8 + $0x11d8] sm:$0xff]  ;;  %v5287_v63 = vcombine.high %v792_v31, %v796_v52  ;;  %v5286_v47 = vcombine.low %v792_v31, %v796_v52 }
 0x222   : > { %v860_v58 = vld [vmem:[%s5449_s8 + $0x11f8] sm:$0xff] }
 0x223   : > { %4514 = vmatpush1.bf16.msra.mxu0 %v5214_v11  ;;  %v5351_v0 = vcombine.high %v856_v57, %v860_v58  ;;  %v784_v17 = vld [vmem:[%s5449_s8 + $0xf98] sm:$0xff]  ;;  %v5350_v5 = vcombine.low %v856_v57, %v860_v58 }
 0x224   : > { %4489 = vmatpush2.bf16.msra.mxu1 %v5150_v13  ;;  %4515 = vmatprep.subr.bf16.mxu0 %v5207_v15  ;;  %v788_v1 = vld [vmem:[%s5449_s8 + $0xfb8] sm:$0xff] }
 0x225   : > { %4490 = vmatprep.subr.bf16.mxu1 %v5143_v28  ;;  %v848_v2 = vld [vmem:[%s5449_s8 + $0x1198] sm:$0xff]  ;;  %v5279_v6 = vcombine.high %v784_v17, %v788_v1  ;;  %v5278_v19 = vcombine.low %v784_v17, %v788_v1 }
 0x226   : > { %v852_v3 = vld [vmem:[%s5449_s8 + $0x11b8] sm:$0xff] }
 0x227   : > { %4516 = vmatpush1.bf16.msra.mxu0 %v5206_v22  ;;  %v5343_v10 = vcombine.high %v848_v2, %v852_v3  ;;  %v776_v11 = vld [vmem:[%s5449_s8 + $0xf58] sm:$0xff] }
 0x228   : > { %4491 = vmatpush2.bf16.msra.mxu1 %v5142_v24  ;;  %4517 = vmatprep.subr.bf16.mxu0 %v5199_v30  ;;  %v780_v13 = vld [vmem:[%s5449_s8 + $0xf78] sm:$0xff]  ;;  %v5342_v24 = vcombine.low %v848_v2, %v852_v3 }
 0x229   : > { %4492 = vmatprep.subr.bf16.mxu1 %v5135_v25  ;;  %v840_v28 = vld [vmem:[%s5449_s8 + $0x1158] sm:$0xff]  ;;  %v5271_v30 = vcombine.high %v776_v11, %v780_v13 }
 0x22a   : > { %v844_v16 = vld [vmem:[%s5449_s8 + $0x1178] sm:$0xff] }
 0x22b   : > { %4518 = vmatpush1.bf16.msra.mxu0 %v5198_v4  ;;  %v5335_v54 = vcombine.high %v840_v28, %v844_v16  ;;  %v768_v26 = vld [vmem:[%s5449_s8 + $0xf18] sm:$0xff]  ;;  %v5334_v36 = vcombine.low %v840_v28, %v844_v16 }
 0x22c   : > { %4493 = vmatpush2.bf16.msra.mxu1 %v5134_v29  ;;  %4519 = vmatprep.subr.bf16.mxu0 %v5191_v32  ;;  %v772_v27 = vld [vmem:[%s5449_s8 + $0xf38] sm:$0xff] }
 0x22d   : > { %4494 = vmatprep.subr.bf16.mxu1 %v5127_v33  ;;  %v832_v4 = vld [vmem:[%s5449_s8 + $0x1118] sm:$0xff]  ;;  %v5270_v33 = vcombine.low %v776_v11, %v780_v13  ;;  %v5263_v45 = vcombine.high %v768_v26, %v772_v27  ;;  %v5262_v60 = vcombine.low %v768_v26, %v772_v27 }
 0x22e   : > { %v836_v29 = vld [vmem:[%s5449_s8 + $0x1138] sm:$0xff] }
 0x22f   : > { %4520 = vmatpush1.bf16.msra.mxu0 %v5190_v7  ;;  %v760_v7 = vld [vmem:[%s5449_s8 + $0xed8] sm:$0xff]  ;;  %v5326_v42 = vcombine.low %v832_v4, %v836_v29 }
 0x230   : > { %4495 = vmatpush2.bf16.msra.mxu1 %v5126_v38  ;;  %4521 = vmatprep.subr.bf16.mxu0 %v5183_v39  ;;  %v764_v38 = vld [vmem:[%s5449_s8 + $0xef8] sm:$0xff] }
 0x231   : > { %4496 = vmatprep.subr.bf16.mxu1 %v5119_v41  ;;  %v824_v39 = vld [vmem:[%s5449_s8 + $0x10d8] sm:$0xff]  ;;  %v5255_v43 = vcombine.high %v760_v7, %v764_v38  ;;  %v5254_v48 = vcombine.low %v760_v7, %v764_v38 }
 0x232   : > { %v828_v41 = vld [vmem:[%s5449_s8 + $0x10f8] sm:$0xff] }
 0x233   : > { %4522 = vmatpush1.bf16.msra.mxu0 %v5182_v20  ;;  %v5319_v44 = vcombine.high %v824_v39, %v828_v41  ;;  %v752_v20 = vld [vmem:[%s5449_s8 + $0xe98] sm:$0xff]  ;;  %v5318_v49 = vcombine.low %v824_v39, %v828_v41 }
 0x234   : > { %4497 = vmatpush2.bf16.msra.mxu1 %v5118_v46  ;;  %4523 = vmatprep.subr.bf16.mxu0 %v5175_v12  ;;  %v756_v46 = vld [vmem:[%s5449_s8 + $0xeb8] sm:$0xff] }
 0x235   : > { %4498 = vmatprep.subr.bf16.mxu1 %v5111_v23  ;;  %v816_v12 = vld [vmem:[%s5449_s8 + $0x1098] sm:$0xff]  ;;  %v5247_v56 = vcombine.high %v752_v20, %v756_v46  ;;  %v5246_v31 = vcombine.low %v752_v20, %v756_v46 }
 0x236   : > { %v820_v23 = vld [vmem:[%s5449_s8 + $0x10b8] sm:$0xff] }
 0x237   : > { %4524 = vmatpush1.bf16.msra.mxu0 %v5174_v50  ;;  %v5311_v8 = vcombine.high %v816_v12, %v820_v23  ;;  %v744_v50 = vld [vmem:[%s5449_s8 + $0xe58] sm:$0xff]  ;;  %v5310_v52 = vcombine.low %v816_v12, %v820_v23  ;;  %v278_v23 = vld [vmem:[#allocation2 + $0x28] sm:$0xff] }
 0x238   : > { %4499 = vmatpush2.bf16.msra.mxu1 %v5110_v51  ;;  %4525 = vmatprep.subr.bf16.mxu0 %v5167_v62  ;;  %v748_v51 = vld [vmem:[%s5449_s8 + $0xe78] sm:$0xff] }
 0x239   : > { %4500 = vmatprep.subr.bf16.mxu1 %v5103_v14  ;;  %v808_v62 = vld [vmem:[%s5449_s8 + $0x1058] sm:$0xff]  ;;  %v5239_v57 = vcombine.high %v744_v50, %v748_v51  ;;  %v5238_v17 = vcombine.low %v744_v50, %v748_v51 }
 0x23a   : > { %v812_v14 = vld [vmem:[%s5449_s8 + $0x1078] sm:$0xff] }
 0x23b   : > { %4526 = vmatpush1.bf16.msra.mxu0 %v5166_v61  ;;  %v5303_v58 = vcombine.high %v808_v62, %v812_v14  ;;  %v736_v61 = vld [vmem:[%s5449_s8 + $0xe18] sm:$0xff]  ;;  %v5302_v1 = vcombine.low %v808_v62, %v812_v14 }
 0x23c   : > { %4501 = vmatpush2.bf16.msra.mxu1 %v5102_v59  ;;  %4527 = vmatprep.subr.bf16.mxu0 %v5287_v63  ;;  %v740_v59 = vld [vmem:[%s5449_s8 + $0xe38] sm:$0xff] }
 0x23d   : > { %4552 = vmatprep.subr.bf16.mxu1 %v5351_v0  ;;  %v800_v63 = vld [vmem:[%s5449_s8 + $0x1018] sm:$0xff]  ;;  %v5231_v2 = vcombine.high %v736_v61, %v740_v59 }
 0x23e   : > { %v4217_v15 = vpop.f32.mrf.mxu0  ;;  %v804_v0 = vld [vmem:[%s5449_s8 + $0x1038] sm:$0xff] }
 0x23f   : > { %v4258_v18 = vpop.f32.mrf.mxu1  ;;  %4503 = vmatmul.mubr.bf16.vlgmr.msra.gmra.mxu1 %v5630_v37  ;;  %4528 = vmatpush2.bf16.msra.mxu0 %v5286_v47  ;;  %v5295_v3 = vcombine.high %v800_v63, %v804_v0  ;;  %v5230_v47 = vcombine.low %v736_v61, %v740_v59  ;;  %v279_v50 = vld [vmem:[#allocation2 + $0x38] sm:$0xff] }
 0x240   : > { %v6131_v21 = vadd.f32 %v4258_v18, %v4217_v15  ;;  %4553 = vmatpush1.bf16.msra.mxu1 %v5350_v5  ;;  %v4219_v22 = vpop.f32.mrf.mxu0  ;;  %4529 = vmatprep.subr.bf16.mxu0 %v5279_v6  ;;  %v5294_v5 = vcombine.low %v800_v63, %v804_v0 }
 0x241   : > { %v4260_v25 = vpop.f32.mrf.mxu1  ;;  %4554 = vmatprep.subr.bf16.mxu1 %v5343_v10  ;;  %4584 = vmatprep.mubr.bf16.mxu1 %v5393_v53  ;;  %v5327_v53 = vcombine.high %v832_v4, %v836_v29 }
 0x242   : > { %v6136_v37 = vadd.f32 %v4260_v25, %v4219_v22  ;;  %v4221_v55 = vpop.f32.mrf.mxu0 }
 0x243   : > { %v4262_v32 = vpop.f32.mrf.mxu1  ;;  %4530 = vmatpush2.bf16.msra.mxu0 %v5278_v19 }
 0x244   : > { %4555 = vmatpush1.bf16.msra.mxu1 %v5342_v24  ;;  %v4222_v34 = vpop.f32.mrf.mxu0  ;;  %4531 = vmatprep.subr.bf16.mxu0 %v5271_v30  ;;  %v276_v30 = vld [vmem:[#allocation2 + $0x8] sm:$0xff] }
 0x245   : > { %v4263_v9 = vpop.f32.mrf.mxu1  ;;  %4556 = vmatprep.subr.bf16.mxu1 %v5335_v54 }
 0x247   : > { %4532 = vmatpush2.bf16.msra.mxu0 %v5270_v33 }
 0x248   : > { %4557 = vmatpush1.bf16.msra.mxu1 %v5334_v36  ;;  %4533 = vmatprep.subr.bf16.mxu0 %v5263_v45 }
 0x249   : > { %4558 = vmatprep.subr.bf16.mxu1 %v5327_v53 }
 0x24b   : > { %4534 = vmatpush2.bf16.msra.mxu0 %v5262_v60 }
 0x24c   : > { %4559 = vmatpush1.bf16.msra.mxu1 %v5326_v42  ;;  %4535 = vmatprep.subr.bf16.mxu0 %v5255_v43 }
 0x24d   : > { %4560 = vmatprep.subr.bf16.mxu1 %v5319_v44 }
 0x24f   : > { %4536 = vmatpush2.bf16.msra.mxu0 %v5254_v48 }
 0x250   : > { %4561 = vmatpush1.bf16.msra.mxu1 %v5318_v49  ;;  %4537 = vmatprep.subr.bf16.mxu0 %v5247_v56 }
 0x251   : > { %4562 = vmatprep.subr.bf16.mxu1 %v5311_v8 }
 0x253   : > { %4538 = vmatpush2.bf16.msra.mxu0 %v5246_v31 }
 0x254   : > { %4563 = vmatpush1.bf16.msra.mxu1 %v5310_v52  ;;  %4539 = vmatprep.subr.bf16.mxu0 %v5239_v57 }
 0x255   : > { %4564 = vmatprep.subr.bf16.mxu1 %v5303_v58 }
 0x257   : > { %4540 = vmatpush2.bf16.msra.mxu0 %v5238_v17 }
 0x258   : > { %4565 = vmatpush1.bf16.msra.mxu1 %v5302_v1  ;;  %4541 = vmatprep.subr.bf16.mxu0 %v5231_v2 }
 0x259   : > { %4566 = vmatprep.subr.bf16.mxu1 %v5295_v3 }
 0x25b   : > { %4542 = vmatpush2.bf16.msra.mxu0 %v5230_v47 }
 0x25c   : > { %4567 = vmatpush1.bf16.msra.mxu1 %v5294_v5 }
 0x25e   : > { %4544 = vmatmul.mubr.bf16.vlgmr.msra.gmra.mxu0 %v5636_v40  ;;  %v277_v40 = vld [vmem:[#allocation2 + $0x20] sm:$0xff] }
 0x25f   : > { %4585 = vmatmul.mubr.bf16.vlgmr.msra.gmra.mxu1 %v6014_v35 }
 0x27e   : > { %v4299_v6 = vpop.f32.mrf.mxu0 }
 0x27f   : > { %v4340_v10 = vpop.f32.mrf.mxu1  ;;  %v4300_v19 = vadd.f32 %v4299_v6, %v6131_v21 }
 0x280   : > { %v4301_v11 = vpop.f32.mrf.mxu0 }
 0x281   : > { %v4342_v13 = vpop.f32.mrf.mxu1  ;;  %v4302_v22 = vadd.f32 %v4301_v11, %v6136_v37  ;;  %v4341_v24 = vadd.f32 %v4340_v10, %v4300_v19 }
 0x282   : > { %v4303_v15 = vpop.f32.mrf.mxu0 }
 0x283   : > { %v4344_v28 = vpop.f32.mrf.mxu1  ;;  %v4343_v54 = vadd.f32 %v4342_v13, %v4302_v22 }
 0x284   : > { %v4304_v16 = vpop.f32.mrf.mxu0 }
 0x285   : > { %v4345_v18 = vpop.f32.mrf.mxu1 }
 0x29e   : > { %v4381_v25 = vpop.f32.mrf.mxu0 }
 0x29f   : > { %v4382_v26 = vadd.f32 %v4381_v25, %v4341_v24 }
 0x2a0   : > { %v4383_v27 = vpop.f32.mrf.mxu0 }
 0x2a1   : > { %v4597_v35 = vadd.f32 %v4382_v26, %v276_v30  ;;  %v4384_v55 = vadd.f32 %v4383_v27, %v4343_v54 }
 0x2a2   : > { %v4385_v4 = vpop.f32.mrf.mxu0 }
 0x2a3   : > { %4605 = vst [vmem:[#allocation2 + $0x8] sm:$0xff] %v4597_v35  ;;  %v4598_v29 = vadd.f32 %v4384_v55, %v277_v40 }
 0x2a4   : > { %v4386_v32 = vpop.f32.mrf.mxu0 }
 0x2a5   : > { %4606 = vst [vmem:[#allocation2 + $0x20] sm:$0xff] %v4598_v29 }
 0x2bf   : > { %v4422_v33 = vpop.f32.mrf.mxu1 }
 0x2c1   : > { %v4424_v34 = vpop.f32.mrf.mxu1 }
 0x2c3   : > { %v4426_v36 = vpop.f32.mrf.mxu1 }
 0x2c5   : > { %v4427_v21 = vpop.f32.mrf.mxu1 }
 0x2de   : > { %v4463_v45 = vpop.f32.mrf.mxu0 }
 0x2df   : > { %v4464_v60 = vadd.f32 %v4463_v45, %v4422_v33 }
 0x2e0   : > { %v4465_v37 = vpop.f32.mrf.mxu0 }
 0x2e1   : > { %v4466_v42 = vadd.f32 %v4465_v37, %v4424_v34 }
 0x2e2   : > { %v4467_v9 = vpop.f32.mrf.mxu0 }
 0x2e4   : > { %v4468_v53 = vpop.f32.mrf.mxu0 }
 0x2ff   : > { %v4504_v7 = vpop.f32.mrf.mxu1 }
 0x300   : > { %v4505_v43 = vadd.f32 %v4504_v7, %v4464_v60 }
 0x301   : > { %v4506_v38 = vpop.f32.mrf.mxu1 }
 0x302   : > { %v4507_v20 = vadd.f32 %v4506_v38, %v4466_v42 }
 0x303   : > { %v4508_v39 = vpop.f32.mrf.mxu1 }
 0x305   : > { %v4509_v41 = vpop.f32.mrf.mxu1 }
 0x31e   : > { %v4545_v44 = vpop.f32.mrf.mxu0 }
 0x31f   : > { %v4546_v46 = vadd.f32 %v4545_v44, %v4505_v43  ;;  %v4586_v12 = vpop.f32.mrf.mxu1 }
 0x320   : > { %v4547_v48 = vpop.f32.mrf.mxu0 }
 0x321   : > { %v4587_v49 = vadd.f32 %v4586_v12, %v4546_v46  ;;  %v4548_v56 = vadd.f32 %v4547_v48, %v4507_v20  ;;  %v4588_v8 = vpop.f32.mrf.mxu1 }
 0x322   : > { %v4549_v51 = vpop.f32.mrf.mxu0 }
 0x323   : > { %v4599_v62 = vadd.f32 %v4587_v49, %v278_v23  ;;  %v4589_v14 = vadd.f32 %v4588_v8, %v4548_v56  ;;  %v4590_v31 = vpop.f32.mrf.mxu1  ;;  %4612 = sbr.rel (%p5352_p6) target bundleno = 845 (0x34d), region = 44 }
 0x324   : > { %v4550_v52 = vpop.f32.mrf.mxu0 }
 0x325   : > { %4607 = vst [vmem:[#allocation2 + $0x28] sm:$0xff] %v4599_v62  ;;  %v4600_v57 = vadd.f32 %v4589_v14, %v279_v50  ;;  %v4591_v58 = vpop.f32.mrf.mxu1 }
 0x327   : > { %4608 = vst [vmem:[#allocation2 + $0x38] sm:$0xff] %v4600_v57 }
 0x328   : > { %v4623_v61 = vlaneseq  ;;  %v4613_v63 = vld [vmem:[#allocation2 + $0x30] sm:$0xff]  ;;  %v4621_v0 = vld [vmem:[%s6217_s2] sm:$0xff]  ;;  %v4615_v3 = vld [vmem:[#allocation2 + $0x18] sm:$0xff] }
 0x329   : > { %v4614_v1 = vld [vmem:[#allocation2] sm:$0xff]  ;;  %v4616_v6 = vld [vmem:[#allocation2 + $0x10] sm:$0xff]  ;;  %v4617_v10 = vld [vmem:[#allocation2 + $0x8] sm:$0xff] }
 0x32a   : > { %v4624_v59 = vshrl.u32 %v4623_v61, 7  ;;  %v4618_v24 = vld [vmem:[#allocation2 + $0x20] sm:$0xff]  ;;  %v4680_v60 = vld [vmem:[%s6218_s3 + $0x8] sm:$0xff]  ;;  %v4681_v43 = vld [vmem:[%s6218_s3 + $0x10] sm:$0xff] }
 0x32b   : > { %v4679_v41 = vld [vmem:[%s6218_s3] sm:$0xff]  ;;  %v4682_v46 = vld [vmem:[%s6218_s3 + $0x18] sm:$0xff] }
 0x32c   : > { %v4625_v17 = vsub.s32 0, %v4624_v59  ;;  %v4629_v2 = vsub.s32 1, %v4624_v59  ;;  %v4633_v47 = vsub.s32 2, %v4624_v59  ;;  %v4637_v5 = vsub.s32 3, %v4624_v59  ;;  %v4619_v30 = vld [vmem:[#allocation2 + $0x28] sm:$0xff] }
 0x32d   : > { %v4641_v11 = vsub.s32 4, %v4624_v59  ;;  %v4645_v13 = vsub.s32 5, %v4624_v59  ;;  %v4649_v15 = vsub.s32 6, %v4624_v59  ;;  %v4653_v28 = vsub.s32 7, %v4624_v59 }
 0x32e   : > { %v4626_v16 = vrot.slane %v4621_v0, %v4625_v17  ;;  %v4630_v18 = vrot.slane %v4621_v0, %v4629_v2  ;;  %v4634_v19 = vrot.slane %v4621_v0, %v4633_v47  ;;  %v4638_v22 = vrot.slane %v4621_v0, %v4637_v5  ;;  %v4620_v25 = vld [vmem:[#allocation2 + $0x38] sm:$0xff] }
 0x32f   : > { %v4642_v54 = vrot.slane %v4621_v0, %v4641_v11  ;;  %v4646_v26 = vrot.slane %v4621_v0, %v4645_v13  ;;  %v4650_v40 = vrot.slane %v4621_v0, %v4649_v15  ;;  %v4654_v27 = vrot.slane %v4621_v0, %v4653_v28 }
 0x330   : > { %v4663_v35 = vadd.f32 %v4626_v16, %v4613_v63  ;;  %v4664_v55 = vadd.f32 %v4630_v18, %v4614_v1  ;;  %v4665_v4 = vadd.f32 %v4634_v19, %v4615_v3  ;;  %v4666_v29 = vadd.f32 %v4638_v22, %v4616_v6 }
 0x331   : > { %v4667_v32 = vadd.f32 %v4642_v54, %v4617_v10  ;;  %v4668_v33 = vadd.f32 %v4646_v26, %v4618_v24  ;;  %v4669_v34 = vadd.f32 %v4650_v40, %v4619_v30  ;;  %v4670_v36 = vadd.f32 %v4654_v27, %v4620_v25 }
 0x332   : > { %4671 = vst [vmem:[%s6220_s5] sm:$0xff] %v4663_v35  ;;  %4672 = vst [vmem:[%s6220_s5 + $0x8] sm:$0xff] %v4664_v55 }
 0x333   : > { %4673 = vst [vmem:[%s6220_s5 + $0x10] sm:$0xff] %v4665_v4  ;;  %4674 = vst [vmem:[%s6220_s5 + $0x18] sm:$0xff] %v4666_v29  ;;  %v4683_v21 = vmul.f32 0.5, %v4667_v32  ;;  %v4684_v45 = vmul.f32 0.5, %v4668_v33  ;;  %v4685_v37 = vmul.f32 0.5, %v4669_v34  ;;  %v4686_v9 = vmul.f32 0.5, %v4670_v36 }
 0x334   : > { %4675 = vst [vmem:[%s6221_s6] sm:$0xff] %v4667_v32  ;;  %4676 = vst [vmem:[%s6221_s6 + $0x8] sm:$0xff] %v4668_v33 }
 0x335   : > { %4677 = vst [vmem:[%s6221_s6 + $0x10] sm:$0xff] %v4669_v34  ;;  %4678 = vst [vmem:[%s6221_s6 + $0x18] sm:$0xff] %v4670_v36  ;;  %v4687_v53 = vmul.f32 1.442695, %v4683_v21  ;;  %v4689_v7 = vmul.f32 1.442695, %v4684_v45 }
 0x336   : > { %v4691_v38 = vmul.f32 1.442695, %v4685_v37  ;;  %v4693_v39 = vmul.f32 1.442695, %v4686_v9 }
 0x337   : > { %5376 = vpow2.f32 %v4687_v53 }
 0x338   : > { %5378 = vpow2.f32 %v4689_v7 }
 0x339   : > { %5380 = vpow2.f32 %v4691_v38 }
 0x33a   : > { %5382 = vpow2.f32 %v4693_v39 }
 0x344   : > { %v5377_v42 = vpop.eup %5376 }
 0x345   : > { %v5379_v44 = vpop.eup %5378  ;;  %v4695_v20 = vmul.f32 %v5377_v42, %v4679_v41 }
 0x346   : > { %v5381_v12 = vpop.eup %5380  ;;  %v4696_v23 = vmul.f32 %v5379_v44, %v4680_v60 }
 0x347   : > { %v5383_v48 = vpop.eup %5382  ;;  %v4699_v49 = vadd.f32 %v4695_v20, %v4663_v35  ;;  %v4697_v56 = vmul.f32 %v5381_v12, %v4681_v43 }
 0x348   : > { %v4700_v8 = vadd.f32 %v4696_v23, %v4664_v55  ;;  %v4698_v50 = vmul.f32 %v5383_v48, %v4682_v46 }
 0x349   : > { %4703 = vst [vmem:[%s6219_s4] sm:$0xff] %v4699_v49  ;;  %v4701_v51 = vadd.f32 %v4697_v56, %v4665_v4 }
 0x34a   : > { %4704 = vst [vmem:[%s6219_s4 + $0x8] sm:$0xff] %v4700_v8  ;;  %v4702_v62 = vadd.f32 %v4698_v50, %v4666_v29 }
 0x34b   : > { %4705 = vst [vmem:[%s6219_s4 + $0x10] sm:$0xff] %v4701_v51 }
 0x34c   : > { %4706 = vst [vmem:[%s6219_s4 + $0x18] sm:$0xff] %v4702_v62 }
 0x34d PF: > { %s17_s21 = sadd.s32 1, %s5390_s21  }
 0x34e   : > { %p14_p7 = scmp.ge.s32.totalorder %s17_s21, 9  }
 0x350   :  { %16 = sbr.rel (!%p14_p7) target bundleno = 1 (0x1), region = 89 }

</bundles_post_ra>
